<compile_context>
chip_gen: v7x
topology: tpu7x:2x2x1
jax: 0.10.0
libtpu: 0.0.40
codegen_flags: <defaults>
</compile_context>

<pallas_src>
import functools

import jax
import jax.numpy as jnp
import numpy as np
from jax.experimental import pallas as pl
from jax.experimental.pallas import tpu as pltpu

EPS = 1e-5
LANE = 128
CHUNK_ROWS = 256          # conv M-chunk size: bounds the fp32 accumulator


def _round_up(x, m):
    return ((x + m - 1) // m) * m


# =============================================================================
# Kernel 1: conv1 + per-image BN partial sums; stores the raw conv output
#           (bf16) in the zero-padded "padded-flat" layout the next conv needs.
#
# Per-image layouts (Cp = padded channels, Wp = W + 2, PADLEN = (H + 3) * Wp):
#   xp_ref   : (PADLEN, Cp) bf16   input; valid pixel (h,w) at row (h+1)*Wp+(w+1)
#   w_ref    : (9, Cp, Cp)  bf16   w_ref[ky*3+kx] = W[ky,kx] laid out (Cin, Cout)
#   mask_ref : (PADLEN, 1)  f32    1.0 on interior positions, 0.0 on halo
#   y_ref    : (PADLEN, Cp) bf16   raw conv output, padded-flat, halo all zeros
#   ps_ref   : (2, Cp)      f32    per-image [sum ; sum of squares]
# =============================================================================
def _conv_stats_kernel(xp_ref, w_ref, mask_ref, y_ref, ps_ref, *, H, W, Wp):
    Cp = w_ref.shape[2]
    M = H * Wp                       # conv rows computed (2 garbage cols / row)
    body0 = Wp + 1                   # padded-flat offset of conv output row 0

    # Zero only the small head/tail halo strips (no full-tile zero + overwrite).
    y_ref[pl.ds(0, body0), :] = jnp.zeros((body0, Cp), y_ref.dtype)
    tail = y_ref.shape[0] - (body0 + M)
    y_ref[pl.ds(body0 + M, tail), :] = jnp.zeros((tail, Cp), y_ref.dtype)

    s = jnp.zeros((1, Cp), jnp.float32)
    sq = jnp.zeros((1, Cp), jnp.float32)
    for m0 in range(0, M, CHUNK_ROWS):               # static; bounded fp32 acc
        mlen = min(CHUNK_ROWS, M - m0)
        acc = jnp.zeros((mlen, Cp), jnp.float32)
        for ky in range(3):
            for kx in range(3):
                # Contiguous sublane-offset slice — no 2-D gather / relayout.
                x_tap = xp_ref[pl.ds(ky * Wp + kx + m0, mlen), :]
                acc = acc + jnp.dot(x_tap, w_ref[ky * 3 + kx],
                                    preferred_element_type=jnp.float32)
        # Zero the 2 garbage columns per row (row wrap-around) before stats
        # and store; the interior mask shifted by body0 is exactly that mask.
        accm = acc * mask_ref[pl.ds(body0 + m0, mlen), :]
        s = s + jnp.sum(accm, axis=0, keepdims=True)
        sq = sq + jnp.sum(accm * accm, axis=0, keepdims=True)
        y_ref[pl.ds(body0 + m0, mlen), :] = accm.astype(y_ref.dtype)

    ps_ref[0:1, :] = s
    ps_ref[1:2, :] = sq


# =============================================================================
# Kernel 2: BN1-apply + ReLU (into VMEM scratch, halo re-zeroed by the mask)
#           + conv2 + per-image BN2 partial sums; raw conv2 output to HBM.
# =============================================================================
def _bn_relu_conv_stats_kernel(y1_ref, ss1_ref, mask_ref, w_ref,
                               y2_ref, ps_ref, h_ref, *, H, W, Wp):
    Cp = w_ref.shape[2]
    PADLEN = y1_ref.shape[0]
    M = H * Wp
    body0 = Wp + 1
    scale = ss1_ref[0:1, :]
    shift = ss1_ref[1:2, :]

    # BN1-apply + ReLU into the padded-flat scratch.  The interior mask
    # re-zeroes the halo (the BN shift would otherwise leak into the padding).
    for q0 in range(0, PADLEN, CHUNK_ROWS):
        qlen = min(CHUNK_ROWS, PADLEN - q0)
        y1 = y1_ref[pl.ds(q0, qlen), :].astype(jnp.float32)
        h = jnp.maximum(y1 * scale + shift, 0.0) * mask_ref[pl.ds(q0, qlen), :]
        h_ref[pl.ds(q0, qlen), :] = h.astype(h_ref.dtype)

    s = jnp.zeros((1, Cp), jnp.float32)
    sq = jnp.zeros((1, Cp), jnp.float32)
    for m0 in range(0, M, CHUNK_ROWS):
        mlen = min(CHUNK_ROWS, M - m0)
        acc = jnp.zeros((mlen, Cp), jnp.float32)
        for ky in range(3):
            for kx in range(3):
                h_tap = h_ref[pl.ds(ky * Wp + kx + m0, mlen), :]
                acc = acc + jnp.dot(h_tap, w_ref[ky * 3 + kx],
                                    preferred_element_type=jnp.float32)
        accm = acc * mask_ref[pl.ds(body0 + m0, mlen), :]
        s = s + jnp.sum(accm, axis=0, keepdims=True)
        sq = sq + jnp.sum(accm * accm, axis=0, keepdims=True)
        y2_ref[pl.ds(m0, mlen), :] = accm.astype(y2_ref.dtype)

    ps_ref[0:1, :] = s
    ps_ref[1:2, :] = sq


# =============================================================================
# Kernel 3: BN2-apply + residual add + ReLU (pure elementwise, chunked).
# =============================================================================
def _bn_res_relu_kernel(y2_ref, ss2_ref, res_ref, o_ref):
    M = y2_ref.shape[0]
    scale = ss2_ref[0:1, :]
    shift = ss2_ref[1:2, :]
    for m0 in range(0, M, CHUNK_ROWS):
        mlen = min(CHUNK_ROWS, M - m0)
        y = y2_ref[pl.ds(m0, mlen), :].astype(jnp.float32) * scale + shift
        o_ref[pl.ds(m0, mlen), :] = jnp.maximum(
            y + res_ref[pl.ds(m0, mlen), :], 0.0)


# -----------------------------------------------------------------------------
# pallas_call wrappers (grid over batch, "parallel" so v7x uses both cores)
# -----------------------------------------------------------------------------
def _conv_stats_call(xp, w, mask, H, W, Wp):
    N, PADLEN, Cp = xp.shape
    kernel = functools.partial(_conv_stats_kernel, H=H, W=W, Wp=Wp)
    flops = 2 * 9 * H * W * Cp * Cp * N
    bytes_acc = xp.size * 2 + w.size * 2 + N * PADLEN * Cp * 2 + N * 2 * Cp * 4
    return pl.pallas_call(
        kernel,
        out_shape=(jax.ShapeDtypeStruct((N, PADLEN, Cp), jnp.bfloat16),
                   jax.ShapeDtypeStruct((N, 2, Cp), jnp.float32)),
        grid_spec=pltpu.PrefetchScalarGridSpec(
            num_scalar_prefetch=0,
            grid=(N,),
            in_specs=[
                pl.BlockSpec((None, PADLEN, Cp), lambda n: (n, 0, 0)),
                pl.BlockSpec((9, Cp, Cp), lambda n: (0, 0, 0)),
                pl.BlockSpec((PADLEN, 1), lambda n: (0, 0)),
            ],
            out_specs=[
                pl.BlockSpec((None, PADLEN, Cp), lambda n: (n, 0, 0)),
                pl.BlockSpec((None, 2, Cp), lambda n: (n, 0, 0)),
            ],
        ),
        compiler_params=pltpu.CompilerParams(
            dimension_semantics=("parallel",)),
        cost_estimate=pl.CostEstimate(flops=flops, transcendentals=0,
                                      bytes_accessed=bytes_acc),
    )(xp, w, mask)


def _bn_relu_conv_stats_call(y1, ss1, mask, w, H, W, Wp):
    N, PADLEN, Cp = y1.shape
    M = H * Wp
    kernel = functools.partial(_bn_relu_conv_stats_kernel, H=H, W=W, Wp=Wp)
    flops = 2 * 9 * H * W * Cp * Cp * N
    bytes_acc = y1.size * 2 + w.size * 2 + N * M * Cp * 2 + N * 2 * Cp * 4
    return pl.pallas_call(
        kernel,
        out_shape=(jax.ShapeDtypeStruct((N, M, Cp), jnp.bfloat16),
                   jax.ShapeDtypeStruct((N, 2, Cp), jnp.float32)),
        grid_spec=pltpu.PrefetchScalarGridSpec(
            num_scalar_prefetch=0,
            grid=(N,),
            in_specs=[
                pl.BlockSpec((None, PADLEN, Cp), lambda n: (n, 0, 0)),
                pl.BlockSpec((2, Cp), lambda n: (0, 0)),
                pl.BlockSpec((PADLEN, 1), lambda n: (0, 0)),
                pl.BlockSpec((9, Cp, Cp), lambda n: (0, 0, 0)),
            ],
            out_specs=[
                pl.BlockSpec((None, M, Cp), lambda n: (n, 0, 0)),
                pl.BlockSpec((None, 2, Cp), lambda n: (n, 0, 0)),
            ],
            scratch_shapes=[pltpu.VMEM((PADLEN, Cp), jnp.bfloat16)],
        ),
        compiler_params=pltpu.CompilerParams(
            dimension_semantics=("parallel",)),
        cost_estimate=pl.CostEstimate(flops=flops, transcendentals=0,
                                      bytes_accessed=bytes_acc),
    )(y1, ss1, mask, w)


def _bn_res_relu_call(y2, ss2, res):
    N, M, Cp = y2.shape
    flops = 4 * N * M * Cp
    bytes_acc = y2.size * 2 + res.size * 4 + N * M * Cp * 4 + 2 * Cp * 4
    return pl.pallas_call(
        _bn_res_relu_kernel,
        out_shape=jax.ShapeDtypeStruct((N, M, Cp), jnp.float32),
        grid_spec=pltpu.PrefetchScalarGridSpec(
            num_scalar_prefetch=0,
            grid=(N,),
            in_specs=[
                pl.BlockSpec((None, M, Cp), lambda n: (n, 0, 0)),
                pl.BlockSpec((2, Cp), lambda n: (0, 0)),
                pl.BlockSpec((None, M, Cp), lambda n: (n, 0, 0)),
            ],
            out_specs=pl.BlockSpec((None, M, Cp), lambda n: (n, 0, 0)),
        ),
        compiler_params=pltpu.CompilerParams(
            dimension_semantics=("parallel",)),
        cost_estimate=pl.CostEstimate(flops=flops, transcendentals=0,
                                      bytes_accessed=bytes_acc),
    )(y2, ss2, res)


# -----------------------------------------------------------------------------
# Parameter layout helpers + BN finalize (tiny, plain XLA)
# -----------------------------------------------------------------------------
def _prep_weight(w_oihw, cp):
    cout, cin = w_oihw.shape[0], w_oihw.shape[1]
    w = jnp.transpose(w_oihw, (2, 3, 1, 0))                  # (3,3,Cin,Cout)
    w = jnp.pad(w, ((0, 0), (0, 0), (0, cp - cin), (0, cp - cout)))
    return w.reshape(9, cp, cp).astype(jnp.bfloat16)


def _prep_bn(gamma, beta, cp):
    c = gamma.shape[-1]
    g = jnp.pad(gamma.astype(jnp.float32), (0, cp - c), constant_values=1.0)
    b = jnp.pad(beta.astype(jnp.float32), (0, cp - c), constant_values=0.0)
    return g, b


def _finalize_bn(part, gamma, beta, count):
    # Chan's parallel-variance combine across per-image partial sums.
    s = part[:, 0, :]                                        # (N, Cp)
    sq = part[:, 1, :]
    mean_i = s / count
    m2_i = jnp.maximum(sq - count * mean_i * mean_i, 0.0)
    mean = jnp.mean(mean_i, axis=0)
    m2 = jnp.sum(m2_i, axis=0) + count * jnp.sum(jnp.square(mean_i - mean), axis=0)
    var = jnp.maximum(m2 / (count * part.shape[0]), 0.0)
    scale = gamma * jax.lax.rsqrt(var + EPS)
    shift = beta - mean * scale
    return jnp.stack([scale, shift], axis=0)                 # (2, Cp)


# -----------------------------------------------------------------------------
# Full BasicBlock forward (stride=1, downsample=None, groups=1, dilation=1)
# -----------------------------------------------------------------------------
def basic_block_forward(x_nchw, params):
    N, Cin, H, W = x_nchw.shape
    planes = params["conv1_w"].shape[0]
    assert Cin == planes, "stride=1 / downsample=None requires inplanes == planes"
    Cp = _round_up(max(Cin, planes), LANE)
    Wp = W + 2
    PADLEN = (H + 3) * Wp            # extra zero row guards the flat-slice taps
    count = float(H * W)             # samples per image per channel

    x = jnp.transpose(x_nchw, (0, 2, 3, 1)).astype(jnp.float32)          # NHWC

    # Padded-flat conv input: valid pixel (h, w) at flat row (h+1)*Wp + (w+1).
    xp = jnp.pad(x, ((0, 0), (1, 2), (1, 1), (0, Cp - Cin)))
    xp = xp.reshape(N, PADLEN, Cp).astype(jnp.bfloat16)

    # Residual in the conv-output-row layout (row = h*Wp + w), f32, zero pad.
    res = jnp.pad(x, ((0, 0), (0, 0), (0, 2), (0, Cp - Cin))).reshape(N, H * Wp, Cp)

    # Interior mask of the padded-flat layout (1 on valid pixels, 0 on halo).
    rr = np.arange(H + 3).reshape(-1, 1)
    cc = np.arange(Wp).reshape(1, -1)
    interior = (rr >= 1) & (rr <= H) & (cc >= 1) & (cc <= W)
    mask = jnp.asarray(interior.reshape(PADLEN, 1).astype(np.float32))

    w1 = _prep_weight(params["conv1_w"], Cp)
    w2 = _prep_weight(params["conv2_w"], Cp)
    g1, b1 = _prep_bn(params["bn1_g"], params["bn1_b"], Cp)
    g2, b2 = _prep_bn(params["bn2_g"], params["bn2_b"], Cp)

    # conv1 (+ BN1 partial stats); raw output stays padded-flat for conv2.
    y1, ps1 = _conv_stats_call(xp, w1, mask, H, W, Wp)
    ss1 = _finalize_bn(ps1, g1, b1, count)

    # BN1-apply + ReLU + conv2 (+ BN2 partial stats).
    y2, ps2 = _bn_relu_conv_stats_call(y1, ss1, mask, w2, H, W, Wp)
    ss2 = _finalize_bn(ps2, g2, b2, count)

    # BN2-apply + residual + ReLU.
    out = _bn_res_relu_call(y2, ss2, res)                    # (N, H*Wp, Cp) f32

    out = out.reshape(N, H, Wp, Cp)[:, :, :W, :planes]
    # TODO(synk): emit bf16 / keep NHWC here if the consumer allows, to cut HBM traffic.
    return jnp.transpose(out, (0, 3, 1, 2))                              # NCHW


# -----------------------------------------------------------------------------
# Pure-JAX reference with the same precision policy (bf16 matmul inputs and
# bf16 storage of raw conv activations between stages; BN math in f32).
# -----------------------------------------------------------------------------
def _reference(x_nchw, params):
    x = jnp.transpose(x_nchw, (0, 2, 3, 1)).astype(jnp.float32)

    def conv(v, w_oihw):
        w_hwio = jnp.transpose(w_oihw, (2, 3, 1, 0)).astype(jnp.bfloat16)
        y = jax.lax.conv_general_dilated(
            v.astype(jnp.bfloat16), w_hwio, (1, 1), ((1, 1), (1, 1)),
            dimension_numbers=("NHWC", "HWIO", "NHWC"),
            preferred_element_type=jnp.float32)
        return y.astype(jnp.bfloat16).astype(jnp.float32)    # activation storage

    def bn(y, g, b):
        m = y.mean(axis=(0, 1, 2))
        v = jnp.square(y - m).mean(axis=(0, 1, 2))
        return (y - m) * jax.lax.rsqrt(v + EPS) * g + b

    h = jnp.maximum(bn(conv(x, params["conv1_w"]),
                       params["bn1_g"], params["bn1_b"]), 0.0)
    o = bn(conv(h, params["conv2_w"]), params["bn2_g"], params["bn2_b"]) + x
    return jnp.transpose(jnp.maximum(o, 0.0), (0, 3, 1, 2))


# -----------------------------------------------------------------------------
if __name__ == "__main__":
    key = jax.random.PRNGKey(0)
    k_x, k_w1, k_w2, k_g1, k_b1, k_g2, k_b2 = jax.random.split(key, 7)

    N, inplanes, H, W = 2, 4, 16, 16
    planes = 4  # expansion = 1, stride = 1, downsample = None

    x = jax.random.normal(k_x, (N, inplanes, H, W), jnp.float32)

    params = {
        "conv1_w": 0.1 * jax.random.normal(k_w1, (planes, inplanes, 3, 3), jnp.float32),
        "conv2_w": 0.1 * jax.random.normal(k_w2, (planes, planes, 3, 3), jnp.float32),
        "bn1_g": 1.0 + 0.1 * jax.random.normal(k_g1, (planes,), jnp.float32),
        "bn1_b": 0.1 * jax.random.normal(k_b1, (planes,), jnp.float32),
        "bn2_g": 1.0 + 0.1 * jax.random.normal(k_g2, (planes,), jnp.float32),
        "bn2_b": 0.1 * jax.random.normal(k_b2, (planes,), jnp.float32),
    }

    out = jax.block_until_ready(jax.jit(basic_block_forward)(x, params))
    ref = jax.block_until_ready(jax.jit(_reference)(x, params))

    np.testing.assert_allclose(np.asarray(out), np.asarray(ref), rtol=1e-2, atol=1e-2)
    assert out.shape == (N, planes, H, W)
    print("KERNEL_OK")
</pallas_src>

<mosaic_0001>
module attributes {stable_mosaic.version = 11 : i64} {
  func.func @_conv_stats_kernel(%arg0: i32, %arg1: memref<1x342x128xbf16, #tpu.memory_space<vmem>>, %arg2: memref<9x128x128xbf16, #tpu.memory_space<vmem>>, %arg3: memref<342x1xf32, #tpu.memory_space<vmem>>, %arg4: memref<1x342x128xbf16, #tpu.memory_space<vmem>>, %arg5: memref<1x2x128xf32, #tpu.memory_space<vmem>>) attributes {dimension_semantics = [#tpu.dimension_semantics<parallel>], iteration_bounds = array<i64: 2>, scalar_prefetch = 0 : i64, scratch_operands = 0 : i64, tpu.core_type = #tpu.core_type<tc>, window_params = [{transform_indices = @transform_0, window_bounds = array<i64: 1, 342, 128>}, {pipeline_mode = #tpu.pipeline_mode<synchronous>, transform_indices = @transform_1, window_bounds = array<i64: 9, 128, 128>}, {pipeline_mode = #tpu.pipeline_mode<synchronous>, transform_indices = @transform_2, window_bounds = array<i64: 342, 1>}, {transform_indices = @transform_3, window_bounds = array<i64: 1, 342, 128>}, {transform_indices = @transform_4, window_bounds = array<i64: 1, 2, 128>}]} {
    %cst = arith.constant 0.000000e+00 : bf16
    %0 = vector.broadcast %cst : bf16 to vector<19x128xbf16>
    %c0 = arith.constant 0 : index
    %c0_0 = arith.constant 0 : index
    %c0_1 = arith.constant 0 : index
    %1 = vector.load %arg4[%c0, %c0_0, %c0_1] : memref<1x342x128xbf16, #tpu.memory_space<vmem>>, vector<1x19x128xbf16>
    %2 = vector.shape_cast %1 : vector<1x19x128xbf16> to vector<19x128xbf16>
    %3 = vector.shape_cast %0 : vector<19x128xbf16> to vector<1x19x128xbf16>
    tpu.vector_store %arg4[%c0, %c0_0, %c0_1], %3 {strides = array<i32>} : memref<1x342x128xbf16, #tpu.memory_space<vmem>>, vector<1x19x128xbf16>,
    %cst_2 = arith.constant 0.000000e+00 : bf16
    %4 = vector.broadcast %cst_2 : bf16 to vector<35x128xbf16>
    %c0_3 = arith.constant 0 : index
    %c307 = arith.constant 307 : index
    %c0_4 = arith.constant 0 : index
    %5 = vector.load %arg4[%c0_3, %c307, %c0_4] : memref<1x342x128xbf16, #tpu.memory_space<vmem>>, vector<1x35x128xbf16>
    %6 = vector.shape_cast %5 : vector<1x35x128xbf16> to vector<35x128xbf16>
    %7 = vector.shape_cast %4 : vector<35x128xbf16> to vector<1x35x128xbf16>
    tpu.vector_store %arg4[%c0_3, %c307, %c0_4], %7 {strides = array<i32>} : memref<1x342x128xbf16, #tpu.memory_space<vmem>>, vector<1x35x128xbf16>,
    %cst_5 = arith.constant 0.000000e+00 : f32
    %8 = vector.broadcast %cst_5 : f32 to vector<1x128xf32>
    %cst_6 = arith.constant 0.000000e+00 : f32
    %9 = vector.broadcast %cst_6 : f32 to vector<1x128xf32>
    %cst_7 = arith.constant 0.000000e+00 : f32
    %10 = vector.broadcast %cst_7 : f32 to vector<256x128xf32>
    %c0_8 = arith.constant 0 : index
    %c0_9 = arith.constant 0 : index
    %c0_10 = arith.constant 0 : index
    %11 = vector.load %arg1[%c0_8, %c0_9, %c0_10] : memref<1x342x128xbf16, #tpu.memory_space<vmem>>, vector<1x256x128xbf16>
    %12 = vector.shape_cast %11 : vector<1x256x128xbf16> to vector<256x128xbf16>
    %c0_11 = arith.constant 0 : index
    %c0_12 = arith.constant 0 : index
    %c0_13 = arith.constant 0 : index
    %13 = vector.load %arg2[%c0_11, %c0_12, %c0_13] : memref<9x128x128xbf16, #tpu.memory_space<vmem>>, vector<1x128x128xbf16>
    %14 = vector.shape_cast %13 : vector<1x128x128xbf16> to vector<128x128xbf16>
    %cst_14 = arith.constant dense<0.000000e+00> : vector<256x128xf32>
    %15 = tpu.matmul %12, %14, %cst_14 {dimension_numbers = #tpu.dot_dimension_numbers<[1], [0], [0], [1], [0, 0, 1, 1], [], []>} : vector<256x128xbf16>, vector<128x128xbf16>, vector<256x128xf32> -> vector<256x128xf32>
    %16 = arith.addf %10, %15 : vector<256x128xf32>
    %c0_15 = arith.constant 0 : index
    %c1 = arith.constant 1 : index
    %c0_16 = arith.constant 0 : index
    %17 = vector.load %arg1[%c0_15, %c1, %c0_16] : memref<1x342x128xbf16, #tpu.memory_space<vmem>>, vector<1x256x128xbf16>
    %18 = vector.shape_cast %17 : vector<1x256x128xbf16> to vector<256x128xbf16>
    %c1_17 = arith.constant 1 : index
    %c0_18 = arith.constant 0 : index
    %c0_19 = arith.constant 0 : index
    %19 = vector.load %arg2[%c1_17, %c0_18, %c0_19] : memref<9x128x128xbf16, #tpu.memory_space<vmem>>, vector<1x128x128xbf16>
    %20 = vector.shape_cast %19 : vector<1x128x128xbf16> to vector<128x128xbf16>
    %cst_20 = arith.constant dense<0.000000e+00> : vector<256x128xf32>
    %21 = tpu.matmul %18, %20, %cst_20 {dimension_numbers = #tpu.dot_dimension_numbers<[1], [0], [0], [1], [0, 0, 1, 1], [], []>} : vector<256x128xbf16>, vector<128x128xbf16>, vector<256x128xf32> -> vector<256x128xf32>
    %22 = arith.addf %16, %21 : vector<256x128xf32>
    %c0_21 = arith.constant 0 : index
    %c2 = arith.constant 2 : index
    %c0_22 = arith.constant 0 : index
    %23 = vector.load %arg1[%c0_21, %c2, %c0_22] : memref<1x342x128xbf16, #tpu.memory_space<vmem>>, vector<1x256x128xbf16>
    %24 = vector.shape_cast %23 : vector<1x256x128xbf16> to vector<256x128xbf16>
    %c2_23 = arith.constant 2 : index
    %c0_24 = arith.constant 0 : index
    %c0_25 = arith.constant 0 : index
    %25 = vector.load %arg2[%c2_23, %c0_24, %c0_25] : memref<9x128x128xbf16, #tpu.memory_space<vmem>>, vector<1x128x128xbf16>
    %26 = vector.shape_cast %25 : vector<1x128x128xbf16> to vector<128x128xbf16>
    %cst_26 = arith.constant dense<0.000000e+00> : vector<256x128xf32>
    %27 = tpu.matmul %24, %26, %cst_26 {dimension_numbers = #tpu.dot_dimension_numbers<[1], [0], [0], [1], [0, 0, 1, 1], [], []>} : vector<256x128xbf16>, vector<128x128xbf16>, vector<256x128xf32> -> vector<256x128xf32>
    %28 = arith.addf %22, %27 : vector<256x128xf32>
    %c0_27 = arith.constant 0 : index
    %c18 = arith.constant 18 : index
    %c0_28 = arith.constant 0 : index
    %29 = vector.load %arg1[%c0_27, %c18, %c0_28] : memref<1x342x128xbf16, #tpu.memory_space<vmem>>, vector<1x256x128xbf16>
    %30 = vector.shape_cast %29 : vector<1x256x128xbf16> to vector<256x128xbf16>
    %c3 = arith.constant 3 : index
    %c0_29 = arith.constant 0 : index
    %c0_30 = arith.constant 0 : index
    %31 = vector.load %arg2[%c3, %c0_29, %c0_30] : memref<9x128x128xbf16, #tpu.memory_space<vmem>>, vector<1x128x128xbf16>
    %32 = vector.shape_cast %31 : vector<1x128x128xbf16> to vector<128x128xbf16>
    %cst_31 = arith.constant dense<0.000000e+00> : vector<256x128xf32>
    %33 = tpu.matmul %30, %32, %cst_31 {dimension_numbers = #tpu.dot_dimension_numbers<[1], [0], [0], [1], [0, 0, 1, 1], [], []>} : vector<256x128xbf16>, vector<128x128xbf16>, vector<256x128xf32> -> vector<256x128xf32>
    %34 = arith.addf %28, %33 : vector<256x128xf32>
    %c0_32 = arith.constant 0 : index
    %c19 = arith.constant 19 : index
    %c0_33 = arith.constant 0 : index
    %35 = vector.load %arg1[%c0_32, %c19, %c0_33] : memref<1x342x128xbf16, #tpu.memory_space<vmem>>, vector<1x256x128xbf16>
    %36 = vector.shape_cast %35 : vector<1x256x128xbf16> to vector<256x128xbf16>
    %c4 = arith.constant 4 : index
    %c0_34 = arith.constant 0 : index
    %c0_35 = arith.constant 0 : index
    %37 = vector.load %arg2[%c4, %c0_34, %c0_35] : memref<9x128x128xbf16, #tpu.memory_space<vmem>>, vector<1x128x128xbf16>
    %38 = vector.shape_cast %37 : vector<1x128x128xbf16> to vector<128x128xbf16>
    %cst_36 = arith.constant dense<0.000000e+00> : vector<256x128xf32>
    %39 = tpu.matmul %36, %38, %cst_36 {dimension_numbers = #tpu.dot_dimension_numbers<[1], [0], [0], [1], [0, 0, 1, 1], [], []>} : vector<256x128xbf16>, vector<128x128xbf16>, vector<256x128xf32> -> vector<256x128xf32>
    %40 = arith.addf %34, %39 : vector<256x128xf32>
    %c0_37 = arith.constant 0 : index
    %c20 = arith.constant 20 : index
    %c0_38 = arith.constant 0 : index
    %41 = vector.load %arg1[%c0_37, %c20, %c0_38] : memref<1x342x128xbf16, #tpu.memory_space<vmem>>, vector<1x256x128xbf16>
    %42 = vector.shape_cast %41 : vector<1x256x128xbf16> to vector<256x128xbf16>
    %c5 = arith.constant 5 : index
    %c0_39 = arith.constant 0 : index
    %c0_40 = arith.constant 0 : index
    %43 = vector.load %arg2[%c5, %c0_39, %c0_40] : memref<9x128x128xbf16, #tpu.memory_space<vmem>>, vector<1x128x128xbf16>
    %44 = vector.shape_cast %43 : vector<1x128x128xbf16> to vector<128x128xbf16>
    %cst_41 = arith.constant dense<0.000000e+00> : vector<256x128xf32>
    %45 = tpu.matmul %42, %44, %cst_41 {dimension_numbers = #tpu.dot_dimension_numbers<[1], [0], [0], [1], [0, 0, 1, 1], [], []>} : vector<256x128xbf16>, vector<128x128xbf16>, vector<256x128xf32> -> vector<256x128xf32>
    %46 = arith.addf %40, %45 : vector<256x128xf32>
    %c0_42 = arith.constant 0 : index
    %c36 = arith.constant 36 : index
    %c0_43 = arith.constant 0 : index
    %47 = vector.load %arg1[%c0_42, %c36, %c0_43] : memref<1x342x128xbf16, #tpu.memory_space<vmem>>, vector<1x256x128xbf16>
    %48 = vector.shape_cast %47 : vector<1x256x128xbf16> to vector<256x128xbf16>
    %c6 = arith.constant 6 : index
    %c0_44 = arith.constant 0 : index
    %c0_45 = arith.constant 0 : index
    %49 = vector.load %arg2[%c6, %c0_44, %c0_45] : memref<9x128x128xbf16, #tpu.memory_space<vmem>>, vector<1x128x128xbf16>
    %50 = vector.shape_cast %49 : vector<1x128x128xbf16> to vector<128x128xbf16>
    %cst_46 = arith.constant dense<0.000000e+00> : vector<256x128xf32>
    %51 = tpu.matmul %48, %50, %cst_46 {dimension_numbers = #tpu.dot_dimension_numbers<[1], [0], [0], [1], [0, 0, 1, 1], [], []>} : vector<256x128xbf16>, vector<128x128xbf16>, vector<256x128xf32> -> vector<256x128xf32>
    %52 = arith.addf %46, %51 : vector<256x128xf32>
    %c0_47 = arith.constant 0 : index
    %c37 = arith.constant 37 : index
    %c0_48 = arith.constant 0 : index
    %53 = vector.load %arg1[%c0_47, %c37, %c0_48] : memref<1x342x128xbf16, #tpu.memory_space<vmem>>, vector<1x256x128xbf16>
    %54 = vector.shape_cast %53 : vector<1x256x128xbf16> to vector<256x128xbf16>
    %c7 = arith.constant 7 : index
    %c0_49 = arith.constant 0 : index
    %c0_50 = arith.constant 0 : index
    %55 = vector.load %arg2[%c7, %c0_49, %c0_50] : memref<9x128x128xbf16, #tpu.memory_space<vmem>>, vector<1x128x128xbf16>
    %56 = vector.shape_cast %55 : vector<1x128x128xbf16> to vector<128x128xbf16>
    %cst_51 = arith.constant dense<0.000000e+00> : vector<256x128xf32>
    %57 = tpu.matmul %54, %56, %cst_51 {dimension_numbers = #tpu.dot_dimension_numbers<[1], [0], [0], [1], [0, 0, 1, 1], [], []>} : vector<256x128xbf16>, vector<128x128xbf16>, vector<256x128xf32> -> vector<256x128xf32>
    %58 = arith.addf %52, %57 : vector<256x128xf32>
    %c0_52 = arith.constant 0 : index
    %c38 = arith.constant 38 : index
    %c0_53 = arith.constant 0 : index
    %59 = vector.load %arg1[%c0_52, %c38, %c0_53] : memref<1x342x128xbf16, #tpu.memory_space<vmem>>, vector<1x256x128xbf16>
    %60 = vector.shape_cast %59 : vector<1x256x128xbf16> to vector<256x128xbf16>
    %c8 = arith.constant 8 : index
    %c0_54 = arith.constant 0 : index
    %c0_55 = arith.constant 0 : index
    %61 = vector.load %arg2[%c8, %c0_54, %c0_55] : memref<9x128x128xbf16, #tpu.memory_space<vmem>>, vector<1x128x128xbf16>
    %62 = vector.shape_cast %61 : vector<1x128x128xbf16> to vector<128x128xbf16>
    %cst_56 = arith.constant dense<0.000000e+00> : vector<256x128xf32>
    %63 = tpu.matmul %60, %62, %cst_56 {dimension_numbers = #tpu.dot_dimension_numbers<[1], [0], [0], [1], [0, 0, 1, 1], [], []>} : vector<256x128xbf16>, vector<128x128xbf16>, vector<256x128xf32> -> vector<256x128xf32>
    %64 = arith.addf %58, %63 : vector<256x128xf32>
    %c19_57 = arith.constant 19 : index
    %c0_58 = arith.constant 0 : index
    %65 = vector.load %arg3[%c19_57, %c0_58] : memref<342x1xf32, #tpu.memory_space<vmem>>, vector<256x1xf32>
    %66 = vector.broadcast %65 : vector<256x1xf32> to vector<256x128xf32>
    %67 = arith.mulf %64, %66 : vector<256x128xf32>
    %cst_59 = arith.constant dense<0.000000e+00> : vector<128xf32>
    %68 = vector.multi_reduction <add>, %67, %cst_59 [0] : vector<256x128xf32> to vector<128xf32>
    %69 = vector.shape_cast %68 : vector<128xf32> to vector<1x128xf32>
    %70 = arith.addf %8, %69 : vector<1x128xf32>
    %71 = arith.mulf %67, %67 : vector<256x128xf32>
    %cst_60 = arith.constant dense<0.000000e+00> : vector<128xf32>
    %72 = vector.multi_reduction <add>, %71, %cst_60 [0] : vector<256x128xf32> to vector<128xf32>
    %73 = vector.shape_cast %72 : vector<128xf32> to vector<1x128xf32>
    %74 = arith.addf %9, %73 : vector<1x128xf32>
    %75 = arith.truncf %67 : vector<256x128xf32> to vector<256x128xbf16>
    %c0_61 = arith.constant 0 : index
    %c19_62 = arith.constant 19 : index
    %c0_63 = arith.constant 0 : index
    %76 = vector.load %arg4[%c0_61, %c19_62, %c0_63] : memref<1x342x128xbf16, #tpu.memory_space<vmem>>, vector<1x256x128xbf16>
    %77 = vector.shape_cast %76 : vector<1x256x128xbf16> to vector<256x128xbf16>
    %78 = vector.shape_cast %75 : vector<256x128xbf16> to vector<1x256x128xbf16>
    tpu.vector_store %arg4[%c0_61, %c19_62, %c0_63], %78 {strides = array<i32>} : memref<1x342x128xbf16, #tpu.memory_space<vmem>>, vector<1x256x128xbf16>,
    %cst_64 = arith.constant 0.000000e+00 : f32
    %79 = vector.broadcast %cst_64 : f32 to vector<32x128xf32>
    %c0_65 = arith.constant 0 : index
    %c256 = arith.constant 256 : index
    %c0_66 = arith.constant 0 : index
    %80 = vector.load %arg1[%c0_65, %c256, %c0_66] : memref<1x342x128xbf16, #tpu.memory_space<vmem>>, vector<1x32x128xbf16>
    %81 = vector.shape_cast %80 : vector<1x32x128xbf16> to vector<32x128xbf16>
    %c0_67 = arith.constant 0 : index
    %c0_68 = arith.constant 0 : index
    %c0_69 = arith.constant 0 : index
    %82 = vector.load %arg2[%c0_67, %c0_68, %c0_69] : memref<9x128x128xbf16, #tpu.memory_space<vmem>>, vector<1x128x128xbf16>
    %83 = vector.shape_cast %82 : vector<1x128x128xbf16> to vector<128x128xbf16>
    %cst_70 = arith.constant dense<0.000000e+00> : vector<32x128xf32>
    %84 = tpu.matmul %81, %83, %cst_70 {dimension_numbers = #tpu.dot_dimension_numbers<[1], [0], [0], [1], [0, 0, 1, 1], [], []>} : vector<32x128xbf16>, vector<128x128xbf16>, vector<32x128xf32> -> vector<32x128xf32>
    %85 = arith.addf %79, %84 : vector<32x128xf32>
    %c0_71 = arith.constant 0 : index
    %c257 = arith.constant 257 : index
    %c0_72 = arith.constant 0 : index
    %86 = vector.load %arg1[%c0_71, %c257, %c0_72] : memref<1x342x128xbf16, #tpu.memory_space<vmem>>, vector<1x32x128xbf16>
    %87 = vector.shape_cast %86 : vector<1x32x128xbf16> to vector<32x128xbf16>
    %c1_73 = arith.constant 1 : index
    %c0_74 = arith.constant 0 : index
    %c0_75 = arith.constant 0 : index
    %88 = vector.load %arg2[%c1_73, %c0_74, %c0_75] : memref<9x128x128xbf16, #tpu.memory_space<vmem>>, vector<1x128x128xbf16>
    %89 = vector.shape_cast %88 : vector<1x128x128xbf16> to vector<128x128xbf16>
    %cst_76 = arith.constant dense<0.000000e+00> : vector<32x128xf32>
    %90 = tpu.matmul %87, %89, %cst_76 {dimension_numbers = #tpu.dot_dimension_numbers<[1], [0], [0], [1], [0, 0, 1, 1], [], []>} : vector<32x128xbf16>, vector<128x128xbf16>, vector<32x128xf32> -> vector<32x128xf32>
    %91 = arith.addf %85, %90 : vector<32x128xf32>
    %c0_77 = arith.constant 0 : index
    %c258 = arith.constant 258 : index
    %c0_78 = arith.constant 0 : index
    %92 = vector.load %arg1[%c0_77, %c258, %c0_78] : memref<1x342x128xbf16, #tpu.memory_space<vmem>>, vector<1x32x128xbf16>
    %93 = vector.shape_cast %92 : vector<1x32x128xbf16> to vector<32x128xbf16>
    %c2_79 = arith.constant 2 : index
    %c0_80 = arith.constant 0 : index
    %c0_81 = arith.constant 0 : index
    %94 = vector.load %arg2[%c2_79, %c0_80, %c0_81] : memref<9x128x128xbf16, #tpu.memory_space<vmem>>, vector<1x128x128xbf16>
    %95 = vector.shape_cast %94 : vector<1x128x128xbf16> to vector<128x128xbf16>
    %cst_82 = arith.constant dense<0.000000e+00> : vector<32x128xf32>
    %96 = tpu.matmul %93, %95, %cst_82 {dimension_numbers = #tpu.dot_dimension_numbers<[1], [0], [0], [1], [0, 0, 1, 1], [], []>} : vector<32x128xbf16>, vector<128x128xbf16>, vector<32x128xf32> -> vector<32x128xf32>
    %97 = arith.addf %91, %96 : vector<32x128xf32>
    %c0_83 = arith.constant 0 : index
    %c274 = arith.constant 274 : index
    %c0_84 = arith.constant 0 : index
    %98 = vector.load %arg1[%c0_83, %c274, %c0_84] : memref<1x342x128xbf16, #tpu.memory_space<vmem>>, vector<1x32x128xbf16>
    %99 = vector.shape_cast %98 : vector<1x32x128xbf16> to vector<32x128xbf16>
    %c3_85 = arith.constant 3 : index
    %c0_86 = arith.constant 0 : index
    %c0_87 = arith.constant 0 : index
    %100 = vector.load %arg2[%c3_85, %c0_86, %c0_87] : memref<9x128x128xbf16, #tpu.memory_space<vmem>>, vector<1x128x128xbf16>
    %101 = vector.shape_cast %100 : vector<1x128x128xbf16> to vector<128x128xbf16>
    %cst_88 = arith.constant dense<0.000000e+00> : vector<32x128xf32>
    %102 = tpu.matmul %99, %101, %cst_88 {dimension_numbers = #tpu.dot_dimension_numbers<[1], [0], [0], [1], [0, 0, 1, 1], [], []>} : vector<32x128xbf16>, vector<128x128xbf16>, vector<32x128xf32> -> vector<32x128xf32>
    %103 = arith.addf %97, %102 : vector<32x128xf32>
    %c0_89 = arith.constant 0 : index
    %c275 = arith.constant 275 : index
    %c0_90 = arith.constant 0 : index
    %104 = vector.load %arg1[%c0_89, %c275, %c0_90] : memref<1x342x128xbf16, #tpu.memory_space<vmem>>, vector<1x32x128xbf16>
    %105 = vector.shape_cast %104 : vector<1x32x128xbf16> to vector<32x128xbf16>
    %c4_91 = arith.constant 4 : index
    %c0_92 = arith.constant 0 : index
    %c0_93 = arith.constant 0 : index
    %106 = vector.load %arg2[%c4_91, %c0_92, %c0_93] : memref<9x128x128xbf16, #tpu.memory_space<vmem>>, vector<1x128x128xbf16>
    %107 = vector.shape_cast %106 : vector<1x128x128xbf16> to vector<128x128xbf16>
    %cst_94 = arith.constant dense<0.000000e+00> : vector<32x128xf32>
    %108 = tpu.matmul %105, %107, %cst_94 {dimension_numbers = #tpu.dot_dimension_numbers<[1], [0], [0], [1], [0, 0, 1, 1], [], []>} : vector<32x128xbf16>, vector<128x128xbf16>, vector<32x128xf32> -> vector<32x128xf32>
    %109 = arith.addf %103, %108 : vector<32x128xf32>
    %c0_95 = arith.constant 0 : index
    %c276 = arith.constant 276 : index
    %c0_96 = arith.constant 0 : index
    %110 = vector.load %arg1[%c0_95, %c276, %c0_96] : memref<1x342x128xbf16, #tpu.memory_space<vmem>>, vector<1x32x128xbf16>
    %111 = vector.shape_cast %110 : vector<1x32x128xbf16> to vector<32x128xbf16>
    %c5_97 = arith.constant 5 : index
    %c0_98 = arith.constant 0 : index
    %c0_99 = arith.constant 0 : index
    %112 = vector.load %arg2[%c5_97, %c0_98, %c0_99] : memref<9x128x128xbf16, #tpu.memory_space<vmem>>, vector<1x128x128xbf16>
    %113 = vector.shape_cast %112 : vector<1x128x128xbf16> to vector<128x128xbf16>
    %cst_100 = arith.constant dense<0.000000e+00> : vector<32x128xf32>
    %114 = tpu.matmul %111, %113, %cst_100 {dimension_numbers = #tpu.dot_dimension_numbers<[1], [0], [0], [1], [0, 0, 1, 1], [], []>} : vector<32x128xbf16>, vector<128x128xbf16>, vector<32x128xf32> -> vector<32x128xf32>
    %115 = arith.addf %109, %114 : vector<32x128xf32>
    %c0_101 = arith.constant 0 : index
    %c292 = arith.constant 292 : index
    %c0_102 = arith.constant 0 : index
    %116 = vector.load %arg1[%c0_101, %c292, %c0_102] : memref<1x342x128xbf16, #tpu.memory_space<vmem>>, vector<1x32x128xbf16>
    %117 = vector.shape_cast %116 : vector<1x32x128xbf16> to vector<32x128xbf16>
    %c6_103 = arith.constant 6 : index
    %c0_104 = arith.constant 0 : index
    %c0_105 = arith.constant 0 : index
    %118 = vector.load %arg2[%c6_103, %c0_104, %c0_105] : memref<9x128x128xbf16, #tpu.memory_space<vmem>>, vector<1x128x128xbf16>
    %119 = vector.shape_cast %118 : vector<1x128x128xbf16> to vector<128x128xbf16>
    %cst_106 = arith.constant dense<0.000000e+00> : vector<32x128xf32>
    %120 = tpu.matmul %117, %119, %cst_106 {dimension_numbers = #tpu.dot_dimension_numbers<[1], [0], [0], [1], [0, 0, 1, 1], [], []>} : vector<32x128xbf16>, vector<128x128xbf16>, vector<32x128xf32> -> vector<32x128xf32>
    %121 = arith.addf %115, %120 : vector<32x128xf32>
    %c0_107 = arith.constant 0 : index
    %c293 = arith.constant 293 : index
    %c0_108 = arith.constant 0 : index
    %122 = vector.load %arg1[%c0_107, %c293, %c0_108] : memref<1x342x128xbf16, #tpu.memory_space<vmem>>, vector<1x32x128xbf16>
    %123 = vector.shape_cast %122 : vector<1x32x128xbf16> to vector<32x128xbf16>
    %c7_109 = arith.constant 7 : index
    %c0_110 = arith.constant 0 : index
    %c0_111 = arith.constant 0 : index
    %124 = vector.load %arg2[%c7_109, %c0_110, %c0_111] : memref<9x128x128xbf16, #tpu.memory_space<vmem>>, vector<1x128x128xbf16>
    %125 = vector.shape_cast %124 : vector<1x128x128xbf16> to vector<128x128xbf16>
    %cst_112 = arith.constant dense<0.000000e+00> : vector<32x128xf32>
    %126 = tpu.matmul %123, %125, %cst_112 {dimension_numbers = #tpu.dot_dimension_numbers<[1], [0], [0], [1], [0, 0, 1, 1], [], []>} : vector<32x128xbf16>, vector<128x128xbf16>, vector<32x128xf32> -> vector<32x128xf32>
    %127 = arith.addf %121, %126 : vector<32x128xf32>
    %c0_113 = arith.constant 0 : index
    %c294 = arith.constant 294 : index
    %c0_114 = arith.constant 0 : index
    %128 = vector.load %arg1[%c0_113, %c294, %c0_114] : memref<1x342x128xbf16, #tpu.memory_space<vmem>>, vector<1x32x128xbf16>
    %129 = vector.shape_cast %128 : vector<1x32x128xbf16> to vector<32x128xbf16>
    %c8_115 = arith.constant 8 : index
    %c0_116 = arith.constant 0 : index
    %c0_117 = arith.constant 0 : index
    %130 = vector.load %arg2[%c8_115, %c0_116, %c0_117] : memref<9x128x128xbf16, #tpu.memory_space<vmem>>, vector<1x128x128xbf16>
    %131 = vector.shape_cast %130 : vector<1x128x128xbf16> to vector<128x128xbf16>
    %cst_118 = arith.constant dense<0.000000e+00> : vector<32x128xf32>
    %132 = tpu.matmul %129, %131, %cst_118 {dimension_numbers = #tpu.dot_dimension_numbers<[1], [0], [0], [1], [0, 0, 1, 1], [], []>} : vector<32x128xbf16>, vector<128x128xbf16>, vector<32x128xf32> -> vector<32x128xf32>
    %133 = arith.addf %127, %132 : vector<32x128xf32>
    %c275_119 = arith.constant 275 : index
    %c0_120 = arith.constant 0 : index
    %134 = vector.load %arg3[%c275_119, %c0_120] : memref<342x1xf32, #tpu.memory_space<vmem>>, vector<32x1xf32>
    %135 = vector.broadcast %134 : vector<32x1xf32> to vector<32x128xf32>
    %136 = arith.mulf %133, %135 : vector<32x128xf32>
    %cst_121 = arith.constant dense<0.000000e+00> : vector<128xf32>
    %137 = vector.multi_reduction <add>, %136, %cst_121 [0] : vector<32x128xf32> to vector<128xf32>
    %138 = vector.shape_cast %137 : vector<128xf32> to vector<1x128xf32>
    %139 = arith.addf %70, %138 : vector<1x128xf32>
    %140 = arith.mulf %136, %136 : vector<32x128xf32>
    %cst_122 = arith.constant dense<0.000000e+00> : vector<128xf32>
    %141 = vector.multi_reduction <add>, %140, %cst_122 [0] : vector<32x128xf32> to vector<128xf32>
    %142 = vector.shape_cast %141 : vector<128xf32> to vector<1x128xf32>
    %143 = arith.addf %74, %142 : vector<1x128xf32>
    %144 = arith.truncf %136 : vector<32x128xf32> to vector<32x128xbf16>
    %c0_123 = arith.constant 0 : index
    %c275_124 = arith.constant 275 : index
    %c0_125 = arith.constant 0 : index
    %145 = vector.load %arg4[%c0_123, %c275_124, %c0_125] : memref<1x342x128xbf16, #tpu.memory_space<vmem>>, vector<1x32x128xbf16>
    %146 = vector.shape_cast %145 : vector<1x32x128xbf16> to vector<32x128xbf16>
    %147 = vector.shape_cast %144 : vector<32x128xbf16> to vector<1x32x128xbf16>
    tpu.vector_store %arg4[%c0_123, %c275_124, %c0_125], %147 {strides = array<i32>} : memref<1x342x128xbf16, #tpu.memory_space<vmem>>, vector<1x32x128xbf16>,
    %c0_126 = arith.constant 0 : index
    %c0_127 = arith.constant 0 : index
    %c0_128 = arith.constant 0 : index
    %148 = vector.load %arg5[%c0_126, %c0_127, %c0_128] : memref<1x2x128xf32, #tpu.memory_space<vmem>>, vector<1x1x128xf32>
    %149 = vector.shape_cast %148 : vector<1x1x128xf32> to vector<1x128xf32>
    %150 = vector.shape_cast %139 : vector<1x128xf32> to vector<1x1x128xf32>
    tpu.vector_store %arg5[%c0_126, %c0_127, %c0_128], %150 {strides = array<i32>} : memref<1x2x128xf32, #tpu.memory_space<vmem>>, vector<1x1x128xf32>,
    %c0_129 = arith.constant 0 : index
    %c1_130 = arith.constant 1 : index
    %c0_131 = arith.constant 0 : index
    %151 = vector.load %arg5[%c0_129, %c1_130, %c0_131] : memref<1x2x128xf32, #tpu.memory_space<vmem>>, vector<1x1x128xf32>
    %152 = vector.shape_cast %151 : vector<1x1x128xf32> to vector<1x128xf32>
    %153 = vector.shape_cast %143 : vector<1x128xf32> to vector<1x1x128xf32>
    tpu.vector_store %arg5[%c0_129, %c1_130, %c0_131], %153 {strides = array<i32>} : memref<1x2x128xf32, #tpu.memory_space<vmem>>, vector<1x1x128xf32>,
    return
  }
  func.func @transform_0(%arg0: i32) -> (i32, i32, i32) {
    %c0_i32 = arith.constant 0 : i32
    %c0_i32_0 = arith.constant 0 : i32
    %c0_i32_1 = arith.constant 0 : i32
    return %arg0, %c0_i32, %c0_i32_0 : i32, i32, i32
  }
  func.func @transform_1(%arg0: i32) -> (i32, i32, i32) {
    %c0_i32 = arith.constant 0 : i32
    %c0_i32_0 = arith.constant 0 : i32
    %c0_i32_1 = arith.constant 0 : i32
    %c0_i32_2 = arith.constant 0 : i32
    return %c0_i32, %c0_i32_0, %c0_i32_1 : i32, i32, i32
  }
  func.func @transform_2(%arg0: i32) -> (i32, i32) {
    %c0_i32 = arith.constant 0 : i32
    %c0_i32_0 = arith.constant 0 : i32
    %c0_i32_1 = arith.constant 0 : i32
    return %c0_i32, %c0_i32_0 : i32, i32
  }
  func.func @transform_3(%arg0: i32) -> (i32, i32, i32) {
    %c0_i32 = arith.constant 0 : i32
    %c0_i32_0 = arith.constant 0 : i32
    %c0_i32_1 = arith.constant 0 : i32
    return %arg0, %c0_i32, %c0_i32_0 : i32, i32, i32
  }
  func.func @transform_4(%arg0: i32) -> (i32, i32, i32) {
    %c0_i32 = arith.constant 0 : i32
    %c0_i32_0 = arith.constant 0 : i32
    %c0_i32_1 = arith.constant 0 : i32
    return %arg0, %c0_i32, %c0_i32_0 : i32, i32, i32
  }
}

module attributes {stable_mosaic.version = 11 : i64} {
  func.func @_bn_relu_conv_stats_kernel(%arg0: i32, %arg1: memref<1x342x128xbf16, #tpu.memory_space<vmem>>, %arg2: memref<2x128xf32, #tpu.memory_space<vmem>>, %arg3: memref<342x1xf32, #tpu.memory_space<vmem>>, %arg4: memref<9x128x128xbf16, #tpu.memory_space<vmem>>, %arg5: memref<1x288x128xbf16, #tpu.memory_space<vmem>>, %arg6: memref<1x2x128xf32, #tpu.memory_space<vmem>>, %arg7: memref<342x128xbf16, #tpu.memory_space<vmem>>) attributes {dimension_semantics = [#tpu.dimension_semantics<parallel>], iteration_bounds = array<i64: 2>, scalar_prefetch = 0 : i64, scratch_operands = 1 : i64, tpu.core_type = #tpu.core_type<tc>, window_params = [{transform_indices = @transform_0, window_bounds = array<i64: 1, 342, 128>}, {pipeline_mode = #tpu.pipeline_mode<synchronous>, transform_indices = @transform_1, window_bounds = array<i64: 2, 128>}, {pipeline_mode = #tpu.pipeline_mode<synchronous>, transform_indices = @transform_2, window_bounds = array<i64: 342, 1>}, {pipeline_mode = #tpu.pipeline_mode<synchronous>, transform_indices = @transform_3, window_bounds = array<i64: 9, 128, 128>}, {transform_indices = @transform_4, window_bounds = array<i64: 1, 288, 128>}, {transform_indices = @transform_5, window_bounds = array<i64: 1, 2, 128>}]} {
    %c0 = arith.constant 0 : index
    %c0_0 = arith.constant 0 : index
    %0 = vector.load %arg2[%c0, %c0_0] : memref<2x128xf32, #tpu.memory_space<vmem>>, vector<1x128xf32>
    %c1 = arith.constant 1 : index
    %c0_1 = arith.constant 0 : index
    %1 = vector.load %arg2[%c1, %c0_1] : memref<2x128xf32, #tpu.memory_space<vmem>>, vector<1x128xf32>
    %c0_2 = arith.constant 0 : index
    %c0_3 = arith.constant 0 : index
    %c0_4 = arith.constant 0 : index
    %2 = vector.load %arg1[%c0_2, %c0_3, %c0_4] : memref<1x342x128xbf16, #tpu.memory_space<vmem>>, vector<1x256x128xbf16>
    %3 = vector.shape_cast %2 : vector<1x256x128xbf16> to vector<256x128xbf16>
    %4 = arith.extf %3 : vector<256x128xbf16> to vector<256x128xf32>
    %5 = vector.broadcast %0 : vector<1x128xf32> to vector<256x128xf32>
    %6 = arith.mulf %4, %5 : vector<256x128xf32>
    %7 = vector.broadcast %1 : vector<1x128xf32> to vector<256x128xf32>
    %8 = arith.addf %6, %7 : vector<256x128xf32>
    %cst = arith.constant 0.000000e+00 : f32
    %9 = vector.broadcast %cst : f32 to vector<256x128xf32>
    %10 = arith.maximumf %8, %9 : vector<256x128xf32>
    %c0_5 = arith.constant 0 : index
    %c0_6 = arith.constant 0 : index
    %11 = vector.load %arg3[%c0_5, %c0_6] : memref<342x1xf32, #tpu.memory_space<vmem>>, vector<256x1xf32>
    %12 = vector.broadcast %11 : vector<256x1xf32> to vector<256x128xf32>
    %13 = arith.mulf %10, %12 : vector<256x128xf32>
    %14 = arith.truncf %13 : vector<256x128xf32> to vector<256x128xbf16>
    %c0_7 = arith.constant 0 : index
    %c0_8 = arith.constant 0 : index
    %15 = vector.load %arg7[%c0_7, %c0_8] : memref<342x128xbf16, #tpu.memory_space<vmem>>, vector<256x128xbf16>
    tpu.vector_store %arg7[%c0_7, %c0_8], %14 {strides = array<i32>} : memref<342x128xbf16, #tpu.memory_space<vmem>>, vector<256x128xbf16>,
    %c0_9 = arith.constant 0 : index
    %c256 = arith.constant 256 : index
    %c0_10 = arith.constant 0 : index
    %16 = vector.load %arg1[%c0_9, %c256, %c0_10] : memref<1x342x128xbf16, #tpu.memory_space<vmem>>, vector<1x86x128xbf16>
    %17 = vector.shape_cast %16 : vector<1x86x128xbf16> to vector<86x128xbf16>
    %18 = arith.extf %17 : vector<86x128xbf16> to vector<86x128xf32>
    %19 = vector.broadcast %0 : vector<1x128xf32> to vector<86x128xf32>
    %20 = arith.mulf %18, %19 : vector<86x128xf32>
    %21 = vector.broadcast %1 : vector<1x128xf32> to vector<86x128xf32>
    %22 = arith.addf %20, %21 : vector<86x128xf32>
    %cst_11 = arith.constant 0.000000e+00 : f32
    %23 = vector.broadcast %cst_11 : f32 to vector<86x128xf32>
    %24 = arith.maximumf %22, %23 : vector<86x128xf32>
    %c256_12 = arith.constant 256 : index
    %c0_13 = arith.constant 0 : index
    %25 = vector.load %arg3[%c256_12, %c0_13] : memref<342x1xf32, #tpu.memory_space<vmem>>, vector<86x1xf32>
    %26 = vector.broadcast %25 : vector<86x1xf32> to vector<86x128xf32>
    %27 = arith.mulf %24, %26 : vector<86x128xf32>
    %28 = arith.truncf %27 : vector<86x128xf32> to vector<86x128xbf16>
    %c256_14 = arith.constant 256 : index
    %c0_15 = arith.constant 0 : index
    %29 = vector.load %arg7[%c256_14, %c0_15] : memref<342x128xbf16, #tpu.memory_space<vmem>>, vector<86x128xbf16>
    tpu.vector_store %arg7[%c256_14, %c0_15], %28 {strides = array<i32>} : memref<342x128xbf16, #tpu.memory_space<vmem>>, vector<86x128xbf16>,
    %cst_16 = arith.constant 0.000000e+00 : f32
    %30 = vector.broadcast %cst_16 : f32 to vector<1x128xf32>
    %cst_17 = arith.constant 0.000000e+00 : f32
    %31 = vector.broadcast %cst_17 : f32 to vector<1x128xf32>
    %cst_18 = arith.constant 0.000000e+00 : f32
    %32 = vector.broadcast %cst_18 : f32 to vector<256x128xf32>
    %c0_19 = arith.constant 0 : index
    %c0_20 = arith.constant 0 : index
    %33 = vector.load %arg7[%c0_19, %c0_20] : memref<342x128xbf16, #tpu.memory_space<vmem>>, vector<256x128xbf16>
    %c0_21 = arith.constant 0 : index
    %c0_22 = arith.constant 0 : index
    %c0_23 = arith.constant 0 : index
    %34 = vector.load %arg4[%c0_21, %c0_22, %c0_23] : memref<9x128x128xbf16, #tpu.memory_space<vmem>>, vector<1x128x128xbf16>
    %35 = vector.shape_cast %34 : vector<1x128x128xbf16> to vector<128x128xbf16>
    %cst_24 = arith.constant dense<0.000000e+00> : vector<256x128xf32>
    %36 = tpu.matmul %33, %35, %cst_24 {dimension_numbers = #tpu.dot_dimension_numbers<[1], [0], [0], [1], [0, 0, 1, 1], [], []>} : vector<256x128xbf16>, vector<128x128xbf16>, vector<256x128xf32> -> vector<256x128xf32>
    %37 = arith.addf %32, %36 : vector<256x128xf32>
    %c1_25 = arith.constant 1 : index
    %c0_26 = arith.constant 0 : index
    %38 = vector.load %arg7[%c1_25, %c0_26] : memref<342x128xbf16, #tpu.memory_space<vmem>>, vector<256x128xbf16>
    %c1_27 = arith.constant 1 : index
    %c0_28 = arith.constant 0 : index
    %c0_29 = arith.constant 0 : index
    %39 = vector.load %arg4[%c1_27, %c0_28, %c0_29] : memref<9x128x128xbf16, #tpu.memory_space<vmem>>, vector<1x128x128xbf16>
    %40 = vector.shape_cast %39 : vector<1x128x128xbf16> to vector<128x128xbf16>
    %cst_30 = arith.constant dense<0.000000e+00> : vector<256x128xf32>
    %41 = tpu.matmul %38, %40, %cst_30 {dimension_numbers = #tpu.dot_dimension_numbers<[1], [0], [0], [1], [0, 0, 1, 1], [], []>} : vector<256x128xbf16>, vector<128x128xbf16>, vector<256x128xf32> -> vector<256x128xf32>
    %42 = arith.addf %37, %41 : vector<256x128xf32>
    %c2 = arith.constant 2 : index
    %c0_31 = arith.constant 0 : index
    %43 = vector.load %arg7[%c2, %c0_31] : memref<342x128xbf16, #tpu.memory_space<vmem>>, vector<256x128xbf16>
    %c2_32 = arith.constant 2 : index
    %c0_33 = arith.constant 0 : index
    %c0_34 = arith.constant 0 : index
    %44 = vector.load %arg4[%c2_32, %c0_33, %c0_34] : memref<9x128x128xbf16, #tpu.memory_space<vmem>>, vector<1x128x128xbf16>
    %45 = vector.shape_cast %44 : vector<1x128x128xbf16> to vector<128x128xbf16>
    %cst_35 = arith.constant dense<0.000000e+00> : vector<256x128xf32>
    %46 = tpu.matmul %43, %45, %cst_35 {dimension_numbers = #tpu.dot_dimension_numbers<[1], [0], [0], [1], [0, 0, 1, 1], [], []>} : vector<256x128xbf16>, vector<128x128xbf16>, vector<256x128xf32> -> vector<256x128xf32>
    %47 = arith.addf %42, %46 : vector<256x128xf32>
    %c18 = arith.constant 18 : index
    %c0_36 = arith.constant 0 : index
    %48 = vector.load %arg7[%c18, %c0_36] : memref<342x128xbf16, #tpu.memory_space<vmem>>, vector<256x128xbf16>
    %c3 = arith.constant 3 : index
    %c0_37 = arith.constant 0 : index
    %c0_38 = arith.constant 0 : index
    %49 = vector.load %arg4[%c3, %c0_37, %c0_38] : memref<9x128x128xbf16, #tpu.memory_space<vmem>>, vector<1x128x128xbf16>
    %50 = vector.shape_cast %49 : vector<1x128x128xbf16> to vector<128x128xbf16>
    %cst_39 = arith.constant dense<0.000000e+00> : vector<256x128xf32>
    %51 = tpu.matmul %48, %50, %cst_39 {dimension_numbers = #tpu.dot_dimension_numbers<[1], [0], [0], [1], [0, 0, 1, 1], [], []>} : vector<256x128xbf16>, vector<128x128xbf16>, vector<256x128xf32> -> vector<256x128xf32>
    %52 = arith.addf %47, %51 : vector<256x128xf32>
    %c19 = arith.constant 19 : index
    %c0_40 = arith.constant 0 : index
    %53 = vector.load %arg7[%c19, %c0_40] : memref<342x128xbf16, #tpu.memory_space<vmem>>, vector<256x128xbf16>
    %c4 = arith.constant 4 : index
    %c0_41 = arith.constant 0 : index
    %c0_42 = arith.constant 0 : index
    %54 = vector.load %arg4[%c4, %c0_41, %c0_42] : memref<9x128x128xbf16, #tpu.memory_space<vmem>>, vector<1x128x128xbf16>
    %55 = vector.shape_cast %54 : vector<1x128x128xbf16> to vector<128x128xbf16>
    %cst_43 = arith.constant dense<0.000000e+00> : vector<256x128xf32>
    %56 = tpu.matmul %53, %55, %cst_43 {dimension_numbers = #tpu.dot_dimension_numbers<[1], [0], [0], [1], [0, 0, 1, 1], [], []>} : vector<256x128xbf16>, vector<128x128xbf16>, vector<256x128xf32> -> vector<256x128xf32>
    %57 = arith.addf %52, %56 : vector<256x128xf32>
    %c20 = arith.constant 20 : index
    %c0_44 = arith.constant 0 : index
    %58 = vector.load %arg7[%c20, %c0_44] : memref<342x128xbf16, #tpu.memory_space<vmem>>, vector<256x128xbf16>
    %c5 = arith.constant 5 : index
    %c0_45 = arith.constant 0 : index
    %c0_46 = arith.constant 0 : index
    %59 = vector.load %arg4[%c5, %c0_45, %c0_46] : memref<9x128x128xbf16, #tpu.memory_space<vmem>>, vector<1x128x128xbf16>
    %60 = vector.shape_cast %59 : vector<1x128x128xbf16> to vector<128x128xbf16>
    %cst_47 = arith.constant dense<0.000000e+00> : vector<256x128xf32>
    %61 = tpu.matmul %58, %60, %cst_47 {dimension_numbers = #tpu.dot_dimension_numbers<[1], [0], [0], [1], [0, 0, 1, 1], [], []>} : vector<256x128xbf16>, vector<128x128xbf16>, vector<256x128xf32> -> vector<256x128xf32>
    %62 = arith.addf %57, %61 : vector<256x128xf32>
    %c36 = arith.constant 36 : index
    %c0_48 = arith.constant 0 : index
    %63 = vector.load %arg7[%c36, %c0_48] : memref<342x128xbf16, #tpu.memory_space<vmem>>, vector<256x128xbf16>
    %c6 = arith.constant 6 : index
    %c0_49 = arith.constant 0 : index
    %c0_50 = arith.constant 0 : index
    %64 = vector.load %arg4[%c6, %c0_49, %c0_50] : memref<9x128x128xbf16, #tpu.memory_space<vmem>>, vector<1x128x128xbf16>
    %65 = vector.shape_cast %64 : vector<1x128x128xbf16> to vector<128x128xbf16>
    %cst_51 = arith.constant dense<0.000000e+00> : vector<256x128xf32>
    %66 = tpu.matmul %63, %65, %cst_51 {dimension_numbers = #tpu.dot_dimension_numbers<[1], [0], [0], [1], [0, 0, 1, 1], [], []>} : vector<256x128xbf16>, vector<128x128xbf16>, vector<256x128xf32> -> vector<256x128xf32>
    %67 = arith.addf %62, %66 : vector<256x128xf32>
    %c37 = arith.constant 37 : index
    %c0_52 = arith.constant 0 : index
    %68 = vector.load %arg7[%c37, %c0_52] : memref<342x128xbf16, #tpu.memory_space<vmem>>, vector<256x128xbf16>
    %c7 = arith.constant 7 : index
    %c0_53 = arith.constant 0 : index
    %c0_54 = arith.constant 0 : index
    %69 = vector.load %arg4[%c7, %c0_53, %c0_54] : memref<9x128x128xbf16, #tpu.memory_space<vmem>>, vector<1x128x128xbf16>
    %70 = vector.shape_cast %69 : vector<1x128x128xbf16> to vector<128x128xbf16>
    %cst_55 = arith.constant dense<0.000000e+00> : vector<256x128xf32>
    %71 = tpu.matmul %68, %70, %cst_55 {dimension_numbers = #tpu.dot_dimension_numbers<[1], [0], [0], [1], [0, 0, 1, 1], [], []>} : vector<256x128xbf16>, vector<128x128xbf16>, vector<256x128xf32> -> vector<256x128xf32>
    %72 = arith.addf %67, %71 : vector<256x128xf32>
    %c38 = arith.constant 38 : index
    %c0_56 = arith.constant 0 : index
    %73 = vector.load %arg7[%c38, %c0_56] : memref<342x128xbf16, #tpu.memory_space<vmem>>, vector<256x128xbf16>
    %c8 = arith.constant 8 : index
    %c0_57 = arith.constant 0 : index
    %c0_58 = arith.constant 0 : index
    %74 = vector.load %arg4[%c8, %c0_57, %c0_58] : memref<9x128x128xbf16, #tpu.memory_space<vmem>>, vector<1x128x128xbf16>
    %75 = vector.shape_cast %74 : vector<1x128x128xbf16> to vector<128x128xbf16>
    %cst_59 = arith.constant dense<0.000000e+00> : vector<256x128xf32>
    %76 = tpu.matmul %73, %75, %cst_59 {dimension_numbers = #tpu.dot_dimension_numbers<[1], [0], [0], [1], [0, 0, 1, 1], [], []>} : vector<256x128xbf16>, vector<128x128xbf16>, vector<256x128xf32> -> vector<256x128xf32>
    %77 = arith.addf %72, %76 : vector<256x128xf32>
    %c19_60 = arith.constant 19 : index
    %c0_61 = arith.constant 0 : index
    %78 = vector.load %arg3[%c19_60, %c0_61] : memref<342x1xf32, #tpu.memory_space<vmem>>, vector<256x1xf32>
    %79 = vector.broadcast %78 : vector<256x1xf32> to vector<256x128xf32>
    %80 = arith.mulf %77, %79 : vector<256x128xf32>
    %cst_62 = arith.constant dense<0.000000e+00> : vector<128xf32>
    %81 = vector.multi_reduction <add>, %80, %cst_62 [0] : vector<256x128xf32> to vector<128xf32>
    %82 = vector.shape_cast %81 : vector<128xf32> to vector<1x128xf32>
    %83 = arith.addf %30, %82 : vector<1x128xf32>
    %84 = arith.mulf %80, %80 : vector<256x128xf32>
    %cst_63 = arith.constant dense<0.000000e+00> : vector<128xf32>
    %85 = vector.multi_reduction <add>, %84, %cst_63 [0] : vector<256x128xf32> to vector<128xf32>
    %86 = vector.shape_cast %85 : vector<128xf32> to vector<1x128xf32>
    %87 = arith.addf %31, %86 : vector<1x128xf32>
    %88 = arith.truncf %80 : vector<256x128xf32> to vector<256x128xbf16>
    %c0_64 = arith.constant 0 : index
    %c0_65 = arith.constant 0 : index
    %c0_66 = arith.constant 0 : index
    %89 = vector.load %arg5[%c0_64, %c0_65, %c0_66] : memref<1x288x128xbf16, #tpu.memory_space<vmem>>, vector<1x256x128xbf16>
    %90 = vector.shape_cast %89 : vector<1x256x128xbf16> to vector<256x128xbf16>
    %91 = vector.shape_cast %88 : vector<256x128xbf16> to vector<1x256x128xbf16>
    tpu.vector_store %arg5[%c0_64, %c0_65, %c0_66], %91 {strides = array<i32>} : memref<1x288x128xbf16, #tpu.memory_space<vmem>>, vector<1x256x128xbf16>,
    %cst_67 = arith.constant 0.000000e+00 : f32
    %92 = vector.broadcast %cst_67 : f32 to vector<32x128xf32>
    %c256_68 = arith.constant 256 : index
    %c0_69 = arith.constant 0 : index
    %93 = vector.load %arg7[%c256_68, %c0_69] : memref<342x128xbf16, #tpu.memory_space<vmem>>, vector<32x128xbf16>
    %c0_70 = arith.constant 0 : index
    %c0_71 = arith.constant 0 : index
    %c0_72 = arith.constant 0 : index
    %94 = vector.load %arg4[%c0_70, %c0_71, %c0_72] : memref<9x128x128xbf16, #tpu.memory_space<vmem>>, vector<1x128x128xbf16>
    %95 = vector.shape_cast %94 : vector<1x128x128xbf16> to vector<128x128xbf16>
    %cst_73 = arith.constant dense<0.000000e+00> : vector<32x128xf32>
    %96 = tpu.matmul %93, %95, %cst_73 {dimension_numbers = #tpu.dot_dimension_numbers<[1], [0], [0], [1], [0, 0, 1, 1], [], []>} : vector<32x128xbf16>, vector<128x128xbf16>, vector<32x128xf32> -> vector<32x128xf32>
    %97 = arith.addf %92, %96 : vector<32x128xf32>
    %c257 = arith.constant 257 : index
    %c0_74 = arith.constant 0 : index
    %98 = vector.load %arg7[%c257, %c0_74] : memref<342x128xbf16, #tpu.memory_space<vmem>>, vector<32x128xbf16>
    %c1_75 = arith.constant 1 : index
    %c0_76 = arith.constant 0 : index
    %c0_77 = arith.constant 0 : index
    %99 = vector.load %arg4[%c1_75, %c0_76, %c0_77] : memref<9x128x128xbf16, #tpu.memory_space<vmem>>, vector<1x128x128xbf16>
    %100 = vector.shape_cast %99 : vector<1x128x128xbf16> to vector<128x128xbf16>
    %cst_78 = arith.constant dense<0.000000e+00> : vector<32x128xf32>
    %101 = tpu.matmul %98, %100, %cst_78 {dimension_numbers = #tpu.dot_dimension_numbers<[1], [0], [0], [1], [0, 0, 1, 1], [], []>} : vector<32x128xbf16>, vector<128x128xbf16>, vector<32x128xf32> -> vector<32x128xf32>
    %102 = arith.addf %97, %101 : vector<32x128xf32>
    %c258 = arith.constant 258 : index
    %c0_79 = arith.constant 0 : index
    %103 = vector.load %arg7[%c258, %c0_79] : memref<342x128xbf16, #tpu.memory_space<vmem>>, vector<32x128xbf16>
    %c2_80 = arith.constant 2 : index
    %c0_81 = arith.constant 0 : index
    %c0_82 = arith.constant 0 : index
    %104 = vector.load %arg4[%c2_80, %c0_81, %c0_82] : memref<9x128x128xbf16, #tpu.memory_space<vmem>>, vector<1x128x128xbf16>
    %105 = vector.shape_cast %104 : vector<1x128x128xbf16> to vector<128x128xbf16>
    %cst_83 = arith.constant dense<0.000000e+00> : vector<32x128xf32>
    %106 = tpu.matmul %103, %105, %cst_83 {dimension_numbers = #tpu.dot_dimension_numbers<[1], [0], [0], [1], [0, 0, 1, 1], [], []>} : vector<32x128xbf16>, vector<128x128xbf16>, vector<32x128xf32> -> vector<32x128xf32>
    %107 = arith.addf %102, %106 : vector<32x128xf32>
    %c274 = arith.constant 274 : index
    %c0_84 = arith.constant 0 : index
    %108 = vector.load %arg7[%c274, %c0_84] : memref<342x128xbf16, #tpu.memory_space<vmem>>, vector<32x128xbf16>
    %c3_85 = arith.constant 3 : index
    %c0_86 = arith.constant 0 : index
    %c0_87 = arith.constant 0 : index
    %109 = vector.load %arg4[%c3_85, %c0_86, %c0_87] : memref<9x128x128xbf16, #tpu.memory_space<vmem>>, vector<1x128x128xbf16>
    %110 = vector.shape_cast %109 : vector<1x128x128xbf16> to vector<128x128xbf16>
    %cst_88 = arith.constant dense<0.000000e+00> : vector<32x128xf32>
    %111 = tpu.matmul %108, %110, %cst_88 {dimension_numbers = #tpu.dot_dimension_numbers<[1], [0], [0], [1], [0, 0, 1, 1], [], []>} : vector<32x128xbf16>, vector<128x128xbf16>, vector<32x128xf32> -> vector<32x128xf32>
    %112 = arith.addf %107, %111 : vector<32x128xf32>
    %c275 = arith.constant 275 : index
    %c0_89 = arith.constant 0 : index
    %113 = vector.load %arg7[%c275, %c0_89] : memref<342x128xbf16, #tpu.memory_space<vmem>>, vector<32x128xbf16>
    %c4_90 = arith.constant 4 : index
    %c0_91 = arith.constant 0 : index
    %c0_92 = arith.constant 0 : index
    %114 = vector.load %arg4[%c4_90, %c0_91, %c0_92] : memref<9x128x128xbf16, #tpu.memory_space<vmem>>, vector<1x128x128xbf16>
    %115 = vector.shape_cast %114 : vector<1x128x128xbf16> to vector<128x128xbf16>
    %cst_93 = arith.constant dense<0.000000e+00> : vector<32x128xf32>
    %116 = tpu.matmul %113, %115, %cst_93 {dimension_numbers = #tpu.dot_dimension_numbers<[1], [0], [0], [1], [0, 0, 1, 1], [], []>} : vector<32x128xbf16>, vector<128x128xbf16>, vector<32x128xf32> -> vector<32x128xf32>
    %117 = arith.addf %112, %116 : vector<32x128xf32>
    %c276 = arith.constant 276 : index
    %c0_94 = arith.constant 0 : index
    %118 = vector.load %arg7[%c276, %c0_94] : memref<342x128xbf16, #tpu.memory_space<vmem>>, vector<32x128xbf16>
    %c5_95 = arith.constant 5 : index
    %c0_96 = arith.constant 0 : index
    %c0_97 = arith.constant 0 : index
    %119 = vector.load %arg4[%c5_95, %c0_96, %c0_97] : memref<9x128x128xbf16, #tpu.memory_space<vmem>>, vector<1x128x128xbf16>
    %120 = vector.shape_cast %119 : vector<1x128x128xbf16> to vector<128x128xbf16>
    %cst_98 = arith.constant dense<0.000000e+00> : vector<32x128xf32>
    %121 = tpu.matmul %118, %120, %cst_98 {dimension_numbers = #tpu.dot_dimension_numbers<[1], [0], [0], [1], [0, 0, 1, 1], [], []>} : vector<32x128xbf16>, vector<128x128xbf16>, vector<32x128xf32> -> vector<32x128xf32>
    %122 = arith.addf %117, %121 : vector<32x128xf32>
    %c292 = arith.constant 292 : index
    %c0_99 = arith.constant 0 : index
    %123 = vector.load %arg7[%c292, %c0_99] : memref<342x128xbf16, #tpu.memory_space<vmem>>, vector<32x128xbf16>
    %c6_100 = arith.constant 6 : index
    %c0_101 = arith.constant 0 : index
    %c0_102 = arith.constant 0 : index
    %124 = vector.load %arg4[%c6_100, %c0_101, %c0_102] : memref<9x128x128xbf16, #tpu.memory_space<vmem>>, vector<1x128x128xbf16>
    %125 = vector.shape_cast %124 : vector<1x128x128xbf16> to vector<128x128xbf16>
    %cst_103 = arith.constant dense<0.000000e+00> : vector<32x128xf32>
    %126 = tpu.matmul %123, %125, %cst_103 {dimension_numbers = #tpu.dot_dimension_numbers<[1], [0], [0], [1], [0, 0, 1, 1], [], []>} : vector<32x128xbf16>, vector<128x128xbf16>, vector<32x128xf32> -> vector<32x128xf32>
    %127 = arith.addf %122, %126 : vector<32x128xf32>
    %c293 = arith.constant 293 : index
    %c0_104 = arith.constant 0 : index
    %128 = vector.load %arg7[%c293, %c0_104] : memref<342x128xbf16, #tpu.memory_space<vmem>>, vector<32x128xbf16>
    %c7_105 = arith.constant 7 : index
    %c0_106 = arith.constant 0 : index
    %c0_107 = arith.constant 0 : index
    %129 = vector.load %arg4[%c7_105, %c0_106, %c0_107] : memref<9x128x128xbf16, #tpu.memory_space<vmem>>, vector<1x128x128xbf16>
    %130 = vector.shape_cast %129 : vector<1x128x128xbf16> to vector<128x128xbf16>
    %cst_108 = arith.constant dense<0.000000e+00> : vector<32x128xf32>
    %131 = tpu.matmul %128, %130, %cst_108 {dimension_numbers = #tpu.dot_dimension_numbers<[1], [0], [0], [1], [0, 0, 1, 1], [], []>} : vector<32x128xbf16>, vector<128x128xbf16>, vector<32x128xf32> -> vector<32x128xf32>
    %132 = arith.addf %127, %131 : vector<32x128xf32>
    %c294 = arith.constant 294 : index
    %c0_109 = arith.constant 0 : index
    %133 = vector.load %arg7[%c294, %c0_109] : memref<342x128xbf16, #tpu.memory_space<vmem>>, vector<32x128xbf16>
    %c8_110 = arith.constant 8 : index
    %c0_111 = arith.constant 0 : index
    %c0_112 = arith.constant 0 : index
    %134 = vector.load %arg4[%c8_110, %c0_111, %c0_112] : memref<9x128x128xbf16, #tpu.memory_space<vmem>>, vector<1x128x128xbf16>
    %135 = vector.shape_cast %134 : vector<1x128x128xbf16> to vector<128x128xbf16>
    %cst_113 = arith.constant dense<0.000000e+00> : vector<32x128xf32>
    %136 = tpu.matmul %133, %135, %cst_113 {dimension_numbers = #tpu.dot_dimension_numbers<[1], [0], [0], [1], [0, 0, 1, 1], [], []>} : vector<32x128xbf16>, vector<128x128xbf16>, vector<32x128xf32> -> vector<32x128xf32>
    %137 = arith.addf %132, %136 : vector<32x128xf32>
    %c275_114 = arith.constant 275 : index
    %c0_115 = arith.constant 0 : index
    %138 = vector.load %arg3[%c275_114, %c0_115] : memref<342x1xf32, #tpu.memory_space<vmem>>, vector<32x1xf32>
    %139 = vector.broadcast %138 : vector<32x1xf32> to vector<32x128xf32>
    %140 = arith.mulf %137, %139 : vector<32x128xf32>
    %cst_116 = arith.constant dense<0.000000e+00> : vector<128xf32>
    %141 = vector.multi_reduction <add>, %140, %cst_116 [0] : vector<32x128xf32> to vector<128xf32>
    %142 = vector.shape_cast %141 : vector<128xf32> to vector<1x128xf32>
    %143 = arith.addf %83, %142 : vector<1x128xf32>
    %144 = arith.mulf %140, %140 : vector<32x128xf32>
    %cst_117 = arith.constant dense<0.000000e+00> : vector<128xf32>
    %145 = vector.multi_reduction <add>, %144, %cst_117 [0] : vector<32x128xf32> to vector<128xf32>
    %146 = vector.shape_cast %145 : vector<128xf32> to vector<1x128xf32>
    %147 = arith.addf %87, %146 : vector<1x128xf32>
    %148 = arith.truncf %140 : vector<32x128xf32> to vector<32x128xbf16>
    %c0_118 = arith.constant 0 : index
    %c256_119 = arith.constant 256 : index
    %c0_120 = arith.constant 0 : index
    %149 = vector.load %arg5[%c0_118, %c256_119, %c0_120] : memref<1x288x128xbf16, #tpu.memory_space<vmem>>, vector<1x32x128xbf16>
    %150 = vector.shape_cast %149 : vector<1x32x128xbf16> to vector<32x128xbf16>
    %151 = vector.shape_cast %148 : vector<32x128xbf16> to vector<1x32x128xbf16>
    tpu.vector_store %arg5[%c0_118, %c256_119, %c0_120], %151 {strides = array<i32>} : memref<1x288x128xbf16, #tpu.memory_space<vmem>>, vector<1x32x128xbf16>,
    %c0_121 = arith.constant 0 : index
    %c0_122 = arith.constant 0 : index
    %c0_123 = arith.constant 0 : index
    %152 = vector.load %arg6[%c0_121, %c0_122, %c0_123] : memref<1x2x128xf32, #tpu.memory_space<vmem>>, vector<1x1x128xf32>
    %153 = vector.shape_cast %152 : vector<1x1x128xf32> to vector<1x128xf32>
    %154 = vector.shape_cast %143 : vector<1x128xf32> to vector<1x1x128xf32>
    tpu.vector_store %arg6[%c0_121, %c0_122, %c0_123], %154 {strides = array<i32>} : memref<1x2x128xf32, #tpu.memory_space<vmem>>, vector<1x1x128xf32>,
    %c0_124 = arith.constant 0 : index
    %c1_125 = arith.constant 1 : index
    %c0_126 = arith.constant 0 : index
    %155 = vector.load %arg6[%c0_124, %c1_125, %c0_126] : memref<1x2x128xf32, #tpu.memory_space<vmem>>, vector<1x1x128xf32>
    %156 = vector.shape_cast %155 : vector<1x1x128xf32> to vector<1x128xf32>
    %157 = vector.shape_cast %147 : vector<1x128xf32> to vector<1x1x128xf32>
    tpu.vector_store %arg6[%c0_124, %c1_125, %c0_126], %157 {strides = array<i32>} : memref<1x2x128xf32, #tpu.memory_space<vmem>>, vector<1x1x128xf32>,
    return
  }
  func.func @transform_0(%arg0: i32) -> (i32, i32, i32) {
    %c0_i32 = arith.constant 0 : i32
    %c0_i32_0 = arith.constant 0 : i32
    %c0_i32_1 = arith.constant 0 : i32
    return %arg0, %c0_i32, %c0_i32_0 : i32, i32, i32
  }
  func.func @transform_1(%arg0: i32) -> (i32, i32) {
    %c0_i32 = arith.constant 0 : i32
    %c0_i32_0 = arith.constant 0 : i32
    %c0_i32_1 = arith.constant 0 : i32
    return %c0_i32, %c0_i32_0 : i32, i32
  }
  func.func @transform_2(%arg0: i32) -> (i32, i32) {
    %c0_i32 = arith.constant 0 : i32
    %c0_i32_0 = arith.constant 0 : i32
    %c0_i32_1 = arith.constant 0 : i32
    return %c0_i32, %c0_i32_0 : i32, i32
  }
  func.func @transform_3(%arg0: i32) -> (i32, i32, i32) {
    %c0_i32 = arith.constant 0 : i32
    %c0_i32_0 = arith.constant 0 : i32
    %c0_i32_1 = arith.constant 0 : i32
    %c0_i32_2 = arith.constant 0 : i32
    return %c0_i32, %c0_i32_0, %c0_i32_1 : i32, i32, i32
  }
  func.func @transform_4(%arg0: i32) -> (i32, i32, i32) {
    %c0_i32 = arith.constant 0 : i32
    %c0_i32_0 = arith.constant 0 : i32
    %c0_i32_1 = arith.constant 0 : i32
    return %arg0, %c0_i32, %c0_i32_0 : i32, i32, i32
  }
  func.func @transform_5(%arg0: i32) -> (i32, i32, i32) {
    %c0_i32 = arith.constant 0 : i32
    %c0_i32_0 = arith.constant 0 : i32
    %c0_i32_1 = arith.constant 0 : i32
    return %arg0, %c0_i32, %c0_i32_0 : i32, i32, i32
  }
}

module attributes {stable_mosaic.version = 11 : i64} {
  func.func @_bn_res_relu_kernel(%arg0: i32, %arg1: memref<1x288x128xbf16, #tpu.memory_space<vmem>>, %arg2: memref<2x128xf32, #tpu.memory_space<vmem>>, %arg3: memref<1x288x128xf32, #tpu.memory_space<vmem>>, %arg4: memref<1x288x128xf32, #tpu.memory_space<vmem>>) attributes {dimension_semantics = [#tpu.dimension_semantics<parallel>], iteration_bounds = array<i64: 2>, scalar_prefetch = 0 : i64, scratch_operands = 0 : i64, tpu.core_type = #tpu.core_type<tc>, window_params = [{transform_indices = @transform_0, window_bounds = array<i64: 1, 288, 128>}, {pipeline_mode = #tpu.pipeline_mode<synchronous>, transform_indices = @transform_1, window_bounds = array<i64: 2, 128>}, {transform_indices = @transform_2, window_bounds = array<i64: 1, 288, 128>}, {transform_indices = @transform_3, window_bounds = array<i64: 1, 288, 128>}]} {
    %c0 = arith.constant 0 : index
    %c0_0 = arith.constant 0 : index
    %0 = vector.load %arg2[%c0, %c0_0] : memref<2x128xf32, #tpu.memory_space<vmem>>, vector<1x128xf32>
    %c1 = arith.constant 1 : index
    %c0_1 = arith.constant 0 : index
    %1 = vector.load %arg2[%c1, %c0_1] : memref<2x128xf32, #tpu.memory_space<vmem>>, vector<1x128xf32>
    %c0_2 = arith.constant 0 : index
    %c0_3 = arith.constant 0 : index
    %c0_4 = arith.constant 0 : index
    %2 = vector.load %arg1[%c0_2, %c0_3, %c0_4] : memref<1x288x128xbf16, #tpu.memory_space<vmem>>, vector<1x256x128xbf16>
    %3 = vector.shape_cast %2 : vector<1x256x128xbf16> to vector<256x128xbf16>
    %4 = arith.extf %3 : vector<256x128xbf16> to vector<256x128xf32>
    %5 = vector.broadcast %0 : vector<1x128xf32> to vector<256x128xf32>
    %6 = arith.mulf %4, %5 : vector<256x128xf32>
    %7 = vector.broadcast %1 : vector<1x128xf32> to vector<256x128xf32>
    %8 = arith.addf %6, %7 : vector<256x128xf32>
    %c0_5 = arith.constant 0 : index
    %c0_6 = arith.constant 0 : index
    %c0_7 = arith.constant 0 : index
    %9 = vector.load %arg3[%c0_5, %c0_6, %c0_7] : memref<1x288x128xf32, #tpu.memory_space<vmem>>, vector<1x256x128xf32>
    %10 = vector.shape_cast %9 : vector<1x256x128xf32> to vector<256x128xf32>
    %11 = arith.addf %8, %10 : vector<256x128xf32>
    %cst = arith.constant 0.000000e+00 : f32
    %12 = vector.broadcast %cst : f32 to vector<256x128xf32>
    %13 = arith.maximumf %11, %12 : vector<256x128xf32>
    %c0_8 = arith.constant 0 : index
    %c0_9 = arith.constant 0 : index
    %c0_10 = arith.constant 0 : index
    %14 = vector.load %arg4[%c0_8, %c0_9, %c0_10] : memref<1x288x128xf32, #tpu.memory_space<vmem>>, vector<1x256x128xf32>
    %15 = vector.shape_cast %14 : vector<1x256x128xf32> to vector<256x128xf32>
    %16 = vector.shape_cast %13 : vector<256x128xf32> to vector<1x256x128xf32>
    tpu.vector_store %arg4[%c0_8, %c0_9, %c0_10], %16 {strides = array<i32>} : memref<1x288x128xf32, #tpu.memory_space<vmem>>, vector<1x256x128xf32>,
    %c0_11 = arith.constant 0 : index
    %c256 = arith.constant 256 : index
    %c0_12 = arith.constant 0 : index
    %17 = vector.load %arg1[%c0_11, %c256, %c0_12] : memref<1x288x128xbf16, #tpu.memory_space<vmem>>, vector<1x32x128xbf16>
    %18 = vector.shape_cast %17 : vector<1x32x128xbf16> to vector<32x128xbf16>
    %19 = arith.extf %18 : vector<32x128xbf16> to vector<32x128xf32>
    %20 = vector.broadcast %0 : vector<1x128xf32> to vector<32x128xf32>
    %21 = arith.mulf %19, %20 : vector<32x128xf32>
    %22 = vector.broadcast %1 : vector<1x128xf32> to vector<32x128xf32>
    %23 = arith.addf %21, %22 : vector<32x128xf32>
    %c0_13 = arith.constant 0 : index
    %c256_14 = arith.constant 256 : index
    %c0_15 = arith.constant 0 : index
    %24 = vector.load %arg3[%c0_13, %c256_14, %c0_15] : memref<1x288x128xf32, #tpu.memory_space<vmem>>, vector<1x32x128xf32>
    %25 = vector.shape_cast %24 : vector<1x32x128xf32> to vector<32x128xf32>
    %26 = arith.addf %23, %25 : vector<32x128xf32>
    %cst_16 = arith.constant 0.000000e+00 : f32
    %27 = vector.broadcast %cst_16 : f32 to vector<32x128xf32>
    %28 = arith.maximumf %26, %27 : vector<32x128xf32>
    %c0_17 = arith.constant 0 : index
    %c256_18 = arith.constant 256 : index
    %c0_19 = arith.constant 0 : index
    %29 = vector.load %arg4[%c0_17, %c256_18, %c0_19] : memref<1x288x128xf32, #tpu.memory_space<vmem>>, vector<1x32x128xf32>
    %30 = vector.shape_cast %29 : vector<1x32x128xf32> to vector<32x128xf32>
    %31 = vector.shape_cast %28 : vector<32x128xf32> to vector<1x32x128xf32>
    tpu.vector_store %arg4[%c0_17, %c256_18, %c0_19], %31 {strides = array<i32>} : memref<1x288x128xf32, #tpu.memory_space<vmem>>, vector<1x32x128xf32>,
    return
  }
  func.func @transform_0(%arg0: i32) -> (i32, i32, i32) {
    %c0_i32 = arith.constant 0 : i32
    %c0_i32_0 = arith.constant 0 : i32
    %c0_i32_1 = arith.constant 0 : i32
    return %arg0, %c0_i32, %c0_i32_0 : i32, i32, i32
  }
  func.func @transform_1(%arg0: i32) -> (i32, i32) {
    %c0_i32 = arith.constant 0 : i32
    %c0_i32_0 = arith.constant 0 : i32
    %c0_i32_1 = arith.constant 0 : i32
    return %c0_i32, %c0_i32_0 : i32, i32
  }
  func.func @transform_2(%arg0: i32) -> (i32, i32, i32) {
    %c0_i32 = arith.constant 0 : i32
    %c0_i32_0 = arith.constant 0 : i32
    %c0_i32_1 = arith.constant 0 : i32
    return %arg0, %c0_i32, %c0_i32_0 : i32, i32, i32
  }
  func.func @transform_3(%arg0: i32) -> (i32, i32, i32) {
    %c0_i32 = arith.constant 0 : i32
    %c0_i32_0 = arith.constant 0 : i32
    %c0_i32_1 = arith.constant 0 : i32
    return %arg0, %c0_i32, %c0_i32_0 : i32, i32, i32
  }
}

</mosaic_0001>

<bundles_post_ra>
// kernel: basic_block_forward.5
= control target key start
LH: loop header
LB: loop body
LE: loop exit
PB: predicated region body
PF: predicated region fallthrough
CT: control target
= control target key end

     0   :  { %s695_s12 = smov 0   ;;  %s901_s0 = inlined_call_operand.vmem [shape: bf16[2,288,128], index: 0, kind: input, shape index: {}]   ;;  %s902_s1 = inlined_call_operand.vmem [shape: f32[2,128], index: 1, kind: input, shape index: {}]   ;;  %s903_s2 = inlined_call_operand.vmem [shape: f32[2,288,128], index: 2, kind: input, shape index: {}]   ;;  %s904_s3 = inlined_call_operand.vmem [shape: f32[2,288,128], index: 3, kind: output, shape index: {}]  }
   0x1 LB: > { %s556_s13 = sadd.s32 4294967295, %s673_s12   ;;  %p560_p0 = scmp.ge.s32.totalorder %s673_s12, 1  ;;  %s673_s12 = sphi %s695_s12, %s13_s12  }
   0x2   : > { %p147_p1 = scmp.lt.s32.totalorder %s673_s12, 3 }
   0x4   : > { %p148_p2 = pnand %p560_p0, %p147_p1 }
   0x5   : > { %p176_p3 = scmp.lt.s32.totalorder (!%p148_p2), %s556_s13, 1  ;;  %v715_v0 = vld [vmem:[%s902_s1] ss:$0 sm:$0xff] (!%p148_p2)  ;;  %v730_v8 = vld [vmem:[%s902_s1 + $0x1] ss:$0 sm:$0xff] (!%p148_p2) }
   0x6   : > { %151 = sbr.rel (%p148_p2) target bundleno = 69 (0x45), region = 32 }
   0xd   : > { %s906_s13 = smov (!%p176_p3, %s556_s13), 1 }
   0xe   : > { %s657_s14 = smul.u32 144, %s906_s13 }
   0xf   : > { %s658_s15 = smul.u32 288, %s906_s13 }
  0x10   : > { %s710_s18 = scalar_lea.vmem %s901_s0, %s657_s14 }
  0x11   : > { %s722_s23 = scalar_lea.vmem %s903_s2, %s658_s15  ;;  %v569_v1 = vld [vmem:[%s710_s18] sm:$0xff]   ;;  %v640_v2 = vld [vmem:[%s710_s18 + $0x8] sm:$0xff]   ;;  %v641_v3 = vld [vmem:[%s710_s18 + $0x10] sm:$0xff]   ;;  %s760_s28 = scalar_lea.vmem %s904_s3, %s658_s15 }
  0x12   : > { %v570_v4 = vunpack.c.l.bf16 %v569_v1  ;;  %v571_v5 = vunpack.c.h.bf16 %v569_v1  ;;  %v574_v6 = vunpack.c.l.bf16 %v640_v2  ;;  %v575_v7 = vunpack.c.h.bf16 %v640_v2  ;;  %v329_v12 = vld [vmem:[%s722_s23] sm:$0xff]  ;;  %v642_v16 = vld [vmem:[%s710_s18 + $0x18] sm:$0xff]   ;;  %v330_v17 = vld [vmem:[%s722_s23 + $0x8] sm:$0xff] }
  0x13   : > { %v578_v9 = vunpack.c.l.bf16 %v641_v3  ;;  %v579_v10 = vunpack.c.h.bf16 %v641_v3  ;;  %v331_v18 = vld [vmem:[%s722_s23 + $0x10] sm:$0xff]  ;;  %v332_v19 = vld [vmem:[%s722_s23 + $0x18] sm:$0xff]  ;;  %v582_v22 = vunpack.c.l.bf16 %v642_v16  ;;  %v583_v23 = vunpack.c.h.bf16 %v642_v16  ;;  %v333_v28 = vld [vmem:[%s722_s23 + $0x20] sm:$0xff] }
  0x14   : > { %v261_v11 = vmul.f32 %v570_v4, %v715_v0  ;;  %v262_v13 = vmul.f32 %v571_v5, %v715_v0  ;;  %v263_v14 = vmul.f32 %v574_v6, %v715_v0  ;;  %v264_v15 = vmul.f32 %v575_v7, %v715_v0  ;;  %v334_v29 = vld [vmem:[%s722_s23 + $0x28] sm:$0xff]  ;;  %v335_v38 = vld [vmem:[%s722_s23 + $0x30] sm:$0xff]  ;;  %v336_v39 = vld [vmem:[%s722_s23 + $0x38] sm:$0xff] }
  0x15   : > { %v265_v20 = vmul.f32 %v578_v9, %v715_v0  ;;  %v266_v21 = vmul.f32 %v579_v10, %v715_v0  ;;  %v267_v32 = vmul.f32 %v582_v22, %v715_v0  ;;  %v268_v33 = vmul.f32 %v583_v23, %v715_v0  ;;  %v643_v44 = vld [vmem:[%s710_s18 + $0x20] sm:$0xff]   ;;  %v644_v45 = vld [vmem:[%s710_s18 + $0x28] sm:$0xff]   ;;  %v645_v50 = vld [vmem:[%s710_s18 + $0x30] sm:$0xff]  }
  0x16   : > { %v297_v24 = vadd.f32 %v730_v8, %v261_v11  ;;  %v298_v25 = vadd.f32 %v730_v8, %v262_v13  ;;  %v299_v26 = vadd.f32 %v730_v8, %v263_v14  ;;  %v300_v27 = vadd.f32 %v730_v8, %v264_v15  ;;  %v646_v59 = vld [vmem:[%s710_s18 + $0x38] sm:$0xff]   ;;  %v337_v2 = vld [vmem:[%s722_s23 + $0x40] sm:$0xff]  ;;  %v338_v6 = vld [vmem:[%s722_s23 + $0x48] sm:$0xff] }
  0x17   : > { %v301_v30 = vadd.f32 %v730_v8, %v265_v20  ;;  %v302_v31 = vadd.f32 %v730_v8, %v266_v21  ;;  %v303_v42 = vadd.f32 %v730_v8, %v267_v32  ;;  %v304_v43 = vadd.f32 %v730_v8, %v268_v33  ;;  %v339_v7 = vld [vmem:[%s722_s23 + $0x50] sm:$0xff]  ;;  %v340_v9 = vld [vmem:[%s722_s23 + $0x58] sm:$0xff] }
  0x18   : > { %v361_v34 = vadd.f32 %v329_v12, %v297_v24  ;;  %v362_v35 = vadd.f32 %v330_v17, %v298_v25  ;;  %v363_v36 = vadd.f32 %v331_v18, %v299_v26  ;;  %v364_v37 = vadd.f32 %v332_v19, %v300_v27  ;;  %v341_v18 = vld [vmem:[%s722_s23 + $0x60] sm:$0xff]  ;;  %v342_v19 = vld [vmem:[%s722_s23 + $0x68] sm:$0xff] }
  0x19   : > { %v365_v40 = vadd.f32 %v333_v28, %v301_v30  ;;  %v366_v41 = vadd.f32 %v334_v29, %v302_v31  ;;  %v367_v53 = vadd.f32 %v335_v38, %v303_v42  ;;  %v368_v54 = vadd.f32 %v336_v39, %v304_v43  ;;  %v343_v28 = vld [vmem:[%s722_s23 + $0x70] sm:$0xff]  ;;  %v344_v29 = vld [vmem:[%s722_s23 + $0x78] sm:$0xff] }
  0x1a   : > { %v393_v46 = vmax.f32 %v361_v34, 0.0  ;;  %v394_v47 = vmax.f32 %v362_v35, 0.0  ;;  %v395_v48 = vmax.f32 %v363_v36, 0.0  ;;  %v396_v49 = vmax.f32 %v364_v37, 0.0  ;;  %v647_v34 = vld [vmem:[%s710_s18 + $0x40] sm:$0xff]   ;;  %v648_v35 = vld [vmem:[%s710_s18 + $0x48] sm:$0xff]  }
  0x1b   : > { %v397_v51 = vmax.f32 %v365_v40, 0.0  ;;  %v398_v52 = vmax.f32 %v366_v41, 0.0  ;;  %v586_v55 = vunpack.c.l.bf16 %v643_v44  ;;  %v587_v56 = vunpack.c.h.bf16 %v643_v44  ;;  %v649_v40 = vld [vmem:[%s710_s18 + $0x50] sm:$0xff]  }
  0x1c   : > { %425 = vst [vmem:[%s760_s28] sm:$0xff] %v393_v46  ;;  %426 = vst [vmem:[%s760_s28 + $0x8] sm:$0xff] %v394_v47  ;;  %v590_v57 = vunpack.c.l.bf16 %v644_v45  ;;  %v591_v58 = vunpack.c.h.bf16 %v644_v45  ;;  %v399_v60 = vmax.f32 %v367_v53, 0.0  ;;  %v400_v61 = vmax.f32 %v368_v54, 0.0 }
  0x1d   : > { %427 = vst [vmem:[%s760_s28 + $0x10] sm:$0xff] %v395_v48  ;;  %428 = vst [vmem:[%s760_s28 + $0x18] sm:$0xff] %v396_v49  ;;  %v594_v62 = vunpack.c.l.bf16 %v645_v50  ;;  %v595_v63 = vunpack.c.h.bf16 %v645_v50  ;;  %v269_v1 = vmul.f32 %v586_v55, %v715_v0  ;;  %v270_v3 = vmul.f32 %v587_v56, %v715_v0  ;;  %v650_v49 = vld [vmem:[%s710_s18 + $0x58] sm:$0xff]   ;;  %v345_v55 = vld [vmem:[%s722_s23 + $0x80] sm:$0xff] }
  0x1e   : > { %429 = vst [vmem:[%s760_s28 + $0x20] sm:$0xff] %v397_v51  ;;  %430 = vst [vmem:[%s760_s28 + $0x28] sm:$0xff] %v398_v52  ;;  %v271_v4 = vmul.f32 %v590_v57, %v715_v0  ;;  %v272_v5 = vmul.f32 %v591_v58, %v715_v0  ;;  %v598_v12 = vunpack.c.l.bf16 %v646_v59  ;;  %v599_v13 = vunpack.c.h.bf16 %v646_v59  ;;  %v346_v59 = vld [vmem:[%s722_s23 + $0x88] sm:$0xff] }
  0x1f   : > { %431 = vst [vmem:[%s760_s28 + $0x30] sm:$0xff] %v399_v60  ;;  %432 = vst [vmem:[%s760_s28 + $0x38] sm:$0xff] %v400_v61  ;;  %v273_v10 = vmul.f32 %v594_v62, %v715_v0  ;;  %v274_v11 = vmul.f32 %v595_v63, %v715_v0  ;;  %v305_v14 = vadd.f32 %v730_v8, %v269_v1  ;;  %v602_v45 = vunpack.c.l.bf16 %v647_v34  ;;  %v347_v60 = vld [vmem:[%s722_s23 + $0x90] sm:$0xff]  ;;  %v348_v61 = vld [vmem:[%s722_s23 + $0x98] sm:$0xff] }
  0x20   : > { %v306_v15 = vadd.f32 %v730_v8, %v270_v3  ;;  %v307_v16 = vadd.f32 %v730_v8, %v271_v4  ;;  %v308_v17 = vadd.f32 %v730_v8, %v272_v5  ;;  %v275_v22 = vmul.f32 %v598_v12, %v715_v0 }
  0x21   : > { %v309_v20 = vadd.f32 %v730_v8, %v273_v10  ;;  %v310_v21 = vadd.f32 %v730_v8, %v274_v11  ;;  %v276_v23 = vmul.f32 %v599_v13, %v715_v0  ;;  %v369_v24 = vadd.f32 %v337_v2, %v305_v14 }
  0x22   : > { %v370_v25 = vadd.f32 %v338_v6, %v306_v15  ;;  %v371_v26 = vadd.f32 %v339_v7, %v307_v16  ;;  %v372_v27 = vadd.f32 %v340_v9, %v308_v17  ;;  %v311_v32 = vadd.f32 %v730_v8, %v275_v22  ;;  %v349_v7 = vld [vmem:[%s722_s23 + $0xa0] sm:$0xff]  ;;  %v350_v9 = vld [vmem:[%s722_s23 + $0xa8] sm:$0xff] }
  0x23   : > { %v373_v30 = vadd.f32 %v341_v18, %v309_v20  ;;  %v374_v31 = vadd.f32 %v342_v19, %v310_v21  ;;  %v312_v33 = vadd.f32 %v730_v8, %v276_v23  ;;  %v401_v36 = vmax.f32 %v369_v24, 0.0  ;;  %v351_v18 = vld [vmem:[%s722_s23 + $0xb0] sm:$0xff]  ;;  %v352_v19 = vld [vmem:[%s722_s23 + $0xb8] sm:$0xff]  ;;  %v651_v24 = vld [vmem:[%s710_s18 + $0x60] sm:$0xff]  }
  0x24   : > { %v402_v37 = vmax.f32 %v370_v25, 0.0  ;;  %v403_v38 = vmax.f32 %v371_v26, 0.0  ;;  %v404_v39 = vmax.f32 %v372_v27, 0.0  ;;  %v375_v43 = vadd.f32 %v343_v28, %v311_v32  ;;  %v652_v25 = vld [vmem:[%s710_s18 + $0x68] sm:$0xff]  }
  0x25   : > { %v405_v41 = vmax.f32 %v373_v30, 0.0  ;;  %v406_v42 = vmax.f32 %v374_v31, 0.0  ;;  %v376_v44 = vadd.f32 %v344_v29, %v312_v33  ;;  %433 = vst [vmem:[%s760_s28 + $0x40] sm:$0xff] %v401_v36  ;;  %v603_v46 = vunpack.c.h.bf16 %v647_v34  ;;  %v653_v30 = vld [vmem:[%s710_s18 + $0x70] sm:$0xff]  }
  0x26   : > { %434 = vst [vmem:[%s760_s28 + $0x48] sm:$0xff] %v402_v37  ;;  %435 = vst [vmem:[%s760_s28 + $0x50] sm:$0xff] %v403_v38  ;;  %v606_v47 = vunpack.c.l.bf16 %v648_v35  ;;  %v607_v48 = vunpack.c.h.bf16 %v648_v35  ;;  %v407_v50 = vmax.f32 %v375_v43, 0.0  ;;  %v610_v52 = vunpack.c.l.bf16 %v649_v40 }
  0x27   : > { %436 = vst [vmem:[%s760_s28 + $0x58] sm:$0xff] %v404_v39  ;;  %437 = vst [vmem:[%s760_s28 + $0x60] sm:$0xff] %v405_v41  ;;  %v408_v51 = vmax.f32 %v376_v44, 0.0  ;;  %v611_v53 = vunpack.c.h.bf16 %v649_v40  ;;  %v277_v54 = vmul.f32 %v602_v45, %v715_v0  ;;  %v278_v56 = vmul.f32 %v603_v46, %v715_v0  ;;  %v654_v39 = vld [vmem:[%s710_s18 + $0x78] sm:$0xff]   ;;  %v353_v45 = vld [vmem:[%s722_s23 + $0xc0] sm:$0xff] }
  0x28   : > { %438 = vst [vmem:[%s760_s28 + $0x68] sm:$0xff] %v406_v42  ;;  %v279_v57 = vmul.f32 %v606_v47, %v715_v0  ;;  %v280_v58 = vmul.f32 %v607_v48, %v715_v0  ;;  %439 = vst [vmem:[%s760_s28 + $0x70] sm:$0xff] %v407_v50  ;;  %v281_v62 = vmul.f32 %v610_v52, %v715_v0  ;;  %v614_v1 = vunpack.c.l.bf16 %v650_v49  ;;  %v355_v50 = vld [vmem:[%s722_s23 + $0xd0] sm:$0xff] }
  0x29   : > { %440 = vst [vmem:[%s760_s28 + $0x78] sm:$0xff] %v408_v51  ;;  %v282_v63 = vmul.f32 %v611_v53, %v715_v0  ;;  %v615_v2 = vunpack.c.h.bf16 %v650_v49  ;;  %v313_v3 = vadd.f32 %v730_v8, %v277_v54  ;;  %v314_v4 = vadd.f32 %v730_v8, %v278_v56  ;;  %v354_v49 = vld [vmem:[%s722_s23 + $0xc8] sm:$0xff]  ;;  %v356_v51 = vld [vmem:[%s722_s23 + $0xd8] sm:$0xff] }
  0x2a   : > { %v315_v5 = vadd.f32 %v730_v8, %v279_v57  ;;  %v316_v6 = vadd.f32 %v730_v8, %v280_v58  ;;  %v317_v10 = vadd.f32 %v730_v8, %v281_v62  ;;  %v283_v12 = vmul.f32 %v614_v1, %v715_v0 }
  0x2b   : > { %v318_v11 = vadd.f32 %v730_v8, %v282_v63  ;;  %v284_v13 = vmul.f32 %v615_v2, %v715_v0  ;;  %v377_v14 = vadd.f32 %v345_v55, %v313_v3  ;;  %v378_v15 = vadd.f32 %v346_v59, %v314_v4 }
  0x2c   : > { %v379_v16 = vadd.f32 %v347_v60, %v315_v5  ;;  %v380_v17 = vadd.f32 %v348_v61, %v316_v6  ;;  %v381_v20 = vadd.f32 %v349_v7, %v317_v10  ;;  %v319_v22 = vadd.f32 %v730_v8, %v283_v12  ;;  %v357_v60 = vld [vmem:[%s722_s23 + $0xe0] sm:$0xff]  ;;  %v358_v61 = vld [vmem:[%s722_s23 + $0xe8] sm:$0xff]  ;;  %v359_v7 = vld [vmem:[%s722_s23 + $0xf0] sm:$0xff] }
  0x2d   : > { %v382_v21 = vadd.f32 %v350_v9, %v318_v11  ;;  %v320_v23 = vadd.f32 %v730_v8, %v284_v13  ;;  %v409_v26 = vmax.f32 %v377_v14, 0.0  ;;  %v410_v27 = vmax.f32 %v378_v15, 0.0  ;;  %v360_v9 = vld [vmem:[%s722_s23 + $0xf8] sm:$0xff]  ;;  %v655_v14 = vld [vmem:[%s710_s18 + $0x80] sm:$0xff]   ;;  %v656_v15 = vld [vmem:[%s710_s18 + $0x88] sm:$0xff]  }
  0x2e   : > { %v411_v28 = vmax.f32 %v379_v16, 0.0  ;;  %v412_v29 = vmax.f32 %v380_v17, 0.0  ;;  %v413_v31 = vmax.f32 %v381_v20, 0.0  ;;  %v383_v33 = vadd.f32 %v351_v18, %v319_v22 }
  0x2f   : > { %v414_v32 = vmax.f32 %v382_v21, 0.0  ;;  %v384_v34 = vadd.f32 %v352_v19, %v320_v23  ;;  %441 = vst [vmem:[%s760_s28 + $0x80] sm:$0xff] %v409_v26  ;;  %442 = vst [vmem:[%s760_s28 + $0x88] sm:$0xff] %v410_v27  ;;  %v618_v35 = vunpack.c.l.bf16 %v651_v24  ;;  %v619_v36 = vunpack.c.h.bf16 %v651_v24 }
  0x30   : > { %443 = vst [vmem:[%s760_s28 + $0x90] sm:$0xff] %v411_v28  ;;  %444 = vst [vmem:[%s760_s28 + $0x98] sm:$0xff] %v412_v29  ;;  %v622_v37 = vunpack.c.l.bf16 %v652_v25  ;;  %v623_v38 = vunpack.c.h.bf16 %v652_v25  ;;  %v415_v40 = vmax.f32 %v383_v33, 0.0  ;;  %v626_v42 = vunpack.c.l.bf16 %v653_v30 }
  0x31   : > { %445 = vst [vmem:[%s760_s28 + $0xa0] sm:$0xff] %v413_v31  ;;  %446 = vst [vmem:[%s760_s28 + $0xa8] sm:$0xff] %v414_v32  ;;  %v416_v41 = vmax.f32 %v384_v34, 0.0  ;;  %v627_v43 = vunpack.c.h.bf16 %v653_v30  ;;  %v285_v44 = vmul.f32 %v618_v35, %v715_v0  ;;  %v286_v46 = vmul.f32 %v619_v36, %v715_v0  ;;  %v473_v31 = vld [vmem:[%s722_s23 + $0x100] sm:$0xff]  ;;  %v474_v35 = vld [vmem:[%s722_s23 + $0x108] sm:$0xff] }
  0x32   : > { %v287_v47 = vmul.f32 %v622_v37, %v715_v0  ;;  %v288_v48 = vmul.f32 %v623_v38, %v715_v0  ;;  %447 = vst [vmem:[%s760_s28 + $0xb0] sm:$0xff] %v415_v40  ;;  %v289_v52 = vmul.f32 %v626_v42, %v715_v0  ;;  %v630_v54 = vunpack.c.l.bf16 %v654_v39  ;;  %v475_v36 = vld [vmem:[%s722_s23 + $0x110] sm:$0xff]  ;;  %v476_v37 = vld [vmem:[%s722_s23 + $0x118] sm:$0xff] }
  0x33   : > { %448 = vst [vmem:[%s760_s28 + $0xb8] sm:$0xff] %v416_v41  ;;  %v290_v53 = vmul.f32 %v627_v43, %v715_v0  ;;  %v631_v55 = vunpack.c.h.bf16 %v654_v39  ;;  %v321_v56 = vadd.f32 %v730_v8, %v285_v44  ;;  %v322_v57 = vadd.f32 %v730_v8, %v286_v46 }
  0x34   : > { %v323_v58 = vadd.f32 %v730_v8, %v287_v47  ;;  %v324_v59 = vadd.f32 %v730_v8, %v288_v48  ;;  %v325_v62 = vadd.f32 %v730_v8, %v289_v52  ;;  %v291_v1 = vmul.f32 %v630_v54, %v715_v0 }
  0x35   : > { %v326_v63 = vadd.f32 %v730_v8, %v290_v53  ;;  %v292_v2 = vmul.f32 %v631_v55, %v715_v0  ;;  %v385_v3 = vadd.f32 %v353_v45, %v321_v56  ;;  %v386_v4 = vadd.f32 %v354_v49, %v322_v57 }
  0x36   : > { %v387_v5 = vadd.f32 %v355_v50, %v323_v58  ;;  %v388_v6 = vadd.f32 %v356_v51, %v324_v59  ;;  %v389_v10 = vadd.f32 %v357_v60, %v325_v62  ;;  %v327_v12 = vadd.f32 %v730_v8, %v291_v1 }
  0x37   : > { %v390_v11 = vadd.f32 %v358_v61, %v326_v63  ;;  %v328_v13 = vadd.f32 %v730_v8, %v292_v2  ;;  %v417_v16 = vmax.f32 %v385_v3, 0.0  ;;  %v418_v17 = vmax.f32 %v386_v4, 0.0 }
  0x38   : > { %v419_v18 = vmax.f32 %v387_v5, 0.0  ;;  %v420_v19 = vmax.f32 %v388_v6, 0.0  ;;  %v421_v20 = vmax.f32 %v389_v10, 0.0  ;;  %v391_v22 = vadd.f32 %v359_v7, %v327_v12 }
  0x39   : > { %v422_v21 = vmax.f32 %v390_v11, 0.0  ;;  %v392_v23 = vadd.f32 %v360_v9, %v328_v13  ;;  %449 = vst [vmem:[%s760_s28 + $0xc0] sm:$0xff] %v417_v16  ;;  %450 = vst [vmem:[%s760_s28 + $0xc8] sm:$0xff] %v418_v17  ;;  %v634_v24 = vunpack.c.l.bf16 %v655_v14  ;;  %v635_v25 = vunpack.c.h.bf16 %v655_v14 }
  0x3a   : > { %451 = vst [vmem:[%s760_s28 + $0xd0] sm:$0xff] %v419_v18  ;;  %452 = vst [vmem:[%s760_s28 + $0xd8] sm:$0xff] %v420_v19  ;;  %v638_v26 = vunpack.c.l.bf16 %v656_v15  ;;  %v639_v27 = vunpack.c.h.bf16 %v656_v15  ;;  %v423_v28 = vmax.f32 %v391_v22, 0.0 }
  0x3b   : > { %453 = vst [vmem:[%s760_s28 + $0xe0] sm:$0xff] %v421_v20  ;;  %454 = vst [vmem:[%s760_s28 + $0xe8] sm:$0xff] %v422_v21  ;;  %v424_v29 = vmax.f32 %v392_v23, 0.0  ;;  %v465_v30 = vmul.f32 %v634_v24, %v715_v0  ;;  %v466_v32 = vmul.f32 %v635_v25, %v715_v0 }
  0x3c   : > { %v467_v33 = vmul.f32 %v638_v26, %v715_v0  ;;  %v468_v34 = vmul.f32 %v639_v27, %v715_v0  ;;  %455 = vst [vmem:[%s760_s28 + $0xf0] sm:$0xff] %v423_v28 }
  0x3d   : > { %456 = vst [vmem:[%s760_s28 + $0xf8] sm:$0xff] %v424_v29  ;;  %v469_v38 = vadd.f32 %v730_v8, %v465_v30  ;;  %v470_v39 = vadd.f32 %v730_v8, %v466_v32 }
  0x3e   : > { %v471_v40 = vadd.f32 %v730_v8, %v467_v33  ;;  %v472_v41 = vadd.f32 %v730_v8, %v468_v34 }
  0x3f   : > { %v477_v42 = vadd.f32 %v473_v31, %v469_v38  ;;  %v478_v43 = vadd.f32 %v474_v35, %v470_v39 }
  0x40   : > { %v479_v0 = vadd.f32 %v475_v36, %v471_v40  ;;  %v480_v44 = vadd.f32 %v476_v37, %v472_v41 }
  0x41   : > { %v481_v45 = vmax.f32 %v477_v42, 0.0  ;;  %v482_v46 = vmax.f32 %v478_v43, 0.0 }
  0x42   : > { %v483_v47 = vmax.f32 %v479_v0, 0.0  ;;  %v484_v48 = vmax.f32 %v480_v44, 0.0 }
  0x43   : > { %485 = vst [vmem:[%s760_s28 + $0x100] sm:$0xff] %v481_v45  ;;  %486 = vst [vmem:[%s760_s28 + $0x108] sm:$0xff] %v482_v46 }
  0x44   : > { %487 = vst [vmem:[%s760_s28 + $0x110] sm:$0xff] %v483_v47  ;;  %488 = vst [vmem:[%s760_s28 + $0x118] sm:$0xff] %v484_v48 }
  0x45 PF: > { %s13_s12 = sadd.s32 1, %s673_s12  }
  0x46   : > { %p10_p4 = scmp.ge.s32.totalorder %s13_s12, 4  }
  0x48   :  { %12 = sbr.rel (!%p10_p4) target bundleno = 1 (0x1), region = 65 }

// kernel: basic_block_forward.3
= control target key start
LH: loop header
LB: loop body
LE: loop exit
PB: predicated region body
PF: predicated region fallthrough
CT: control target
= control target key end

     0   :  { %s7904_s15 = smov 0   ;;  %s9637_s0 = inlined_call_operand.vmem [shape: bf16[2,342,128], index: 0, kind: input, shape index: {}]   ;;  %s9638_s1 = inlined_call_operand.vmem [shape: bf16[9,128,128], index: 1, kind: input, shape index: {}]   ;;  %s9639_s2 = inlined_call_operand.vmem [shape: f32[342,1], index: 2, kind: input, shape index: {}]   ;;  %s9640_s3 = inlined_call_operand.vmem [shape: bf16[2,342,128], index: 3, kind: output, shape index: {0}]   ;;  %s9641_s4 = inlined_call_operand.vmem [shape: f32[2,2,128], index: 4, kind: output, shape index: {1}]  }
   0x1 LB: > { %s5862_s16 = sadd.s32 4294967295, %s7876_s15   ;;  %p5866_p0 = scmp.ge.s32.totalorder %s7876_s15, 1  ;;  %s7876_s15 = sphi %s7904_s15, %s15_s15  }
   0x2   : > { %p165_p1 = scmp.lt.s32.totalorder %s7876_s15, 3 }
   0x4   : > { %p166_p2 = pnand %p5866_p0, %p165_p1 }
   0x5   : > { %v7648_v0 = vld [vmem:[%s9638_s1 + $0x40] sm:$0xff] (!%p166_p2)   ;;  %p195_p3 = scmp.lt.s32.totalorder (!%p166_p2), %s5862_s16, 1  ;;  %v7650_v2 = vld [vmem:[%s9638_s1 + $0x48] sm:$0xff] (!%p166_p2)   ;;  %v7652_v4 = vld [vmem:[%s9638_s1 + $0x50] sm:$0xff] (!%p166_p2)   ;;  %vm981_vm0 = vcmask (!%p166_p2), 1046528   ;;  %vm2147_vm2 = vcmask (!%p166_p2), 1045504  }
   0x6   : > { %169 = sbr.rel (%p166_p2) target bundleno = 738 (0x2e2), region = 32  ;;  %v7918_v1 = vld [vmem:[%s9638_s1 + $0x80] sm:$0xff] (!%p166_p2)   ;;  %6720 = vmatprep.subr.bf16.mxu1 (!%p166_p2), %v7648_v0  ;;  %v7927_v3 = vld [vmem:[%s9638_s1 + $0x88] sm:$0xff] (!%p166_p2)   ;;  %v7937_v5 = vld [vmem:[%s9638_s1 + $0x90] sm:$0xff] (!%p166_p2)   ;;  %vm377_vm1 = vsmask.f32 (!%p166_p2), 7424 }
   0x7   : > { %6816 = vmatprep.subr.bf16.mxu0 (!%p166_p2), %v7918_v1  ;;  %6721 = vmatpush3.bf16.msra.mxu1 (!%p166_p2), %v7648_v0  ;;  %v7654_v6 = vld [vmem:[%s9638_s1 + $0x58] sm:$0xff] (!%p166_p2)   ;;  %v7656_v8 = vld [vmem:[%s9638_s1 + $0x60] sm:$0xff] (!%p166_p2)   ;;  %v7658_v10 = vld [vmem:[%s9638_s1 + $0x68] sm:$0xff] (!%p166_p2)   ;;  %vm1716_vm3 = vsmask.f32 (!%p166_p2), 6400  ;;  %vm3313_vm5 = vcmask (!%p166_p2), 1044480  }
   0x8   : > { %6817 = vmatpush3.bf16.msra.mxu0 (!%p166_p2), %v7918_v1  ;;  %6722 = vmatprep.subr.bf16.mxu1 (!%p166_p2), %v7650_v2  ;;  %v7949_v7 = vld [vmem:[%s9638_s1 + $0x98] sm:$0xff] (!%p166_p2)   ;;  %v7960_v9 = vld [vmem:[%s9638_s1 + $0xa0] sm:$0xff] (!%p166_p2)   ;;  %v7659_v11 = vld [vmem:[%s9638_s1 + $0xa8] sm:$0xff] (!%p166_p2)   ;;  %vm2882_vm4 = vsmask.f32 (!%p166_p2), 5376  ;;  %vm212_vm6 = vcmask (!%p166_p2), 1041408  }
   0x9   : > { %6818 = vmatprep.subr.bf16.mxu0 (!%p166_p2), %v7927_v3  ;;  %v7660_v22 = vld [vmem:[%s9638_s1 + $0x70] sm:$0xff] (!%p166_p2)   ;;  %v7662_v28 = vld [vmem:[%s9638_s1 + $0x78] sm:$0xff] (!%p166_p2)   ;;  %v7668_v41 = vld [vmem:[%s9638_s1] sm:$0xff] (!%p166_p2)   ;;  %vm213_vm7 = vsmask.f32 (!%p166_p2), 1280  ;;  %vm218_vm9 = vcmask (!%p166_p2), 1043457  }
   0xa   : > { %v7661_v24 = vld [vmem:[%s9638_s1 + $0xb0] sm:$0xff] (!%p166_p2)   ;;  %v7663_v31 = vld [vmem:[%s9638_s1 + $0xb8] sm:$0xff] (!%p166_p2)   ;;  %v7669_v42 = vld [vmem:[%s9638_s1 + $0xc0] sm:$0xff] (!%p166_p2)   ;;  %vm219_vm10 = vsmask.f32 (!%p166_p2), 7942 }
   0xb   : > { %6723 = vmatpush3.bf16.msra.mxu1 (!%p166_p2), %v7650_v2  ;;  %v7670_v53 = vld [vmem:[%s9638_s1 + $0xc8] sm:$0xff] (!%p166_p2)   ;;  %v7678_v63 = vld [vmem:[%s9638_s1 + $0x10] sm:$0xff] (!%p166_p2)   ;;  %vm9264_vm8 = vmand (!%p166_p2), %vm212_vm6, %vm213_vm7  ;;  %vm4032_vm12 = vsmask.f32 (!%p166_p2), 5392 }
   0xc   : > { %6819 = vmatpush3.bf16.msra.mxu0 (!%p166_p2), %v7927_v3  ;;  %6724 = vmatprep.subr.bf16.mxu1 (!%p166_p2), %v7652_v4  ;;  %v7673_v57 = vld [vmem:[%s9638_s1 + $0x8] sm:$0xff] (!%p166_p2)   ;;  %vm9272_vm11 = vmand (!%p166_p2), %vm218_vm9, %vm219_vm10 }
   0xd   : > { %s9649_s16 = smov (!%p195_p3, %s5862_s16), 1  ;;  %6820 = vmatprep.subr.bf16.mxu0 %v7937_v5  ;;  %vm9287_vm13 = vmor %vm213_vm7, %vm4032_vm12 }
   0xe   : > { %s7636_s7 = smul.u32 172, %s9649_s16 }
   0xf   : > { %6725 = vmatpush3.bf16.msra.mxu1 %v7652_v4  ;;  %v7674_v4 = vld [vmem:[%s9638_s1 + $0xd0] sm:$0xff]  }
  0x10   : > { %6821 = vmatpush3.bf16.msra.mxu0 %v7937_v5  ;;  %6726 = vmatprep.subr.bf16.mxu1 %v7654_v6  ;;  %s7967_s14 = scalar_lea.vmem %s9637_s0, %s7636_s7  ;;  %s8723_s10 = scalar_lea.vmem %s9640_s3, %s7636_s7 }
  0x11   : > { %6822 = vmatprep.subr.bf16.mxu0 %v7949_v7  ;;  %v228_v12 = vld [vmem:[%s7967_s14] sm:$0xf]  ;;  %v229_v13 = vld [vmem:[%s7967_s14 + $0x4] sm:$0xf]  ;;  %v7982_v15 = vld [vmem:[%s7967_s14 + $0x8] sm:$0xff]   ;;  %s5869_s7 = sshll.u32 %s9649_s16, 1 }
  0x12   : > { %v7979_v14 = vcombine.low %v228_v12, %v229_v13  ;;  %v7985_v16 = vld [vmem:[%s7967_s14 + $0x10] sm:$0xff]   ;;  %v960_v17 = vld [vmem:[%s7967_s14] sm:$0xe]  ;;  %v386_v20 = vshll.u32 %v7982_v15, 16  ;;  %v983_v23 = vrot.slane %v7982_v15, 1  ;;  %v390_v29 = vshrl.u32 %v7982_v15, 16  ;;  %s208_s13 = scalar_lea.vmem %s9641_s4, %s5869_s7 }
  0x13   : > { %6727 = vmatpush3.bf16.msra.mxu1 %v7654_v6  ;;  %v5935_v21 = vcombine.low %v960_v17, %v229_v13  ;;  %v394_v30 = vshll.u32 %v7985_v16, 16  ;;  %v8009_v34 = vld [vmem:[%s7967_s14 + $0x18] sm:$0xff]   ;;  %v398_v36 = vshrl.u32 %v7985_v16, 16  ;;  %v8014_v37 = vld [vmem:[%s7967_s14 + $0x20] sm:$0xff]   ;;  %v985_v43 = vrot.slane %v7985_v16, 1  ;;  %v8025_v44 = vld [vmem:[%s7967_s14 + $0x28] sm:$0xff]  }
  0x14   : > { %6823 = vmatpush3.bf16.msra.mxu0 %v7949_v7  ;;  %6728 = vmatprep.subr.bf16.mxu1 %v7656_v8  ;;  %v379_v18 = vshrl.u32 %v7979_v14, 16  ;;  %v381_v19 = vshll.u32 %v7979_v14, 16  ;;  %v388_v26 = vrot.slane %v386_v20, 1  ;;  %v402_v38 = vshll.u32 %v8009_v34, 16  ;;  %v8042_v58 = vld [vmem:[%s7967_s14 + $0x30] sm:$0xff]   ;;  %v8050_v0 = vld [vmem:[%s7967_s14 + $0x38] sm:$0xff]  }
  0x15   : > { %6824 = vmatprep.subr.bf16.mxu0 %v7960_v9  ;;  %v982_v27 = vrot.slane %v5935_v21, 1  ;;  %v396_v40 = vrot.slane %v394_v30, 1  ;;  %v410_v47 = vshll.u32 %v8014_v37, 16  ;;  %v987_v48 = vrot.slane %v8009_v34, 1 }
  0x16   : > { %v383_v25 = vrot.slane %v381_v19, 1  ;;  %v392_v39 = vor.u32 %v390_v29, %v388_v26  ;;  %v404_v46 = vrot.slane %v402_v38, 1  ;;  %v406_v50 = vshrl.u32 %v8009_v34, 16  ;;  %v7675_v19 = vld [vmem:[%s9638_s1 + $0xd8] sm:$0xff]   ;;  %v8079_v29 = vld [vmem:[%s7967_s14 + $0x48] sm:$0xff]  }
  0x17   : > { %6729 = vmatpush3.bf16.msra.mxu1 %v7656_v8  ;;  %v984_v33 = vsel %vm981_vm0, %v982_v27, %v983_v23  ;;  %v400_v45 = vor.u32 %v398_v36, %v396_v40  ;;  %v418_v51 = vshll.u32 %v8025_v44, 16  ;;  %v986_v52 = vsel %vm981_vm0, %v983_v23, %v985_v43  ;;  %v8069_v23 = vld [vmem:[%s7967_s14 + $0x40] sm:$0xff]   ;;  %v7680_v38 = vld [vmem:[%s9638_s1 + $0xe8] sm:$0xff]  }
  0x18   : > { %6825 = vmatpush3.bf16.msra.mxu0 %v7960_v9  ;;  %6730 = vmatprep.subr.bf16.mxu1 %v7658_v10  ;;  %v384_v32 = vor.u32 %v383_v25, %v379_v18  ;;  %v397_v49 = vsel %vm377_vm1, %v392_v39, %v396_v40  ;;  %v414_v54 = vshrl.u32 %v8014_v37, 16  ;;  %v412_v56 = vrot.slane %v410_v47, 1  ;;  %v8103_v47 = vld [vmem:[%s7967_s14 + $0x10] sm:$0xff]  }
  0x19   : > { %6826 = vmatprep.subr.bf16.mxu0 %v7659_v11  ;;  %6832 = vmatprep.mubr.bf16.mxu0 %v984_v33  ;;  %v405_v55 = vsel %vm377_vm1, %v400_v45, %v404_v46  ;;  %v988_v59 = vsel %vm981_vm0, %v985_v43, %v987_v48  ;;  %v408_v60 = vor.u32 %v406_v50, %v404_v46  ;;  %v989_v61 = vrot.slane %v8014_v37, 1  ;;  %v7696_v50 = vld [vmem:[%s9638_s1 + $0x28] sm:$0xff]  }
  0x1a   : > { %v389_v35 = vsel %vm377_vm1, %v384_v32, %v388_v26  ;;  %v420_v62 = vrot.slane %v418_v51, 1  ;;  %v416_v2 = vor.u32 %v414_v54, %v412_v56  ;;  %v991_v6 = vrot.slane %v8025_v44, 1  ;;  %v7679_v26 = vld [vmem:[%s9638_s1 + $0xe0] sm:$0xff]   ;;  %v8083_v32 = vld [vmem:[%s7967_s14 + $0xc] sm:$0xf] }
  0x1b   : > { %6731 = vmatpush3.bf16.msra.mxu1 %v7658_v10  ;;  %6736 = vmatprep.mubr.bf16.mxu1 %v389_v35  ;;  %v426_v8 = vshll.u32 %v8042_v58, 16  ;;  %v413_v10 = vsel %vm377_vm1, %v408_v60, %v412_v56  ;;  %v434_v12 = vshll.u32 %v8050_v0, 16  ;;  %v990_v13 = vsel %vm981_vm0, %v987_v48, %v989_v61  ;;  %v7690_v35 = vld [vmem:[%s9638_s1 + $0x20] sm:$0xff]   ;;  %v8116_v56 = vld [vmem:[%s7967_s14 + $0x58] sm:$0xff]  }
  0x1c   : > { %6827 = vmatpush3.bf16.msra.mxu0 %v7659_v11  ;;  %6732 = vmatprep.subr.bf16.mxu1 %v7660_v22  ;;  %v422_v11 = vshrl.u32 %v8025_v44, 16  ;;  %v421_v17 = vsel %vm377_vm1, %v416_v2, %v420_v62  ;;  %v430_v18 = vshrl.u32 %v8042_v58, 16  ;;  %v992_v20 = vsel %vm981_vm0, %v989_v61, %v991_v6 }
  0x1d   : > { %6828 = vmatprep.subr.bf16.mxu0 %v7661_v24  ;;  %v428_v21 = vrot.slane %v426_v8, 1  ;;  %v436_v27 = vrot.slane %v434_v12, 1  ;;  %v442_v33 = vshll.u32 %v8069_v23, 16  ;;  %v438_v39 = vshrl.u32 %v8050_v0, 16 }
  0x1e   : > { %v424_v25 = vor.u32 %v422_v11, %v420_v62  ;;  %v450_v43 = vshll.u32 %v8079_v29, 16  ;;  %v454_v60 = vshrl.u32 %v8079_v29, 16  ;;  %v8123_v62 = vld [vmem:[%s7967_s14 + $0x18] sm:$0xff]   ;;  %v7702_v11 = vld [vmem:[%s9638_s1 + $0x30] sm:$0xff]  }
  0x1f   : > { %6733 = vmatpush3.bf16.msra.mxu1 %v7660_v22  ;;  %v993_v22 = vrot.slane %v8042_v58, 1  ;;  %v432_v30 = vor.u32 %v430_v18, %v428_v21  ;;  %v444_v48 = vrot.slane %v442_v33, 1  ;;  %v440_v51 = vor.u32 %v438_v39, %v436_v27  ;;  %v8143_v18 = vld [vmem:[%s7967_s14 + $0x60] sm:$0xff]   ;;  %v7698_v33 = vld [vmem:[%s9638_s1 + $0x108] sm:$0xff]  }
  0x20   : > { %6829 = vmatpush3.bf16.msra.mxu0 %v7661_v24  ;;  %6734 = vmatprep.subr.bf16.mxu1 %v7662_v28  ;;  %v7683_v24 = vld [vmem:[%s9638_s1 + $0x18] sm:$0xff]   ;;  %v429_v36 = vsel %vm377_vm1, %v424_v25, %v428_v21  ;;  %v7692_v25 = vld [vmem:[%s9638_s1 + $0x100] sm:$0xff]  }
  0x21   : > { %6830 = vmatprep.subr.bf16.mxu0 %v7663_v31  ;;  %v994_v40 = vsel %vm981_vm0, %v991_v6, %v993_v22 }
  0x23   : > { %6735 = vmatpush3.bf16.msra.mxu1 %v7662_v28  ;;  %v995_v28 = vrot.slane %v8050_v0, 1 }
  0x24   : > { %6831 = vmatpush3.bf16.msra.mxu0 %v7663_v31  ;;  %6768 = vmatprep.subr.bf16.mxu1 %v7668_v41  ;;  %v1272_v31 = vld [vmem:[%s7967_s14 + $0x8] sm:$0xe] }
  0x25   : > { %6864 = vmatprep.subr.bf16.mxu0 %v7669_v42  ;;  %v996_v45 = vsel %vm981_vm0, %v993_v22, %v995_v28  ;;  %v8100_v46 = vcombine.low %v1272_v31, %v8083_v32  ;;  %v470_v31 = vshrl.u32 %v8116_v56, 16 }
  0x26   : > { %6737 = vmatmul.mubr.bf16.vlgmr.msra.gmra.mrb[0].mxu1 %v397_v49  ;;  %v8106_v49 = vld [vmem:[%s7967_s14 + $0x50] sm:$0xff]  }
  0x27   : > { %6833 = vmatmul.mubr.bf16.vlgmr.msra.gmra.mrb[0].mxu0 %v986_v52  ;;  %6769 = vmatpush3.bf16.msra.mxu1 %v7668_v41  ;;  %v437_v41 = vsel %vm377_vm1, %v432_v30, %v436_v27  ;;  %v997_v52 = vrot.slane %v8069_v23, 1  ;;  %v458_v61 = vshll.u32 %v8106_v49, 16  ;;  %v462_v8 = vshrl.u32 %v8106_v49, 16 }
  0x28   : > { %6865 = vmatpush3.bf16.msra.mxu0 %v7669_v42  ;;  %6740 = vmatprep.mubr.bf16.mxu1 %v405_v55  ;;  %v446_v42 = vshrl.u32 %v8069_v23, 16  ;;  %v452_v55 = vrot.slane %v450_v43, 1  ;;  %v474_v27 = vshll.u32 %v8143_v18, 16 }
  0x29   : > { %6866 = vmatprep.subr.bf16.mxu0 %v7670_v53  ;;  %6836 = vmatprep.mubr.bf16.mxu0 %v988_v59  ;;  %v1406_v59 = vrot.slane %v8103_v47, 1  ;;  %v998_v2 = vsel %vm981_vm0, %v995_v28, %v997_v52  ;;  %v8155_v28 = vld [vmem:[%s7967_s14 + $0x28] sm:$0xff]  }
  0x2a   : > { %6770 = vmatprep.subr.bf16.mxu1 %v7673_v57  ;;  %v448_v54 = vor.u32 %v446_v42, %v444_v48  ;;  %v476_v43 = vrot.slane %v474_v27, 1  ;;  %v7713_v27 = vld [vmem:[%s9638_s1 + $0x120] sm:$0xff]  }
  0x2b   : > { %6771 = vmatpush3.bf16.msra.mxu1 %v7673_v57  ;;  %v1405_v57 = vrot.slane %v8100_v46, 1 }
  0x2c   : > { %6867 = vmatpush3.bf16.msra.mxu0 %v7670_v53  ;;  %6772 = vmatprep.subr.bf16.mxu1 %v7678_v63  ;;  %v7684_v53 = vld [vmem:[%s9638_s1 + $0xf0] sm:$0xff]   ;;  %v453_v6 = vsel %vm377_vm1, %v448_v54, %v452_v55  ;;  %v8178_v54 = vld [vmem:[%s7967_s14 + $0x78] sm:$0xff]  }
  0x2d   : > { %6868 = vmatprep.subr.bf16.mxu0 %v7674_v4  ;;  %v1407_v12 = vsel %vm981_vm0, %v1405_v57, %v1406_v59  ;;  %v7704_v57 = vld [vmem:[%s9638_s1 + $0x110] sm:$0xff]  }
  0x2e   : > { %6741 = vmatmul.mubr.bf16.gmra.mrb[4].mxu1 %v413_v10  ;;  %v466_v10 = vshll.u32 %v8116_v56, 16 }
  0x2f   : > { %6837 = vmatmul.mubr.bf16.gmra.mrb[4].mxu0 %v990_v13  ;;  %6744 = vmatprep.mubr.bf16.mxu1 %v421_v17  ;;  %v8140_v13 = vld [vmem:[%s7967_s14 + $0x20] sm:$0xff]   ;;  %v460_v17 = vrot.slane %v458_v61, 1 }
  0x30   : > { %6869 = vmatpush3.bf16.msra.mxu0 %v7674_v4  ;;  %6840 = vmatprep.mubr.bf16.mxu0 %v992_v20  ;;  %v7685_v4 = vld [vmem:[%s9638_s1 + $0xf8] sm:$0xff]   ;;  %v1408_v20 = vrot.slane %v8123_v62, 1  ;;  %v468_v22 = vrot.slane %v466_v10, 1  ;;  %v8196_v10 = vld [vmem:[%s7967_s14 + $0x40] sm:$0xff]  }
  0x31   : > { %6870 = vmatprep.subr.bf16.mxu0 %v7675_v19  ;;  %6773 = vmatpush3.bf16.msra.mxu1 %v7678_v63  ;;  %v445_v63 = vsel %vm377_vm1, %v440_v51, %v444_v48  ;;  %v464_v21 = vor.u32 %v462_v8, %v460_v17  ;;  %v8175_v48 = vld [vmem:[%s7967_s14 + $0x70] sm:$0xff]   ;;  %v498_v8 = vshll.u32 %v8178_v54, 16 }
  0x32   : > { %6774 = vmatprep.subr.bf16.mxu1 %v7683_v24 }
  0x34   : > { %6871 = vmatpush3.bf16.msra.mxu0 %v7675_v19  ;;  %v456_v19 = vor.u32 %v454_v60, %v452_v55  ;;  %v490_v60 = vshll.u32 %v8175_v48, 16 }
  0x35   : > { %6872 = vmatprep.subr.bf16.mxu0 %v7679_v26  ;;  %6775 = vmatpush3.bf16.msra.mxu1 %v7683_v24  ;;  %v8147_v24 = vld [vmem:[%s7967_s14 + $0x68] sm:$0xff]  }
  0x36   : > { %6745 = vmatmul.mubr.bf16.gmra.mrb[8].mxu1 %v429_v36  ;;  %6776 = vmatprep.subr.bf16.mxu1 %v7690_v35  ;;  %v461_v30 = vsel %vm377_vm1, %v456_v19, %v460_v17  ;;  %v469_v36 = vsel %vm377_vm1, %v464_v21, %v468_v22  ;;  %v482_v39 = vshll.u32 %v8147_v24, 16  ;;  %v7710_v17 = vld [vmem:[%s9638_s1 + $0x118] sm:$0xff]   ;;  %v492_v19 = vrot.slane %v490_v60, 1 }
  0x37   : > { %6841 = vmatmul.mubr.bf16.gmra.mrb[8].mxu0 %v994_v40  ;;  %6748 = vmatprep.mubr.bf16.mxu1 %v437_v41  ;;  %v8167_v40 = vld [vmem:[%s7967_s14 + $0x30] sm:$0xff]   ;;  %v7708_v41 = vld [vmem:[%s9638_s1 + $0x38] sm:$0xff]  }
  0x38   : > { %6873 = vmatpush3.bf16.msra.mxu0 %v7679_v26  ;;  %6844 = vmatprep.mubr.bf16.mxu0 %v996_v45  ;;  %v1410_v26 = vrot.slane %v8140_v13, 1  ;;  %v1412_v45 = vrot.slane %v8155_v28, 1  ;;  %v1414_v55 = vrot.slane %v8167_v40, 1 }
  0x39   : > { %6874 = vmatprep.subr.bf16.mxu0 %v7680_v38  ;;  %6777 = vmatpush3.bf16.msra.mxu1 %v7690_v35  ;;  %v1409_v35 = vsel %vm981_vm0, %v1406_v59, %v1408_v20  ;;  %v486_v59 = vshrl.u32 %v8147_v24, 16 }
  0x3a   : > { %6778 = vmatprep.subr.bf16.mxu1 %v7696_v50  ;;  %v1411_v42 = vsel %vm981_vm0, %v1408_v20, %v1410_v26 }
  0x3c   : > { %6875 = vmatpush3.bf16.msra.mxu0 %v7680_v38  ;;  %v478_v38 = vshrl.u32 %v8143_v18, 16 }
  0x3d   : > { %6876 = vmatprep.subr.bf16.mxu0 %v7684_v53  ;;  %6779 = vmatpush3.bf16.msra.mxu1 %v7696_v50  ;;  %v472_v50 = vor.u32 %v470_v31, %v468_v22  ;;  %v502_v31 = vshrl.u32 %v8178_v54, 16 }
  0x3e   : > { %6749 = vmatmul.mubr.bf16.gmra.mrb[12].mxu1 %v445_v63  ;;  %6780 = vmatprep.subr.bf16.mxu1 %v7702_v11  ;;  %v480_v51 = vor.u32 %v478_v38, %v476_v43  ;;  %v8189_v63 = vld [vmem:[%s7967_s14 + $0x38] sm:$0xff]   ;;  %v8216_v38 = vld [vmem:[%s7967_s14 + $0x48] sm:$0xff]  }
  0x3f   : > { %6845 = vmatmul.mubr.bf16.gmra.mrb[12].mxu0 %v998_v2  ;;  %6752 = vmatprep.mubr.bf16.mxu1 %v453_v6  ;;  %v477_v61 = vsel %vm377_vm1, %v472_v50, %v476_v43  ;;  %v494_v2 = vshrl.u32 %v8175_v48, 16  ;;  %v1416_v21 = vrot.slane %v8189_v63, 1  ;;  %v1420_v50 = vrot.slane %v8216_v38, 1 }
  0x40   : > { %6877 = vmatpush3.bf16.msra.mxu0 %v7684_v53  ;;  %6880 = vmatprep.mubr.bf16.mxu0 %v1407_v12  ;;  %v484_v53 = vrot.slane %v482_v39, 1  ;;  %v8200_v12 = vld [vmem:[%s7967_s14 + $0x80] ss:$0 sps:$4 sm:$0x11]  }
  0x41   : > { %6878 = vmatprep.subr.bf16.mxu0 %v7685_v4  ;;  %6781 = vmatpush3.bf16.msra.mxu1 %v7702_v11  ;;  %v1415_v11 = vsel %vm981_vm0, %v1412_v45, %v1414_v55  ;;  %v496_v22 = vor.u32 %v494_v2, %v492_v19  ;;  %v7722_v2 = vld [vmem:[%s9638_s1 + $0x138] sm:$0xff]  }
  0x42   : > { %6782 = vmatprep.subr.bf16.mxu1 %v7708_v41  ;;  %v485_v6 = vsel %vm377_vm1, %v480_v51, %v484_v53  ;;  %v488_v20 = vor.u32 %v486_v59, %v484_v53  ;;  %v7719_v53 = vld [vmem:[%s9638_s1 + $0x130] sm:$0xff]   ;;  %v8233_v59 = vld [vmem:[%s7967_s14 + $0x58] sm:$0xff]  }
  0x44   : > { %6879 = vmatpush3.bf16.msra.mxu0 %v7685_v4  ;;  %v1413_v4 = vsel %vm981_vm0, %v1410_v26, %v1412_v45  ;;  %v1418_v26 = vrot.slane %v8196_v10, 1 }
  0x45   : > { %6912 = vmatprep.subr.bf16.mxu0 %v7692_v25  ;;  %6783 = vmatpush3.bf16.msra.mxu1 %v7708_v41  ;;  %v8220_v41 = vld [vmem:[%s7967_s14 + $0x50] sm:$0xff]  }
  0x46   : > { %6753 = vmatmul.mubr.bf16.gmra.mrb[16].mxu1 %v461_v30  ;;  %7332 = vmatprep.subr.bf16.mxu1 %v7918_v1  ;;  %v493_v30 = vsel %vm377_vm1, %v488_v20, %v492_v19  ;;  %v1419_v39 = vsel %vm981_vm0, %v1416_v21, %v1418_v26  ;;  %v1422_v51 = vrot.slane %v8220_v41, 1  ;;  %v8256_v19 = vld [vmem:[%s7967_s14 + $0x70] sm:$0xff]  }
  0x47   : > { %6881 = vmatmul.mubr.bf16.vlgmr.msra.gmra.mrb[0].mxu0 %v1409_v35  ;;  %6756 = vmatprep.mubr.bf16.mxu1 %v469_v36  ;;  %v1417_v35 = vsel %vm981_vm0, %v1414_v55, %v1416_v21  ;;  %v1430_v21 = vrot.slane %v8256_v19, 1 }
  0x48   : > { %6913 = vmatpush3.bf16.msra.mxu0 %v7692_v25  ;;  %6884 = vmatprep.mubr.bf16.mxu0 %v1411_v42  ;;  %v500_v25 = vrot.slane %v498_v8, 1  ;;  %v7716_v42 = vld [vmem:[%s9638_s1 + $0x128] sm:$0xff]   ;;  %v1423_v60 = vsel %vm981_vm0, %v1420_v50, %v1422_v51  ;;  %v8248_v8 = vld [vmem:[%s9638_s1 + $0x140] sm:$0xff]  }
  0x49   : > { %6914 = vmatprep.subr.bf16.mxu0 %v7698_v33 }
  0x4a   : > { %v501_v36 = vsel %vm377_vm1, %v496_v22, %v500_v25  ;;  %v504_v43 = vor.u32 %v502_v31, %v500_v25  ;;  %v8267_v22 = vld [vmem:[%s7967_s14 + $0x78] sm:$0xff]  }
  0x4c   : > { %6915 = vmatpush3.bf16.msra.mxu0 %v7698_v33  ;;  %v506_v33 = vshll.u32 %v8200_v12, 16 }
  0x4d   : > { %6916 = vmatprep.subr.bf16.mxu0 %v7704_v57 }
  0x4e   : > { %6757 = vmatmul.mubr.bf16.gmra.mrb[20].mxu1 %v477_v61  ;;  %v508_v45 = vrot.slane %v506_v33, 1  ;;  %v8237_v61 = vld [vmem:[%s7967_s14 + $0x60] sm:$0xff]   ;;  %v2149_v33 = vrot.slane %v8103_v47, 2 }
  0x4f   : > { %6885 = vmatmul.mubr.bf16.gmra.mrb[4].mxu0 %v1413_v4  ;;  %6760 = vmatprep.mubr.bf16.mxu1 %v485_v6  ;;  %v1424_v4 = vrot.slane %v8233_v59, 1  ;;  %v1426_v6 = vrot.slane %v8237_v61, 1 }
  0x50   : > { %6888 = vmatprep.mubr.bf16.mxu0 %v1415_v11  ;;  %6917 = vmatpush3.bf16.msra.mxu0 %v7704_v57  ;;  %v509_v55 = vsel %vm377_vm1, %v504_v43, %v508_v45  ;;  %v1421_v57 = vsel %vm981_vm0, %v1418_v26, %v1420_v50  ;;  %v8274_v26 = vld [vmem:[%s7967_s14 + $0x80] sm:$0xff]   ;;  %v2153_v45 = vrot.slane %v8140_v13, 2 }
  0x51   : > { %6918 = vmatprep.subr.bf16.mxu0 %v7710_v17  ;;  %v1425_v11 = vsel %vm981_vm0, %v1422_v51, %v1424_v4 }
  0x54   : > { %6919 = vmatpush3.bf16.msra.mxu0 %v7710_v17  ;;  %v8252_v17 = vld [vmem:[%s7967_s14 + $0x68] sm:$0xff]  }
  0x55   : > { %6920 = vmatprep.subr.bf16.mxu0 %v7713_v27  ;;  %v1428_v20 = vrot.slane %v8252_v17, 1 }
  0x56   : > { %6761 = vmatmul.mubr.bf16.gmra.mrb[24].mxu1 %v493_v30  ;;  %v1721_v30 = vshll.u32 %v8100_v46, 16 }
  0x57   : > { %6889 = vmatmul.mubr.bf16.gmra.mrb[8].mxu0 %v1417_v35  ;;  %6764 = vmatprep.mubr.bf16.mxu1 %v501_v36  ;;  %v1429_v25 = vsel %vm981_vm0, %v1426_v6, %v1428_v20  ;;  %v1432_v35 = vrot.slane %v8267_v22, 1 }
  0x58   : > { %6892 = vmatprep.mubr.bf16.mxu0 %v1419_v39  ;;  %6921 = vmatpush3.bf16.msra.mxu0 %v7713_v27  ;;  %v1718_v27 = vshrl.u32 %v8100_v46, 16  ;;  %v2151_v46 = vrot.slane %v8123_v62, 2 }
  0x59   : > { %6922 = vmatprep.subr.bf16.mxu0 %v7716_v42  ;;  %v1433_v51 = vsel %vm981_vm0, %v1430_v21, %v1432_v35 }
  0x5a   : > { %v1720_v39 = vrot.slane %v1718_v27, 1 }
  0x5c   : > { %6923 = vmatpush3.bf16.msra.mxu0 %v7716_v42  ;;  %v1723_v42 = vrot.slane %v1721_v30, 2  ;;  %v2165_v30 = vrot.slane %v8220_v41, 2 }
  0x5d   : > { %6924 = vmatprep.subr.bf16.mxu0 %v7719_v53 }
  0x5e   : > { %6765 = vmatmul.mubr.bf16.gmra.mrb[28].mxu1 %v509_v55  ;;  %v2155_v55 = vrot.slane %v8155_v28, 2 }
  0x5f   : > { %6893 = vmatmul.mubr.bf16.gmra.mrb[12].mxu0 %v1421_v57  ;;  %6784 = vmatprep.mubr.bf16.mxu1 %v7979_v14  ;;  %v1427_v14 = vsel %vm981_vm0, %v1424_v4, %v1426_v6  ;;  %v1744_v4 = vshrl.u32 %v8140_v13, 16  ;;  %v2157_v6 = vrot.slane %v8167_v40, 2 }
  0x60   : > { %6896 = vmatprep.mubr.bf16.mxu0 %v1423_v60  ;;  %6925 = vmatpush3.bf16.msra.mxu0 %v7719_v53  ;;  %v1735_v53 = vshrl.u32 %v8123_v62, 16 }
  0x61   : > { %6926 = vmatprep.subr.bf16.mxu0 %v7722_v2 }
  0x64   : > { %6927 = vmatpush3.bf16.msra.mxu0 %v7722_v2  ;;  %v1738_v2 = vshll.u32 %v8123_v62, 16  ;;  %v8320_v62 = vsel %vm2147_vm2, %v2155_v55, %v2157_v6 }
  0x65   : > { %6960 = vmatprep.subr.bf16.mxu0 %v8248_v8 }
  0x66   : > { %6785 = vmatmul.mubr.bf16.vlgmr.msra.gmra.mrb[0].mxu1 %v7982_v15  ;;  %v2126_v15 = vld [vmem:[%s7967_s14 + $0x8] sm:$0xc] }
  0x67   : > { %6897 = vmatmul.mubr.bf16.gmra.mrb[16].mxu0 %v1425_v11  ;;  %7340 = vmatpush3.bf16.msra.mxu1 %v7918_v1  ;;  %v1431_v1 = vsel %vm981_vm0, %v1428_v20, %v1430_v21  ;;  %v6026_v31 = vcombine.low %v2126_v15, %v8083_v32  ;;  %v1729_v32 = vshll.u32 %v8103_v47, 16  ;;  %v1747_v11 = vshll.u32 %v8140_v13, 16  ;;  %v7863_v21 = vld [vmem:[%s9638_s1 + $0xa8] sm:$0xff]  }
  0x68   : > { %6788 = vmatprep.mubr.bf16.mxu1 %v7985_v16  ;;  %6900 = vmatprep.mubr.bf16.mxu0 %v1427_v14  ;;  %v7721_v16 = vld [vmem:[%s7967_s14 + $0x88] ss:$0 sps:$4 sm:$0x11]   ;;  %v2159_v14 = vrot.slane %v8189_v63, 2  ;;  %v1737_v15 = vrot.slane %v1735_v53, 1 }
  0x69   : > { %7333 = vmatprep.subr.bf16.mxu1 %v7927_v3  ;;  %v2148_v36 = vrot.slane %v6026_v31, 2  ;;  %v1731_v60 = vrot.slane %v1729_v32, 2  ;;  %v1746_v31 = vrot.slane %v1744_v4, 1  ;;  %v7865_v4 = vld [vmem:[%s9638_s1 + $0xb8] sm:$0xff]  }
  0x6a   : > { %v8327_v13 = vsel %vm2147_vm2, %v2157_v6, %v2159_v14  ;;  %v8374_v6 = vld [vmem:[%s9638_s1 + $0x40] sm:$0xff]  }
  0x6b   : > { %7341 = vmatpush3.bf16.msra.mxu1 %v7927_v3  ;;  %v1726_v3 = vshrl.u32 %v8103_v47, 16  ;;  %v8291_v43 = vsel %vm2147_vm2, %v2148_v36, %v2149_v33  ;;  %v8301_v47 = vsel %vm2147_vm2, %v2151_v46, %v2153_v45 }
  0x6c   : > { %7334 = vmatprep.subr.bf16.mxu1 %v7937_v5 }
  0x6d   : > { %v1728_v50 = vrot.slane %v1726_v3, 1 }
  0x6e   : > { %6789 = vmatmul.mubr.bf16.gmra.mrb[4].mxu1 %v8009_v34  ;;  %v1434_v34 = vrot.slane %v8274_v26, 1 }
  0x6f   : > { %6901 = vmatmul.mubr.bf16.gmra.mrb[20].mxu0 %v1429_v25  ;;  %6792 = vmatprep.mubr.bf16.mxu1 %v8014_v37  ;;  %v8294_v37 = vsel %vm2147_vm2, %v2149_v33, %v2151_v46  ;;  %v1732_v20 = vor.u32 %v1731_v60, %v1728_v50  ;;  %v2161_v25 = vrot.slane %v8196_v10, 2  ;;  %v1749_v46 = vrot.slane %v1747_v11, 2 }
  0x70   : > { %6904 = vmatprep.mubr.bf16.mxu0 %v1431_v1  ;;  %7342 = vmatpush3.bf16.msra.mxu1 %v7937_v5  ;;  %v1436_v5 = vrot.slane %v7721_v16, 1  ;;  %v1435_v57 = vsel %vm981_vm0, %v1432_v35, %v1434_v34  ;;  %v2163_v1 = vrot.slane %v8216_v38, 2  ;;  %v1740_v16 = vrot.slane %v1738_v2, 2 }
  0x71   : > { %7335 = vmatprep.subr.bf16.mxu1 %v7949_v7  ;;  %v8332_v27 = vsel %vm2147_vm2, %v2159_v14, %v2161_v25  ;;  %v2167_v35 = vrot.slane %v8233_v59, 2  ;;  %v2171_v50 = vrot.slane %v8252_v17, 2  ;;  %v2175_v60 = vrot.slane %v8267_v22, 2 }
  0x72   : > { %v1437_v3 = vsel %vm981_vm0, %v1434_v34, %v1436_v5  ;;  %v8337_v33 = vsel %vm2147_vm2, %v2161_v25, %v2163_v1  ;;  %v8345_v32 = vsel %vm2147_vm2, %v2163_v1, %v2165_v30  ;;  %v2169_v34 = vrot.slane %v8237_v61, 2 }
  0x73   : > { %v8354_v5 = vsel %vm2147_vm2, %v2165_v30, %v2167_v35  ;;  %v1750_v2 = vor.u32 %v1749_v46, %v1746_v31 }
  0x74   : > { %7343 = vmatpush3.bf16.msra.mxu1 %v7949_v7  ;;  %v8310_v7 = vsel %vm2147_vm2, %v2153_v45, %v2155_v55  ;;  %v8351_v45 = vld [vmem:[%s7967_s14 + $0x88] ss:$0 sps:$4 sm:$0x33]   ;;  %v8360_v53 = vsel %vm2147_vm2, %v2167_v35, %v2169_v34  ;;  %v2173_v55 = vrot.slane %v8256_v19, 2  ;;  %v1774_v35 = vshll.u32 %v8189_v63, 16 }
  0x75   : > { %7336 = vmatprep.subr.bf16.mxu1 %v7960_v9  ;;  %v1724_v9 = vor.u32 %v1723_v42, %v1720_v39  ;;  %v7864_v39 = vld [vmem:[%s9638_s1 + $0xb0] sm:$0xff]   ;;  %v1756_v42 = vshll.u32 %v8155_v28, 16 }
  0x76   : > { %6793 = vmatmul.mubr.bf16.gmra.mrb[8].mxu1 %v8025_v44  ;;  %v7862_v44 = vld [vmem:[%s9638_s1 + $0xa0] sm:$0xff]   ;;  %v8377_v11 = vsel %vm2147_vm2, %v2171_v50, %v2173_v55  ;;  %v8381_v14 = vsel %vm2147_vm2, %v2173_v55, %v2175_v60 }
  0x77   : > { %6905 = vmatmul.mubr.bf16.gmra.mrb[24].mxu0 %v1433_v51  ;;  %6796 = vmatprep.mubr.bf16.mxu1 %v8042_v58  ;;  %v1753_v58 = vshrl.u32 %v8155_v28, 16  ;;  %v1733_v36 = vsel %vm1716_vm3, %v1724_v9, %v1732_v20  ;;  %v1762_v51 = vshrl.u32 %v8167_v40, 16  ;;  %v1765_v28 = vshll.u32 %v8167_v40, 16 }
  0x78   : > { %6908 = vmatprep.mubr.bf16.mxu0 %v1435_v57  ;;  %7344 = vmatpush3.bf16.msra.mxu1 %v7862_v44  ;;  %v8365_v57 = vsel %vm2147_vm2, %v2169_v34, %v2171_v50  ;;  %v2177_v40 = vrot.slane %v8274_v26, 2  ;;  %v2179_v9 = vrot.slane %v8351_v45, 2  ;;  %v7724_v44 = vld [vmem:[%s9638_s1 + $0x148] sm:$0xff]   ;;  %v1758_v1 = vrot.slane %v1756_v42, 2  ;;  %v7726_v50 = vld [vmem:[%s9638_s1 + $0x158] sm:$0xff]  }
  0x79   : > { %7337 = vmatprep.subr.bf16.mxu1 %v7863_v21  ;;  %v1767_v31 = vrot.slane %v1765_v28, 2  ;;  %v1776_v42 = vrot.slane %v1774_v35, 2  ;;  %v1001_v35 = vrot.slane %v8106_v49, 1 }
  0x7c   : > { %7345 = vmatpush3.bf16.msra.mxu1 %v7863_v21  ;;  %v8388_v21 = vsel %vm2147_vm2, %v2175_v60, %v2177_v40  ;;  %v7729_v60 = vld [vmem:[%s9638_s1 + $0x160] sm:$0xff]  }
  0x7d   : > { %7338 = vmatprep.subr.bf16.mxu1 %v7864_v39 }
  0x7e   : > { %6797 = vmatmul.mubr.bf16.gmra.mrb[12].mxu1 %v8050_v0  ;;  %v1741_v0 = vor.u32 %v1740_v16, %v1737_v15  ;;  %v1755_v15 = vrot.slane %v1753_v58, 1  ;;  %v8392_v16 = vsel %vm2147_vm2, %v2177_v40, %v2179_v9  ;;  %v1771_v58 = vshrl.u32 %v8189_v63, 16 }
  0x7f   : > { %6909 = vmatmul.mubr.bf16.gmra.mrb[28].mxu0 %v1437_v3  ;;  %6800 = vmatprep.mubr.bf16.mxu1 %v8069_v23  ;;  %v1764_v3 = vrot.slane %v1762_v51, 1  ;;  %v1837_v23 = vshll.u32 %v8256_v19, 16 }
  0x80   : > { %6928 = vmatprep.mubr.bf16.mxu0 %v1733_v36  ;;  %7346 = vmatpush3.bf16.msra.mxu1 %v7864_v39  ;;  %v1742_v25 = vsel %vm1716_vm3, %v1732_v20, %v1741_v0  ;;  %v1751_v30 = vsel %vm1716_vm3, %v1741_v0, %v1750_v2  ;;  %v1759_v20 = vor.u32 %v1758_v1, %v1755_v15  ;;  %v7725_v36 = vld [vmem:[%s9638_s1 + $0x150] sm:$0xff]   ;;  %v1780_v39 = vshrl.u32 %v8196_v10, 16 }
  0x81   : > { %7339 = vmatprep.subr.bf16.mxu1 %v7865_v4  ;;  %v1768_v46 = vor.u32 %v1767_v31, %v1764_v3  ;;  %v1789_v0 = vshrl.u32 %v8216_v38, 16  ;;  %v7866_v3 = vld [vmem:[%s7967_s14 + $0x48] sm:$0xff]   ;;  %v1810_v31 = vshll.u32 %v8233_v59, 16 }
  0x82   : > { %v1760_v34 = vsel %vm1716_vm3, %v1750_v2, %v1759_v20  ;;  %v1782_v51 = vrot.slane %v1780_v39, 1  ;;  %v1819_v39 = vshll.u32 %v8237_v61, 16 }
  0x83   : > { %v1769_v63 = vsel %vm1716_vm3, %v1759_v20, %v1768_v46  ;;  %v1791_v40 = vrot.slane %v1789_v0, 1  ;;  %v1816_v20 = vshrl.u32 %v8237_v61, 16 }
  0x84   : > { %7347 = vmatpush3.bf16.msra.mxu1 %v7865_v4  ;;  %v1798_v4 = vshrl.u32 %v8220_v41, 16 }
  0x85   : > { %7152 = vmatprep.subr.bf16.mxu1 %v8374_v6 }
  0x86   : > { %6801 = vmatmul.mubr.bf16.gmra.mrb[16].mxu1 %v8079_v29  ;;  %v1783_v29 = vshll.u32 %v8196_v10, 16  ;;  %v1792_v10 = vshll.u32 %v8216_v38, 16  ;;  %v1800_v1 = vrot.slane %v1798_v4, 1 }
  0x87   : > { %6929 = vmatmul.mubr.bf16.vlgmr.msra.gmra.mrb[0].mxu0 %v1742_v25  ;;  %6804 = vmatprep.mubr.bf16.mxu1 %v8106_v49  ;;  %v7732_v25 = vld [vmem:[%s9638_s1 + $0x168] sm:$0xff]  }
  0x88   : > { %6961 = vmatpush3.bf16.msra.mxu0 %v8248_v8  ;;  %6932 = vmatprep.mubr.bf16.mxu0 %v1751_v30  ;;  %v1773_v8 = vrot.slane %v1771_v58, 1  ;;  %v1785_v55 = vrot.slane %v1783_v29, 2  ;;  %v1794_v9 = vrot.slane %v1792_v10, 2  ;;  %v1812_v29 = vrot.slane %v1810_v31, 2  ;;  %v8454_v10 = vld [vmem:[%s9638_s1 + $0x180] sm:$0xff]  }
  0x89   : > { %6962 = vmatprep.subr.bf16.mxu0 %v7724_v44 }
  0x8a   : > { %v1777_v28 = vor.u32 %v1776_v42, %v1773_v8  ;;  %v1786_v2 = vor.u32 %v1785_v55, %v1782_v51  ;;  %v1795_v58 = vor.u32 %v1794_v9, %v1791_v40  ;;  %v1828_v8 = vshll.u32 %v8252_v17, 16  ;;  %v7867_v55 = vld [vmem:[%s7967_s14 + $0x58] sm:$0xff]  }
  0x8b   : > { %v1003_v0 = vrot.slane %v7867_v55, 1  ;;  %v1843_v40 = vshrl.u32 %v8267_v22, 16  ;;  %v1846_v9 = vshll.u32 %v8267_v22, 16  ;;  %v4423_v22 = vld [vmem:[%s7967_s14 + $0x80] sm:$0xf]  ;;  %v1013_v55 = vrot.slane %v8200_v12, 1 }
  0x8c   : > { %6963 = vmatpush3.bf16.msra.mxu0 %v7724_v44  ;;  %v1778_v38 = vsel %vm1716_vm3, %v1768_v46, %v1777_v28  ;;  %v1807_v44 = vshrl.u32 %v8233_v59, 16  ;;  %v1787_v15 = vsel %vm1716_vm3, %v1777_v28, %v1786_v2  ;;  %v1825_v59 = vshrl.u32 %v8252_v17, 16  ;;  %v7736_v12 = vld [vmem:[%s9638_s1 + $0x70] sm:$0xff]  }
  0x8d   : > { %6964 = vmatprep.subr.bf16.mxu0 %v7725_v36  ;;  %v1796_v42 = vsel %vm1716_vm3, %v1786_v2, %v1795_v58  ;;  %v1834_v17 = vshrl.u32 %v8256_v19, 16  ;;  %v1005_v28 = vrot.slane %v8143_v18, 1  ;;  %v1830_v2 = vrot.slane %v1828_v8, 2  ;;  %v7728_v19 = vld [vmem:[%s9638_s1 + $0x48] sm:$0xff]  }
  0x8e   : > { %6805 = vmatmul.mubr.bf16.gmra.mrb[20].mxu1 %v8116_v56  ;;  %v1801_v56 = vshll.u32 %v8220_v41, 16  ;;  %v999_v41 = vrot.slane %v7866_v3, 1  ;;  %v7868_v3 = vld [vmem:[%s7967_s14 + $0x68] sm:$0xff]  }
  0x8f   : > { %6933 = vmatmul.mubr.bf16.gmra.mrb[4].mxu0 %v1760_v34  ;;  %6808 = vmatprep.mubr.bf16.mxu1 %v8143_v18  ;;  %v1818_v34 = vrot.slane %v1816_v20, 1  ;;  %v1836_v4 = vrot.slane %v1834_v17, 1  ;;  %v1855_v18 = vshll.u32 %v8274_v26, 16  ;;  %v1006_v31 = vsel %vm981_vm0, %v1003_v0, %v1005_v28 }
  0x90   : > { %6936 = vmatprep.mubr.bf16.mxu0 %v1769_v63  ;;  %6965 = vmatpush3.bf16.msra.mxu0 %v7725_v36  ;;  %v1803_v30 = vrot.slane %v1801_v56, 2  ;;  %v1809_v36 = vrot.slane %v1807_v44, 1  ;;  %v1000_v49 = vsel %vm981_vm0, %v997_v52, %v999_v41  ;;  %v7739_v63 = vld [vmem:[%s9638_s1 + $0x178] sm:$0xff]   ;;  %v1002_v52 = vsel %vm981_vm0, %v999_v41, %v1001_v35 }
  0x91   : > { %6966 = vmatprep.subr.bf16.mxu0 %v7726_v50  ;;  %v1839_v56 = vrot.slane %v1837_v23, 2  ;;  %v1852_v44 = vshrl.u32 %v8274_v26, 16  ;;  %v1007_v41 = vrot.slane %v7868_v3, 1 }
  0x92   : > { %v1804_v46 = vor.u32 %v1803_v30, %v1800_v1  ;;  %v1813_v51 = vor.u32 %v1812_v29, %v1809_v36  ;;  %v7730_v1 = vld [vmem:[%s9638_s1 + $0x50] sm:$0xff]   ;;  %v8474_v30 = vld [vmem:[%s7967_s14 + $0x84] sm:$0xf]  ;;  %v1848_v36 = vrot.slane %v1846_v9, 2 }
  0x93   : > { %v1840_v20 = vor.u32 %v1839_v56, %v1836_v4  ;;  %v1854_v29 = vrot.slane %v1852_v44, 1  ;;  %v8508_v4 = vld [vmem:[%s7967_s14 + $0x90] ss:$0 sps:$4 sm:$0x11]  }
  0x94   : > { %6967 = vmatpush3.bf16.msra.mxu0 %v7726_v50  ;;  %v1805_v61 = vsel %vm1716_vm3, %v1795_v58, %v1804_v46  ;;  %v1821_v50 = vrot.slane %v1819_v39, 2  ;;  %v1009_v58 = vrot.slane %v8175_v48, 1  ;;  %v8484_v39 = vcombine.low %v4423_v22, %v8474_v30 }
  0x95   : > { %6968 = vmatprep.subr.bf16.mxu0 %v7729_v60 }
  0x96   : > { %6809 = vmatmul.mubr.bf16.gmra.mrb[24].mxu1 %v8147_v24  ;;  %v7735_v24 = vld [vmem:[%s9638_s1 + $0x170] sm:$0xff]   ;;  %v1010_v23 = vsel %vm981_vm0, %v1007_v41, %v1009_v58 }
  0x97   : > { %6937 = vmatmul.mubr.bf16.gmra.mrb[8].mxu0 %v1778_v38  ;;  %6812 = vmatprep.mubr.bf16.mxu1 %v8175_v48  ;;  %v1814_v38 = vsel %vm1716_vm3, %v1804_v46, %v1813_v51  ;;  %v1861_v46 = vshrl.u32 %v8351_v45, 16  ;;  %v1008_v48 = vsel %vm981_vm0, %v1005_v28, %v1007_v41  ;;  %v7743_v41 = vld [vmem:[%s9638_s1] sm:$0xff]  }
  0x98   : > { %6940 = vmatprep.mubr.bf16.mxu0 %v1787_v15  ;;  %6969 = vmatpush3.bf16.msra.mxu0 %v7729_v60  ;;  %v1827_v60 = vrot.slane %v1825_v59, 1  ;;  %v8489_v59 = vld [vmem:[%s7967_s14 + $0x88] sm:$0xff]  }
  0x99   : > { %6970 = vmatprep.subr.bf16.mxu0 %v7732_v25 }
  0x9a   : > { %v1831_v26 = vor.u32 %v1830_v2, %v1827_v60  ;;  %v4474_v60 = vshrl.u32 %v8484_v39, 16 }
  0x9c   : > { %6971 = vmatpush3.bf16.msra.mxu0 %v7732_v25  ;;  %v1004_v25 = vsel %vm981_vm0, %v1001_v35, %v1003_v0  ;;  %v7731_v35 = vld [vmem:[%s9638_s1 + $0x58] sm:$0xff]   ;;  %v1841_v8 = vsel %vm1716_vm3, %v1831_v26, %v1840_v20 }
  0x9d   : > { %6972 = vmatprep.subr.bf16.mxu0 %v7735_v24 }
  0x9e   : > { %6813 = vmatmul.mubr.bf16.gmra.mrb[28].mxu1 %v8178_v54  ;;  %v1822_v54 = vor.u32 %v1821_v50, %v1818_v34  ;;  %v1857_v34 = vrot.slane %v1855_v18, 2  ;;  %v4485_v18 = vshrl.u32 %v8489_v59, 16 }
  0x9f   : > { %6941 = vmatmul.mubr.bf16.gmra.mrb[12].mxu0 %v1796_v42  ;;  %6848 = vmatprep.mubr.bf16.mxu1 %v1000_v49  ;;  %v7733_v42 = vld [vmem:[%s9638_s1 + $0x60] sm:$0xff]   ;;  %v1864_v49 = vshll.u32 %v8351_v45, 16  ;;  %v1863_v45 = vrot.slane %v1861_v46, 1  ;;  %v7764_v46 = vld [vmem:[%s9638_s1 + $0x1b0] sm:$0xff]  }
  0xa0   : > { %6944 = vmatprep.mubr.bf16.mxu0 %v1805_v61  ;;  %6973 = vmatpush3.bf16.msra.mxu0 %v7735_v24  ;;  %v1823_v15 = vsel %vm1716_vm3, %v1813_v51, %v1822_v54  ;;  %v1832_v24 = vsel %vm1716_vm3, %v1822_v54, %v1831_v26  ;;  %v4476_v61 = vshll.u32 %v8484_v39, 16  ;;  %v7734_v51 = vld [vmem:[%s9638_s1 + $0x68] sm:$0xff]   ;;  %v4481_v54 = vshll.u32 %v8489_v59, 16 }
  0xa1   : > { %6974 = vmatprep.subr.bf16.mxu0 %v7739_v63  ;;  %v1866_v0 = vrot.slane %v1864_v49, 2 }
  0xa2   : > { %v4478_v2 = vrot.slane %v4476_v61, 1 }
  0xa4   : > { %6975 = vmatpush3.bf16.msra.mxu0 %v7739_v63  ;;  %v7869_v63 = vld [vmem:[%s7967_s14 + $0x78] sm:$0xff]   ;;  %v4479_v9 = vor.u32 %v4478_v2, %v4474_v60  ;;  %v4714_v2 = vrot.slane %v8508_v4, 1 }
  0xa5   : > { %7008 = vmatprep.subr.bf16.mxu0 %v8454_v10  ;;  %v1011_v17 = vrot.slane %v7869_v63, 1 }
  0xa6   : > { %6849 = vmatmul.mubr.bf16.vlgmr.msra.gmra.mrb[16].mxu1 %v1002_v52  ;;  %v1858_v52 = vor.u32 %v1857_v34, %v1854_v29  ;;  %v7756_v29 = vld [vmem:[%s9638_s1 + $0x80] sm:$0xff]   ;;  %v4820_v34 = vld [vmem:[%s7967_s14 + $0x8c] sm:$0xf] }
  0xa7   : > { %6945 = vmatmul.mubr.bf16.gmra.mrb[16].mxu0 %v1814_v38  ;;  %7153 = vmatpush3.bf16.msra.mxu1 %v8374_v6  ;;  %v1845_v6 = vrot.slane %v1843_v40, 1  ;;  %v1867_v40 = vor.u32 %v1866_v0, %v1863_v45  ;;  %v4483_v38 = vrot.slane %v4481_v54, 1  ;;  %v1014_v44 = vsel %vm981_vm0, %v1011_v17, %v1013_v55  ;;  %v7765_v55 = vld [vmem:[%s9638_s1 + $0xb0] sm:$0xff]   ;;  %v7766_v54 = vld [vmem:[%s9638_s1 + $0xb8] sm:$0xff]  }
  0xa8   : > { %7154 = vmatprep.subr.bf16.mxu1 %v7728_v19  ;;  %6852 = vmatprep.mubr.bf16.mxu1 %v1004_v25  ;;  %v4489_v25 = vshll.u32 %v8508_v4, 16 }
  0xa9   : > { %6948 = vmatprep.mubr.bf16.mxu0 %v1823_v15  ;;  %v1849_v50 = vor.u32 %v1848_v36, %v1845_v6  ;;  %v1868_v15 = vsel %vm1716_vm3, %v1858_v52, %v1867_v40  ;;  %v4484_v22 = vsel %vm377_vm1, %v4479_v9, %v4483_v38  ;;  %v4487_v26 = vor.u32 %v4485_v18, %v4483_v38  ;;  %v7758_v6 = vld [vmem:[%s9638_s1 + $0x1a0] sm:$0xff]   ;;  %v7753_v36 = vld [vmem:[%s9638_s1 + $0x30] sm:$0xff]  }
  0xaa   : > { %v4491_v3 = vrot.slane %v4489_v25, 1  ;;  %v8668_v18 = vld [vmem:[%s7967_s14 + $0x30] sm:$0xff]   ;;  %v7779_v25 = vld [vmem:[%s9638_s1 + $0x1c8] sm:$0xff]  }
  0xab   : > { %7155 = vmatpush3.bf16.msra.mxu1 %v7728_v19  ;;  %v1850_v28 = vsel %vm1716_vm3, %v1840_v20, %v1849_v50  ;;  %v1012_v19 = vsel %vm981_vm0, %v1009_v58, %v1011_v17  ;;  %v1859_v56 = vsel %vm1716_vm3, %v1849_v50, %v1858_v52  ;;  %v7745_v20 = vld [vmem:[%s9638_s1 + $0x8] sm:$0xff]  }
  0xac   : > { %7156 = vmatprep.subr.bf16.mxu1 %v7730_v1  ;;  %v7749_v58 = vld [vmem:[%s9638_s1 + $0x188] sm:$0xff]  }
  0xad   : > { %v7757_v50 = vld [vmem:[%s9638_s1 + $0x88] sm:$0xff]  }
  0xae   : > { %6853 = vmatmul.mubr.bf16.gmra.mrb[20].mxu1 %v1006_v31  ;;  %v4492_v31 = vsel %vm377_vm1, %v4487_v26, %v4491_v3  ;;  %v7763_v52 = vld [vmem:[%s9638_s1 + $0xa8] sm:$0xff]   ;;  %v7776_v26 = vld [vmem:[%s9638_s1 + $0xd0] sm:$0xff]   ;;  %v2578_v3 = vrot.slane %v8668_v18, 2 }
  0xaf   : > { %6949 = vmatmul.mubr.bf16.gmra.mrb[20].mxu0 %v1832_v24  ;;  %7157 = vmatpush3.bf16.msra.mxu1 %v7730_v1  ;;  %v7738_v1 = vld [vmem:[%s9638_s1 + $0x78] sm:$0xff]  }
  0xb0   : > { %7158 = vmatprep.subr.bf16.mxu1 %v7731_v35  ;;  %6856 = vmatprep.mubr.bf16.mxu1 %v1008_v48  ;;  %v5110_v48 = vld [vmem:[%s7967_s14 + $0x88] sm:$0xc] }
  0xb1   : > { %6952 = vmatprep.mubr.bf16.mxu0 %v1841_v8  ;;  %v8587_v8 = vld [vmem:[%s7967_s14 + $0x90] sm:$0xff]  }
  0xb2   : > { %v5131_v61 = vrot.slane %v8587_v8, 2  ;;  %v4854_v4 = vrot.slane %v8587_v8, 1 }
  0xb3   : > { %7159 = vmatpush3.bf16.msra.mxu1 %v7731_v35  ;;  %v7752_v35 = vld [vmem:[%s9638_s1 + $0x190] sm:$0xff]  }
  0xb4   : > { %7160 = vmatprep.subr.bf16.mxu1 %v7733_v42 }
  0xb6   : > { %6857 = vmatmul.mubr.bf16.gmra.mrb[24].mxu1 %v1010_v23  ;;  %v7759_v23 = vld [vmem:[%s9638_s1 + $0x90] sm:$0xff]  }
  0xb7   : > { %6953 = vmatmul.mubr.bf16.gmra.mrb[24].mxu0 %v1850_v28  ;;  %7161 = vmatpush3.bf16.msra.mxu1 %v7733_v42  ;;  %v6286_v42 = vcombine.low %v5110_v48, %v4820_v34  ;;  %v8644_v28 = vld [vmem:[%s7967_s14 + $0x20] sm:$0xff]  }
  0xb8   : > { %7162 = vmatprep.subr.bf16.mxu1 %v7734_v51  ;;  %6860 = vmatprep.mubr.bf16.mxu1 %v1012_v19  ;;  %v3606_v48 = vld [vmem:[%s9639_s2 + $0x23] sm:$0xff] }
  0xb9   : > { %6956 = vmatprep.mubr.bf16.mxu0 %v1859_v56  ;;  %v7771_v56 = vld [vmem:[%s9638_s1 + $0xc0] sm:$0xff]  }
  0xbb   : > { %7163 = vmatpush3.bf16.msra.mxu1 %v7734_v51  ;;  %v8622_v51 = vld [vmem:[%s7967_s14 + $0x14] sm:$0xf] }
  0xbc   : > { %7164 = vmatprep.subr.bf16.mxu1 %v7736_v12 }
  0xbe   : > { %6861 = vmatmul.mubr.bf16.gmra.mrb[28].mxu1 %v1014_v44  ;;  %v7773_v44 = vld [vmem:[%s9638_s1 + $0xc8] sm:$0xff]  }
  0xbf   : > { %6957 = vmatmul.mubr.bf16.gmra.mrb[28].mxu0 %v1868_v15  ;;  %7165 = vmatpush3.bf16.msra.mxu1 %v7736_v12  ;;  %v2574_v12 = vrot.slane %v8644_v28, 2  ;;  %v8674_v15 = vld [vmem:[%s7967_s14 + $0x38] sm:$0xff]  }
  0xc0   : > { %7166 = vmatprep.subr.bf16.mxu1 %v7738_v1  ;;  %6976 = vmatprep.mubr.bf16.mxu0 %v8291_v43  ;;  %v7747_v43 = vld [vmem:[%s9638_s1 + $0x10] sm:$0xff]  }
  0xc1   : > { %7168 = vmatprep.mubr.bf16.mxu1 %v4484_v22 }
  0xc3   : > { %7167 = vmatpush3.bf16.msra.mxu1 %v7738_v1 }
  0xc4   : > { %7172 = vmatprep.subr.bf16.mxu1 %v7743_v41 }
  0xc6   : > { %7169 = vmatmul.mubr.bf16.vlgmr.msra.gmra.mrb[32].mxu1 %v4492_v31  ;;  %v7784_v31 = vld [vmem:[%s9638_s1 + $0x1d0] sm:$0xff]  }
  0xc7   : > { %6977 = vmatmul.mubr.bf16.vlgmr.msra.gmra.mrb[0].mxu0 %v8294_v37  ;;  %7173 = vmatpush3.bf16.msra.mxu1 %v7743_v41  ;;  %v7748_v37 = vld [vmem:[%s9638_s1 + $0x18] sm:$0xff]   ;;  %v2580_v41 = vrot.slane %v8674_v15, 2 }
  0xc8   : > { %7174 = vmatprep.subr.bf16.mxu1 %v7745_v20  ;;  %7009 = vmatpush3.bf16.msra.mxu0 %v8454_v10  ;;  %v7755_v10 = vld [vmem:[%s9638_s1 + $0x198] sm:$0xff]  }
  0xc9   : > { %6980 = vmatprep.mubr.bf16.mxu0 %v8301_v47  ;;  %7010 = vmatprep.subr.bf16.mxu0 %v7749_v58  ;;  %v7750_v47 = vld [vmem:[%s9638_s1 + $0x20] sm:$0xff]  }
  0xca   : > { %7188 = vmatprep.mubr.bf16.mxu1 %v8484_v39  ;;  %v4691_v39 = vld [vmem:[%s7967_s14 + $0x80] sm:$0xe] }
  0xcb   : > { %7175 = vmatpush3.bf16.msra.mxu1 %v7745_v20  ;;  %v6209_v24 = vcombine.low %v4691_v39, %v8474_v30  ;;  %v4712_v30 = vrot.slane %v8489_v59, 1 }
  0xcc   : > { %7176 = vmatprep.subr.bf16.mxu1 %v7747_v43  ;;  %7011 = vmatpush3.bf16.msra.mxu0 %v7749_v58  ;;  %v7778_v58 = vld [vmem:[%s9638_s1 + $0xd8] sm:$0xff]  }
  0xcd   : > { %7012 = vmatprep.subr.bf16.mxu0 %v7752_v35  ;;  %v4711_v49 = vrot.slane %v6209_v24, 1  ;;  %v7878_v24 = vmov 0  }
  0xce   : > { %7646 = vset.pattern.permute.xlu0 %v7878_v24  ;;  %210 = vst [vmem:[%s8723_s10] sm:$0xf] %v7878_v24  ;;  %211 = vst [vmem:[%s8723_s10 + $0x4] sm:$0xf] %v7878_v24  ;;  %7647 = vset.pattern.permute.xlu1 %v7878_v24 }
  0xcf   : > { %6981 = vmatmul.mubr.bf16.gmra.mrb[4].mxu0 %v8310_v7  ;;  %7177 = vmatpush3.bf16.msra.mxu1 %v7747_v43  ;;  %v7751_v7 = vld [vmem:[%s9638_s1 + $0x28] sm:$0xff]   ;;  %v4713_v17 = vsel %vm981_vm0, %v4711_v49, %v4712_v30  ;;  %v8694_v43 = vld [vmem:[%s7967_s14 + $0x40] sm:$0xff]   ;;  %224 = vst [vmem:[%s8723_s10 + $0x9c] sm:$0xf] %v7878_v24  ;;  %225 = vst [vmem:[%s8723_s10 + $0xa0] sm:$0xf] %v7878_v24 }
  0xd0   : > { %7178 = vmatprep.subr.bf16.mxu1 %v7748_v37  ;;  %6984 = vmatprep.mubr.bf16.mxu0 %v8320_v62  ;;  %v7761_v62 = vld [vmem:[%s9638_s1 + $0x1a8] sm:$0xff]   ;;  %226 = vst [vmem:[%s8723_s10 + $0xa4] sm:$0xf] %v7878_v24  ;;  %227 = vst [vmem:[%s8723_s10 + $0xa8] sm:$0x7] %v7878_v24  ;;  %v7801_v24 = vld [vmem:[%s9638_s1 + $0x118] sm:$0xff]  }
  0xd1   : > { %7013 = vmatpush3.bf16.msra.mxu0 %v7752_v35  ;;  %v2581_v35 = vsel %vm2147_vm2, %v2578_v3, %v2580_v41  ;;  %3648 = vperm.xlu1 %7647, %v3606_v48  }
  0xd2   : > { %7014 = vmatprep.subr.bf16.mxu0 %v7755_v10 }
  0xd3   : > { %7179 = vmatpush3.bf16.msra.mxu1 %v7748_v37  ;;  %v8698_v37 = vld [vmem:[%s7967_s14 + $0x48] sm:$0xff]  }
  0xd4   : > { %7180 = vmatprep.subr.bf16.mxu1 %v7750_v47 }
  0xd5   : > { %7015 = vmatpush3.bf16.msra.mxu0 %v7755_v10  ;;  %v7789_v10 = vld [vmem:[%s9638_s1 + $0x1d8] sm:$0xff]  }
  0xd6   : > { %7016 = vmatprep.subr.bf16.mxu0 %v7758_v6 }
  0xd7   : > { %6985 = vmatmul.mubr.bf16.gmra.mrb[8].mxu0 %v8327_v13  ;;  %7181 = vmatpush3.bf16.msra.mxu1 %v7750_v47  ;;  %v7754_v13 = vld [vmem:[%s9638_s1 + $0x38] sm:$0xff]   ;;  %v7781_v47 = vld [vmem:[%s9638_s1 + $0xe0] sm:$0xff]  }
  0xd8   : > { %7182 = vmatprep.subr.bf16.mxu1 %v7751_v7  ;;  %6988 = vmatprep.mubr.bf16.mxu0 %v8332_v27  ;;  %v7767_v27 = vld [vmem:[%s9638_s1 + $0x1b8] sm:$0xff]  }
  0xd9   : > { %7017 = vmatpush3.bf16.msra.mxu0 %v7758_v6  ;;  %v2582_v6 = vrot.slane %v8694_v43, 2 }
  0xda   : > { %7018 = vmatprep.subr.bf16.mxu0 %v7761_v62 }
  0xdb   : > { %7183 = vmatpush3.bf16.msra.mxu1 %v7751_v7  ;;  %v2584_v7 = vrot.slane %v8698_v37, 2 }
  0xdc   : > { %7184 = vmatprep.subr.bf16.mxu1 %v7753_v36 }
  0xdd   : > { %7019 = vmatpush3.bf16.msra.mxu0 %v7761_v62  ;;  %v7797_v62 = vld [vmem:[%s9638_s1 + $0x1e0] sm:$0xff]   ;;  %v2585_v39 = vsel %vm2147_vm2, %v2582_v6, %v2584_v7 }
  0xde   : > { %7020 = vmatprep.subr.bf16.mxu0 %v7764_v46 }
  0xdf   : > { %6989 = vmatmul.mubr.bf16.gmra.mrb[12].mxu0 %v8337_v33  ;;  %7185 = vmatpush3.bf16.msra.mxu1 %v7753_v36  ;;  %v8593_v33 = vld [vmem:[%s9638_s1 + $0x1c0] sm:$0xff]   ;;  %v2583_v36 = vsel %vm2147_vm2, %v2580_v41, %v2582_v6  ;;  %v7799_v6 = vld [vmem:[%s9638_s1 + $0x110] sm:$0xff]  }
  0xe0   : > { %7186 = vmatprep.subr.bf16.mxu1 %v7754_v13  ;;  %6992 = vmatprep.mubr.bf16.mxu0 %v8345_v32  ;;  %v5130_v32 = vrot.slane %v6286_v42, 2  ;;  %v7786_v42 = vld [vmem:[%s9638_s1 + $0xf0] sm:$0xff]  }
  0xe1   : > { %7021 = vmatpush3.bf16.msra.mxu0 %v7764_v46  ;;  %v7783_v46 = vld [vmem:[%s9638_s1 + $0xe8] sm:$0xff]  }
  0xe2   : > { %7022 = vmatprep.subr.bf16.mxu0 %v7767_v27  ;;  %v8602_v63 = vsel %vm2147_vm2, %v5130_v32, %v5131_v61 }
  0xe3   : > { %7187 = vmatpush3.bf16.msra.mxu1 %v7754_v13  ;;  %v8716_v13 = vld [vmem:[%s7967_s14 + $0x50] sm:$0xff]  }
  0xe4   : > { %7192 = vmatprep.subr.bf16.mxu1 %v7756_v29  ;;  %v2586_v49 = vrot.slane %v8716_v13, 2 }
  0xe5   : > { %7023 = vmatpush3.bf16.msra.mxu0 %v7767_v27  ;;  %v8727_v27 = vld [vmem:[%s7967_s14 + $0x58] sm:$0xff]  }
  0xe6   : > { %7189 = vmatmul.mubr.bf16.vlgmr.msra.gmra.mrb[32].mxu1 %v8489_v59  ;;  %7056 = vmatprep.subr.bf16.mxu0 %v8593_v33  ;;  %v7760_v59 = vld [vmem:[%s9638_s1 + $0x98] sm:$0xff]  }
  0xe7   : > { %6993 = vmatmul.mubr.bf16.gmra.mrb[16].mxu0 %v8354_v5  ;;  %7193 = vmatpush3.bf16.msra.mxu1 %v7756_v29  ;;  %v7762_v5 = vld [vmem:[%s9638_s1 + $0xa0] sm:$0xff]   ;;  %v7802_v29 = vld [vmem:[%s9638_s1 + $0x1e8] sm:$0xff]  }
  0xe8   : > { %7194 = vmatprep.subr.bf16.mxu1 %v7757_v50  ;;  %6996 = vmatprep.mubr.bf16.mxu0 %v8360_v53  ;;  %v2438_v53 = vld [vmem:[%s7967_s14 + $0x10] sm:$0xc] }
  0xe9   : > { %7208 = vmatprep.mubr.bf16.mxu1 %v4713_v17  ;;  %v4990_v17 = vshrl.u32 %v8587_v8, 16 }
  0xeb   : > { %7195 = vmatpush3.bf16.msra.mxu1 %v7757_v50 }
  0xec   : > { %7196 = vmatprep.subr.bf16.mxu1 %v7759_v23 }
  0xef   : > { %6997 = vmatmul.mubr.bf16.gmra.mrb[20].mxu0 %v8365_v57  ;;  %7197 = vmatpush3.bf16.msra.mxu1 %v7759_v23  ;;  %v8628_v57 = vcombine.low %v2438_v53, %v8622_v51  ;;  %v4993_v23 = vshll.u32 %v8587_v8, 16  ;;  %v3607_v53 = vld [vmem:[%s9639_s2 + $0x2b] sm:$0xff] }
  0xf0   : > { %7198 = vmatprep.subr.bf16.mxu1 %v7760_v59  ;;  %7000 = vmatprep.mubr.bf16.mxu0 %v8377_v11  ;;  %v8631_v11 = vld [vmem:[%s7967_s14 + $0x18] sm:$0xff]  }
  0xf1   : > { %v2571_v45 = vrot.slane %v8628_v57, 2  ;;  %v2572_v0 = vrot.slane %v8631_v11, 2  ;;  %3653 = vperm.xlu1 %7647, %v3607_v53   ;;  %v8862_v53 = vld [vmem:[%s7967_s14 + $0x98] ss:$0 sps:$4 sm:$0x33]  }
  0xf3   : > { %7199 = vmatpush3.bf16.msra.mxu1 %v7760_v59  ;;  %v2573_v60 = vsel %vm2147_vm2, %v2571_v45, %v2572_v0  ;;  %v2575_v38 = vsel %vm2147_vm2, %v2572_v0, %v2574_v12  ;;  %v3605_v59 = vld [vmem:[%s9639_s2 + $0x1b] sm:$0xff] }
  0xf4   : > { %7200 = vmatprep.subr.bf16.mxu1 %v7762_v5  ;;  %v8768_v45 = vld [vmem:[%s7967_s14 + $0x60] sm:$0xff]  }
  0xf7   : > { %7001 = vmatmul.mubr.bf16.gmra.mrb[24].mxu0 %v8381_v14  ;;  %7201 = vmatpush3.bf16.msra.mxu1 %v7762_v5  ;;  %v4819_v14 = vld [vmem:[%s7967_s14 + $0x88] sm:$0xe]  ;;  %v7795_v5 = vld [vmem:[%s7967_s14 + $0x98] ss:$0 sps:$4 sm:$0x11]  }
  0xf8   : > { %7202 = vmatprep.subr.bf16.mxu1 %v7763_v52  ;;  %7004 = vmatprep.mubr.bf16.mxu0 %v8388_v21  ;;  %v8649_v21 = vld [vmem:[%s7967_s14 + $0x28] sm:$0xff]   ;;  %v8653_v19 = vcombine.low %v4819_v14, %v4820_v34  ;;  %v3604_v34 = vld [vmem:[%s9639_s2 + $0x13] sm:$0xff] }
  0xf9   : > { %v2576_v40 = vrot.slane %v8649_v21, 2  ;;  %3638 = vperm.xlu0 %7646, %v3604_v34   ;;  %v7812_v14 = vld [vmem:[%s9638_s1 + $0x1f8] sm:$0xff]   ;;  %v8840_v34 = vld [vmem:[%s7967_s14 + $0x88] sm:$0xff]  }
  0xfa   : > { %v4853_v9 = vrot.slane %v8653_v19, 1  ;;  %v4982_v32 = vshrl.u32 %v8653_v19, 16  ;;  %v4985_v50 = vshll.u32 %v8653_v19, 16  ;;  %v4992_v19 = vrot.slane %v4990_v17, 1 }
  0xfb   : > { %7203 = vmatpush3.bf16.msra.mxu1 %v7763_v52  ;;  %v2577_v1 = vsel %vm2147_vm2, %v2574_v12, %v2576_v40  ;;  %v2579_v20 = vsel %vm2147_vm2, %v2576_v40, %v2578_v3  ;;  %v2587_v52 = vsel %vm2147_vm2, %v2584_v7, %v2586_v49  ;;  %v3608_v12 = vld [vmem:[%s9639_s2 + $0x33] sm:$0xff]  ;;  %v4856_v40 = vrot.slane %v7795_v5, 1  ;;  %v3617_v5 = vld [vmem:[%s9639_s2 + $0x7b] sm:$0xff] }
  0xfc   : > { %7204 = vmatprep.subr.bf16.mxu1 %v7765_v55  ;;  %v4855_v22 = vsel %vm981_vm0, %v4853_v9, %v4854_v4  ;;  %v7793_v9 = vld [vmem:[%s9638_s1 + $0x100] sm:$0xff]   ;;  %v2887_v17 = vshll.u32 %v8628_v57, 16 }
  0xfd   : > { %3643 = vperm.xlu0 %7646, %v3605_v59   ;;  %v4857_v3 = vsel %vm981_vm0, %v4854_v4, %v4856_v40  ;;  %v3611_v4 = vld [vmem:[%s9639_s2 + $0x4b] sm:$0xff]  ;;  %v2895_v59 = vshll.u32 %v8631_v11, 16  ;;  %v4999_v40 = vshrl.u32 %v8862_v53, 16 }
  0xff   : > { %7005 = vmatmul.mubr.bf16.gmra.mrb[28].mxu0 %v8392_v16  ;;  %7205 = vmatpush3.bf16.msra.mxu1 %v7765_v55  ;;  %v4715_v16 = vsel %vm981_vm0, %v4712_v30, %v4714_v2  ;;  %v2588_v30 = vrot.slane %v8727_v27, 2  ;;  %v7788_v55 = vld [vmem:[%s9638_s1 + $0xf8] sm:$0xff]   ;;  %v4987_v2 = vrot.slane %v4985_v50, 2  ;;  %v2884_v50 = vshrl.u32 %v8628_v57, 16 }
 0x100   : > { %7206 = vmatprep.subr.bf16.mxu1 %v7766_v54  ;;  %7024 = vmatprep.mubr.bf16.mxu0 %v2573_v60  ;;  %v4984_v60 = vrot.slane %v4982_v32, 1  ;;  %v2600_v32 = vrot.slane %v8840_v34, 2 }
 0x101   : > { %v2589_v0 = vsel %vm2147_vm2, %v2586_v49, %v2588_v30  ;;  %3658 = vperm.xlu0 %7646, %v3608_v12   ;;  %v3616_v49 = vld [vmem:[%s9639_s2 + $0x73] sm:$0xff]  ;;  %v3619_v12 = vld [vmem:[%s9639_s2 + $0x8b] sm:$0xff] }
 0x103   : > { %7207 = vmatpush3.bf16.msra.mxu1 %v7766_v54  ;;  %v8772_v54 = vld [vmem:[%s7967_s14 + $0x68] sm:$0xff]  }
 0x104   : > { %7212 = vmatprep.subr.bf16.mxu1 %v7771_v56 }
 0x106   : > { %7209 = vmatmul.mubr.bf16.vlgmr.msra.gmra.mrb[32].mxu1 %v4715_v16  ;;  %v3609_v16 = vld [vmem:[%s9639_s2 + $0x3b] sm:$0xff] }
 0x107   : > { %7025 = vmatmul.mubr.bf16.vlgmr.msra.gmra.mrb[0].mxu0 %v2575_v38  ;;  %7213 = vmatpush3.bf16.msra.mxu1 %v7771_v56  ;;  %v4995_v56 = vrot.slane %v4993_v23, 2  ;;  %v2590_v38 = vrot.slane %v8768_v45, 2  ;;  %v2892_v23 = vshrl.u32 %v8631_v11, 16 }
 0x108   : > { %7214 = vmatprep.subr.bf16.mxu1 %v7773_v44  ;;  %7057 = vmatpush3.bf16.msra.mxu0 %v8593_v33  ;;  %v7807_v33 = vld [vmem:[%s9638_s1 + $0x1f0] sm:$0xff]  }
 0x109   : > { %7028 = vmatprep.mubr.bf16.mxu0 %v2577_v1  ;;  %7058 = vmatprep.subr.bf16.mxu0 %v7779_v25  ;;  %v8788_v1 = vor.u32 %v4995_v56, %v4992_v19  ;;  %v2591_v41 = vsel %vm2147_vm2, %v2588_v30, %v2590_v38  ;;  %v7804_v30 = vld [vmem:[%s9638_s1 + $0x120] sm:$0xff]   ;;  %v2894_v19 = vrot.slane %v2892_v23, 2  ;;  %v2897_v56 = vrot.slane %v2895_v59, 3  ;;  %v3624_v23 = vld [vmem:[%s9639_s2 + $0xb3] sm:$0xff] }
 0x10a   : > { %7228 = vmatprep.mubr.bf16.mxu1 %v4855_v22  ;;  %v8793_v22 = vld [vmem:[%s9638_s1 + $0x200] sm:$0xff]   ;;  %3663 = vperm.xlu1 %7647, %v3609_v16   ;;  %v5002_v16 = vshll.u32 %v8862_v53, 16  ;;  %v5529_v59 = vld [vmem:[%s7967_s14 + $0x90] sm:$0x8] }
 0x10b   : > { %7215 = vmatpush3.bf16.msra.mxu1 %v7773_v44  ;;  %v2592_v44 = vrot.slane %v8772_v54, 2 }
 0x10c   : > { %7216 = vmatprep.subr.bf16.mxu1 %v7776_v26  ;;  %7059 = vmatpush3.bf16.msra.mxu0 %v7779_v25  ;;  %v4988_v25 = vor.u32 %v4987_v2, %v4984_v60  ;;  %v2886_v60 = vrot.slane %v2884_v50, 2  ;;  %v2889_v2 = vrot.slane %v2887_v17, 3  ;;  %v3623_v50 = vld [vmem:[%s9639_s2 + $0xab] sm:$0xff]  ;;  %v8911_v17 = vld [vmem:[%s7967_s14 + $0x94] sm:$0xf] }
 0x10d   : > { %7060 = vmatprep.subr.bf16.mxu0 %v7784_v31 }
 0x10e   : > { %3673 = vperm.xlu1 %7647, %v3611_v4   ;;  %v2913_v4 = vshll.u32 %v8649_v21, 16 }
 0x10f   : > { %7029 = vmatmul.mubr.bf16.gmra.mrb[4].mxu0 %v2579_v20  ;;  %7217 = vmatpush3.bf16.msra.mxu1 %v7776_v26  ;;  %v3610_v26 = vld [vmem:[%s9639_s2 + $0x43] sm:$0xff]  ;;  %v8806_v20 = vld [vmem:[%s7967_s14 + $0x70] sm:$0xff]  }
 0x110   : > { %7218 = vmatprep.subr.bf16.mxu1 %v7778_v58  ;;  %7032 = vmatprep.mubr.bf16.mxu0 %v2581_v35  ;;  %v8810_v35 = vld [vmem:[%s7967_s14 + $0x78] sm:$0xff]   ;;  %v2594_v7 = vrot.slane %v8806_v20, 2 }
 0x111   : > { %7061 = vmatpush3.bf16.msra.mxu0 %v7784_v31  ;;  %v7796_v31 = vld [vmem:[%s9638_s1 + $0x108] sm:$0xff]   ;;  %3668 = vperm.xlu0 %7646, %v3610_v26   ;;  %v2904_v26 = vshll.u32 %v8644_v28, 16 }
 0x112   : > { %7062 = vmatprep.subr.bf16.mxu0 %v7789_v10 }
 0x113   : > { %7219 = vmatpush3.bf16.msra.mxu1 %v7778_v58  ;;  %v2593_v58 = vsel %vm2147_vm2, %v2590_v38, %v2592_v44  ;;  %v7809_v38 = vld [vmem:[%s9638_s1 + $0x130] sm:$0xff]  }
 0x114   : > { %7220 = vmatprep.subr.bf16.mxu1 %v7781_v47 }
 0x115   : > { %7063 = vmatpush3.bf16.msra.mxu0 %v7789_v10  ;;  %v4997_v10 = vsel %vm1716_vm3, %v4988_v25, %v8788_v1  ;;  %v2901_v25 = vshrl.u32 %v8644_v28, 16 }
 0x116   : > { %7064 = vmatprep.subr.bf16.mxu0 %v7797_v62 }
 0x117   : > { %7033 = vmatmul.mubr.bf16.gmra.mrb[8].mxu0 %v2583_v36  ;;  %7221 = vmatpush3.bf16.msra.mxu1 %v7781_v47  ;;  %v3612_v47 = vld [vmem:[%s9639_s2 + $0x53] sm:$0xff]  ;;  %v3613_v36 = vld [vmem:[%s9639_s2 + $0x5b] sm:$0xff] }
 0x118   : > { %7222 = vmatprep.subr.bf16.mxu1 %v7783_v46  ;;  %7036 = vmatprep.mubr.bf16.mxu0 %v2585_v39  ;;  %v2595_v39 = vsel %vm2147_vm2, %v2592_v44, %v2594_v7 }
 0x119   : > { %7065 = vmatpush3.bf16.msra.mxu0 %v7797_v62  ;;  %v2596_v62 = vrot.slane %v8810_v35, 2  ;;  %3678 = vperm.xlu0 %7646, %v3612_v47   ;;  %v3621_v47 = vld [vmem:[%s9639_s2 + $0x9b] sm:$0xff] }
 0x11a   : > { %7066 = vmatprep.subr.bf16.mxu0 %v7802_v29  ;;  %3683 = vperm.xlu1 %7647, %v3613_v36   ;;  %v3622_v36 = vld [vmem:[%s9639_s2 + $0xa3] sm:$0xff] }
 0x11b   : > { %7223 = vmatpush3.bf16.msra.mxu1 %v7783_v46  ;;  %v3614_v46 = vld [vmem:[%s9639_s2 + $0x63] sm:$0xff]  ;;  %v2597_v48 = vsel %vm2147_vm2, %v2594_v7, %v2596_v62  ;;  %v5001_v7 = vrot.slane %v4999_v40, 1 }
 0x11c   : > { %7224 = vmatprep.subr.bf16.mxu1 %v7786_v42 }
 0x11d   : > { %7067 = vmatpush3.bf16.msra.mxu0 %v7802_v29  ;;  %v8837_v29 = vld [vmem:[%s7967_s14 + $0x80] sm:$0xff]   ;;  %3688 = vperm.xlu0 %7646, %v3614_v46  }
 0x11e   : > { %7068 = vmatprep.subr.bf16.mxu0 %v7807_v33 }
 0x11f   : > { %7037 = vmatmul.mubr.bf16.gmra.mrb[12].mxu0 %v2587_v52  ;;  %7225 = vmatpush3.bf16.msra.mxu1 %v7786_v42  ;;  %v3615_v42 = vld [vmem:[%s9639_s2 + $0x6b] sm:$0xff]  ;;  %v3618_v52 = vld [vmem:[%s9639_s2 + $0x83] sm:$0xff] }
 0x120   : > { %7226 = vmatprep.subr.bf16.mxu1 %v7788_v55  ;;  %7040 = vmatprep.mubr.bf16.mxu0 %v2589_v0 }
 0x121   : > { %7069 = vmatpush3.bf16.msra.mxu0 %v7807_v33  ;;  %v2598_v33 = vrot.slane %v8837_v29, 2  ;;  %3693 = vperm.xlu1 %7647, %v3615_v42   ;;  %v2906_v42 = vrot.slane %v2904_v26, 3  ;;  %v3626_v26 = vld [vmem:[%s9639_s2 + $0xc3] sm:$0xff] }
 0x122   : > { %7070 = vmatprep.subr.bf16.mxu0 %v7812_v14  ;;  %3698 = vperm.xlu0 %7646, %v3616_v49  }
 0x123   : > { %7227 = vmatpush3.bf16.msra.mxu1 %v7788_v55  ;;  %v2599_v57 = vsel %vm2147_vm2, %v2596_v62, %v2598_v33  ;;  %v7806_v55 = vld [vmem:[%s9638_s1 + $0x128] sm:$0xff]   ;;  %v2601_v0 = vsel %vm2147_vm2, %v2598_v33, %v2600_v32  ;;  %v5004_v62 = vrot.slane %v5002_v16, 2  ;;  %v2915_v33 = vrot.slane %v2913_v4, 3  ;;  %v3625_v16 = vld [vmem:[%s9639_s2 + $0xbb] sm:$0xff] }
 0x124   : > { %7232 = vmatprep.subr.bf16.mxu1 %v7793_v9 }
 0x125   : > { %7071 = vmatpush3.bf16.msra.mxu0 %v7812_v14  ;;  %v7810_v14 = vld [vmem:[%s7967_s14 + $0x90] ss:$0 sps:$4 sm:$0x33]   ;;  %3703 = vperm.xlu1 %7647, %v3617_v5   ;;  %v7813_v5 = vld [vmem:[%s9638_s1 + $0x140] sm:$0xff]  }
 0x126   : > { %7229 = vmatmul.mubr.bf16.vlgmr.msra.gmra.mrb[32].mxu1 %v4857_v3  ;;  %7104 = vmatprep.subr.bf16.mxu0 %v8793_v22  ;;  %v2602_v44 = vrot.slane %v7810_v14, 2  ;;  %v6363_v14 = vcombine.low %v5529_v59, %v8911_v17 }
 0x127   : > { %7041 = vmatmul.mubr.bf16.gmra.mrb[16].mxu0 %v2591_v41  ;;  %7233 = vmatpush3.bf16.msra.mxu1 %v7793_v9  ;;  %v3620_v9 = vld [vmem:[%s9639_s2 + $0x93] sm:$0xff]  ;;  %v2890_v41 = vor.u32 %v2889_v2, %v2886_v60  ;;  %v2928_v2 = vshrl.u32 %v8674_v15, 16 }
 0x128   : > { %7234 = vmatprep.subr.bf16.mxu1 %v7796_v31  ;;  %7044 = vmatprep.mubr.bf16.mxu0 %v2593_v58 }
 0x129   : > { %7248 = vmatprep.mubr.bf16.mxu1 %v4997_v10  ;;  %3708 = vperm.xlu0 %7646, %v3618_v52   ;;  %v2910_v10 = vshrl.u32 %v8649_v21, 16 }
 0x12a   : > { %3713 = vperm.xlu1 %7647, %v3619_v12  }
 0x12b   : > { %7235 = vmatpush3.bf16.msra.mxu1 %v7796_v31  ;;  %v2898_v31 = vor.u32 %v2897_v56, %v2894_v19  ;;  %v2931_v19 = vshll.u32 %v8674_v15, 16  ;;  %v8931_v56 = vld [vmem:[%s7967_s14 + $0xa0] ss:$0 sps:$4 sm:$0x77]  }
 0x12c   : > { %7236 = vmatprep.subr.bf16.mxu1 %v7799_v6 }
 0x12d   : > { %3718 = vperm.xlu0 %7646, %v3620_v9   ;;  %v2899_v49 = vsel %vm2882_vm4, %v2890_v41, %v2898_v31  ;;  %v5549_v9 = vrot.slane %v6363_v14, 3  ;;  %v5552_v41 = vrot.slane %v8931_v56, 3  ;;  %v3629_v14 = vld [vmem:[%s9639_s2 + $0xdb] sm:$0xff] }
 0x12e   : > { %3723 = vperm.xlu1 %7647, %v3621_v47   ;;  %v7815_v47 = vld [vmem:[%s9638_s1 + $0x148] sm:$0xff]  }
 0x12f   : > { %7045 = vmatmul.mubr.bf16.gmra.mrb[20].mxu0 %v2595_v39  ;;  %7237 = vmatpush3.bf16.msra.mxu1 %v7799_v6  ;;  %v2603_v39 = vsel %vm2147_vm2, %v2600_v32, %v2602_v44  ;;  %v5005_v32 = vor.u32 %v5004_v62, %v5001_v7 }
 0x130   : > { %7238 = vmatprep.subr.bf16.mxu1 %v7801_v24  ;;  %7048 = vmatprep.mubr.bf16.mxu0 %v2597_v48  ;;  %v2903_v48 = vrot.slane %v2901_v25, 2 }
 0x131   : > { %3728 = vperm.xlu0 %7646, %v3622_v36   ;;  %v5006_v25 = vsel %vm1716_vm3, %v8788_v1, %v5005_v32  ;;  %v7819_v36 = vld [vmem:[%s9638_s1 + $0x208] sm:$0xff]   ;;  %v3628_v32 = vld [vmem:[%s9639_s2 + $0xd3] sm:$0xff] }
 0x132   : > { %v2907_v52 = vor.u32 %v2906_v42, %v2903_v48  ;;  %3733 = vperm.xlu1 %7647, %v3623_v50   ;;  %v3627_v42 = vld [vmem:[%s9639_s2 + $0xcb] sm:$0xff]  ;;  %v2940_v50 = vshll.u32 %v8694_v43, 16 }
 0x133   : > { %7239 = vmatpush3.bf16.msra.mxu1 %v7801_v24  ;;  %v7811_v24 = vld [vmem:[%s9638_s1 + $0x138] sm:$0xff]  }
 0x134   : > { %7240 = vmatprep.subr.bf16.mxu1 %v7804_v30  ;;  %v2908_v4 = vsel %vm2882_vm4, %v2898_v31, %v2907_v52 }
 0x135   : > { %3738 = vperm.xlu0 %7646, %v3624_v23  }
 0x136   : > { %3743 = vperm.xlu1 %7647, %v3625_v16   ;;  %v7818_v16 = vld [vmem:[%s9638_s1 + $0x158] sm:$0xff]  }
 0x137   : > { %7049 = vmatmul.mubr.bf16.gmra.mrb[24].mxu0 %v2599_v57  ;;  %7241 = vmatpush3.bf16.msra.mxu1 %v7804_v30  ;;  %v2912_v30 = vrot.slane %v2910_v10, 2  ;;  %v2919_v57 = vshrl.u32 %v8668_v18, 16 }
 0x138   : > { %7242 = vmatprep.subr.bf16.mxu1 %v7806_v55  ;;  %7052 = vmatprep.mubr.bf16.mxu0 %v2601_v0  ;;  %v8923_v0 = vld [vmem:[%s7967_s14 + $0x98] sm:$0xff]  }
 0x139   : > { %v8886_v3 = vpop.f32.mrb[0].mxu1  ;;  %v2916_v40 = vor.u32 %v2915_v33, %v2912_v30  ;;  %v2921_v7 = vrot.slane %v2919_v57, 2  ;;  %3748 = vperm.xlu0 %7646, %v3626_v26   ;;  %v2937_v33 = vshrl.u32 %v8694_v43, 16 }
 0x13a   : > { %v8888_v58 = vpop.f32.mrb[1].mxu1  ;;  %3753 = vperm.xlu1 %7647, %v3627_v42   ;;  %v2967_v42 = vshll.u32 %v8727_v27, 16 }
 0x13b   : > { %7243 = vmatpush3.bf16.msra.mxu1 %v7806_v55  ;;  %v8895_v6 = vpop.f32.mrb[2].mxu1  ;;  %v2922_v55 = vshll.u32 %v8668_v18, 16  ;;  %v2917_v31 = vsel %vm2882_vm4, %v2907_v52, %v2916_v40  ;;  %v2949_v52 = vshll.u32 %v8698_v37, 16 }
 0x13c   : > { %v8900_v46 = vpop.f32.mrb[3].mxu1  ;;  %7244 = vmatprep.subr.bf16.mxu1 %v7809_v38 }
 0x13d   : > { %v2924_v62 = vrot.slane %v2922_v55, 3  ;;  %3758 = vperm.xlu0 %7646, %v3628_v32   ;;  %v2951_v26 = vrot.slane %v2949_v52, 3  ;;  %v3633_v32 = vld [vmem:[%s9639_s2 + $0xfb] sm:$0xff]  ;;  %v7821_v52 = vld [vmem:[%s9638_s1 + $0x168] sm:$0xff]  }
 0x13e   : > { %3763 = vperm.xlu1 %7647, %v3629_v14  }
 0x13f   : > { %7053 = vmatmul.mubr.bf16.gmra.mrb[28].mxu0 %v2603_v39  ;;  %7245 = vmatpush3.bf16.msra.mxu1 %v7809_v38  ;;  %v5550_v38 = vrot.slane %v8923_v0, 3  ;;  %v2930_v39 = vrot.slane %v2928_v2, 2  ;;  %v2925_v30 = vor.u32 %v2924_v62, %v2921_v7  ;;  %v2955_v62 = vshrl.u32 %v8716_v13, 16 }
 0x140   : > { %7246 = vmatprep.subr.bf16.mxu1 %v7811_v24  ;;  %7072 = vmatprep.mubr.bf16.mxu0 %v2899_v49  ;;  %v7817_v49 = vld [vmem:[%s9638_s1 + $0x150] sm:$0xff]  }
 0x141   : > { %v8926_v60 = vpop.f32.mrb[4].mxu1  ;;  %v8954_v1 = vsel %vm3313_vm5, %v5549_v9, %v5550_v38  ;;  %v8960_v48 = vsel %vm3313_vm5, %v5550_v38, %v5552_v41  ;;  %v2942_v9 = vrot.slane %v2940_v50, 3  ;;  %v7825_v41 = vld [vmem:[%s9638_s1 + $0x218] sm:$0xff]   ;;  %v2957_v14 = vrot.slane %v2955_v62, 2 }
 0x142   : > { %v8933_v12 = vpop.f32.mrb[5].mxu1  ;;  %v2985_v62 = vshll.u32 %v8772_v54, 16 }
 0x143   : > { %7247 = vmatpush3.bf16.msra.mxu1 %v7811_v24  ;;  %v8939_v44 = vpop.f32.mrb[6].mxu1  ;;  %v2933_v24 = vrot.slane %v2931_v19, 3  ;;  %v2926_v19 = vsel %vm2882_vm4, %v2916_v40, %v2925_v30  ;;  %v3630_v40 = vld [vmem:[%s9639_s2 + $0xe3] sm:$0xff] }
 0x144   : > { %v8947_v10 = vpop.f32.mrb[7].mxu1  ;;  %7252 = vmatprep.subr.bf16.mxu1 %v7813_v5  ;;  %3768 = vperm.xlu0 %7646, %v3630_v40   ;;  %v2973_v40 = vshrl.u32 %v8768_v45, 16 }
 0x145   : > { %v2934_v59 = vor.u32 %v2933_v24, %v2930_v39 }
 0x146   : > { %7249 = vmatmul.mubr.bf16.vlgmr.msra.gmra.mrb[32].mxu1 %v5006_v25 }
 0x147   : > { %7073 = vmatmul.mubr.bf16.vlgmr.msra.gmra.mrb[0].mxu0 %v2908_v4  ;;  %7253 = vmatpush3.bf16.msra.mxu1 %v7813_v5  ;;  %v2946_v5 = vshrl.u32 %v8698_v37, 16  ;;  %v2935_v38 = vsel %vm2882_vm4, %v2925_v30, %v2934_v59  ;;  %v3631_v4 = vld [vmem:[%s9639_s2 + $0xeb] sm:$0xff]  ;;  %v7829_v30 = vld [vmem:[%s9638_s1 + $0x220] sm:$0xff]  }
 0x148   : > { %7254 = vmatprep.subr.bf16.mxu1 %v7815_v47  ;;  %7105 = vmatpush3.bf16.msra.mxu0 %v8793_v22  ;;  %v7822_v22 = vld [vmem:[%s9638_s1 + $0x210] sm:$0xff]  }
 0x149   : > { %v8975_v23 = vpop.f32.mrb[8].mxu1  ;;  %7076 = vmatprep.mubr.bf16.mxu0 %v2917_v31  ;;  %7106 = vmatprep.subr.bf16.mxu0 %v7819_v36  ;;  %v2948_v25 = vrot.slane %v2946_v5, 2  ;;  %v2964_v31 = vshrl.u32 %v8727_v27, 16 }
 0x14a   : > { %v8982_v57 = vpop.f32.mrb[9].mxu1  ;;  %7268 = vmatprep.mubr.bf16.mxu1 %v8602_v63  ;;  %v2939_v63 = vrot.slane %v2937_v33, 2  ;;  %3773 = vperm.xlu1 %7647, %v3631_v4   ;;  %v3632_v33 = vld [vmem:[%s9639_s2 + $0xf3] sm:$0xff]  ;;  %v2976_v4 = vshll.u32 %v8768_v45, 16 }
 0x14b   : > { %7255 = vmatpush3.bf16.msra.mxu1 %v7815_v47  ;;  %v8985_v55 = vpop.f32.mrb[10].mxu1  ;;  %v7820_v47 = vld [vmem:[%s9638_s1 + $0x160] sm:$0xff]   ;;  %v2952_v24 = vor.u32 %v2951_v26, %v2948_v25  ;;  %3778 = vperm.xlu0 %7646, %v3632_v33   ;;  %v7823_v26 = vld [vmem:[%s9638_s1 + $0x170] sm:$0xff]  }
 0x14c   : > { %v8990_v2 = vpop.f32.mrb[11].mxu1  ;;  %7256 = vmatprep.subr.bf16.mxu1 %v7817_v49  ;;  %7107 = vmatpush3.bf16.msra.mxu0 %v7819_v36  ;;  %v2943_v7 = vor.u32 %v2942_v9, %v2939_v63  ;;  %v2958_v36 = vshll.u32 %v8716_v13, 16  ;;  %v2969_v9 = vrot.slane %v2967_v42, 3  ;;  %v5658_v25 = vld [vmem:[%s9639_s2 + $0x11b] sm:$0xff]  ;;  %v5238_v42 = vld [vmem:[%s7967_s14 + $0x90] sm:$0xc] }
 0x14d   : > { %7108 = vmatprep.subr.bf16.mxu0 %v7822_v22 }
 0x14e   : > { %v2944_v5 = vsel %vm2882_vm4, %v2934_v59, %v2943_v7  ;;  %v2953_v63 = vsel %vm2882_vm4, %v2943_v7, %v2952_v24  ;;  %3783 = vperm.xlu1 %7647, %v3633_v32   ;;  %v5657_v59 = vld [vmem:[%s9639_s2 + $0x113] sm:$0xff] }
 0x14f   : > { %7077 = vmatmul.mubr.bf16.gmra.mrb[4].mxu0 %v2926_v19  ;;  %7257 = vmatpush3.bf16.msra.mxu1 %v7817_v49  ;;  %v2960_v19 = vrot.slane %v2958_v36, 3  ;;  %v7835_v36 = vld [vmem:[%s9638_s1 + $0x230] sm:$0xff]   ;;  %v7824_v32 = vld [vmem:[%s9638_s1 + $0x178] sm:$0xff]  }
 0x150   : > { %7258 = vmatprep.subr.bf16.mxu1 %v7818_v16  ;;  %7080 = vmatprep.mubr.bf16.mxu0 %v2935_v38  ;;  %v7832_v38 = vld [vmem:[%s9638_s1 + $0x228] sm:$0xff]  }
 0x151   : > { %v9011_v39 = vpop.f32.mrb[12].mxu1  ;;  %7109 = vmatpush3.bf16.msra.mxu0 %v7822_v22  ;;  %5663 = vperm.xlu0 %7646, %v5657_v59   ;;  %v5133_v59 = vrot.slane %v8862_v53, 2  ;;  %v3003_v53 = vshll.u32 %v8810_v35, 16 }
 0x152   : > { %v9015_v49 = vpop.f32.mrb[13].mxu1  ;;  %7110 = vmatprep.subr.bf16.mxu0 %v7825_v41  ;;  %5668 = vperm.xlu1 %7647, %v5658_v25  }
 0x153   : > { %7259 = vmatpush3.bf16.msra.mxu1 %v7818_v16  ;;  %v9023_v50 = vpop.f32.mrb[14].mxu1  ;;  %v2966_v16 = vrot.slane %v2964_v31, 2  ;;  %v3634_v31 = vld [vmem:[%s9639_s2 + $0x103] sm:$0xff] }
 0x154   : > { %v9028_v22 = vpop.f32.mrb[15].mxu1  ;;  %7260 = vmatprep.subr.bf16.mxu1 %v7820_v47 }
 0x155   : > { %7111 = vmatpush3.bf16.msra.mxu0 %v7825_v41  ;;  %v2961_v41 = vor.u32 %v2960_v19, %v2957_v14  ;;  %v2970_v7 = vor.u32 %v2969_v9, %v2966_v16  ;;  %v2978_v14 = vrot.slane %v2976_v4, 3  ;;  %v2987_v16 = vrot.slane %v2985_v62, 3  ;;  %3788 = vperm.xlu0 %7646, %v3634_v31  }
 0x156   : > { %7112 = vmatprep.subr.bf16.mxu0 %v7829_v30  ;;  %v9070_v9 = vcombine.low %v5238_v42, %v8911_v17  ;;  %v7827_v17 = vld [vmem:[%s9638_s1 + $0x180] sm:$0xff]   ;;  %v5273_v62 = vrot.slane %v8923_v0, 2  ;;  %v5134_v31 = vsel %vm2147_vm2, %v5131_v61, %v5133_v59  ;;  %v7830_v61 = vld [vmem:[%s9638_s1 + $0x190] sm:$0xff]  }
 0x157   : > { %7081 = vmatmul.mubr.bf16.gmra.mrb[8].mxu0 %v2944_v5  ;;  %7261 = vmatpush3.bf16.msra.mxu1 %v7820_v47  ;;  %v2982_v47 = vshrl.u32 %v8772_v54, 16  ;;  %v2962_v33 = vsel %vm2882_vm4, %v2952_v24, %v2961_v41  ;;  %v2975_v5 = vrot.slane %v2973_v40, 2  ;;  %v2971_v19 = vsel %vm2882_vm4, %v2961_v41, %v2970_v7  ;;  %v5659_v24 = vld [vmem:[%s9639_s2 + $0x123] sm:$0xff] }
 0x158   : > { %7262 = vmatprep.subr.bf16.mxu1 %v7821_v52  ;;  %7084 = vmatprep.mubr.bf16.mxu0 %v2953_v63  ;;  %v2991_v41 = vshrl.u32 %v8806_v20, 16  ;;  %v2994_v40 = vshll.u32 %v8806_v20, 16 }
 0x159   : > { %7113 = vmatpush3.bf16.msra.mxu0 %v7829_v30  ;;  %v3635_v30 = vld [vmem:[%s9639_s2 + $0x10b] sm:$0xff]  ;;  %v2984_v63 = vrot.slane %v2982_v47, 2  ;;  %v2979_v25 = vor.u32 %v2978_v14, %v2975_v5  ;;  %5673 = vperm.xlu0 %7646, %v5659_v24   ;;  %v5272_v47 = vrot.slane %v9070_v9, 2  ;;  %v3021_v24 = vshll.u32 %v8840_v34, 16 }
 0x15a   : > { %7114 = vmatprep.subr.bf16.mxu0 %v7832_v38  ;;  %3793 = vperm.xlu1 %7647, %v3635_v30   ;;  %v7828_v30 = vld [vmem:[%s9638_s1 + $0x188] sm:$0xff]  }
 0x15b   : > { %7263 = vmatpush3.bf16.msra.mxu1 %v7821_v52  ;;  %v7839_v52 = vld [vmem:[%s9638_s1 + $0x238] sm:$0xff]   ;;  %v2988_v4 = vor.u32 %v2987_v16, %v2984_v63  ;;  %v2980_v42 = vsel %vm2882_vm4, %v2970_v7, %v2979_v25  ;;  %v5274_v8 = vsel %vm2147_vm2, %v5272_v47, %v5273_v62  ;;  %v3012_v63 = vshll.u32 %v8837_v29, 16 }
 0x15c   : > { %7264 = vmatprep.subr.bf16.mxu1 %v7823_v26 }
 0x15d   : > { %7115 = vmatpush3.bf16.msra.mxu0 %v7832_v38  ;;  %v5660_v38 = vld [vmem:[%s9639_s2 + $0x12b] sm:$0xff]  ;;  %v2989_v5 = vsel %vm2882_vm4, %v2979_v25, %v2988_v4  ;;  %v3014_v25 = vrot.slane %v3012_v63, 3 }
 0x15e   : > { %7116 = vmatprep.subr.bf16.mxu0 %v7835_v36  ;;  %5678 = vperm.xlu1 %7647, %v5660_v38   ;;  %v7831_v38 = vld [vmem:[%s9638_s1 + $0x198] sm:$0xff]  }
 0x15f   : > { %7085 = vmatmul.mubr.bf16.gmra.mrb[12].mxu0 %v2962_v33  ;;  %7265 = vmatpush3.bf16.msra.mxu1 %v7823_v26  ;;  %v3000_v26 = vshrl.u32 %v8810_v35, 16  ;;  %v2996_v33 = vrot.slane %v2994_v40, 3 }
 0x160   : > { %7266 = vmatprep.subr.bf16.mxu1 %v7824_v32  ;;  %7088 = vmatprep.mubr.bf16.mxu0 %v2971_v19  ;;  %v3005_v19 = vrot.slane %v3003_v53, 3  ;;  %v3023_v53 = vrot.slane %v3021_v24, 3 }
 0x161   : > { %7117 = vmatpush3.bf16.msra.mxu0 %v7835_v36  ;;  %v2993_v36 = vrot.slane %v2991_v41, 2  ;;  %v3002_v14 = vrot.slane %v3000_v26, 2  ;;  %v9111_v41 = vld [vmem:[%s7967_s14 + $0x90] ss:$0 sps:$4 sm:$0x77]  }
 0x162   : > { %7118 = vmatprep.subr.bf16.mxu0 %v7839_v52 }
 0x163   : > { %7267 = vmatpush3.bf16.msra.mxu1 %v7824_v32  ;;  %v2997_v7 = vor.u32 %v2996_v33, %v2993_v36  ;;  %v3009_v32 = vshrl.u32 %v8837_v29, 16  ;;  %v3006_v16 = vor.u32 %v3005_v19, %v3002_v14  ;;  %v3292_v36 = vld [vmem:[%s7967_s14 + $0x10] sm:$0x8] }
 0x164   : > { %7272 = vmatprep.subr.bf16.mxu1 %v7827_v17 }
 0x165   : > { %7119 = vmatpush3.bf16.msra.mxu0 %v7839_v52  ;;  %v3018_v52 = vshrl.u32 %v8840_v34, 16  ;;  %v2998_v59 = vsel %vm2882_vm4, %v2988_v4, %v2997_v7  ;;  %v3007_v40 = vsel %vm2882_vm4, %v2997_v7, %v3006_v16  ;;  %v7833_v4 = vld [vmem:[%s9638_s1 + $0x1a0] sm:$0xff]   ;;  %v7836_v7 = vld [vmem:[%s9638_s1 + $0x1b0] sm:$0xff]  }
 0x166   : > { %7269 = vmatmul.mubr.bf16.vlgmr.msra.gmra.mrb[32].mxu1 %v5134_v31  ;;  %v3027_v31 = vshrl.u32 %v9111_v41, 16 }
 0x167   : > { %7089 = vmatmul.mubr.bf16.gmra.mrb[16].mxu0 %v2980_v42  ;;  %7273 = vmatpush3.bf16.msra.mxu1 %v7827_v17  ;;  %v3011_v17 = vrot.slane %v3009_v32, 2  ;;  %v3020_v26 = vrot.slane %v3018_v52, 2  ;;  %v3030_v42 = vshll.u32 %v9111_v41, 16  ;;  %v3315_v52 = vrot.slane %v8631_v11, 3  ;;  %v7838_v11 = vld [vmem:[%s9638_s1 + $0x1b8] sm:$0xff]  }
 0x168   : > { %7274 = vmatprep.subr.bf16.mxu1 %v7828_v30  ;;  %7092 = vmatprep.mubr.bf16.mxu0 %v2989_v5  ;;  %v7834_v5 = vld [vmem:[%s9638_s1 + $0x1a8] sm:$0xff]   ;;  %v3029_v14 = vrot.slane %v3027_v31, 2 }
 0x169   : > { %7288 = vmatprep.mubr.bf16.mxu1 %v5274_v8  ;;  %v3015_v47 = vor.u32 %v3014_v25, %v3011_v17  ;;  %v3032_v19 = vrot.slane %v3030_v42, 3  ;;  %v5412_v17 = vshll.u32 %v8923_v0, 16 }
 0x16b   : > { %7275 = vmatpush3.bf16.msra.mxu1 %v7828_v30  ;;  %v3024_v30 = vor.u32 %v3023_v53, %v3020_v26  ;;  %v3016_v33 = vsel %vm2882_vm4, %v3006_v16, %v3015_v47  ;;  %v3033_v32 = vor.u32 %v3032_v19, %v3029_v14  ;;  %v5414_v42 = vrot.slane %v5412_v17, 3 }
 0x16c   : > { %7276 = vmatprep.subr.bf16.mxu1 %v7830_v61  ;;  %v3319_v14 = vrot.slane %v8649_v21, 3  ;;  %v7845_v21 = vld [vmem:[%s9638_s1 + $0x1c8] sm:$0xff]  }
 0x16d   : > { %v3025_v8 = vsel %vm2882_vm4, %v3015_v47, %v3024_v30  ;;  %v3034_v53 = vsel %vm2882_vm4, %v3024_v30, %v3033_v32  ;;  %v3317_v30 = vrot.slane %v8644_v28, 3 }
 0x16f   : > { %7093 = vmatmul.mubr.bf16.gmra.mrb[20].mxu0 %v2998_v59  ;;  %7277 = vmatpush3.bf16.msra.mxu1 %v7830_v61  ;;  %v6117_v61 = vcombine.low %v3292_v36, %v8622_v51  ;;  %v5401_v59 = vshrl.u32 %v9070_v9, 16  ;;  %v5404_v51 = vshll.u32 %v9070_v9, 16  ;;  %v3318_v28 = vsel %vm3313_vm5, %v3315_v52, %v3317_v30 }
 0x170   : > { %7278 = vmatprep.subr.bf16.mxu1 %v7831_v38  ;;  %7096 = vmatprep.mubr.bf16.mxu0 %v3007_v40  ;;  %v7844_v40 = vld [vmem:[%s7967_s14 + $0xa0] ss:$0 sps:$4 sm:$0x33]  }
 0x171   : > { %v3314_v16 = vrot.slane %v6117_v61, 3  ;;  %v5403_v9 = vrot.slane %v5401_v59, 2  ;;  %v5406_v47 = vrot.slane %v5404_v51, 3  ;;  %v5275_v36 = vrot.slane %v7844_v40, 2 }
 0x172   : > { %v3320_v59 = vsel %vm3313_vm5, %v3317_v30, %v3319_v14 }
 0x173   : > { %7279 = vmatpush3.bf16.msra.mxu1 %v7831_v38  ;;  %v5409_v38 = vshrl.u32 %v8923_v0, 16  ;;  %v5276_v32 = vsel %vm2147_vm2, %v5273_v62, %v5275_v36  ;;  %v7846_v0 = vld [vmem:[%s9638_s1 + $0x1d0] sm:$0xff]   ;;  %v3321_v62 = vrot.slane %v8668_v18, 3 }
 0x174   : > { %7280 = vmatprep.subr.bf16.mxu1 %v7833_v4 }
 0x175   : > { %v5411_v31 = vrot.slane %v5409_v38, 2  ;;  %v3323_v38 = vrot.slane %v8674_v15, 3  ;;  %v7848_v15 = vld [vmem:[%s9638_s1 + $0x1e0] sm:$0xff]  }
 0x177   : > { %7097 = vmatmul.mubr.bf16.gmra.mrb[24].mxu0 %v3016_v33  ;;  %7281 = vmatpush3.bf16.msra.mxu1 %v7833_v4  ;;  %v3316_v4 = vsel %vm3313_vm5, %v3314_v16, %v3315_v52  ;;  %v7843_v33 = vld [vmem:[%s9638_s1 + $0x1c0] sm:$0xff]   ;;  %v9157_v61 = vor.u32 %v5414_v42, %v5411_v31  ;;  %v3324_v18 = vsel %vm3313_vm5, %v3321_v62, %v3323_v38  ;;  %v3327_v31 = vrot.slane %v8698_v37, 3 }
 0x178   : > { %7282 = vmatprep.subr.bf16.mxu1 %v7834_v5  ;;  %7100 = vmatprep.mubr.bf16.mxu0 %v3025_v8  ;;  %v5407_v8 = vor.u32 %v5406_v47, %v5403_v9  ;;  %v3325_v9 = vrot.slane %v8694_v43, 3  ;;  %v5418_v37 = vshrl.u32 %v8931_v56, 16 }
 0x179   : > { %v9129_v63 = vpop.f32.mrb[16].mxu1 }
 0x17a   : > { %v9132_v24 = vpop.f32.mrb[17].mxu1  ;;  %v5416_v51 = vsel %vm2882_vm4, %v5407_v8, %v9157_v61  ;;  %v3326_v30 = vsel %vm3313_vm5, %v3323_v38, %v3325_v9  ;;  %v3328_v43 = vsel %vm3313_vm5, %v3325_v9, %v3327_v31  ;;  %v5421_v8 = vshll.u32 %v8931_v56, 16  ;;  %v7851_v56 = vld [vmem:[%s9638_s1 + $0x1f8] sm:$0xff]  }
 0x17b   : > { %7283 = vmatpush3.bf16.msra.mxu1 %v7834_v5  ;;  %v9138_v25 = vpop.f32.mrb[18].mxu1 }
 0x17c   : > { %v9141_v26 = vpop.f32.mrb[19].mxu1  ;;  %7284 = vmatprep.subr.bf16.mxu1 %v7836_v7 }
 0x17f   : > { %7101 = vmatmul.mubr.bf16.gmra.mrb[28].mxu0 %v3034_v53  ;;  %7285 = vmatpush3.bf16.msra.mxu1 %v7836_v7 }
 0x180   : > { %7286 = vmatprep.subr.bf16.mxu1 %v7838_v11  ;;  %7120 = vmatprep.mubr.bf16.mxu0 %v3316_v4  ;;  %v7847_v4 = vld [vmem:[%s9638_s1 + $0x1d8] sm:$0xff]  }
 0x181   : > { %v9152_v5 = vpop.f32.mrb[20].mxu1 }
 0x182   : > { %v9155_v19 = vpop.f32.mrb[21].mxu1 }
 0x183   : > { %7287 = vmatpush3.bf16.msra.mxu1 %v7838_v11  ;;  %v9159_v7 = vpop.f32.mrb[22].mxu1  ;;  %v3322_v11 = vsel %vm3313_vm5, %v3319_v14, %v3321_v62  ;;  %v7849_v14 = vld [vmem:[%s9638_s1 + $0x1e8] sm:$0xff]  }
 0x184   : > { %v9164_v16 = vpop.f32.mrb[23].mxu1  ;;  %7292 = vmatprep.subr.bf16.mxu1 %v7843_v33 }
 0x186   : > { %7289 = vmatmul.mubr.bf16.vlgmr.msra.gmra.mrb[32].mxu1 %v5276_v32  ;;  %v7850_v32 = vld [vmem:[%s9638_s1 + $0x1f0] sm:$0xff]  }
 0x187   : > { %7121 = vmatmul.mubr.bf16.vlgmr.msra.gmra.mrb[0].mxu0 %v3318_v28  ;;  %7293 = vmatpush3.bf16.msra.mxu1 %v7843_v33  ;;  %v3329_v28 = vrot.slane %v8716_v13, 3  ;;  %v7852_v13 = vld [vmem:[%s9638_s1 + $0x200] sm:$0xff]  }
 0x188   : > { %7294 = vmatprep.subr.bf16.mxu1 %v7845_v21  ;;  %7124 = vmatprep.mubr.bf16.mxu0 %v3320_v59  ;;  %v5420_v59 = vrot.slane %v5418_v37, 2  ;;  %v7858_v37 = vld [vmem:[%s9638_s1 + $0x228] sm:$0xff]  }
 0x189   : > { %v9177_v52 = vpop.f32.mrb[24].mxu1  ;;  %7308 = vmatprep.mubr.bf16.mxu1 %v5416_v51  ;;  %v5423_v51 = vrot.slane %v5421_v8, 3 }
 0x18a   : > { %v9180_v17 = vpop.f32.mrb[25].mxu1 }
 0x18b   : > { %7295 = vmatpush3.bf16.msra.mxu1 %v7845_v21  ;;  %v9182_v40 = vpop.f32.mrb[26].mxu1  ;;  %v3331_v21 = vrot.slane %v8727_v27, 3  ;;  %v5424_v38 = vor.u32 %v5423_v51, %v5420_v59  ;;  %v3333_v27 = vrot.slane %v8768_v45, 3  ;;  %v7855_v45 = vld [vmem:[%s9638_s1 + $0x210] sm:$0xff]  }
 0x18c   : > { %v9184_v53 = vpop.f32.mrb[27].mxu1  ;;  %7296 = vmatprep.subr.bf16.mxu1 %v7846_v0 }
 0x18d   : > { %v3332_v62 = vsel %vm3313_vm5, %v3329_v28, %v3331_v21 }
 0x18f   : > { %7125 = vmatmul.mubr.bf16.gmra.mrb[4].mxu0 %v3322_v11  ;;  %7297 = vmatpush3.bf16.msra.mxu1 %v7846_v0  ;;  %v3330_v0 = vsel %vm3313_vm5, %v3327_v31, %v3329_v28  ;;  %v3335_v11 = vrot.slane %v8772_v54, 3  ;;  %v3337_v54 = vrot.slane %v8806_v20, 3  ;;  %v7857_v20 = vld [vmem:[%s9638_s1 + $0x220] sm:$0xff]   ;;  %v7860_v28 = vld [vmem:[%s9638_s1 + $0x238] sm:$0xff]  }
 0x190   : > { %7298 = vmatprep.subr.bf16.mxu1 %v7847_v4  ;;  %7128 = vmatprep.mubr.bf16.mxu0 %v3324_v18  ;;  %v3334_v18 = vsel %vm3313_vm5, %v3331_v21, %v3333_v27  ;;  %v215_v21 = vld [vmem:[%s8723_s10 + $0x8] sm:$0x3] }
 0x191   : > { %v9195_v47 = vpop.f32.mrb[28].mxu1  ;;  %v3336_v9 = vsel %vm3313_vm5, %v3333_v27, %v3335_v11  ;;  %v3338_v31 = vsel %vm3313_vm5, %v3335_v11, %v3337_v54  ;;  %v216_v59 = vsel %vm9264_vm8, 0, %v215_v21 }
 0x192   : > { %v9198_v42 = vpop.f32.mrb[29].mxu1  ;;  %217 = vst [vmem:[%s8723_s10 + $0x8] sm:$0x3] %v216_v59 }
 0x193   : > { %7299 = vmatpush3.bf16.msra.mxu1 %v7847_v4  ;;  %v9200_v36 = vpop.f32.mrb[30].mxu1  ;;  %v5425_v4 = vsel %vm2882_vm4, %v9157_v61, %v5424_v38  ;;  %v3339_v61 = vrot.slane %v8810_v35, 3  ;;  %v3341_v35 = vrot.slane %v8837_v29, 3  ;;  %v7859_v29 = vld [vmem:[%s9638_s1 + $0x230] sm:$0xff]   ;;  %v3649_v38 = vpop.permute.xlu1 %3648 }
 0x194   : > { %v9202_v33 = vpop.f32.mrb[31].mxu1  ;;  %7300 = vmatprep.subr.bf16.mxu1 %v7848_v15 }
 0x197   : > { %7129 = vmatmul.mubr.bf16.gmra.mrb[8].mxu0 %v3326_v30  ;;  %7301 = vmatpush3.bf16.msra.mxu1 %v7848_v15  ;;  %v7854_v15 = vld [vmem:[%s9638_s1 + $0x208] sm:$0xff]   ;;  %v7856_v30 = vld [vmem:[%s9638_s1 + $0x218] sm:$0xff]  }
 0x198   : > { %7302 = vmatprep.subr.bf16.mxu1 %v7849_v14  ;;  %7132 = vmatprep.mubr.bf16.mxu0 %v3328_v43  ;;  %v3342_v43 = vsel %vm3313_vm5, %v3339_v61, %v3341_v35 }
 0x19b   : > { %7303 = vmatpush3.bf16.msra.mxu1 %v7849_v14  ;;  %v3340_v14 = vsel %vm3313_vm5, %v3337_v54, %v3339_v61  ;;  %v3654_v61 = vpop.permute.xlu1 %3653 }
 0x19c   : > { %7304 = vmatprep.subr.bf16.mxu1 %v7850_v32 }
 0x19f   : > { %7133 = vmatmul.mubr.bf16.gmra.mrb[12].mxu0 %v3330_v0  ;;  %7305 = vmatpush3.bf16.msra.mxu1 %v7850_v32  ;;  %v221_v0 = vld [vmem:[%s8723_s10 + $0x98] sm:$0xe] }
 0x1a0   : > { %7306 = vmatprep.subr.bf16.mxu1 %v7851_v56  ;;  %7136 = vmatprep.mubr.bf16.mxu0 %v3332_v62 }
 0x1a3   : > { %7307 = vmatpush3.bf16.msra.mxu1 %v7851_v56  ;;  %v3639_v56 = vpop.permute.xlu0 %3638 }
 0x1a4   : > { %7312 = vmatprep.subr.bf16.mxu1 %v7852_v13 }
 0x1a6   : > { %7309 = vmatmul.mubr.bf16.vlgmr.msra.gmra.mrb[32].mxu1 %v5425_v4 }
 0x1a7   : > { %7137 = vmatmul.mubr.bf16.gmra.mrb[16].mxu0 %v3334_v18  ;;  %7313 = vmatpush3.bf16.msra.mxu1 %v7852_v13  ;;  %v3644_v62 = vpop.permute.xlu0 %3643 }
 0x1a8   : > { %7314 = vmatprep.subr.bf16.mxu1 %v7854_v15  ;;  %7140 = vmatprep.mubr.bf16.mxu0 %v3336_v9 }
 0x1a9   : > { %7328 = vmatprep.mubr.bf16.mxu1 %v8954_v1  ;;  %v3343_v1 = vrot.slane %v8840_v34, 3  ;;  %v3345_v34 = vrot.slane %v9111_v41, 3 }
 0x1ab   : > { %7315 = vmatpush3.bf16.msra.mxu1 %v7854_v15  ;;  %v3344_v8 = vsel %vm3313_vm5, %v3341_v35, %v3343_v1  ;;  %v3346_v32 = vsel %vm3313_vm5, %v3343_v1, %v3345_v34  ;;  %v3659_v4 = vpop.permute.xlu0 %3658 }
 0x1ac   : > { %7316 = vmatprep.subr.bf16.mxu1 %v7855_v45 }
 0x1af   : > { %7141 = vmatmul.mubr.bf16.gmra.mrb[20].mxu0 %v3338_v31  ;;  %7317 = vmatpush3.bf16.msra.mxu1 %v7855_v45 }
 0x1b0   : > { %7318 = vmatprep.subr.bf16.mxu1 %v7856_v30  ;;  %7144 = vmatprep.mubr.bf16.mxu0 %v3340_v14 }
 0x1b3   : > { %7319 = vmatpush3.bf16.msra.mxu1 %v7856_v30 }
 0x1b4   : > { %7320 = vmatprep.subr.bf16.mxu1 %v7857_v20 }
 0x1b7   : > { %7145 = vmatmul.mubr.bf16.gmra.mrb[24].mxu0 %v3342_v43  ;;  %7321 = vmatpush3.bf16.msra.mxu1 %v7857_v20 }
 0x1b8   : > { %7322 = vmatprep.subr.bf16.mxu1 %v7858_v37  ;;  %7148 = vmatprep.mubr.bf16.mxu0 %v3344_v8 }
 0x1bb   : > { %7323 = vmatpush3.bf16.msra.mxu1 %v7858_v37 }
 0x1bc   : > { %7324 = vmatprep.subr.bf16.mxu1 %v7859_v29 }
 0x1bf   : > { %7149 = vmatmul.mubr.bf16.gmra.mrb[28].mxu0 %v3346_v32  ;;  %7325 = vmatpush3.bf16.msra.mxu1 %v7859_v29 }
 0x1c0   : > { %7326 = vmatprep.subr.bf16.mxu1 %v7860_v28 }
 0x1c3   : > { %7327 = vmatpush3.bf16.msra.mxu1 %v7860_v28 }
 0x1c6   : > { %7329 = vmatmul.mubr.bf16.vlgmr.msra.gmra.mrb[32].mxu1 %v8960_v48  ;;  %v222_v48 = vsel %vm9272_vm11, 0, %v221_v0 }
 0x1c7   : > { %223 = vst [vmem:[%s8723_s10 + $0x98] sm:$0xe] %v222_v48 }
 0x25a   : > { %v7122_v13 = vpop.f32.mrb[0].mxu0 }
 0x25b   : > { %v7348_v27 = vadd.f32 %v7122_v13, %v8886_v3  ;;  %v3445_v11 = vpop.f32.mrb[1].mxu0 }
 0x25c   : > { %v7349_v18 = vadd.f32 %v3445_v11, %v8888_v58  ;;  %v7123_v15 = vpop.f32.mrb[2].mxu0  ;;  %v3669_v58 = vpop.permute.xlu0 %3668 }
 0x25d   : > { %v3798_v9 = vmul.f32 %v7348_v27, %v3649_v38  ;;  %v7350_v45 = vadd.f32 %v7123_v15, %v8895_v6  ;;  %v3448_v54 = vpop.f32.mrb[3].mxu0  ;;  %v4386_v15 = vld [vmem:[%s8723_s10 + $0x8] sm:$0xe] }
 0x25e   : > { %v3796_v31 = vmul.f32 %v7349_v18, %v3639_v56  ;;  %v7351_v30 = vadd.f32 %v3448_v54, %v8900_v46 }
 0x25f   : > { %v6380_v14 = vpack.c.bf16 %v3798_v9, %v3798_v9  ;;  %v3799_v20 = vmul.f32 %v7350_v45, %v3654_v61  ;;  %v3868_v35 = vmul.f32 %v3798_v9, %v3798_v9 }
 0x260   : > { %v6378_v1 = vpack.c.bf16 %v3796_v31, %v3796_v31  ;;  %v3797_v43 = vmul.f32 %v7351_v30, %v3644_v62  ;;  %v3866_v8 = vmul.f32 %v3796_v31, %v3796_v31 }
 0x261   : > { %v4054_v3 = vshrl.u32 %v6380_v14, 16  ;;  %v4057_v37 = vshll.u32 %v6380_v14, 16  ;;  %v6381_v29 = vpack.c.bf16 %v3799_v20, %v3799_v20  ;;  %v3664_v14 = vpop.permute.xlu1 %3663 }
 0x262   : > { %v4035_v34 = vshrl.u32 %v6378_v1, 16  ;;  %v4038_v32 = vshll.u32 %v6378_v1, 16  ;;  %v3828_v6 = vadd.f32 %v3797_v43, %v3796_v31  ;;  %v3867_v28 = vmul.f32 %v3797_v43, %v3797_v43  ;;  %v7126_v21 = vpop.f32.mrb[4].mxu0 }
 0x263   : > { %v4056_v59 = vrot.slane %v4054_v3, 6  ;;  %v4059_v0 = vrot.slane %v4057_v37, 7  ;;  %v4064_v46 = vshrl.u32 %v6381_v29, 16  ;;  %v4067_v48 = vshll.u32 %v6381_v29, 16  ;;  %v3461_v56 = vpop.f32.mrb[5].mxu0 }
 0x264   : > { %v4037_v38 = vrot.slane %v4035_v34, 6  ;;  %v4040_v13 = vrot.slane %v4038_v32, 7  ;;  %v3829_v27 = vadd.f32 %v3828_v6, %v3798_v9  ;;  %v3898_v62 = vadd.f32 %v3867_v28, %v3866_v8  ;;  %v7127_v11 = vpop.f32.mrb[6].mxu0  ;;  %v9295_v32 = vpop.permute.xlu0 %3678 }
 0x265   : > { %v4060_v18 = vor.u32 %v4059_v0, %v4056_v59  ;;  %v4066_v45 = vrot.slane %v4064_v46, 6  ;;  %v4069_v54 = vrot.slane %v4067_v48, 7  ;;  %v6379_v61 = vpack.c.bf16 %v3797_v43, %v3797_v43  ;;  %v3464_v30 = vpop.f32.mrb[7].mxu0 }
 0x266   : > { %v4041_v1 = vor.u32 %v4040_v13, %v4037_v38  ;;  %v3899_v3 = vadd.f32 %v3898_v62, %v3868_v35  ;;  %v7352_v9 = vadd.f32 %v7126_v21, %v8926_v60  ;;  %v7353_v37 = vadd.f32 %v3461_v56, %v8933_v12 }
 0x267   : > { %v4062_v8 = vrot.slane %v4060_v18, 4  ;;  %v9293_v29 = vor.u32 %v4069_v54, %v4066_v45  ;;  %v4044_v43 = vshrl.u32 %v6379_v61, 16  ;;  %v4047_v34 = vshll.u32 %v6379_v61, 16  ;;  %v3674_v54 = vpop.permute.xlu1 %3673 }
 0x268   : > { %v4387_v6 = vsel %vm9272_vm11, %v4041_v1, %v4386_v15  ;;  %v3869_v28 = vmul.f32 %v3799_v20, %v3799_v20  ;;  %v3802_v59 = vmul.f32 %v7352_v9, %v3669_v58  ;;  %v3800_v0 = vmul.f32 %v7353_v37, %v3659_v4 }
 0x269   : > { %v4042_v46 = vrot.slane %v4041_v1, 4  ;;  %4388 = vst [vmem:[%s8723_s10 + $0x8] sm:$0xe] %v4387_v6  ;;  %v4071_v60 = vsel %vm9287_vm13, %v4062_v8, %v9293_v29  ;;  %v4046_v12 = vrot.slane %v4044_v43, 6  ;;  %v4049_v35 = vrot.slane %v4047_v34, 7  ;;  %v3689_v34 = vpop.permute.xlu0 %3688 }
 0x26a   : > { %v4072_v21 = vrot.slane %v9293_v29, 4  ;;  %4391 = vst [vmem:[%s8723_s10 + $0x14] sm:$0xf] %v4071_v60  ;;  %v6384_v48 = vpack.c.bf16 %v3802_v59, %v3802_v59  ;;  %v3830_v56 = vadd.f32 %v3829_v27, %v3799_v20  ;;  %v3870_v38 = vmul.f32 %v3800_v0, %v3800_v0  ;;  %v7130_v13 = vpop.f32.mrb[8].mxu0 }
 0x26b   : > { %v4050_v62 = vor.u32 %v4049_v35, %v4046_v12  ;;  %v3900_v15 = vadd.f32 %v3899_v3, %v3869_v28  ;;  %v6382_v58 = vpack.c.bf16 %v3800_v0, %v3800_v0  ;;  %v7354_v4 = vadd.f32 %v7127_v11, %v8939_v44  ;;  %v3477_v45 = vpop.f32.mrb[9].mxu0 }
 0x26c   : > { %v4094_v61 = vshrl.u32 %v6384_v48, 16  ;;  %v4097_v1 = vshll.u32 %v6384_v48, 16  ;;  %v3831_v9 = vadd.f32 %v3830_v56, %v3800_v0  ;;  %v7355_v37 = vadd.f32 %v3464_v30, %v8947_v10  ;;  %v7131_v8 = vpop.f32.mrb[10].mxu0 }
 0x26d   : > { %v4051_v20 = vsel %vm9287_vm13, %v4042_v46, %v4050_v62  ;;  %v4052_v27 = vrot.slane %v4050_v62, 4  ;;  %v3901_v29 = vadd.f32 %v3900_v15, %v3870_v38  ;;  %v4074_v43 = vshrl.u32 %v6382_v58, 16  ;;  %v3480_v3 = vpop.f32.mrb[11].mxu0 }
 0x26e   : > { %4389 = vst [vmem:[%s8723_s10 + $0xc] sm:$0xf] %v4051_v20  ;;  %v4096_v6 = vrot.slane %v4094_v61, 6  ;;  %v4099_v44 = vrot.slane %v4097_v1, 7  ;;  %v4077_v11 = vshll.u32 %v6382_v58, 16  ;;  %v3803_v28 = vmul.f32 %v7354_v4, %v3674_v54  ;;  %v3684_v61 = vpop.permute.xlu1 %3683 }
 0x26f   : > { %v4061_v0 = vsel %vm9287_vm13, %v4052_v27, %v4060_v18  ;;  %v4076_v60 = vrot.slane %v4074_v43, 6  ;;  %v3801_v10 = vmul.f32 %v7355_v37, %v3664_v14  ;;  %v7356_v30 = vadd.f32 %v7130_v13, %v8975_v23  ;;  %v9318_v27 = vpop.permute.xlu0 %3698 }
 0x270   : > { %4390 = vst [vmem:[%s8723_s10 + $0x10] sm:$0xf] %v4061_v0  ;;  %v3872_v12 = vmul.f32 %v3802_v59, %v3802_v59  ;;  %v4100_v46 = vor.u32 %v4099_v44, %v4096_v6  ;;  %v4079_v35 = vrot.slane %v4077_v11, 7  ;;  %v6385_v48 = vpack.c.bf16 %v3803_v28, %v3803_v28 }
 0x271   : > { %v3873_v56 = vmul.f32 %v3803_v28, %v3803_v28  ;;  %v3832_v38 = vadd.f32 %v3831_v9, %v3801_v10  ;;  %v3871_v62 = vmul.f32 %v3801_v10, %v3801_v10  ;;  %v6383_v15 = vpack.c.bf16 %v3801_v10, %v3801_v10 }
 0x272   : > { %v4080_v1 = vor.u32 %v4079_v35, %v4076_v60  ;;  %v4104_v58 = vshrl.u32 %v6385_v48, 16  ;;  %v4107_v4 = vshll.u32 %v6385_v48, 16  ;;  %v9314_v54 = vmul.f32 %v7356_v30, %v3689_v34  ;;  %v7134_v18 = vpop.f32.mrb[12].mxu0 }
 0x273   : > { %v3833_v14 = vadd.f32 %v3832_v38, %v3802_v59  ;;  %v3902_v37 = vadd.f32 %v3901_v29, %v3871_v62  ;;  %v4084_v23 = vshrl.u32 %v6383_v15, 16  ;;  %v4087_v13 = vshll.u32 %v6383_v15, 16  ;;  %v9316_v20 = vpop.f32.mrb[13].mxu0  ;;  %v3694_v15 = vpop.permute.xlu1 %3693 }
 0x274   : > { %v4102_v43 = vrot.slane %v4100_v46, 4  ;;  %v4081_v9 = vsel %vm9287_vm13, %v4072_v21, %v4080_v1  ;;  %v4106_v6 = vrot.slane %v4104_v58, 6  ;;  %v4109_v44 = vrot.slane %v4107_v4, 7  ;;  %v9322_v11 = vpop.f32.mrb[14].mxu0 }
 0x275   : > { %v4082_v0 = vrot.slane %v4080_v1, 4  ;;  %4392 = vst [vmem:[%s8723_s10 + $0x18] sm:$0xf] %v4081_v9  ;;  %v3903_v34 = vadd.f32 %v3902_v37, %v3872_v12  ;;  %v4086_v60 = vrot.slane %v4084_v23, 6  ;;  %v4089_v59 = vrot.slane %v4087_v13, 7  ;;  %v9325_v29 = vpop.f32.mrb[15].mxu0 }
 0x276   : > { %v9327_v10 = vor.u32 %v4109_v44, %v4106_v6  ;;  %v6388_v30 = vpack.c.bf16 %v9314_v54, %v9314_v54  ;;  %v7357_v35 = vadd.f32 %v3477_v45, %v8982_v57  ;;  %v3834_v21 = vadd.f32 %v3833_v14, %v3803_v28 }
 0x277   : > { %v4090_v48 = vor.u32 %v4089_v59, %v4086_v60  ;;  %v3904_v38 = vadd.f32 %v3903_v34, %v3873_v56  ;;  %v7358_v62 = vadd.f32 %v7131_v8, %v8985_v55  ;;  %v7359_v12 = vadd.f32 %v3480_v3, %v8990_v2  ;;  %v3709_v2 = vpop.permute.xlu0 %3708 }
 0x278   : > { %v4111_v1 = vsel %vm9287_vm13, %v4102_v43, %v9327_v10  ;;  %v3876_v58 = vmul.f32 %v9314_v54, %v9314_v54  ;;  %v4134_v4 = vshrl.u32 %v6388_v30, 16  ;;  %v4137_v37 = vshll.u32 %v6388_v30, 16 }
 0x279   : > { %4395 = vst [vmem:[%s8723_s10 + $0x24] sm:$0xf] %v4111_v1  ;;  %v4091_v57 = vsel %vm9287_vm13, %v4082_v0, %v4090_v48  ;;  %v4092_v45 = vrot.slane %v4090_v48, 4  ;;  %v3804_v55 = vmul.f32 %v7357_v35, %v9295_v32  ;;  %v3807_v8 = vmul.f32 %v7358_v62, %v3694_v15 }
 0x27a   : > { %4393 = vst [vmem:[%s8723_s10 + $0x1c] sm:$0xf] %v4091_v57  ;;  %v4136_v3 = vrot.slane %v4134_v4, 6  ;;  %v4139_v28 = vrot.slane %v4137_v37, 7  ;;  %v3805_v56 = vmul.f32 %v7359_v12, %v3684_v61  ;;  %v7360_v14 = vadd.f32 %v7134_v18, %v9011_v39  ;;  %v9345_v23 = vpop.f32.mrb[16].mxu0 }
 0x27b   : > { %v4101_v13 = vsel %vm9287_vm13, %v4092_v45, %v4100_v46  ;;  %v3835_v43 = vadd.f32 %v3834_v21, %v3804_v55  ;;  %v3874_v9 = vmul.f32 %v3804_v55, %v3804_v55  ;;  %v6386_v6 = vpack.c.bf16 %v3804_v55, %v3804_v55  ;;  %v9349_v44 = vpop.f32.mrb[17].mxu0  ;;  %v3704_v46 = vpop.permute.xlu1 %3703 }
 0x27c   : > { %v4112_v32 = vrot.slane %v9327_v10, 4  ;;  %4394 = vst [vmem:[%s8723_s10 + $0x20] sm:$0xf] %v4101_v13  ;;  %v4140_v0 = vor.u32 %v4139_v28, %v4136_v3  ;;  %v6389_v34 = vpack.c.bf16 %v3807_v8, %v3807_v8  ;;  %v3875_v60 = vmul.f32 %v3805_v56, %v3805_v56  ;;  %v9353_v59 = vpop.f32.mrb[18].mxu0  ;;  %v9358_v37 = vpop.permute.xlu0 %3718 }
 0x27d   : > { %v3905_v61 = vadd.f32 %v3904_v38, %v3874_v9  ;;  %v4114_v39 = vshrl.u32 %v6386_v6, 16  ;;  %v4117_v18 = vshll.u32 %v6386_v6, 16  ;;  %v3836_v30 = vadd.f32 %v3835_v43, %v3805_v56  ;;  %v9355_v35 = vpop.f32.mrb[19].mxu0 }
 0x27e   : > { %v4142_v21 = vrot.slane %v4140_v0, 4  ;;  %v4144_v48 = vshrl.u32 %v6389_v34, 16  ;;  %v4147_v62 = vshll.u32 %v6389_v34, 16  ;;  %v6387_v12 = vpack.c.bf16 %v3805_v56, %v3805_v56 }
 0x27f   : > { %v4116_v15 = vrot.slane %v4114_v39, 6  ;;  %v4119_v1 = vrot.slane %v4117_v18, 7  ;;  %v3837_v10 = vadd.f32 %v3836_v30, %v9314_v54  ;;  %v3906_v4 = vadd.f32 %v3905_v61, %v3875_v60 }
 0x280   : > { %v4146_v57 = vrot.slane %v4144_v48, 6  ;;  %v4149_v45 = vrot.slane %v4147_v62, 7  ;;  %v4124_v38 = vshrl.u32 %v6387_v12, 16  ;;  %v4127_v55 = vshll.u32 %v6387_v12, 16 }
 0x281   : > { %v4120_v3 = vor.u32 %v4119_v1, %v4116_v15  ;;  %v3907_v28 = vadd.f32 %v3906_v4, %v3876_v58  ;;  %v9360_v13 = vmul.f32 %v7360_v14, %v3709_v2  ;;  %v7361_v43 = vadd.f32 %v9316_v20, %v9015_v49  ;;  %v3714_v14 = vpop.permute.xlu1 %3713 }
 0x282   : > { %v9364_v56 = vor.u32 %v4149_v45, %v4146_v57  ;;  %v4126_v9 = vrot.slane %v4124_v38, 6  ;;  %v4129_v54 = vrot.slane %v4127_v55, 7  ;;  %v3838_v6 = vadd.f32 %v3837_v10, %v3807_v8  ;;  %v9366_v34 = vpop.f32.mrb[20].mxu0 }
 0x283   : > { %v4121_v60 = vsel %vm9287_vm13, %v4112_v32, %v4120_v3  ;;  %v4122_v61 = vrot.slane %v4120_v3, 4  ;;  %v3877_v39 = vmul.f32 %v3807_v8, %v3807_v8  ;;  %v6392_v58 = vpack.c.bf16 %v9360_v13, %v9360_v13  ;;  %v9372_v2 = vpop.f32.mrb[21].mxu0 }
 0x284   : > { %4396 = vst [vmem:[%s8723_s10 + $0x28] sm:$0xf] %v4121_v60  ;;  %v4151_v49 = vsel %vm9287_vm13, %v4142_v21, %v9364_v56  ;;  %v4130_v20 = vor.u32 %v4129_v54, %v4126_v9  ;;  %v3880_v18 = vmul.f32 %v9360_v13, %v9360_v13  ;;  %v3808_v32 = vmul.f32 %v7361_v43, %v9318_v27  ;;  %v9381_v30 = vpop.f32.mrb[22].mxu0  ;;  %v3729_v21 = vpop.permute.xlu0 %3728 }
 0x285   : > { %4399 = vst [vmem:[%s8723_s10 + $0x34] sm:$0xf] %v4151_v49  ;;  %v4174_v8 = vshrl.u32 %v6392_v58, 16  ;;  %v4177_v48 = vshll.u32 %v6392_v58, 16  ;;  %v3908_v62 = vadd.f32 %v3907_v28, %v3877_v39  ;;  %v7362_v12 = vadd.f32 %v9322_v11, %v9023_v50  ;;  %v9386_v15 = vpop.f32.mrb[23].mxu0  ;;  %v9401_v60 = vpop.permute.xlu1 %3723 }
 0x286   : > { %v4131_v1 = vsel %vm9287_vm13, %v4122_v61, %v4130_v20  ;;  %v4132_v10 = vrot.slane %v4130_v20, 4  ;;  %v3839_v4 = vadd.f32 %v3838_v6, %v3808_v32  ;;  %v3878_v57 = vmul.f32 %v3808_v32, %v3808_v32 }
 0x287   : > { %4397 = vst [vmem:[%s8723_s10 + $0x2c] sm:$0xf] %v4131_v1  ;;  %v4176_v27 = vrot.slane %v4174_v8, 6  ;;  %v4179_v45 = vrot.slane %v4177_v48, 7  ;;  %v6390_v38 = vpack.c.bf16 %v3808_v32, %v3808_v32  ;;  %v3811_v55 = vmul.f32 %v7362_v12, %v3714_v14 }
 0x288   : > { %v4141_v3 = vsel %vm9287_vm13, %v4132_v10, %v4140_v0  ;;  %v3909_v28 = vadd.f32 %v3908_v62, %v3878_v57  ;;  %v7363_v50 = vadd.f32 %v9325_v29, %v9028_v22  ;;  %v7364_v11 = vadd.f32 %v9345_v23, %v9129_v63  ;;  %v9413_v49 = vpop.permute.xlu0 %3738 }
 0x289   : > { %v4152_v43 = vrot.slane %v9364_v56, 4  ;;  %4398 = vst [vmem:[%s8723_s10 + $0x30] sm:$0xf] %v4141_v3  ;;  %v9399_v9 = vor.u32 %v4179_v45, %v4176_v27  ;;  %v4154_v54 = vshrl.u32 %v6390_v38, 16  ;;  %v4157_v6 = vshll.u32 %v6390_v38, 16  ;;  %v3734_v38 = vpop.permute.xlu1 %3733 }
 0x28a   : > { %v6393_v61 = vpack.c.bf16 %v3811_v55, %v3811_v55  ;;  %v3809_v39 = vmul.f32 %v7363_v50, %v3704_v46  ;;  %v9403_v58 = vmul.f32 %v7364_v11, %v3729_v21  ;;  %v7365_v0 = vadd.f32 %v9349_v44, %v9132_v24  ;;  %v9407_v22 = vpop.f32.mrb[24].mxu0 }
 0x28b   : > { %v4156_v29 = vrot.slane %v4154_v54, 6  ;;  %v4159_v63 = vrot.slane %v4157_v6, 7  ;;  %v3881_v23 = vmul.f32 %v3811_v55, %v3811_v55  ;;  %v7366_v56 = vadd.f32 %v9353_v59, %v9138_v25  ;;  %v9411_v14 = vpop.f32.mrb[25].mxu0 }
 0x28c   : > { %v4184_v20 = vshrl.u32 %v6393_v61, 16  ;;  %v4187_v32 = vshll.u32 %v6393_v61, 16  ;;  %v3840_v46 = vadd.f32 %v3839_v4, %v3809_v39  ;;  %v3879_v8 = vmul.f32 %v3809_v39, %v3809_v39  ;;  %v9415_v48 = vpop.f32.mrb[26].mxu0 }
 0x28d   : > { %v4182_v24 = vrot.slane %v9399_v9, 4  ;;  %v4160_v44 = vor.u32 %v4159_v63, %v4156_v29  ;;  %v6391_v62 = vpack.c.bf16 %v3809_v39, %v3809_v39  ;;  %v6396_v12 = vpack.c.bf16 %v9403_v58, %v9403_v58  ;;  %v9420_v21 = vpop.f32.mrb[27].mxu0 }
 0x28e   : > { %v4186_v25 = vrot.slane %v4184_v20, 6  ;;  %v4189_v59 = vrot.slane %v4187_v32, 7  ;;  %v3841_v1 = vadd.f32 %v3840_v46, %v9360_v13  ;;  %v3910_v10 = vadd.f32 %v3909_v28, %v3879_v8  ;;  %v3749_v28 = vpop.permute.xlu0 %3748 }
 0x28f   : > { %v4161_v4 = vsel %vm9287_vm13, %v4152_v43, %v4160_v44  ;;  %v4162_v57 = vrot.slane %v4160_v44, 4  ;;  %v4164_v27 = vshrl.u32 %v6391_v62, 16  ;;  %v4167_v45 = vshll.u32 %v6391_v62, 16 }
 0x290   : > { %4400 = vst [vmem:[%s8723_s10 + $0x38] sm:$0xf] %v4161_v4  ;;  %v9426_v3 = vor.u32 %v4189_v59, %v4186_v25  ;;  %v3911_v50 = vadd.f32 %v3910_v10, %v3880_v18  ;;  %v4214_v11 = vshrl.u32 %v6396_v12, 16  ;;  %v4217_v54 = vshll.u32 %v6396_v12, 16  ;;  %v9451_v4 = vpop.permute.xlu1 %3743 }
 0x291   : > { %v4166_v6 = vrot.slane %v4164_v27, 6  ;;  %v4169_v61 = vrot.slane %v4167_v45, 7  ;;  %v3812_v39 = vmul.f32 %v7365_v0, %v9358_v37  ;;  %v3842_v13 = vadd.f32 %v3841_v1, %v3811_v55 }
 0x292   : > { %v4191_v43 = vsel %vm9287_vm13, %v4182_v24, %v9426_v3  ;;  %v3884_v29 = vmul.f32 %v9403_v58, %v9403_v58  ;;  %v4216_v63 = vrot.slane %v4214_v11, 6  ;;  %v4219_v20 = vrot.slane %v4217_v54, 7  ;;  %v9434_v32 = vpop.f32.mrb[28].mxu0 }
 0x293   : > { %4403 = vst [vmem:[%s8723_s10 + $0x44] sm:$0xf] %v4191_v43  ;;  %v4170_v18 = vor.u32 %v4169_v61, %v4166_v6  ;;  %v3843_v46 = vadd.f32 %v3842_v13, %v3812_v39  ;;  %v3882_v8 = vmul.f32 %v3812_v39, %v3812_v39  ;;  %v3912_v44 = vadd.f32 %v3911_v50, %v3881_v23  ;;  %v9437_v37 = vpop.f32.mrb[29].mxu0 }
 0x294   : > { %v9439_v55 = vor.u32 %v4219_v20, %v4216_v63  ;;  %v6394_v0 = vpack.c.bf16 %v3812_v39, %v3812_v39  ;;  %v3815_v62 = vmul.f32 %v7366_v56, %v3734_v38  ;;  %v7367_v24 = vadd.f32 %v9355_v35, %v9141_v26  ;;  %v9443_v12 = vpop.f32.mrb[30].mxu0 }
 0x295   : > { %v4171_v25 = vsel %vm9287_vm13, %v4162_v57, %v4170_v18  ;;  %v4172_v59 = vrot.slane %v4170_v18, 4  ;;  %v3913_v1 = vadd.f32 %v3912_v44, %v3882_v8  ;;  %v7368_v23 = vadd.f32 %v9366_v34, %v9152_v5  ;;  %v9449_v10 = vpop.f32.mrb[31].mxu0  ;;  %v9462_v5 = vpop.permute.xlu0 %3758 }
 0x296   : > { %v4192_v56 = vrot.slane %v9426_v3, 4  ;;  %4401 = vst [vmem:[%s8723_s10 + $0x3c] sm:$0xf] %v4171_v25  ;;  %v4222_v26 = vrot.slane %v9439_v55, 4  ;;  %v4194_v35 = vshrl.u32 %v6394_v0, 16  ;;  %v4197_v27 = vshll.u32 %v6394_v0, 16 }
 0x297   : > { %v4181_v57 = vsel %vm9287_vm13, %v4172_v59, %v9399_v9  ;;  %v6397_v45 = vpack.c.bf16 %v3815_v62, %v3815_v62  ;;  %v3813_v38 = vmul.f32 %v7367_v24, %v9401_v60  ;;  %v9460_v50 = vmul.f32 %v7368_v23, %v3749_v28 }
 0x298   : > { %4402 = vst [vmem:[%s8723_s10 + $0x40] sm:$0xf] %v4181_v57  ;;  %v4196_v34 = vrot.slane %v4194_v35, 6  ;;  %v4199_v11 = vrot.slane %v4197_v27, 7  ;;  %v7369_v3 = vadd.f32 %v9372_v2, %v9155_v19  ;;  %v7370_v54 = vadd.f32 %v9381_v30, %v9159_v7 }
 0x299   : > { %v4224_v6 = vshrl.u32 %v6397_v45, 16  ;;  %v4227_v61 = vshll.u32 %v6397_v45, 16  ;;  %v3844_v39 = vadd.f32 %v3843_v46, %v3813_v38  ;;  %v3883_v9 = vmul.f32 %v3813_v38, %v3813_v38  ;;  %v9469_v13 = vpop.f32.mrb[32].mxu1  ;;  %v3754_v46 = vpop.permute.xlu1 %3753 }
 0x29a   : > { %v4200_v60 = vor.u32 %v4199_v11, %v4196_v34  ;;  %v3885_v28 = vmul.f32 %v3815_v62, %v3815_v62  ;;  %v6395_v43 = vpack.c.bf16 %v3813_v38, %v3813_v38  ;;  %v6400_v63 = vpack.c.bf16 %v9460_v50, %v9460_v50  ;;  %v9473_v20 = vpop.f32.mrb[33].mxu1  ;;  %v3769_v57 = vpop.permute.xlu0 %3768 }
 0x29b   : > { %v4226_v18 = vrot.slane %v4224_v6, 6  ;;  %v4229_v19 = vrot.slane %v4227_v61, 7  ;;  %v3845_v2 = vadd.f32 %v3844_v39, %v9403_v58  ;;  %v3914_v7 = vadd.f32 %v3913_v1, %v3883_v9  ;;  %v9476_v30 = vpop.f32.mrb[34].mxu1 }
 0x29c   : > { %v4201_v8 = vsel %vm9287_vm13, %v4192_v56, %v4200_v60  ;;  %v4202_v44 = vrot.slane %v4200_v60, 4  ;;  %v4204_v0 = vshrl.u32 %v6395_v43, 16  ;;  %v4207_v24 = vshll.u32 %v6395_v43, 16  ;;  %v9480_v25 = vpop.f32.mrb[35].mxu1 }
 0x29d   : > { %4404 = vst [vmem:[%s8723_s10 + $0x48] sm:$0xf] %v4201_v8  ;;  %v4230_v59 = vor.u32 %v4229_v19, %v4226_v18  ;;  %v3915_v23 = vadd.f32 %v3914_v7, %v3884_v29  ;;  %v4254_v35 = vshrl.u32 %v6400_v63, 16  ;;  %v4257_v27 = vshll.u32 %v6400_v63, 16 }
 0x29e   : > { %v4206_v58 = vrot.slane %v4204_v0, 6  ;;  %v4209_v1 = vrot.slane %v4207_v24, 7  ;;  %v3816_v45 = vmul.f32 %v7369_v3, %v9413_v49  ;;  %v3846_v38 = vadd.f32 %v3845_v2, %v3815_v62  ;;  %v9493_v62 = vpop.permute.xlu1 %3763 }
 0x29f   : > { %v4231_v56 = vsel %vm9287_vm13, %v4222_v26, %v4230_v59  ;;  %v3888_v34 = vmul.f32 %v9460_v50, %v9460_v50  ;;  %v4256_v11 = vrot.slane %v4254_v35, 6  ;;  %v4259_v6 = vrot.slane %v4257_v27, 7 }
 0x2a0   : > { %4407 = vst [vmem:[%s8723_s10 + $0x54] sm:$0xf] %v4231_v56  ;;  %v4210_v61 = vor.u32 %v4209_v1, %v4206_v58  ;;  %v3847_v29 = vadd.f32 %v3846_v38, %v3816_v45  ;;  %v3886_v39 = vmul.f32 %v3816_v45, %v3816_v45  ;;  %v3916_v9 = vadd.f32 %v3915_v23, %v3885_v28 }
 0x2a1   : > { %v9489_v60 = vor.u32 %v4259_v6, %v4256_v11  ;;  %v6398_v43 = vpack.c.bf16 %v3816_v45, %v3816_v45  ;;  %v3819_v63 = vmul.f32 %v7370_v54, %v3754_v46  ;;  %v7371_v49 = vadd.f32 %v9386_v15, %v9164_v16  ;;  %v9501_v46 = vpop.permute.xlu0 %3778 }
 0x2a2   : > { %v4211_v26 = vsel %vm9287_vm13, %v4202_v44, %v4210_v61  ;;  %v4212_v3 = vrot.slane %v4210_v61, 4  ;;  %v3917_v18 = vadd.f32 %v3916_v9, %v3886_v39  ;;  %v7372_v19 = vadd.f32 %v9407_v22, %v9177_v52 }
 0x2a3   : > { %v4232_v2 = vrot.slane %v4230_v59, 4  ;;  %4405 = vst [vmem:[%s8723_s10 + $0x4c] sm:$0xf] %v4211_v26  ;;  %v4262_v28 = vrot.slane %v9489_v60, 4  ;;  %v4234_v7 = vshrl.u32 %v6398_v43, 16  ;;  %v4237_v54 = vshll.u32 %v6398_v43, 16 }
 0x2a4   : > { %v4221_v16 = vsel %vm9287_vm13, %v4212_v3, %v9439_v55  ;;  %v6401_v15 = vpack.c.bf16 %v3819_v63, %v3819_v63  ;;  %v3817_v8 = vmul.f32 %v7371_v49, %v9451_v4  ;;  %v9507_v44 = vmul.f32 %v7372_v19, %v3769_v57  ;;  %v3774_v57 = vpop.permute.xlu1 %3773 }
 0x2a5   : > { %4406 = vst [vmem:[%s8723_s10 + $0x50] sm:$0xf] %v4221_v16  ;;  %v4236_v0 = vrot.slane %v4234_v7, 6  ;;  %v4239_v52 = vrot.slane %v4237_v54, 7  ;;  %v7373_v22 = vadd.f32 %v9411_v14, %v9180_v17  ;;  %v7374_v24 = vadd.f32 %v9415_v48, %v9182_v40  ;;  %v9519_v6 = vpop.permute.xlu0 %5663 }
 0x2a6   : > { %v4264_v59 = vshrl.u32 %v6401_v15, 16  ;;  %v4267_v23 = vshll.u32 %v6401_v15, 16  ;;  %v3848_v35 = vadd.f32 %v3847_v29, %v3817_v8  ;;  %v3887_v27 = vmul.f32 %v3817_v8, %v3817_v8 }
 0x2a7   : > { %v4240_v55 = vor.u32 %v4239_v52, %v4236_v0  ;;  %v3889_v58 = vmul.f32 %v3819_v63, %v3819_v63  ;;  %v6399_v1 = vpack.c.bf16 %v3817_v8, %v3817_v8  ;;  %v6404_v4 = vpack.c.bf16 %v9507_v44, %v9507_v44 }
 0x2a8   : > { %v4266_v45 = vrot.slane %v4264_v59, 6  ;;  %v4269_v38 = vrot.slane %v4267_v23, 7  ;;  %v3849_v56 = vadd.f32 %v3848_v35, %v9460_v50  ;;  %v3918_v17 = vadd.f32 %v3917_v18, %v3887_v27  ;;  %v9528_v15 = vpop.permute.xlu1 %3783 }
 0x2a9   : > { %v4241_v40 = vsel %vm9287_vm13, %v4232_v2, %v4240_v55  ;;  %v4242_v14 = vrot.slane %v4240_v55, 4  ;;  %v4244_v48 = vshrl.u32 %v6399_v1, 16  ;;  %v4247_v11 = vshll.u32 %v6399_v1, 16  ;;  %v3789_v23 = vpop.permute.xlu0 %3788 }
 0x2aa   : > { %4408 = vst [vmem:[%s8723_s10 + $0x58] sm:$0xf] %v4241_v40  ;;  %v4270_v61 = vor.u32 %v4269_v38, %v4266_v45  ;;  %v3919_v29 = vadd.f32 %v3918_v17, %v3888_v34  ;;  %v4294_v39 = vshrl.u32 %v6404_v4, 16  ;;  %v4297_v9 = vshll.u32 %v6404_v4, 16 }
 0x2ab   : > { %v4246_v43 = vrot.slane %v4244_v48, 6  ;;  %v4249_v49 = vrot.slane %v4247_v11, 7  ;;  %v3820_v26 = vmul.f32 %v7373_v22, %v9462_v5  ;;  %v3850_v50 = vadd.f32 %v3849_v56, %v3819_v63 }
 0x2ac   : > { %v4271_v3 = vsel %vm9287_vm13, %v4262_v28, %v4270_v61  ;;  %v3892_v18 = vmul.f32 %v9507_v44, %v9507_v44  ;;  %v4296_v19 = vrot.slane %v4294_v39, 6  ;;  %v4299_v2 = vrot.slane %v4297_v9, 7 }
 0x2ad   : > { %4411 = vst [vmem:[%s8723_s10 + $0x64] sm:$0xf] %v4271_v3  ;;  %v4250_v7 = vor.u32 %v4249_v49, %v4246_v43  ;;  %v3851_v54 = vadd.f32 %v3850_v50, %v3820_v26  ;;  %v3890_v34 = vmul.f32 %v3820_v26, %v3820_v26  ;;  %v3920_v16 = vadd.f32 %v3919_v29, %v3889_v58 }
 0x2ae   : > { %v9530_v8 = vor.u32 %v4299_v2, %v4296_v19  ;;  %v6402_v5 = vpack.c.bf16 %v3820_v26, %v3820_v26  ;;  %v3823_v63 = vmul.f32 %v7374_v24, %v3774_v57  ;;  %v7375_v28 = vadd.f32 %v9420_v21, %v9184_v53 }
 0x2af   : > { %v4251_v0 = vsel %vm9287_vm13, %v4242_v14, %v4250_v7  ;;  %v4252_v52 = vrot.slane %v4250_v7, 4  ;;  %v3921_v22 = vadd.f32 %v3920_v16, %v3890_v34  ;;  %v7376_v59 = vadd.f32 %v9434_v32, %v9195_v47 }
 0x2b0   : > { %v4272_v35 = vrot.slane %v4270_v61, 4  ;;  %4409 = vst [vmem:[%s8723_s10 + $0x5c] sm:$0xf] %v4251_v0  ;;  %v4302_v27 = vrot.slane %v9530_v8, 4  ;;  %v4274_v55 = vshrl.u32 %v6402_v5, 16  ;;  %v4277_v58 = vshll.u32 %v6402_v5, 16 }
 0x2b1   : > { %v4261_v24 = vsel %vm9287_vm13, %v4252_v52, %v9489_v60  ;;  %v6405_v53 = vpack.c.bf16 %v3823_v63, %v3823_v63  ;;  %v3821_v21 = vmul.f32 %v7375_v28, %v9493_v62  ;;  %v9544_v1 = vmul.f32 %v7376_v59, %v3789_v23  ;;  %v9551_v60 = vpop.permute.xlu1 %5668 }
 0x2b2   : > { %4410 = vst [vmem:[%s8723_s10 + $0x60] sm:$0xf] %v4261_v24  ;;  %v4276_v4 = vrot.slane %v4274_v55, 6  ;;  %v4279_v57 = vrot.slane %v4277_v58, 7  ;;  %v7377_v47 = vadd.f32 %v9437_v37, %v9198_v42  ;;  %v7378_v32 = vadd.f32 %v9443_v12, %v9200_v36 }
 0x2b3   : > { %v4304_v45 = vshrl.u32 %v6405_v53, 16  ;;  %v4307_v38 = vshll.u32 %v6405_v53, 16  ;;  %v3852_v56 = vadd.f32 %v3851_v54, %v3821_v21  ;;  %v3891_v17 = vmul.f32 %v3821_v21, %v3821_v21 }
 0x2b4   : > { %v4280_v40 = vor.u32 %v4279_v57, %v4276_v4  ;;  %v3893_v62 = vmul.f32 %v3823_v63, %v3823_v63  ;;  %v6403_v14 = vpack.c.bf16 %v3821_v21, %v3821_v21  ;;  %v6408_v48 = vpack.c.bf16 %v9544_v1, %v9544_v1 }
 0x2b5   : > { %v4306_v11 = vrot.slane %v4304_v45, 6  ;;  %v4309_v61 = vrot.slane %v4307_v38, 7  ;;  %v3853_v42 = vadd.f32 %v3852_v56, %v9507_v44  ;;  %v3922_v37 = vadd.f32 %v3921_v22, %v3891_v17  ;;  %v3794_v34 = vpop.permute.xlu1 %3793 }
 0x2b6   : > { %v4281_v36 = vsel %vm9287_vm13, %v4272_v35, %v4280_v40  ;;  %v4282_v12 = vrot.slane %v4280_v40, 4  ;;  %v4284_v29 = vshrl.u32 %v6403_v14, 16  ;;  %v4287_v39 = vshll.u32 %v6403_v14, 16 }
 0x2b7   : > { %4412 = vst [vmem:[%s8723_s10 + $0x68] sm:$0xf] %v4281_v36  ;;  %v4310_v9 = vor.u32 %v4309_v61, %v4306_v11  ;;  %v3923_v43 = vadd.f32 %v3922_v37, %v3892_v18  ;;  %v4334_v49 = vshrl.u32 %v6408_v48, 16  ;;  %v4337_v26 = vshll.u32 %v6408_v48, 16  ;;  %v5674_v18 = vpop.permute.xlu0 %5673 }
 0x2b8   : > { %v4286_v50 = vrot.slane %v4284_v29, 6  ;;  %v4289_v3 = vrot.slane %v4287_v39, 7  ;;  %v3824_v19 = vmul.f32 %v7377_v47, %v9501_v46  ;;  %v3854_v2 = vadd.f32 %v3853_v42, %v3823_v63 }
 0x2b9   : > { %v4311_v44 = vsel %vm9287_vm13, %v4302_v27, %v4310_v9  ;;  %v4336_v7 = vrot.slane %v4334_v49, 6  ;;  %v4339_v54 = vrot.slane %v4337_v26, 7  ;;  %v3924_v0 = vadd.f32 %v3923_v43, %v3893_v62  ;;  %v4420_v26 = vld [vmem:[%s8723_s10 + $0x88] sm:$0x3] }
 0x2ba   : > { %4415 = vst [vmem:[%s8723_s10 + $0x74] sm:$0xf] %v4311_v44  ;;  %v4290_v16 = vor.u32 %v4289_v3, %v4286_v50  ;;  %v3855_v5 = vadd.f32 %v3854_v2, %v3824_v19  ;;  %v3894_v28 = vmul.f32 %v3824_v19, %v3824_v19  ;;  %v6406_v22 = vpack.c.bf16 %v3824_v19, %v3824_v19  ;;  %v5679_v19 = vpop.permute.xlu1 %5678 }
 0x2bb   : > { %v9563_v52 = vor.u32 %v4339_v54, %v4336_v7  ;;  %v3827_v59 = vmul.f32 %v7378_v32, %v3794_v34  ;;  %v7379_v46 = vadd.f32 %v9449_v10, %v9202_v33  ;;  %v9570_v27 = vmul.f32 %v9469_v13, %v5674_v18 }
 0x2bc   : > { %v4291_v63 = vsel %vm9287_vm13, %v4282_v12, %v4290_v16  ;;  %v4292_v23 = vrot.slane %v4290_v16, 4  ;;  %v3925_v35 = vadd.f32 %v3924_v0, %v3894_v28  ;;  %v4312_v55 = vrot.slane %v4310_v9, 4 }
 0x2bd   : > { %4413 = vst [vmem:[%s8723_s10 + $0x6c] sm:$0xf] %v4291_v63  ;;  %v3896_v58 = vmul.f32 %v9544_v1, %v9544_v1  ;;  %v4314_v24 = vshrl.u32 %v6406_v22, 16  ;;  %v4317_v53 = vshll.u32 %v6406_v22, 16  ;;  %v4342_v33 = vrot.slane %v9563_v52, 4 }
 0x2be   : > { %v4301_v21 = vsel %vm9287_vm13, %v4292_v23, %v9530_v8  ;;  %v6409_v10 = vpack.c.bf16 %v3827_v59, %v3827_v59  ;;  %v3825_v4 = vmul.f32 %v7379_v46, %v9528_v15  ;;  %v3897_v47 = vmul.f32 %v3827_v59, %v3827_v59 }
 0x2bf   : > { %4414 = vst [vmem:[%s8723_s10 + $0x70] sm:$0xf] %v4301_v21  ;;  %v4316_v57 = vrot.slane %v4314_v24, 6  ;;  %v4319_v13 = vrot.slane %v4317_v53, 7  ;;  %v6412_v32 = vpack.c.bf16 %v9570_v27, %v9570_v27  ;;  %v5681_v12 = vmul.f32 %v9519_v6, %v9473_v20 }
 0x2c0   : > { %v4344_v45 = vshrl.u32 %v6409_v10, 16  ;;  %v4347_v38 = vshll.u32 %v6409_v10, 16  ;;  %v3856_v56 = vadd.f32 %v3855_v5, %v3825_v4  ;;  %v3895_v17 = vmul.f32 %v3825_v4, %v3825_v4 }
 0x2c1   : > { %v4320_v40 = vor.u32 %v4319_v13, %v4316_v57  ;;  %v6407_v62 = vpack.c.bf16 %v3825_v4, %v3825_v4  ;;  %v5741_v8 = vshrl.u32 %v6412_v32, 16  ;;  %v5744_v14 = vshll.u32 %v6412_v32, 16 }
 0x2c2   : > { %v4346_v48 = vrot.slane %v4344_v45, 6  ;;  %v4349_v11 = vrot.slane %v4347_v38, 7  ;;  %v3857_v15 = vadd.f32 %v3856_v56, %v9544_v1  ;;  %v3926_v61 = vadd.f32 %v3925_v35, %v3895_v17 }
 0x2c3   : > { %v4321_v42 = vsel %vm9287_vm13, %v4312_v55, %v4320_v40  ;;  %v4324_v37 = vshrl.u32 %v6407_v62, 16  ;;  %v4327_v36 = vshll.u32 %v6407_v62, 16  ;;  %v5743_v43 = vrot.slane %v5741_v8, 6 }
 0x2c4   : > { %4416 = vst [vmem:[%s8723_s10 + $0x78] sm:$0xf] %v4321_v42  ;;  %v4350_v29 = vor.u32 %v4349_v11, %v4346_v48  ;;  %v3858_v39 = vadd.f32 %v3857_v15, %v3827_v59  ;;  %v3927_v9 = vadd.f32 %v3926_v61, %v3896_v58  ;;  %v4322_v49 = vrot.slane %v4320_v40, 4  ;;  %v5771_v11 = vld [vmem:[%s8723_s10 + $0x98] sm:$0x3] }
 0x2c5   : > { %v4326_v50 = vrot.slane %v4324_v37, 6  ;;  %v4329_v1 = vrot.slane %v4327_v36, 7  ;;  %v5746_v3 = vrot.slane %v5744_v14, 7  ;;  %v6410_v54 = vpack.c.bf16 %v5681_v12, %v5681_v12 }
 0x2c6   : > { %v4351_v2 = vsel %vm9287_vm13, %v4342_v33, %v4350_v29  ;;  %v4352_v44 = vrot.slane %v4350_v29, 4  ;;  %v3859_v7 = vrot.slane %v3858_v39, 4  ;;  %v3928_v20 = vadd.f32 %v3927_v9, %v3897_v47 }
 0x2c7   : > { %4419 = vst [vmem:[%s8723_s10 + $0x84] sm:$0xf] %v4351_v2  ;;  %v4330_v6 = vor.u32 %v4329_v1, %v4326_v50  ;;  %v5684_v34 = vmul.f32 %v9476_v30, %v5679_v19  ;;  %v9596_v5 = vor.u32 %v5746_v3, %v5743_v43  ;;  %v5682_v28 = vmul.f32 %v9551_v60, %v9480_v25 }
 0x2c8   : > { %v4421_v16 = vsel %vm9264_vm8, %v4352_v44, %v4420_v26  ;;  %v5722_v22 = vshrl.u32 %v6410_v54, 16  ;;  %v3860_v59 = vadd.f32 %v3859_v7, %v3858_v39  ;;  %v3929_v46 = vrot.slane %v3928_v20, 4 }
 0x2c9   : > { %4422 = vst [vmem:[%s8723_s10 + $0x88] sm:$0x3] %v4421_v16  ;;  %v4331_v0 = vsel %vm9287_vm13, %v4322_v49, %v4330_v6  ;;  %v4332_v18 = vrot.slane %v4330_v6, 4  ;;  %v5697_v30 = vmul.f32 %v9570_v27, %v9570_v27  ;;  %v5725_v63 = vshll.u32 %v6410_v54, 16 }
 0x2ca   : > { %4417 = vst [vmem:[%s8723_s10 + $0x7c] sm:$0xf] %v4331_v0  ;;  %v5724_v35 = vrot.slane %v5722_v22, 6  ;;  %v6413_v55 = vpack.c.bf16 %v5684_v34, %v5684_v34  ;;  %v5685_v25 = vadd.f32 %v5682_v28, %v5681_v12  ;;  %v5749_v60 = vrot.slane %v9596_v5, 4 }
 0x2cb   : > { %v4341_v23 = vsel %vm9287_vm13, %v4332_v18, %v9563_v52  ;;  %v5695_v58 = vmul.f32 %v5681_v12, %v5681_v12  ;;  %v5727_v24 = vrot.slane %v5725_v63, 7  ;;  %v5696_v53 = vmul.f32 %v5682_v28, %v5682_v28 }
 0x2cc   : > { %4418 = vst [vmem:[%s8723_s10 + $0x80] sm:$0xf] %v4341_v23  ;;  %v5751_v21 = vshrl.u32 %v6413_v55, 16  ;;  %v5754_v33 = vshll.u32 %v6413_v55, 16  ;;  %v5686_v10 = vadd.f32 %v5685_v25, %v9570_v27  ;;  %v6411_v4 = vpack.c.bf16 %v5682_v28, %v5682_v28 }
 0x2cd   : > { %v3861_v57 = vrot.slane %v3860_v59, 2  ;;  %v3930_v13 = vadd.f32 %v3929_v46, %v3928_v20  ;;  %v5728_v52 = vor.u32 %v5727_v24, %v5724_v35  ;;  %v5699_v47 = vadd.f32 %v5696_v53, %v5695_v58 }
 0x2ce   : > { %v5753_v32 = vrot.slane %v5751_v21, 6  ;;  %v5756_v45 = vrot.slane %v5754_v33, 7  ;;  %v5687_v38 = vadd.f32 %v5686_v10, %v5684_v34  ;;  %v5731_v56 = vshrl.u32 %v6411_v4, 16 }
 0x2cf   : > { %v5698_v40 = vmul.f32 %v5684_v34, %v5684_v34  ;;  %v5700_v62 = vadd.f32 %v5699_v47, %v5697_v30  ;;  %v3931_v48 = vrot.slane %v3930_v13, 2  ;;  %v5734_v42 = vshll.u32 %v6411_v4, 16 }
 0x2d0   : > { %v5765_v17 = vld [vmem:[%s8723_s10 + $0x88] sm:$0xe]  ;;  %v5757_v14 = vor.u32 %v5756_v45, %v5753_v32  ;;  %v5688_v27 = vrot.slane %v5687_v38, 4  ;;  %v5733_v61 = vrot.slane %v5731_v56, 6  ;;  %v3862_v37 = vadd.f32 %v3861_v57, %v3860_v59 }
 0x2d1   : > { %v5766_v8 = vsel %vm9272_vm11, %v5728_v52, %v5765_v17  ;;  %v5701_v15 = vadd.f32 %v5700_v62, %v5698_v40  ;;  %v5729_v39 = vrot.slane %v5728_v52, 4  ;;  %v5736_v9 = vrot.slane %v5734_v42, 7 }
 0x2d2   : > { %5767 = vst [vmem:[%s8723_s10 + $0x88] sm:$0xe] %v5766_v8  ;;  %v5758_v36 = vsel %vm9287_vm13, %v5749_v60, %v5757_v14  ;;  %v5759_v12 = vrot.slane %v5757_v14, 4  ;;  %v5689_v29 = vadd.f32 %v5688_v27, %v5687_v38  ;;  %v3932_v26 = vadd.f32 %v3931_v48, %v3930_v13 }
 0x2d3   : > { %5770 = vst [vmem:[%s8723_s10 + $0x94] sm:$0xf] %v5758_v36  ;;  %v5702_v51 = vrot.slane %v5701_v15, 4  ;;  %v5737_v1 = vor.u32 %v5736_v9, %v5733_v61  ;;  %v3863_v3 = vrot.slane %v3862_v37, 1 }
 0x2d4   : > { %v5772_v43 = vsel %vm9264_vm8, %v5759_v12, %v5771_v11  ;;  %v5690_v49 = vrot.slane %v5689_v29, 2  ;;  %v3933_v6 = vrot.slane %v3932_v26, 1 }
 0x2d5   : > { %5773 = vst [vmem:[%s8723_s10 + $0x98] sm:$0x3] %v5772_v43  ;;  %v5703_v50 = vadd.f32 %v5702_v51, %v5701_v15  ;;  %v5738_v44 = vsel %vm9287_vm13, %v5729_v39, %v5737_v1  ;;  %v5739_v7 = vrot.slane %v5737_v1, 4  ;;  %v3864_v34 = vadd.f32 %v3863_v3, %v3862_v37 }
 0x2d6   : > { %v5691_v19 = vadd.f32 %v5690_v49, %v5689_v29  ;;  %5768 = vst [vmem:[%s8723_s10 + $0x8c] sm:$0xf] %v5738_v44  ;;  %v3934_v18 = vadd.f32 %v3933_v6, %v3932_v26 }
 0x2d7   : > { %v5704_v2 = vrot.slane %v5703_v50, 2  ;;  %v5748_v41 = vsel %vm9287_vm13, %v5739_v7, %v9596_v5 }
 0x2d8   : > { %v5692_v20 = vrot.slane %v5691_v19, 1  ;;  %5769 = vst [vmem:[%s8723_s10 + $0x90] sm:$0xf] %v5748_v41 }
 0x2d9   : > { %v5705_v54 = vadd.f32 %v5704_v2, %v5703_v50 }
 0x2da   : > { %v5693_v16 = vadd.f32 %v5692_v20, %v5691_v19 }
 0x2db   : > { %v5706_v28 = vrot.slane %v5705_v54, 1 }
 0x2dc   : > { %v5694_v0 = vadd.f32 %v5693_v16, %v3864_v34 }
 0x2dd   : > { %v5707_v22 = vadd.f32 %v5706_v28, %v5705_v54 }
 0x2de   : > { %5774 = vst [vmem:[%s208_s13] sm:$0x1] %v5694_v0 }
 0x2df   : > { %v5708_v59 = vadd.f32 %v5707_v22, %v3934_v18 }
 0x2e1   : > { %5775 = vst [vmem:[%s208_s13 + $0x1] sm:$0x1] %v5708_v59 }
 0x2e2 PF: > { %s15_s15 = sadd.s32 1, %s7876_s15  }
 0x2e3   : > { %p12_p4 = scmp.ge.s32.totalorder %s15_s15, 4  }
 0x2e5   :  { %14 = sbr.rel (!%p12_p4) target bundleno = 1 (0x1), region = 82 }

// kernel: basic_block_forward.4
= control target key start
LH: loop header
LB: loop body
LE: loop exit
PB: predicated region body
PF: predicated region fallthrough
CT: control target
= control target key end

     0   :  { %s8732_s18 = smov 0   ;;  %s10585_s0 = inlined_call_operand.vmem [shape: bf16[2,342,128], index: 0, kind: input, shape index: {}]   ;;  %s10586_s1 = inlined_call_operand.vmem [shape: f32[2,128], index: 1, kind: input, shape index: {}]   ;;  %s10587_s2 = inlined_call_operand.vmem [shape: f32[342,1], index: 2, kind: input, shape index: {}]   ;;  %s10588_s3 = inlined_call_operand.vmem [shape: bf16[9,128,128], index: 3, kind: input, shape index: {}]   ;;  %s10589_s4 = inlined_call_operand.vmem [shape: bf16[2,288,128], index: 4, kind: output, shape index: {0}]   ;;  %s10590_s5 = inlined_call_operand.vmem [shape: f32[2,2,128], index: 5, kind: output, shape index: {1}]  }
   0x1 LB: > { %s6241_s19 = sadd.s32 4294967295, %s8699_s18   ;;  %p6245_p0 = scmp.ge.s32.totalorder %s8699_s18, 1  ;;  %s8699_s18 = sphi %s8732_s18, %s16_s18  }
   0x2   : > { %p190_p1 = scmp.lt.s32.totalorder %s8699_s18, 3 }
   0x4   : > { %p191_p2 = pnand %p6245_p0, %p190_p1 }
   0x6   : > { %194 = sbr.rel (%p191_p2) target bundleno = 826 (0x33a), region = 36 }
   0xd   : > { %v409_v0 = vld [vmem:[%s10587_s2 + $0x10] sm:$0xff]  ;;  %v407_v1 = vld [vmem:[%s10587_s2] sm:$0xff]  ;;  %v8701_v2 = vmov 0   ;;  %v410_v3 = vld [vmem:[%s10587_s2 + $0x18] sm:$0xff]  ;;  %p222_p3 = scmp.lt.s32.totalorder %s6241_s19, 1  ;;  %vm1732_vm0 = vcmask 1046528  }
   0xe   : > { %8451 = vset.pattern.permute.xlu1 %v8701_v2  ;;  %8450 = vset.pattern.permute.xlu0 %v8701_v2  ;;  %v408_v4 = vld [vmem:[%s10587_s2 + $0x8] sm:$0xff]  ;;  %v411_v6 = vld [vmem:[%s10587_s2 + $0x20] sm:$0xff]  ;;  %v414_v7 = vld [vmem:[%s10587_s2 + $0x38] sm:$0xff]  ;;  %vm1128_vm1 = vsmask.f32 7424  ;;  %vm2898_vm3 = vcmask 1045504  }
   0xf   : > { %451 = vperm.xlu1 %8451, %v409_v0   ;;  %441 = vperm.xlu0 %8450, %v407_v1   ;;  %v412_v5 = vld [vmem:[%s10587_s2 + $0x28] sm:$0xff]  ;;  %v413_v8 = vld [vmem:[%s10587_s2 + $0x30] sm:$0xff]  ;;  %v415_v10 = vld [vmem:[%s10587_s2 + $0x40] sm:$0xff]  ;;  %s10629_s19 = smov (!%p222_p3, %s6241_s19), 1  ;;  %vm2467_vm2 = vsmask.f32 6400 }
  0x10   : > { %v416_v9 = vld [vmem:[%s10587_s2 + $0x48] sm:$0xff]  ;;  %v418_v11 = vld [vmem:[%s10587_s2 + $0x58] sm:$0xff]  ;;  %v417_v12 = vld [vmem:[%s10587_s2 + $0x50] sm:$0xff]  ;;  %s8439_s28 = smul.u32 172, %s10629_s19  ;;  %vm4064_vm4 = vcmask 1044480   ;;  %s6248_s23 = sshll.u32 %s10629_s19, 1 }
  0x11   : > { %v8452_v13 = vld [vmem:[%s10588_s3 + $0x80] sm:$0xff]   ;;  %v420_v14 = vld [vmem:[%s10587_s2 + $0x68] sm:$0xff]  ;;  %v422_v19 = vld [vmem:[%s10587_s2 + $0x78] sm:$0xff]  ;;  %vm3633_vm5 = vsmask.f32 5376  ;;  %s8440_s20 = smul.u32 144, %s10629_s19  ;;  %s235_s26 = scalar_lea.vmem %s10590_s5, %s6248_s23 }
  0x12   : > { %v8453_v15 = vld [vmem:[%s10588_s3 + $0x40] sm:$0xff]   ;;  %7619 = vmatprep.subr.bf16.mxu0 %v8452_v13  ;;  %v8454_v17 = vld [vmem:[%s10588_s3 + $0x88] sm:$0xff]   ;;  %v421_v20 = vld [vmem:[%s10587_s2 + $0x70] sm:$0xff]  ;;  %s8909_s12 = scalar_lea.vmem %s10585_s0, %s8439_s28 }
  0x13   : > { %456 = vperm.xlu1 %8451, %v410_v3   ;;  %446 = vperm.xlu0 %8450, %v408_v4   ;;  %v419_v16 = vld [vmem:[%s10587_s2 + $0x60] sm:$0xff]  ;;  %v8455_v18 = vld [vmem:[%s10588_s3 + $0x48] sm:$0xff]   ;;  %v8456_v21 = vld [vmem:[%s10588_s3 + $0x90] sm:$0xff]  }
  0x14   : > { %7523 = vmatprep.subr.bf16.mxu1 %v8453_v15  ;;  %7620 = vmatpush3.bf16.msra.mxu0 %v8452_v13  ;;  %v424_v22 = vld [vmem:[%s10587_s2 + $0x88] sm:$0xff]  ;;  %v423_v23 = vld [vmem:[%s10587_s2 + $0x80] sm:$0xff]  ;;  %v8457_v24 = vld [vmem:[%s10588_s3 + $0x50] sm:$0xff]  }
  0x15   : > { %7524 = vmatpush3.bf16.msra.mxu1 %v8453_v15  ;;  %7621 = vmatprep.subr.bf16.mxu0 %v8454_v17  ;;  %v8458_v25 = vld [vmem:[%s10588_s3 + $0x98] sm:$0xff]   ;;  %v8460_v27 = vld [vmem:[%s10588_s3 + $0xa0] sm:$0xff]   ;;  %v425_v29 = vld [vmem:[%s10587_s2 + $0x90] sm:$0xff] }
  0x16   : > { %7525 = vmatprep.subr.bf16.mxu1 %v8455_v18  ;;  %v8459_v26 = vld [vmem:[%s10588_s3 + $0x58] sm:$0xff]   ;;  %v8461_v30 = vld [vmem:[%s10588_s3 + $0x60] sm:$0xff]   ;;  %v8462_v31 = vld [vmem:[%s10588_s3 + $0xa8] sm:$0xff]  }
  0x17   : > { %466 = vperm.xlu1 %8451, %v412_v5   ;;  %461 = vperm.xlu0 %8450, %v411_v6   ;;  %v426_v28 = vld [vmem:[%s10587_s2 + $0x98] sm:$0xff]  ;;  %v428_v32 = vld [vmem:[%s10587_s2 + $0xa8] sm:$0xff]  ;;  %v427_v33 = vld [vmem:[%s10587_s2 + $0xa0] sm:$0xff] }
  0x18   : > { %7622 = vmatpush3.bf16.msra.mxu0 %v8454_v17  ;;  %v8463_v34 = vld [vmem:[%s10588_s3 + $0x68] sm:$0xff]   ;;  %v430_v35 = vld [vmem:[%s10587_s2 + $0xb8] sm:$0xff]  ;;  %v8464_v36 = vld [vmem:[%s10588_s3 + $0xb0] sm:$0xff]  }
  0x19   : > { %7526 = vmatpush3.bf16.msra.mxu1 %v8455_v18  ;;  %7623 = vmatprep.subr.bf16.mxu0 %v8456_v21  ;;  %v429_v37 = vld [vmem:[%s10587_s2 + $0xb0] sm:$0xff]  ;;  %v8466_v39 = vld [vmem:[%s10588_s3 + $0xb8] sm:$0xff]   ;;  %v432_v40 = vld [vmem:[%s10587_s2 + $0xc8] sm:$0xff] }
  0x1a   : > { %7527 = vmatprep.subr.bf16.mxu1 %v8457_v24  ;;  %v8465_v38 = vld [vmem:[%s10588_s3 + $0x70] sm:$0xff]   ;;  %v431_v41 = vld [vmem:[%s10587_s2 + $0xc0] sm:$0xff]  ;;  %v8470_v42 = vld [vmem:[%s10588_s3 + $0x78] sm:$0xff]  }
  0x1b   : > { %476 = vperm.xlu1 %8451, %v414_v7   ;;  %471 = vperm.xlu0 %8450, %v413_v8   ;;  %v8472_v43 = vld [vmem:[%s10588_s3 + $0xc0] sm:$0xff]   ;;  %v434_v44 = vld [vmem:[%s10587_s2 + $0xd8] sm:$0xff]  ;;  %v433_v45 = vld [vmem:[%s10587_s2 + $0xd0] sm:$0xff] }
  0x1c   : > { %7624 = vmatpush3.bf16.msra.mxu0 %v8456_v21  ;;  %v8473_v46 = vld [vmem:[%s10588_s3] sm:$0xff]   ;;  %v436_v47 = vld [vmem:[%s10587_s2 + $0xe8] sm:$0xff]  ;;  %v438_v49 = vld [vmem:[%s10587_s2 + $0xf8] sm:$0xff] }
  0x1d   : > { %7528 = vmatpush3.bf16.msra.mxu1 %v8457_v24  ;;  %7625 = vmatprep.subr.bf16.mxu0 %v8458_v25  ;;  %v435_v48 = vld [vmem:[%s10587_s2 + $0xe0] sm:$0xff]  ;;  %v437_v50 = vld [vmem:[%s10587_s2 + $0xf0] sm:$0xff]  ;;  %v847_v51 = vld [vmem:[%s10587_s2 + $0x108] sm:$0xff] }
  0x1e   : > { %7529 = vmatprep.subr.bf16.mxu1 %v8459_v26  ;;  %v846_v52 = vld [vmem:[%s10587_s2 + $0x100] sm:$0xff]  ;;  %v849_v53 = vld [vmem:[%s10587_s2 + $0x118] sm:$0xff]  ;;  %v7191_v54 = vld [vmem:[%s8909_s12 + $0x88] sm:$0xff]  }
  0x1f   : > { %486 = vperm.xlu1 %8451, %v416_v9   ;;  %481 = vperm.xlu0 %8450, %v415_v10   ;;  %v848_v55 = vld [vmem:[%s10587_s2 + $0x110] sm:$0xff]  ;;  %v851_v56 = vld [vmem:[%s10587_s2 + $0x128] sm:$0xff]  ;;  %v850_v57 = vld [vmem:[%s10587_s2 + $0x120] sm:$0xff]  ;;  %v7032_v58 = vunpack.c.h.bf16 %v7191_v54  ;;  %v7031_v59 = vunpack.c.l.bf16 %v7191_v54 }
  0x20   : > { %7626 = vmatpush3.bf16.msra.mxu0 %v8458_v25  ;;  %v8924_v60 = vld [vmem:[%s10586_s1] ss:$0 sm:$0xff]  ;;  %v8929_v61 = vld [vmem:[%s10586_s1 + $0x1] ss:$0 sm:$0xff]  ;;  %v7192_v62 = vld [vmem:[%s8909_s12 + $0x90] sm:$0xff]  }
  0x21   : > { %7530 = vmatpush3.bf16.msra.mxu1 %v8459_v26  ;;  %7627 = vmatprep.subr.bf16.mxu0 %v8460_v27  ;;  %v816_v63 = vmul.f32 %v7032_v58, %v8924_v60  ;;  %v815_v0 = vmul.f32 %v7031_v59, %v8924_v60  ;;  %v7036_v1 = vunpack.c.h.bf16 %v7192_v62  ;;  %v7035_v2 = vunpack.c.l.bf16 %v7192_v62  ;;  %v7160_v3 = vld [vmem:[%s8909_s12 + $0x8] sm:$0xff]   ;;  %v6882_v4 = vld [vmem:[%s8909_s12] sm:$0xff]   ;;  %v853_v5 = vld [vmem:[%s10587_s2 + $0x138] sm:$0xff] }
  0x22   : > { %7531 = vmatprep.subr.bf16.mxu1 %v8461_v30  ;;  %v7193_v10 = vld [vmem:[%s8909_s12 + $0x98] sm:$0xff]   ;;  %v6883_v17 = vunpack.c.l.bf16 %v6882_v4  ;;  %v855_v18 = vld [vmem:[%s10587_s2 + $0x148] sm:$0xff] }
  0x23   : > { %496 = vperm.xlu1 %8451, %v418_v11   ;;  %491 = vperm.xlu0 %8450, %v417_v12   ;;  %v8940_v6 = vadd.f32 %v8929_v61, %v816_v63  ;;  %v8943_v7 = vadd.f32 %v8929_v61, %v815_v0  ;;  %v818_v8 = vmul.f32 %v7036_v1, %v8924_v60  ;;  %v852_v11 = vld [vmem:[%s10587_s2 + $0x130] sm:$0xff]  ;;  %v7039_v15 = vunpack.c.l.bf16 %v7193_v10  ;;  %v4360_v54 = vld [vmem:[%s10587_s2 + $0x3b] sm:$0xff] }
  0x24   : > { %7628 = vmatpush3.bf16.msra.mxu0 %v8460_v27  ;;  %v817_v9 = vmul.f32 %v7035_v2, %v8924_v60  ;;  %v4363_v59 = vld [vmem:[%s10587_s2 + $0x53] sm:$0xff]  ;;  %v4362_v62 = vld [vmem:[%s10587_s2 + $0x4b] sm:$0xff] }
  0x25   : > { %7532 = vmatpush3.bf16.msra.mxu1 %v8461_v30  ;;  %7629 = vmatprep.subr.bf16.mxu0 %v8462_v31  ;;  %v8952_v12 = vadd.f32 %v8929_v61, %v818_v8 }
  0x26   : > { %7533 = vmatprep.subr.bf16.mxu1 %v8463_v34  ;;  %v8955_v13 = vadd.f32 %v8929_v61, %v817_v9 }
  0x27   : > { %506 = vperm.xlu1 %8451, %v420_v14   ;;  %501 = vperm.xlu0 %8450, %v419_v16   ;;  %v7040_v14 = vunpack.c.h.bf16 %v7193_v10  ;;  %v6887_v16 = vunpack.c.l.bf16 %v7160_v3  ;;  %v7163_v10 = vld [vmem:[%s8909_s12 + $0x20] sm:$0xff]  }
  0x28   : > { %7630 = vmatpush3.bf16.msra.mxu0 %v8462_v31  ;;  %v307_v31 = vmul.f32 %v6883_v17, %v8924_v60 }
  0x29   : > { %7534 = vmatpush3.bf16.msra.mxu1 %v8463_v34  ;;  %7631 = vmatprep.subr.bf16.mxu0 %v8464_v36  ;;  %v820_v21 = vmul.f32 %v7040_v14, %v8924_v60  ;;  %v309_v30 = vmul.f32 %v6887_v16, %v8924_v60  ;;  %v4366_v14 = vld [vmem:[%s10587_s2 + $0x6b] sm:$0xff] }
  0x2a   : > { %7535 = vmatprep.subr.bf16.mxu1 %v8465_v38 }
  0x2b   : > { %516 = vperm.xlu1 %8451, %v422_v19   ;;  %511 = vperm.xlu0 %8450, %v421_v20   ;;  %v854_v19 = vld [vmem:[%s10587_s2 + $0x140] sm:$0xff]  ;;  %v6888_v20 = vunpack.c.h.bf16 %v7160_v3  ;;  %v8967_v26 = vadd.f32 %v8929_v61, %v820_v21 }
  0x2c   : > { %7632 = vmatpush3.bf16.msra.mxu0 %v8464_v36  ;;  %v4365_v3 = vld [vmem:[%s10587_s2 + $0x63] sm:$0xff]  ;;  %v4368_v21 = vld [vmem:[%s10587_s2 + $0x7b] sm:$0xff] }
  0x2d   : > { %7536 = vmatpush3.bf16.msra.mxu1 %v8465_v38  ;;  %7633 = vmatprep.subr.bf16.mxu0 %v8466_v39  ;;  %v310_v34 = vmul.f32 %v6888_v20, %v8924_v60  ;;  %v6884_v38 = vunpack.c.h.bf16 %v6882_v4  ;;  %v4364_v4 = vld [vmem:[%s10587_s2 + $0x5b] sm:$0xff]  ;;  %v4369_v20 = vld [vmem:[%s10587_s2 + $0x83] sm:$0xff] }
  0x2e   : > { %7537 = vmatprep.subr.bf16.mxu1 %v8470_v42 }
  0x2f   : > { %526 = vperm.xlu1 %8451, %v424_v22   ;;  %521 = vperm.xlu0 %8450, %v423_v23   ;;  %v819_v22 = vmul.f32 %v7039_v15, %v8924_v60  ;;  %v7194_v23 = vld [vmem:[%s8909_s12 + $0xa0] sm:$0xff]  }
  0x30   : > { %7634 = vmatpush3.bf16.msra.mxu0 %v8466_v39  ;;  %v7044_v24 = vunpack.c.h.bf16 %v7194_v23  ;;  %v7043_v25 = vunpack.c.l.bf16 %v7194_v23  ;;  %v8991_v39 = vadd.f32 %v8929_v61, %v309_v30 }
  0x31   : > { %7538 = vmatpush3.bf16.msra.mxu1 %v8470_v42  ;;  %7667 = vmatprep.subr.bf16.mxu0 %v8472_v43  ;;  %v8970_v27 = vadd.f32 %v8929_v61, %v819_v22  ;;  %v4357_v42 = vld [vmem:[%s10587_s2 + $0x23] sm:$0xff]  ;;  %v4356_v43 = vld [vmem:[%s10587_s2 + $0x1b] sm:$0xff] }
  0x32   : > { %7571 = vmatprep.subr.bf16.mxu1 %v8473_v46  ;;  %v4358_v46 = vld [vmem:[%s10587_s2 + $0x2b] sm:$0xff] }
  0x33   : > { %536 = vperm.xlu1 %8451, %v426_v28   ;;  %531 = vperm.xlu0 %8450, %v425_v29   ;;  %v4355_v28 = vld [vmem:[%s10587_s2 + $0x13] sm:$0xff] }
  0x34   : > { %v856_v29 = vld [vmem:[%s10587_s2 + $0x150] sm:$0x3f] }
  0x37   : > { %546 = vperm.xlu1 %8451, %v428_v32   ;;  %541 = vperm.xlu0 %8450, %v427_v33   ;;  %v822_v32 = vmul.f32 %v7044_v24, %v8924_v60  ;;  %v821_v33 = vmul.f32 %v7043_v25, %v8924_v60  ;;  %v6899_v24 = vunpack.c.l.bf16 %v7163_v10 }
  0x39   : > { %v8985_v36 = vadd.f32 %v8929_v61, %v822_v32 }
  0x3b   : > { %556 = vperm.xlu1 %8451, %v430_v35   ;;  %551 = vperm.xlu0 %8450, %v429_v37   ;;  %v7161_v35 = vld [vmem:[%s8909_s12 + $0x10] sm:$0xff]   ;;  %v8988_v37 = vadd.f32 %v8929_v61, %v821_v33  ;;  %v315_v33 = vmul.f32 %v6899_v24, %v8924_v60 }
  0x3f   : > { %566 = vperm.xlu1 %8451, %v432_v40   ;;  %561 = vperm.xlu0 %8450, %v431_v41   ;;  %v8994_v40 = vadd.f32 %v8929_v61, %v307_v31  ;;  %v6892_v41 = vunpack.c.h.bf16 %v7161_v35  ;;  %v7165_v31 = vld [vmem:[%s8909_s12 + $0x30] sm:$0xff]  }
  0x43   : > { %576 = vperm.xlu1 %8451, %v434_v44   ;;  %571 = vperm.xlu0 %8450, %v433_v45   ;;  %v9003_v44 = vadd.f32 %v8929_v61, %v310_v34  ;;  %v4359_v45 = vld [vmem:[%s10587_s2 + $0x33] sm:$0xff] }
  0x47   : > { %586 = vperm.xlu1 %8451, %v436_v47   ;;  %581 = vperm.xlu0 %8450, %v435_v48   ;;  %v377_v47 = vmax.f32 %v8991_v39, 0.0  ;;  %v375_v48 = vmax.f32 %v8994_v40, 0.0 }
  0x4b   : > { %596 = vperm.xlu1 %8451, %v438_v49   ;;  %591 = vperm.xlu0 %8450, %v437_v50   ;;  %v308_v49 = vmul.f32 %v6884_v38, %v8924_v60  ;;  %v312_v50 = vmul.f32 %v6892_v41, %v8924_v60  ;;  %v4372_v38 = vld [vmem:[%s10587_s2 + $0x9b] sm:$0xff] }
  0x4f   : > { %864 = vperm.xlu1 %8451, %v847_v51   ;;  %859 = vperm.xlu0 %8450, %v846_v52   ;;  %v378_v51 = vmax.f32 %v9003_v44, 0.0  ;;  %v7162_v52 = vld [vmem:[%s8909_s12 + $0x18] sm:$0xff]  }
  0x50   : > { %v6896_v58 = vunpack.c.h.bf16 %v7162_v52  ;;  %v6895_v9 = vunpack.c.l.bf16 %v7162_v52  ;;  %v4375_v52 = vld [vmem:[%s10587_s2 + $0xb3] sm:$0xff] }
  0x52   : > { %v314_v2 = vmul.f32 %v6896_v58, %v8924_v60  ;;  %v313_v17 = vmul.f32 %v6895_v9, %v8924_v60  ;;  %v6907_v58 = vunpack.c.l.bf16 %v7165_v31 }
  0x53   : > { %874 = vperm.xlu1 %8451, %v849_v53   ;;  %869 = vperm.xlu0 %8450, %v848_v55   ;;  %v4361_v53 = vld [vmem:[%s10587_s2 + $0x43] sm:$0xff]  ;;  %v9024_v55 = vadd.f32 %v8929_v61, %v308_v49 }
  0x54   : > { %v9049_v8 = vadd.f32 %v8929_v61, %v314_v2  ;;  %v9069_v22 = vadd.f32 %v8929_v61, %v313_v17  ;;  %v4377_v2 = vld [vmem:[%s10587_s2 + $0xc3] sm:$0xff] }
  0x55   : > { %v376_v63 = vmax.f32 %v9024_v55, 0.0  ;;  %v4382_v55 = vld [vmem:[%s10587_s2 + $0xeb] sm:$0xff] }
  0x56   : > { %v382_v16 = vmax.f32 %v9049_v8, 0.0  ;;  %v381_v30 = vmax.f32 %v9069_v22, 0.0  ;;  %v9204_v8 = vld [vmem:[%s8909_s12 + $0x60] sm:$0xff]  }
  0x57   : > { %884 = vperm.xlu1 %8451, %v851_v56   ;;  %879 = vperm.xlu0 %8450, %v850_v57   ;;  %v9027_v56 = vadd.f32 %v8929_v61, %v312_v50  ;;  %v6891_v57 = vunpack.c.l.bf16 %v7161_v35  ;;  %v4373_v35 = vld [vmem:[%s10587_s2 + $0xa3] sm:$0xff] }
  0x58   : > { %v9100_v50 = vld [vmem:[%s8909_s12 + $0x40] sm:$0xff]  }
  0x59   : > { %v380_v0 = vmax.f32 %v9027_v56, 0.0  ;;  %v311_v1 = vmul.f32 %v6891_v57, %v8924_v60  ;;  %v6081_v56 = vld [vmem:[%s10587_s2 + $0x113] sm:$0xff] }
  0x5b   : > { %894 = vperm.xlu1 %8451, %v853_v5   ;;  %889 = vperm.xlu0 %8450, %v852_v11   ;;  %v9046_v5 = vadd.f32 %v8929_v61, %v311_v1  ;;  %v4367_v11 = vld [vmem:[%s10587_s2 + $0x73] sm:$0xff] }
  0x5d   : > { %v379_v15 = vmax.f32 %v9046_v5, 0.0 }
  0x5f   : > { %904 = vperm.xlu1 %8451, %v855_v18   ;;  %899 = vperm.xlu0 %8450, %v854_v19   ;;  %v6900_v18 = vunpack.c.h.bf16 %v7163_v10  ;;  %v7164_v19 = vld [vmem:[%s8909_s12 + $0x28] sm:$0xff]  }
  0x60   : > { %v6904_v25 = vunpack.c.h.bf16 %v7164_v19  ;;  %v6903_v41 = vunpack.c.l.bf16 %v7164_v19 }
  0x61   : > { %v316_v23 = vmul.f32 %v6900_v18, %v8924_v60 }
  0x62   : > { %v318_v34 = vmul.f32 %v6904_v25, %v8924_v60 }
  0x63   : > { %4389 = vperm.xlu1 %8451, %v4355_v28   ;;  %909 = vperm.xlu0 %8450, %v856_v29   ;;  %v4371_v28 = vld [vmem:[%s10587_s2 + $0x93] sm:$0xff]  ;;  %v4370_v29 = vld [vmem:[%s10587_s2 + $0x8b] sm:$0xff]  ;;  %v9081_v32 = vadd.f32 %v8929_v61, %v316_v23 }
  0x64   : > { %v9097_v49 = vadd.f32 %v8929_v61, %v318_v34 }
  0x66   : > { %v386_v1 = vmax.f32 %v9097_v49, 0.0  ;;  %v6083_v49 = vld [vmem:[%s10587_s2 + $0x123] sm:$0xff] }
  0x67   : > { %4399 = vperm.xlu1 %8451, %v4357_v42   ;;  %4394 = vperm.xlu0 %8450, %v4356_v43   ;;  %v6908_v42 = vunpack.c.h.bf16 %v7165_v31  ;;  %v384_v43 = vmax.f32 %v9081_v32, 0.0  ;;  %v6082_v32 = vld [vmem:[%s10587_s2 + $0x11b] sm:$0xff] }
  0x69   : > { %v320_v57 = vmul.f32 %v6908_v42, %v8924_v60  ;;  %v4380_v42 = vld [vmem:[%s10587_s2 + $0xdb] sm:$0xff] }
  0x6b   : > { %4409 = vperm.xlu1 %8451, %v4359_v45   ;;  %4404 = vperm.xlu0 %8450, %v4358_v46   ;;  %v7166_v45 = vld [vmem:[%s8909_s12 + $0x38] sm:$0xff]   ;;  %v9094_v46 = vadd.f32 %v8929_v61, %v315_v33  ;;  %v9122_v9 = vadd.f32 %v8929_v61, %v320_v57 }
  0x6c   : > { %v6911_v10 = vunpack.c.l.bf16 %v7166_v45 }
  0x6d   : > { %v388_v24 = vmax.f32 %v9122_v9, 0.0 }
  0x6e   : > { %v321_v25 = vmul.f32 %v6911_v10, %v8924_v60 }
  0x6f   : > { %4419 = vperm.xlu1 %8451, %v4361_v53   ;;  %4414 = vperm.xlu0 %8450, %v4360_v54   ;;  %v4374_v53 = vld [vmem:[%s10587_s2 + $0xab] sm:$0xff]  ;;  %v317_v54 = vmul.f32 %v6903_v41, %v8924_v60  ;;  %v4381_v41 = vld [vmem:[%s10587_s2 + $0xe3] sm:$0xff] }
  0x73   : > { %4429 = vperm.xlu1 %8451, %v4363_v59   ;;  %4424 = vperm.xlu0 %8450, %v4362_v62   ;;  %v6912_v59 = vunpack.c.h.bf16 %v7166_v45  ;;  %v383_v62 = vmax.f32 %v9094_v46, 0.0  ;;  %v9153_v45 = vadd.f32 %v8929_v61, %v321_v25 }
  0x75   : > { %v322_v17 = vmul.f32 %v6912_v59, %v8924_v60 }
  0x77   : > { %4439 = vperm.xlu1 %8451, %v4365_v3   ;;  %4434 = vperm.xlu0 %8450, %v4364_v4   ;;  %v4376_v3 = vld [vmem:[%s10587_s2 + $0xbb] sm:$0xff]  ;;  %v9119_v4 = vadd.f32 %v8929_v61, %v317_v54  ;;  %v9142_v33 = vadd.f32 %v8929_v61, %v322_v17  ;;  %v6915_v54 = vunpack.c.l.bf16 %v9100_v50 }
  0x79   : > { %v385_v23 = vmax.f32 %v9119_v4, 0.0  ;;  %v323_v17 = vmul.f32 %v6915_v54, %v8924_v60 }
  0x7b   : > { %4449 = vperm.xlu1 %8451, %v4367_v11   ;;  %4444 = vperm.xlu0 %8450, %v4366_v14   ;;  %v6916_v11 = vunpack.c.h.bf16 %v9100_v50  ;;  %v319_v14 = vmul.f32 %v6907_v58, %v8924_v60  ;;  %v390_v58 = vmax.f32 %v9142_v33, 0.0 }
  0x7d   : > { %v9139_v31 = vadd.f32 %v8929_v61, %v319_v14 }
  0x7f   : > { %4459 = vperm.xlu1 %8451, %v4369_v20   ;;  %4454 = vperm.xlu0 %8450, %v4368_v21   ;;  %v4379_v20 = vld [vmem:[%s10587_s2 + $0xd3] sm:$0xff]  ;;  %v4378_v21 = vld [vmem:[%s10587_s2 + $0xcb] sm:$0xff]  ;;  %v387_v57 = vmax.f32 %v9139_v31, 0.0 }
  0x83   : > { %4469 = vperm.xlu1 %8451, %v4371_v28   ;;  %4464 = vperm.xlu0 %8450, %v4370_v29   ;;  %v324_v28 = vmul.f32 %v6916_v11, %v8924_v60  ;;  %v7168_v29 = vld [vmem:[%s8909_s12 + $0x48] sm:$0xff]  }
  0x84   : > { %v6920_v59 = vunpack.c.h.bf16 %v7168_v29  ;;  %v6919_v40 = vunpack.c.l.bf16 %v7168_v29 }
  0x87   : > { %4479 = vperm.xlu1 %8451, %v4373_v35   ;;  %4474 = vperm.xlu0 %8450, %v4372_v38  }
  0x8b   : > { %4489 = vperm.xlu1 %8451, %v4375_v52   ;;  %4484 = vperm.xlu0 %8450, %v4374_v53   ;;  %v9156_v52 = vadd.f32 %v8929_v61, %v324_v28 }
  0x8d   : > { %v392_v50 = vmax.f32 %v9156_v52, 0.0 }
  0x8e   : > { %v452_v18 = vpop.permute.xlu1 %451  ;;  %v442_v19 = vpop.permute.xlu0 %441 }
  0x8f   : > { %4499 = vperm.xlu1 %8451, %v4377_v2   ;;  %4494 = vperm.xlu0 %8450, %v4376_v3   ;;  %v601_v34 = vmul.f32 %v452_v18, %v377_v47  ;;  %v599_v39 = vmul.f32 %v442_v19, %v375_v48  ;;  %v7169_v48 = vld [vmem:[%s8909_s12 + $0x50] sm:$0xff]   ;;  %v7170_v18 = vld [vmem:[%s8909_s12 + $0x58] sm:$0xff]   ;;  %v326_v19 = vmul.f32 %v6920_v59, %v8924_v60 }
  0x90   : > { %v6924_v5 = vunpack.c.h.bf16 %v7169_v48 }
  0x92   : > { %v457_v35 = vpop.permute.xlu1 %456  ;;  %v447_v38 = vpop.permute.xlu0 %446  ;;  %v328_v54 = vmul.f32 %v6924_v5, %v8924_v60 }
  0x93   : > { %v602_v47 = vmul.f32 %v457_v35, %v378_v51  ;;  %v600_v53 = vmul.f32 %v447_v38, %v376_v63  ;;  %4509 = vperm.xlu1 %8451, %v4379_v20   ;;  %4504 = vperm.xlu0 %8450, %v4378_v21   ;;  %v4383_v51 = vld [vmem:[%s10587_s2 + $0xf3] sm:$0xff]  ;;  %v389_v63 = vmax.f32 %v9153_v45, 0.0  ;;  %v325_v21 = vmul.f32 %v6919_v40, %v8924_v60 }
  0x94   : > { %v9195_v35 = vadd.f32 %v8929_v61, %v323_v17  ;;  %v9198_v38 = vadd.f32 %v8929_v61, %v326_v19  ;;  %v9241_v4 = vadd.f32 %v8929_v61, %v328_v54 }
  0x95   : > { %v6953_v2 = vpack.c.bf16 %v602_v47, %v601_v34  ;;  %v6948_v3 = vpack.c.bf16 %v600_v53, %v599_v39  ;;  %v9201_v47 = vadd.f32 %v8929_v61, %v325_v21 }
  0x96   : > { %v467_v10 = vpop.permute.xlu1 %466  ;;  %v462_v44 = vpop.permute.xlu0 %461  ;;  %v394_v46 = vmax.f32 %v9198_v38, 0.0 }
  0x97   : > { %7175 = vst [vmem:[#allocation2 + $0x8] sm:$0xff] %v6953_v2   ;;  %6949 = vst [vmem:[#allocation2] sm:$0xff] %v6948_v3   ;;  %v604_v11 = vmul.f32 %v467_v10, %v380_v0  ;;  %v603_v14 = vmul.f32 %v462_v44, %v379_v15  ;;  %4519 = vperm.xlu1 %8451, %v4381_v41   ;;  %4514 = vperm.xlu0 %8450, %v4380_v42   ;;  %v4384_v0 = vld [vmem:[%s10587_s2 + $0xfb] sm:$0xff]  ;;  %v6923_v15 = vunpack.c.l.bf16 %v7169_v48 }
  0x98   : > { %v6928_v41 = vunpack.c.h.bf16 %v7170_v18  ;;  %v6927_v42 = vunpack.c.l.bf16 %v7170_v18  ;;  %v391_v44 = vmax.f32 %v9195_v35, 0.0  ;;  %v393_v18 = vmax.f32 %v9201_v47, 0.0 }
  0x99   : > { %v6958_v20 = vpack.c.bf16 %v604_v11, %v603_v14  ;;  %v327_v59 = vmul.f32 %v6923_v15, %v8924_v60 }
  0x9a   : > { %v477_v25 = vpop.permute.xlu1 %476  ;;  %v472_v28 = vpop.permute.xlu0 %471 }
  0x9b   : > { %7176 = vst [vmem:[#allocation2 + $0x10] sm:$0xff] %v6958_v20   ;;  %v606_v29 = vmul.f32 %v477_v25, %v382_v16  ;;  %v605_v34 = vmul.f32 %v472_v28, %v381_v30  ;;  %4529 = vperm.xlu1 %8451, %v4383_v51   ;;  %4524 = vperm.xlu0 %8450, %v4382_v55   ;;  %v4385_v51 = vld [vmem:[%s10587_s2 + $0x103] sm:$0xff]  ;;  %v6932_v28 = vunpack.c.h.bf16 %v9204_v8 }
  0x9c   : > { %v329_v55 = vmul.f32 %v6927_v42, %v8924_v60  ;;  %v4386_v42 = vld [vmem:[%s10587_s2 + $0x10b] sm:$0xff] }
  0x9d   : > { %v6963_v39 = vpack.c.bf16 %v606_v29, %v605_v34 }
  0x9e   : > { %v487_v16 = vpop.permute.xlu1 %486  ;;  %v482_v22 = vpop.permute.xlu0 %481  ;;  %v979_v30 = vld [vmem:[#allocation2] sm:$0xf]  ;;  %v980_v53 = vld [vmem:[#allocation2 + $0x4] sm:$0xf]  ;;  %v8468_v48 = vld [vmem:[#allocation2 + $0x8] sm:$0xff]  }
  0x9f   : > { %7177 = vst [vmem:[#allocation2 + $0x18] sm:$0xff] %v6963_v39   ;;  %v608_v2 = vmul.f32 %v487_v16, %v384_v43  ;;  %v607_v3 = vmul.f32 %v482_v22, %v383_v62  ;;  %6087 = vperm.xlu1 %8451, %v6081_v56   ;;  %4534 = vperm.xlu0 %8450, %v4384_v0   ;;  %v1711_v10 = vld [vmem:[#allocation2] sm:$0xe]  ;;  %v1734_v14 = vrot.slane %v8468_v48, 1  ;;  %v1137_v25 = vshll.u32 %v8468_v48, 16 }
  0xa0   : > { %v9212_v40 = vcombine.low %v979_v30, %v980_v53  ;;  %v6359_v43 = vcombine.low %v1711_v10, %v980_v53  ;;  %v330_v62 = vmul.f32 %v6928_v41, %v8924_v60  ;;  %v6931_v56 = vunpack.c.l.bf16 %v9204_v8 }
  0xa1   : > { %v6968_v11 = vpack.c.bf16 %v608_v2, %v607_v3  ;;  %v1141_v39 = vshrl.u32 %v8468_v48, 16  ;;  %v6084_v3 = vld [vmem:[%s10587_s2 + $0x12b] sm:$0xff]  ;;  %v9255_v48 = vadd.f32 %v8929_v61, %v329_v55 }
  0xa2   : > { %v1132_v17 = vshll.u32 %v9212_v40, 16  ;;  %v497_v19 = vpop.permute.xlu1 %496  ;;  %v492_v20 = vpop.permute.xlu0 %491  ;;  %v1733_v21 = vrot.slane %v6359_v43, 1  ;;  %v1130_v15 = vshrl.u32 %v9212_v40, 16  ;;  %v8471_v34 = vld [vmem:[#allocation2 + $0x10] sm:$0xff]   ;;  %v9252_v54 = vadd.f32 %v8929_v61, %v330_v62  ;;  %v8475_v62 = vld [vmem:[%s10588_s3 + $0xc8] sm:$0xff]  }
  0xa3   : > { %7178 = vst [vmem:[#allocation2 + $0x20] sm:$0xff] %v6968_v11   ;;  %v610_v0 = vmul.f32 %v497_v19, %v386_v1  ;;  %v609_v5 = vmul.f32 %v492_v20, %v385_v23  ;;  %4539 = vperm.xlu1 %8451, %v4385_v51   ;;  %6092 = vperm.xlu0 %8450, %v6082_v32   ;;  %v1139_v1 = vrot.slane %v1137_v25, 1  ;;  %v1736_v16 = vrot.slane %v8471_v34, 1  ;;  %v8478_v19 = vld [vmem:[%s10588_s3 + $0x8] sm:$0xff]  }
  0xa4   : > { %v1134_v29 = vrot.slane %v1132_v17, 1  ;;  %v1735_v41 = vsel %vm1732_vm0, %v1733_v21, %v1734_v14  ;;  %v1145_v22 = vshll.u32 %v8471_v34, 16  ;;  %v9249_v51 = vadd.f32 %v8929_v61, %v327_v59 }
  0xa5   : > { %v6973_v23 = vpack.c.bf16 %v610_v0, %v609_v5  ;;  %7635 = vmatprep.mubr.bf16.mxu0 %v1735_v41  ;;  %v1143_v2 = vor.u32 %v1141_v39, %v1139_v1  ;;  %v1737_v61 = vsel %vm1732_vm0, %v1734_v14, %v1736_v16  ;;  %v1149_v17 = vshrl.u32 %v8471_v34, 16  ;;  %v8666_v14 = vld [vmem:[%s10588_s3 + $0xc0] sm:$0xff]  }
  0xa6   : > { %v1135_v8 = vor.u32 %v1134_v29, %v1130_v15  ;;  %v507_v30 = vpop.permute.xlu1 %506  ;;  %v502_v53 = vpop.permute.xlu0 %501  ;;  %v9246_v10 = vld [vmem:[#allocation2 + $0x18] sm:$0xff]   ;;  %v1147_v59 = vrot.slane %v1145_v22, 1  ;;  %7636 = vmatmul.mubr.bf16.vlgmr.msra.gmra.mrb[0].mxu0 %v1737_v61  ;;  %v396_v20 = vmax.f32 %v9241_v4, 0.0  ;;  %v332_v21 = vmul.f32 %v6932_v28, %v8924_v60  ;;  %v9286_v41 = vld [vmem:[%s10586_s1] ss:$0 sm:$0xff] }
  0xa7   : > { %7179 = vst [vmem:[#allocation2 + $0x28] sm:$0xff] %v6973_v23   ;;  %v612_v32 = vmul.f32 %v507_v30, %v388_v24  ;;  %v611_v43 = vmul.f32 %v502_v53, %v387_v57  ;;  %4544 = vperm.xlu1 %8451, %v4386_v42   ;;  %6097 = vperm.xlu0 %8450, %v6083_v49   ;;  %v1738_v55 = vrot.slane %v9246_v10, 1  ;;  %v1153_v9 = vshll.u32 %v9246_v10, 16  ;;  %v9269_v24 = vld [vmem:[%s8909_s12 + $0x68] sm:$0xff]   ;;  %v8668_v49 = vld [vmem:[%s10588_s3] sm:$0xff]   ;;  %v8483_v23 = vld [vmem:[%s10588_s3 + $0x10] sm:$0xff]  }
  0xa8   : > { %v1140_v11 = vsel %vm1128_vm1, %v1135_v8, %v1139_v1  ;;  %v1148_v57 = vsel %vm1128_vm1, %v1143_v2, %v1147_v59  ;;  %7668 = vmatpush3.bf16.msra.mxu0 %v8666_v14  ;;  %v1151_v15 = vor.u32 %v1149_v17, %v1147_v59  ;;  %v331_v60 = vmul.f32 %v9286_v41, %v6931_v56  ;;  %v8477_v1 = vld [vmem:[%s10588_s3 + $0xd0] sm:$0xff]  }
  0xa9   : > { %7539 = vmatprep.mubr.bf16.mxu1 %v1140_v11  ;;  %v6978_v31 = vpack.c.bf16 %v612_v32, %v611_v43  ;;  %v1739_v5 = vsel %vm1732_vm0, %v1736_v16, %v1738_v55  ;;  %v1155_v29 = vrot.slane %v1153_v9, 1  ;;  %v395_v39 = vmax.f32 %v9249_v51, 0.0  ;;  %7669 = vmatprep.subr.bf16.mxu0 %v8475_v62  ;;  %v8480_v16 = vld [vmem:[%s10588_s3 + $0xd8] sm:$0xff]   ;;  %v9331_v9 = vld [vmem:[%s8909_s12 + $0x70] sm:$0xff]  }
  0xaa   : > { %v517_v25 = vpop.permute.xlu1 %516  ;;  %v512_v0 = vpop.permute.xlu0 %511  ;;  %7540 = vmatmul.mubr.bf16.vlgmr.msra.gmra.mrb[0].mxu1 %v1148_v57  ;;  %v9281_v34 = vld [vmem:[#allocation2 + $0x20] sm:$0xff]   ;;  %v6936_v56 = vunpack.c.h.bf16 %v9269_v24  ;;  %7639 = vmatprep.mubr.bf16.mxu0 %v1739_v5  ;;  %v398_v22 = vmax.f32 %v9252_v54, 0.0  ;;  %v397_v30 = vmax.f32 %v9255_v48, 0.0  ;;  %v6935_v53 = vunpack.c.l.bf16 %v9269_v24 }
  0xab   : > { %7180 = vst [vmem:[#allocation2 + $0x30] sm:$0xff] %v6978_v31   ;;  %v614_v28 = vmul.f32 %v517_v25, %v390_v58  ;;  %v613_v42 = vmul.f32 %v512_v0, %v389_v63  ;;  %7572 = vmatpush3.bf16.msra.mxu1 %v8668_v49  ;;  %6102 = vperm.xlu0 %8450, %v6084_v3   ;;  %v1740_v45 = vrot.slane %v9281_v34, 1  ;;  %v1157_v58 = vshrl.u32 %v9246_v10, 16  ;;  %v8488_v31 = vld [vmem:[%s10588_s3 + $0x18] sm:$0xff]   ;;  %v8482_v49 = vld [vmem:[%s10588_s3 + $0xe0] sm:$0xff]  }
  0xac   : > { %v1156_v33 = vsel %vm1128_vm1, %v1151_v15, %v1155_v29  ;;  %v1161_v63 = vshll.u32 %v9281_v34, 16  ;;  %7573 = vmatprep.subr.bf16.mxu1 %v8478_v19  ;;  %7670 = vmatpush3.bf16.msra.mxu0 %v8475_v62  ;;  %v1165_v62 = vshrl.u32 %v9281_v34, 16  ;;  %v334_v57 = vmul.f32 %v9286_v41, %v6936_v56 }
  0xad   : > { %v6983_v8 = vpack.c.bf16 %v614_v28, %v613_v42  ;;  %7543 = vmatprep.mubr.bf16.mxu1 %v1156_v33  ;;  %v1741_v10 = vsel %vm1732_vm0, %v1738_v55, %v1740_v45  ;;  %v1159_v32 = vor.u32 %v1157_v58, %v1155_v29  ;;  %7671 = vmatprep.subr.bf16.mxu0 %v8477_v1  ;;  %v9325_v55 = vld [vmem:[%s10586_s1 + $0x1] ss:$0 sm:$0xff]  ;;  %v6939_v56 = vunpack.c.l.bf16 %v9331_v9 }
  0xae   : > { %v527_v2 = vpop.permute.xlu1 %526  ;;  %v522_v3 = vpop.permute.xlu0 %521  ;;  %v1163_v43 = vrot.slane %v1161_v63, 1  ;;  %v9315_v11 = vld [vmem:[#allocation2 + $0x28] sm:$0xff]   ;;  %v9328_v17 = vadd.f32 %v9325_v55, %v332_v21  ;;  %7640 = vmatmul.mubr.bf16.gmra.mrb[4].mxu0 %v1741_v10  ;;  %v9337_v24 = vadd.f32 %v9325_v55, %v331_v60  ;;  %v7174_v21 = vld [vmem:[%s8909_s12 + $0x78] sm:$0xff]   ;;  %v6940_v60 = vunpack.c.h.bf16 %v9331_v9  ;;  %v8494_v63 = vld [vmem:[%s10588_s3 + $0x20] sm:$0xff]  }
  0xaf   : > { %7181 = vst [vmem:[#allocation2 + $0x38] sm:$0xff] %v6983_v8   ;;  %v616_v59 = vmul.f32 %v527_v2, %v392_v50  ;;  %v615_v61 = vmul.f32 %v522_v3, %v391_v44  ;;  %7574 = vmatpush3.bf16.msra.mxu1 %v8478_v19  ;;  %v1742_v50 = vrot.slane %v9315_v11, 1  ;;  %v1169_v35 = vshll.u32 %v9315_v11, 16 }
  0xb0   : > { %v1164_v52 = vsel %vm1128_vm1, %v1159_v32, %v1163_v43  ;;  %7575 = vmatprep.subr.bf16.mxu1 %v8483_v23  ;;  %v333_v19 = vmul.f32 %v9286_v41, %v6935_v53  ;;  %7672 = vmatpush3.bf16.msra.mxu0 %v8477_v1  ;;  %v1167_v5 = vor.u32 %v1165_v62, %v1163_v43  ;;  %v400_v1 = vmax.f32 %v9328_v17, 0.0 }
  0xb1   : > { %v6988_v44 = vpack.c.bf16 %v616_v59, %v615_v61  ;;  %v1743_v0 = vsel %vm1732_vm0, %v1740_v45, %v1742_v50  ;;  %v1171_v15 = vrot.slane %v1169_v35, 1  ;;  %7673 = vmatprep.subr.bf16.mxu0 %v8480_v16  ;;  %v1173_v38 = vshrl.u32 %v9315_v11, 16  ;;  %v2023_v59 = vld [vmem:[#allocation2 + $0x8] sm:$0xe]  ;;  %v2024_v61 = vld [vmem:[#allocation2 + $0xc] sm:$0xf] }
  0xb2   : > { %v537_v14 = vpop.permute.xlu1 %536  ;;  %v532_v25 = vpop.permute.xlu0 %531  ;;  %7544 = vmatmul.mubr.bf16.gmra.mrb[4].mxu1 %v1164_v52  ;;  %v9346_v29 = vld [vmem:[#allocation2 + $0x30] sm:$0xff]   ;;  %7643 = vmatprep.mubr.bf16.mxu0 %v1743_v0  ;;  %v9368_v58 = vadd.f32 %v9325_v55, %v334_v57  ;;  %v6944_v8 = vunpack.c.h.bf16 %v7174_v21  ;;  %v6943_v53 = vunpack.c.l.bf16 %v7174_v21  ;;  %v9377_v62 = vadd.f32 %v9325_v55, %v333_v19  ;;  %v9386_v35 = vld [vmem:[%s8909_s12 + $0x80] sm:$0xff]   ;;  %s10486_s12 = scalar_lea.vmem %s10589_s4, %s8440_s20 }
  0xb3   : > { %7182 = vst [vmem:[#allocation2 + $0x40] sm:$0xff] %v6988_v44   ;;  %v618_v28 = vmul.f32 %v537_v14, %v394_v46  ;;  %v617_v42 = vmul.f32 %v532_v25, %v393_v18  ;;  %v1172_v33 = vsel %vm1128_vm1, %v1167_v5, %v1171_v15  ;;  %v1744_v45 = vrot.slane %v9346_v29, 1  ;;  %7576 = vmatpush3.bf16.msra.mxu1 %v8483_v23  ;;  %v9365_v18 = vld [vmem:[%s10588_s3 + $0xe8] sm:$0xff]  }
  0xb4   : > { %v1177_v46 = vshll.u32 %v9346_v29, 16  ;;  %7547 = vmatprep.mubr.bf16.mxu1 %v1172_v33  ;;  %7577 = vmatprep.subr.bf16.mxu1 %v8488_v31  ;;  %v1175_v10 = vor.u32 %v1173_v38, %v1171_v15  ;;  %v1181_v52 = vshrl.u32 %v9346_v29, 16  ;;  %v335_v4 = vmul.f32 %v9286_v41, %v6939_v56  ;;  %v8500_v25 = vld [vmem:[%s10588_s3 + $0x28] sm:$0xff]  }
  0xb5   : > { %v6993_v47 = vpack.c.bf16 %v618_v28, %v617_v42  ;;  %7674 = vmatpush3.bf16.msra.mxu0 %v8480_v16  ;;  %v1745_v3 = vsel %vm1732_vm0, %v1742_v50, %v1744_v45  ;;  %v336_v50 = vmul.f32 %v9286_v41, %v6940_v60  ;;  %v399_v51 = vmax.f32 %v9337_v24, 0.0 }
  0xb6   : > { %v547_v23 = vpop.permute.xlu1 %546  ;;  %v542_v2 = vpop.permute.xlu0 %541  ;;  %v1179_v32 = vrot.slane %v1177_v46, 1  ;;  %v9374_v43 = vld [vmem:[#allocation2 + $0x38] sm:$0xff]   ;;  %7675 = vmatprep.subr.bf16.mxu0 %v8482_v49  ;;  %7644 = vmatmul.mubr.bf16.gmra.mrb[8].mxu0 %v1745_v3  ;;  %v338_v21 = vmul.f32 %v9286_v41, %v6944_v8  ;;  %v9397_v14 = vmul.f32 %v9286_v41, %v6943_v53  ;;  %v7028_v28 = vunpack.c.h.bf16 %v9386_v35 }
  0xb7   : > { %7183 = vst [vmem:[#allocation2 + $0x48] sm:$0xff] %v6993_v47   ;;  %v620_v9 = vmul.f32 %v547_v23, %v396_v20  ;;  %v619_v16 = vmul.f32 %v542_v2, %v395_v39  ;;  %v1746_v57 = vrot.slane %v9374_v43, 1  ;;  %v1185_v19 = vshll.u32 %v9374_v43, 16  ;;  %7578 = vmatpush3.bf16.msra.mxu1 %v8488_v31  ;;  %v9393_v39 = vld [vmem:[#allocation2 + $0x10] sm:$0xff]  }
  0xb8   : > { %v1180_v44 = vsel %vm1128_vm1, %v1175_v10, %v1179_v32  ;;  %7579 = vmatprep.subr.bf16.mxu1 %v8494_v63  ;;  %v1183_v15 = vor.u32 %v1181_v52, %v1179_v32  ;;  %v9414_v33 = vcombine.low %v2023_v59, %v2024_v61  ;;  %v1189_v54 = vshrl.u32 %v9374_v43, 16 }
  0xb9   : > { %v6998_v20 = vpack.c.bf16 %v620_v9, %v619_v16  ;;  %7676 = vmatpush3.bf16.msra.mxu0 %v8482_v49  ;;  %v1747_v5 = vsel %vm1732_vm0, %v1744_v45, %v1746_v57  ;;  %v1187_v24 = vrot.slane %v1185_v19, 1  ;;  %v8487_v49 = vld [vmem:[%s10588_s3 + $0xf0] sm:$0xff]   ;;  %v402_v45 = vmax.f32 %v9368_v58, 0.0 }
  0xba   : > { %v557_v31 = vpop.permute.xlu1 %556  ;;  %v552_v0 = vpop.permute.xlu0 %551  ;;  %7548 = vmatmul.mubr.bf16.gmra.mrb[8].mxu1 %v1180_v44  ;;  %v9403_v60 = vld [vmem:[#allocation2 + $0x40] sm:$0xff]   ;;  %7647 = vmatprep.mubr.bf16.mxu0 %v1747_v5  ;;  %v401_v47 = vmax.f32 %v9377_v62, 0.0  ;;  %v9424_v8 = vadd.f32 %v9325_v55, %v336_v50  ;;  %v8506_v58 = vld [vmem:[%s10588_s3 + $0x30] sm:$0xff]   ;;  %v7027_v32 = vunpack.c.l.bf16 %v9386_v35  ;;  %v8491_v62 = vld [vmem:[%s10588_s3 + $0xf8] sm:$0xff]   ;;  %v371_v9 = vadd.f32 %v9325_v55, %v335_v4 }
  0xbb   : > { %7184 = vst [vmem:[#allocation2 + $0x50] sm:$0xff] %v6998_v20   ;;  %v622_v42 = vmul.f32 %v557_v31, %v398_v22  ;;  %v621_v56 = vmul.f32 %v552_v0, %v397_v30  ;;  %7677 = vmatprep.subr.bf16.mxu0 %v9365_v18  ;;  %v1188_v38 = vsel %vm1128_vm1, %v1183_v15, %v1187_v24  ;;  %v1748_v46 = vrot.slane %v9403_v60, 1  ;;  %v9446_v35 = vld [vmem:[#allocation2 + $0x18] sm:$0xff]   ;;  %v9458_v4 = vld [vmem:[#allocation2 + $0x20] sm:$0xff]  }
  0xbc   : > { %v1193_v48 = vshll.u32 %v9403_v60, 16  ;;  %7580 = vmatpush3.bf16.msra.mxu1 %v8494_v63  ;;  %7551 = vmatprep.mubr.bf16.mxu1 %v1188_v38  ;;  %v2157_v30 = vrot.slane %v9393_v39, 1  ;;  %v1191_v2 = vor.u32 %v1189_v54, %v1187_v24  ;;  %v1197_v52 = vshrl.u32 %v9403_v60, 16 }
  0xbd   : > { %v7003_v22 = vpack.c.bf16 %v622_v42, %v621_v56  ;;  %7581 = vmatprep.subr.bf16.mxu1 %v8500_v25  ;;  %7678 = vmatpush3.bf16.msra.mxu0 %v9365_v18  ;;  %v1749_v63 = vsel %vm1732_vm0, %v1746_v57, %v1748_v46  ;;  %v2156_v18 = vrot.slane %v9414_v33, 1  ;;  %v9449_v17 = vadd.f32 %v9325_v55, %v338_v21  ;;  %v8498_v56 = vld [vmem:[%s10588_s3 + $0x100] sm:$0xff]  }
  0xbe   : > { %v567_v53 = vpop.permute.xlu1 %566  ;;  %v562_v23 = vpop.permute.xlu0 %561  ;;  %v1195_v3 = vrot.slane %v1193_v48, 1  ;;  %v9433_v10 = vld [vmem:[#allocation2 + $0x48] sm:$0xff]   ;;  %7679 = vmatprep.subr.bf16.mxu0 %v8487_v49  ;;  %7648 = vmatmul.mubr.bf16.gmra.mrb[12].mxu0 %v1749_v63  ;;  %v404_v19 = vmax.f32 %v9424_v8, 0.0  ;;  %v814_v20 = vmul.f32 %v9286_v41, %v7028_v28  ;;  %v373_v0 = vadd.f32 %v9325_v55, %v9397_v14 }
  0xbf   : > { %7185 = vst [vmem:[#allocation2 + $0x58] sm:$0xff] %v7003_v22   ;;  %v624_v59 = vmul.f32 %v567_v53, %v400_v1  ;;  %v623_v61 = vmul.f32 %v562_v23, %v399_v51  ;;  %v1201_v50 = vshll.u32 %v9433_v10, 16  ;;  %v8512_v1 = vld [vmem:[%s10588_s3 + $0x38] sm:$0xff]   ;;  %v2158_v57 = vsel %vm1732_vm0, %v2156_v18, %v2157_v30 }
  0xc0   : > { %v1196_v16 = vsel %vm1128_vm1, %v1191_v2, %v1195_v3  ;;  %7582 = vmatpush3.bf16.msra.mxu1 %v8500_v25  ;;  %7683 = vmatprep.mubr.bf16.mxu0 %v2158_v57  ;;  %v1199_v25 = vor.u32 %v1197_v52, %v1195_v3  ;;  %v403_v42 = vmax.f32 %v371_v9, 0.0  ;;  %v813_v28 = vmul.f32 %v9286_v41, %v7027_v32 }
  0xc1   : > { %v7008_v44 = vpack.c.bf16 %v624_v59, %v623_v61  ;;  %7583 = vmatprep.subr.bf16.mxu1 %v8506_v58  ;;  %7680 = vmatpush3.bf16.msra.mxu0 %v8487_v49  ;;  %v1203_v31 = vrot.slane %v1201_v50, 1  ;;  %v2159_v38 = vrot.slane %v9446_v35, 1  ;;  %v1205_v14 = vshrl.u32 %v9433_v10, 16  ;;  %v9482_v61 = vld [vmem:[#allocation2 + $0x28] sm:$0xff]  }
  0xc2   : > { %v577_v51 = vpop.permute.xlu1 %576  ;;  %v572_v21 = vpop.permute.xlu0 %571  ;;  %v9463_v5 = vld [vmem:[#allocation2 + $0x50] sm:$0xff]   ;;  %7552 = vmatmul.mubr.bf16.gmra.mrb[12].mxu1 %v1196_v16  ;;  %7681 = vmatprep.subr.bf16.mxu0 %v8491_v62  ;;  %v2161_v48 = vrot.slane %v9458_v4, 1  ;;  %v406_v22 = vmax.f32 %v9449_v17, 0.0  ;;  %v825_v41 = vadd.f32 %v9325_v55, %v814_v20  ;;  %v405_v32 = vmax.f32 %v373_v0, 0.0 }
  0xc3   : > { %7186 = vst [vmem:[#allocation2 + $0x60] sm:$0xff] %v7008_v44   ;;  %v626_v15 = vmul.f32 %v577_v51, %v402_v45  ;;  %v625_v24 = vmul.f32 %v572_v21, %v401_v47  ;;  %v1204_v49 = vsel %vm1128_vm1, %v1199_v25, %v1203_v31  ;;  %v1209_v54 = vshll.u32 %v9463_v5, 16  ;;  %v8504_v47 = vld [vmem:[%s10588_s3 + $0x108] sm:$0xff]   ;;  %v9493_v17 = vld [vmem:[#allocation2 + $0x30] sm:$0xff]  }
  0xc4   : > { %7584 = vmatpush3.bf16.msra.mxu1 %v8506_v58  ;;  %7555 = vmatprep.mubr.bf16.mxu1 %v1204_v49  ;;  %v1207_v23 = vor.u32 %v1205_v14, %v1203_v31  ;;  %v824_v59 = vadd.f32 %v9325_v55, %v813_v28  ;;  %v2160_v18 = vsel %vm1732_vm0, %v2157_v30, %v2159_v38  ;;  %v1213_v9 = vshrl.u32 %v9463_v5, 16  ;;  %v9498_v30 = vld [vmem:[%s10588_s3 + $0x80] sm:$0xff]   ;;  %v8510_v31 = vld [vmem:[%s10588_s3 + $0x110] sm:$0xff]  }
  0xc5   : > { %v7013_v45 = vpack.c.bf16 %v626_v15, %v625_v24  ;;  %7585 = vmatprep.subr.bf16.mxu1 %v8512_v1  ;;  %7682 = vmatpush3.bf16.msra.mxu0 %v8491_v62  ;;  %v1211_v63 = vrot.slane %v1209_v54, 1  ;;  %v2162_v55 = vsel %vm1732_vm0, %v2159_v38, %v2161_v48  ;;  %v836_v50 = vmax.f32 %v825_v41, 0.0  ;;  %v8515_v38 = vld [vmem:[%s10588_s3 + $0x118] sm:$0xff]  }
  0xc6   : > { %v587_v8 = vpop.permute.xlu1 %586  ;;  %v582_v53 = vpop.permute.xlu0 %581  ;;  %v9479_v2 = vld [vmem:[#allocation2 + $0x58] sm:$0xff]   ;;  %7715 = vmatprep.subr.bf16.mxu0 %v8498_v56  ;;  %v835_v25 = vmax.f32 %v824_v59, 0.0  ;;  %v2163_v15 = vrot.slane %v9482_v61, 1  ;;  %v838_v49 = vmax.f32 %v8940_v6, 0.0 }
  0xc7   : > { %7187 = vst [vmem:[#allocation2 + $0x68] sm:$0xff] %v7013_v45   ;;  %v628_v58 = vmul.f32 %v587_v8, %v404_v19  ;;  %v627_v3 = vmul.f32 %v582_v53, %v403_v42  ;;  %v1212_v62 = vsel %vm1128_vm1, %v1207_v23, %v1211_v63  ;;  %v1217_v16 = vshll.u32 %v9479_v2, 16 }
  0xc8   : > { %7586 = vmatpush3.bf16.msra.mxu1 %v8512_v1  ;;  %7684 = vmatmul.mubr.bf16.vlgmr.msra.gmra.mrb[0].mxu0 %v2160_v18  ;;  %v1215_v1 = vor.u32 %v1213_v9, %v1211_v63  ;;  %v1221_v24 = vshrl.u32 %v9479_v2, 16  ;;  %v837_v23 = vmax.f32 %v8943_v7, 0.0  ;;  %v9518_v63 = vld [vmem:[#allocation2 + $0x38] sm:$0xff]   ;;  %v2164_v6 = vsel %vm1732_vm0, %v2161_v48, %v2163_v15  ;;  %v9528_v7 = vld [vmem:[#allocation2 + $0x40] sm:$0xff]  }
  0xc9   : > { %v7018_v52 = vpack.c.bf16 %v628_v58, %v627_v3  ;;  %8135 = vmatprep.subr.bf16.mxu1 %v9498_v30  ;;  %7687 = vmatprep.mubr.bf16.mxu0 %v2162_v55  ;;  %v1219_v19 = vrot.slane %v1217_v16, 1  ;;  %v840_v18 = vmax.f32 %v8952_v12, 0.0  ;;  %v8518_v12 = vld [vmem:[%s10588_s3 + $0x120] sm:$0xff]  }
  0xca   : > { %v597_v44 = vpop.permute.xlu1 %596  ;;  %v592_v57 = vpop.permute.xlu0 %591  ;;  %7716 = vmatpush3.bf16.msra.mxu0 %v8498_v56  ;;  %v9501_v20 = vld [vmem:[#allocation2 + $0x60] sm:$0xff]   ;;  %7556 = vmatmul.mubr.bf16.gmra.mrb[16].mxu1 %v1212_v62  ;;  %v2165_v56 = vrot.slane %v9493_v17, 1 }
  0xcb   : > { %7188 = vst [vmem:[#allocation2 + $0x70] sm:$0xff] %v7018_v52   ;;  %v630_v51 = vmul.f32 %v597_v44, %v406_v22  ;;  %v629_v21 = vmul.f32 %v592_v57, %v405_v32  ;;  %7717 = vmatprep.subr.bf16.mxu0 %v8504_v47  ;;  %v1220_v0 = vsel %vm1128_vm1, %v1215_v1, %v1219_v19  ;;  %v1225_v42 = vshll.u32 %v9501_v20, 16 }
  0xcc   : > { %7559 = vmatprep.mubr.bf16.mxu1 %v1220_v0  ;;  %v1223_v45 = vor.u32 %v1221_v24, %v1219_v19  ;;  %v1229_v3 = vshrl.u32 %v9501_v20, 16  ;;  %v839_v44 = vmax.f32 %v8955_v13, 0.0  ;;  %v2167_v1 = vrot.slane %v9518_v63, 1 }
  0xcd   : > { %v7023_v28 = vpack.c.bf16 %v630_v51, %v629_v21  ;;  %v1227_v22 = vrot.slane %v1225_v42, 1 }
  0xce   : > { %v865_v14 = vpop.permute.xlu1 %864  ;;  %v860_v54 = vpop.permute.xlu0 %859  ;;  %v9515_v41 = vld [vmem:[#allocation2 + $0x68] sm:$0xff]   ;;  %7718 = vmatpush3.bf16.msra.mxu0 %v8504_v47  ;;  %v2166_v47 = vsel %vm1732_vm0, %v2163_v15, %v2165_v56 }
  0xcf   : > { %7189 = vst [vmem:[#allocation2 + $0x78] sm:$0xff] %v7023_v28   ;;  %v913_v8 = vmul.f32 %v865_v14, %v836_v50  ;;  %v912_v53 = vmul.f32 %v860_v54, %v835_v25  ;;  %7719 = vmatprep.subr.bf16.mxu0 %v8510_v31  ;;  %v1228_v58 = vsel %vm1128_vm1, %v1223_v45, %v1227_v22  ;;  %v1233_v32 = vshll.u32 %v9515_v41, 16  ;;  %v8521_v54 = vld [vmem:[%s10588_s3 + $0x128] sm:$0xff]  }
  0xd0   : > { %7688 = vmatmul.mubr.bf16.gmra.mrb[4].mxu0 %v2164_v6  ;;  %v1231_v16 = vor.u32 %v1229_v3, %v1227_v22  ;;  %v1237_v19 = vshrl.u32 %v9515_v41, 16  ;;  %v2169_v25 = vrot.slane %v9528_v7, 1  ;;  %v841_v14 = vmax.f32 %v8970_v27, 0.0  ;;  %v9556_v6 = vld [vmem:[#allocation2 + $0x50] sm:$0xff]  }
  0xd1   : > { %v7048_v59 = vpack.c.bf16 %v913_v8, %v912_v53  ;;  %7691 = vmatprep.mubr.bf16.mxu0 %v2166_v47  ;;  %v1235_v52 = vrot.slane %v1233_v32, 1  ;;  %v2168_v45 = vsel %vm1732_vm0, %v2165_v56, %v2167_v1  ;;  %v9552_v53 = vld [vmem:[#allocation2 + $0x48] sm:$0xff]   ;;  %v844_v27 = vmax.f32 %v8985_v36, 0.0  ;;  %v8524_v36 = vld [vmem:[%s10588_s3 + $0x130] sm:$0xff]  }
  0xd2   : > { %v875_v62 = vpop.permute.xlu1 %874  ;;  %v870_v9 = vpop.permute.xlu0 %869  ;;  %v9530_v48 = vld [vmem:[#allocation2 + $0x70] sm:$0xff]   ;;  %7720 = vmatpush3.bf16.msra.mxu0 %v8510_v31  ;;  %7560 = vmatmul.mubr.bf16.gmra.mrb[20].mxu1 %v1228_v58  ;;  %v842_v31 = vmax.f32 %v8967_v26, 0.0 }
  0xd3   : > { %7195 = vst [vmem:[#allocation2 + $0x80] sm:$0xff] %v7048_v59   ;;  %v915_v55 = vmul.f32 %v875_v62, %v838_v49  ;;  %v914_v50 = vmul.f32 %v870_v9, %v837_v23  ;;  %7721 = vmatprep.subr.bf16.mxu0 %v8515_v38  ;;  %v1236_v57 = vsel %vm1128_vm1, %v1231_v16, %v1235_v52  ;;  %v1241_v51 = vshll.u32 %v9530_v48, 16 }
  0xd4   : > { %7563 = vmatprep.mubr.bf16.mxu1 %v1236_v57  ;;  %v1239_v15 = vor.u32 %v1237_v19, %v1235_v52  ;;  %v1245_v22 = vshrl.u32 %v9530_v48, 16  ;;  %v2170_v23 = vsel %vm1732_vm0, %v2167_v1, %v2169_v25  ;;  %v843_v62 = vmax.f32 %v8988_v37, 0.0 }
  0xd5   : > { %v7053_v21 = vpack.c.bf16 %v915_v55, %v914_v50  ;;  %v1243_v24 = vrot.slane %v1241_v51, 1  ;;  %v2171_v16 = vrot.slane %v9552_v53, 1 }
  0xd6   : > { %v885_v13 = vpop.permute.xlu1 %884  ;;  %v880_v0 = vpop.permute.xlu0 %879  ;;  %v9542_v42 = vld [vmem:[#allocation2 + $0x78] sm:$0xff]   ;;  %7722 = vmatpush3.bf16.msra.mxu0 %v8515_v38 }
  0xd7   : > { %7196 = vst [vmem:[#allocation2 + $0x88] sm:$0xff] %v7053_v21   ;;  %v917_v28 = vmul.f32 %v885_v13, %v840_v18  ;;  %v916_v49 = vmul.f32 %v880_v0, %v839_v44  ;;  %7723 = vmatprep.subr.bf16.mxu0 %v8518_v12  ;;  %v1244_v26 = vsel %vm1128_vm1, %v1239_v15, %v1243_v24  ;;  %v1249_v8 = vshll.u32 %v9542_v42, 16  ;;  %v8526_v21 = vld [vmem:[%s10588_s3 + $0x138] sm:$0xff]  }
  0xd8   : > { %7692 = vmatmul.mubr.bf16.gmra.mrb[8].mxu0 %v2168_v45  ;;  %v1247_v56 = vor.u32 %v1245_v22, %v1243_v24  ;;  %v1253_v52 = vshrl.u32 %v9542_v42, 16  ;;  %v2173_v44 = vrot.slane %v9556_v6, 1  ;;  %v9574_v0 = vld [vmem:[#allocation2 + $0x58] sm:$0xff]  }
  0xd9   : > { %v7058_v38 = vpack.c.bf16 %v917_v28, %v916_v49  ;;  %7695 = vmatprep.mubr.bf16.mxu0 %v2170_v23  ;;  %v1251_v32 = vrot.slane %v1249_v8, 1  ;;  %v9577_v28 = vld [vmem:[#allocation2 + $0x60] sm:$0xff]   ;;  %v9592_v8 = vld [vmem:[#allocation2 + $0x70] sm:$0xff]  }
  0xda   : > { %v895_v58 = vpop.permute.xlu1 %894  ;;  %v890_v3 = vpop.permute.xlu0 %889  ;;  %v9558_v59 = vld [vmem:[#allocation2 + $0x80] ss:$0 sps:$4 sm:$0x11]   ;;  %7724 = vmatpush3.bf16.msra.mxu0 %v8518_v12  ;;  %7564 = vmatmul.mubr.bf16.gmra.mrb[24].mxu1 %v1244_v26  ;;  %v2174_v24 = vsel %vm1732_vm0, %v2171_v16, %v2173_v44  ;;  %v9589_v26 = vld [vmem:[#allocation2 + $0x68] sm:$0xff]  }
  0xdb   : > { %7197 = vst [vmem:[#allocation2 + $0x90] sm:$0xff] %v7058_v38   ;;  %v919_v47 = vmul.f32 %v895_v58, %v842_v31  ;;  %v918_v18 = vmul.f32 %v890_v3, %v841_v14  ;;  %7725 = vmatprep.subr.bf16.mxu0 %v8521_v54  ;;  %v1252_v9 = vsel %vm1128_vm1, %v1247_v56, %v1251_v32  ;;  %v1257_v55 = vshll.u32 %v9558_v59, 16  ;;  %v8671_v38 = vld [vmem:[#allocation2 + $0x8] sm:$0xff]   ;;  %v9601_v56 = vld [vmem:[#allocation2 + $0x78] sm:$0xff]  }
  0xdc   : > { %7567 = vmatprep.mubr.bf16.mxu1 %v1252_v9  ;;  %v1255_v37 = vor.u32 %v1253_v52, %v1251_v32  ;;  %v2172_v31 = vsel %vm1732_vm0, %v2169_v25, %v2171_v16  ;;  %v9582_v25 = vld [vmem:[%s10588_s3 + $0x140] sm:$0xff]   ;;  %v2175_v14 = vrot.slane %v9574_v0, 1  ;;  %v2179_v23 = vrot.slane %v9589_v26, 1 }
  0xdd   : > { %v7063_v50 = vpack.c.bf16 %v919_v47, %v918_v18  ;;  %v1259_v1 = vrot.slane %v1257_v55, 1  ;;  %v2181_v58 = vrot.slane %v9592_v8, 1  ;;  %v9607_v47 = vld [vmem:[#allocation2 + $0x80] sm:$0xff]   ;;  %v2469_v18 = vshrl.u32 %v9414_v33, 16 }
  0xde   : > { %v905_v12 = vpop.permute.xlu1 %904  ;;  %v900_v57 = vpop.permute.xlu0 %899  ;;  %7726 = vmatpush3.bf16.msra.mxu0 %v8521_v54  ;;  %v2177_v54 = vrot.slane %v9577_v28, 1  ;;  %v2176_v45 = vsel %vm1732_vm0, %v2173_v44, %v2175_v14  ;;  %v2477_v9 = vshrl.u32 %v9393_v39, 16  ;;  %v2480_v16 = vshll.u32 %v9393_v39, 16 }
  0xdf   : > { %7198 = vst [vmem:[#allocation2 + $0x98] sm:$0xff] %v7063_v50   ;;  %v921_v19 = vmul.f32 %v905_v12, %v844_v27  ;;  %v920_v51 = vmul.f32 %v900_v57, %v843_v62  ;;  %7727 = vmatprep.subr.bf16.mxu0 %v8524_v36  ;;  %v1260_v13 = vsel %vm1128_vm1, %v1255_v37, %v1259_v1  ;;  %v8673_v27 = vld [vmem:[%s10588_s3 + $0x88] sm:$0xff]   ;;  %v8675_v62 = vld [vmem:[#allocation2 + $0x18] sm:$0xff]   ;;  %v2183_v52 = vrot.slane %v9601_v56, 1 }
  0xe0   : > { %7696 = vmatmul.mubr.bf16.gmra.mrb[12].mxu0 %v2172_v31  ;;  %v2178_v22 = vsel %vm1732_vm0, %v2175_v14, %v2177_v54  ;;  %v2180_v3 = vsel %vm1732_vm0, %v2177_v54, %v2179_v23  ;;  %v2182_v32 = vsel %vm1732_vm0, %v2179_v23, %v2181_v58  ;;  %v2185_v55 = vrot.slane %v9607_v47, 1  ;;  %v8676_v50 = vld [vmem:[%s10588_s3 + $0x98] sm:$0xff]   ;;  %v8525_v12 = vld [vmem:[#allocation2 + $0x88] ss:$0 sps:$4 sm:$0x11]  }
  0xe1   : > { %v7068_v15 = vpack.c.bf16 %v921_v19, %v920_v51  ;;  %7699 = vmatprep.mubr.bf16.mxu0 %v2174_v24  ;;  %v2471_v44 = vrot.slane %v2469_v18, 1  ;;  %v2482_v37 = vrot.slane %v2480_v16, 2  ;;  %v2184_v1 = vsel %vm1732_vm0, %v2181_v58, %v2183_v52  ;;  %v8677_v19 = vld [vmem:[%s10588_s3 + $0xa0] sm:$0xff]  }
  0xe2   : > { %v910_v49 = vpop.permute.xlu0 %909  ;;  %7728 = vmatpush3.bf16.msra.mxu0 %v8524_v36  ;;  %7568 = vmatmul.mubr.bf16.gmra.mrb[28].mxu1 %v1260_v13  ;;  %v2472_v36 = vshll.u32 %v9414_v33, 16  ;;  %v2479_v33 = vrot.slane %v2477_v9, 1  ;;  %v2186_v39 = vsel %vm1732_vm0, %v2183_v52, %v2185_v55  ;;  %v2489_v51 = vshll.u32 %v9446_v35, 16 }
  0xe3   : > { %7199 = vst [vmem:[#allocation2 + $0xa0] sm:$0xff] %v7068_v15   ;;  %7729 = vmatprep.subr.bf16.mxu0 %v8526_v21  ;;  %7587 = vmatprep.mubr.bf16.mxu1 %v9212_v40  ;;  %v8672_v40 = vld [vmem:[#allocation2 + $0x10] sm:$0xff]   ;;  %v2187_v31 = vrot.slane %v8525_v12, 1  ;;  %v10591_v49 = vrot.slane %v9528_v7, 2  ;;  %v2914_v14 = vrot.slane %v9552_v53, 2  ;;  %v2916_v54 = vrot.slane %v9556_v6, 2 }
  0xe4   : > { %v2474_v57 = vrot.slane %v2472_v36, 2  ;;  %v2483_v15 = vor.u32 %v2482_v37, %v2479_v33  ;;  %v2926_v18 = vrot.slane %v9601_v56, 2  ;;  %v2504_v37 = vshrl.u32 %v9482_v61, 16 }
  0xe5   : > { %v9646_v23 = vsel %vm2898_vm3, %v2914_v14, %v2916_v54 }
  0xe6   : > { %7730 = vmatpush3.bf16.msra.mxu0 %v8526_v21  ;;  %v9626_v21 = vld [vmem:[#allocation2 + $0x88] ss:$0 sps:$4 sm:$0x33]   ;;  %v2475_v13 = vor.u32 %v2474_v57, %v2471_v44 }
  0xe7   : > { %7763 = vmatprep.subr.bf16.mxu0 %v9582_v25  ;;  %v2930_v36 = vrot.slane %v9626_v21, 2 }
  0xe8   : > { %7700 = vmatmul.mubr.bf16.gmra.mrb[16].mxu0 %v2176_v45  ;;  %v2498_v45 = vshll.u32 %v9458_v4, 16  ;;  %v2484_v9 = vsel %vm2467_vm2, %v2475_v13, %v2483_v15  ;;  %v2506_v13 = vrot.slane %v2504_v37, 1  ;;  %v2543_v37 = vshll.u32 %v9552_v53, 16 }
  0xe9   : > { %7703 = vmatprep.mubr.bf16.mxu0 %v2178_v22  ;;  %v2918_v22 = vrot.slane %v9574_v0, 2 }
  0xea   : > { %7588 = vmatmul.mubr.bf16.vlgmr.msra.gmra.mrb[0].mxu1 %v8671_v38  ;;  %v2491_v38 = vrot.slane %v2489_v51, 2  ;;  %v2500_v52 = vrot.slane %v2498_v45, 2  ;;  %v8680_v51 = vld [vmem:[%s10588_s3 + $0xb8] sm:$0xff]   ;;  %v2522_v45 = vshrl.u32 %v9518_v63, 16 }
  0xeb   : > { %8143 = vmatpush3.bf16.msra.mxu1 %v9498_v30  ;;  %7591 = vmatprep.mubr.bf16.mxu1 %v8672_v40  ;;  %v8674_v30 = vld [vmem:[%s10588_s3 + $0x90] sm:$0xff]   ;;  %v9643_v40 = vsel %vm2898_vm3, %v10591_v49, %v2914_v14  ;;  %v9651_v58 = vsel %vm2898_vm3, %v2916_v54, %v2918_v22  ;;  %v9859_v49 = vld [vmem:[#allocation2 + $0x78] sm:$0xff]  }
  0xec   : > { %8136 = vmatprep.subr.bf16.mxu1 %v8673_v27 }
  0xef   : > { %8144 = vmatpush3.bf16.msra.mxu1 %v8673_v27  ;;  %v2188_v27 = vsel %vm1732_vm0, %v2185_v55, %v2187_v31  ;;  %v8679_v55 = vld [vmem:[%s10588_s3 + $0xb0] sm:$0xff]  }
  0xf0   : > { %7704 = vmatmul.mubr.bf16.gmra.mrb[20].mxu0 %v2180_v3  ;;  %8137 = vmatprep.subr.bf16.mxu1 %v8674_v30 }
  0xf1   : > { %7707 = vmatprep.mubr.bf16.mxu0 %v2182_v32  ;;  %v2924_v32 = vrot.slane %v9592_v8, 2 }
  0xf2   : > { %7592 = vmatmul.mubr.bf16.gmra.mrb[4].mxu1 %v8675_v62  ;;  %v2928_v62 = vrot.slane %v9607_v47, 2 }
  0xf3   : > { %7595 = vmatprep.mubr.bf16.mxu1 %v9281_v34  ;;  %8145 = vmatpush3.bf16.msra.mxu1 %v8674_v30  ;;  %v2486_v34 = vshrl.u32 %v9446_v35, 16  ;;  %v2495_v35 = vshrl.u32 %v9458_v4, 16  ;;  %v2922_v4 = vrot.slane %v9589_v26, 2  ;;  %v9671_v44 = vsel %vm2898_vm3, %v2924_v32, %v2926_v18 }
  0xf4   : > { %8138 = vmatprep.subr.bf16.mxu1 %v8676_v50  ;;  %v9674_v12 = vsel %vm2898_vm3, %v2926_v18, %v2928_v62  ;;  %v9677_v57 = vsel %vm2898_vm3, %v2928_v62, %v2930_v36  ;;  %v9714_v36 = vld [vmem:[#allocation2 + $0x8c] sm:$0xf] }
  0xf5   : > { %v2488_v24 = vrot.slane %v2486_v34, 1  ;;  %v2497_v16 = vrot.slane %v2495_v35, 1 }
  0xf7   : > { %8146 = vmatpush3.bf16.msra.mxu1 %v8676_v50  ;;  %v9668_v50 = vsel %vm2898_vm3, %v2922_v4, %v2924_v32  ;;  %v2492_v33 = vor.u32 %v2491_v38, %v2488_v24  ;;  %v2501_v34 = vor.u32 %v2500_v52, %v2497_v16  ;;  %v2534_v38 = vshll.u32 %v9528_v7, 16  ;;  %v5534_v16 = vld [vmem:[#allocation2 + $0x88] sm:$0xc]  ;;  %v8533_v52 = vld [vmem:[%s10588_s3 + $0x160] sm:$0xff]  }
  0xf8   : > { %7708 = vmatmul.mubr.bf16.gmra.mrb[24].mxu0 %v2184_v1  ;;  %8139 = vmatprep.subr.bf16.mxu1 %v8677_v19  ;;  %v2507_v1 = vshll.u32 %v9482_v61, 16  ;;  %v8528_v61 = vld [vmem:[%s10588_s3 + $0x148] sm:$0xff]  }
  0xf9   : > { %7711 = vmatprep.mubr.bf16.mxu0 %v2186_v39  ;;  %v2513_v39 = vshrl.u32 %v9493_v17, 16  ;;  %v2493_v31 = vsel %vm2467_vm2, %v2483_v15, %v2492_v33  ;;  %v8529_v15 = vld [vmem:[%s10588_s3 + $0x150] sm:$0xff]  }
  0xfa   : > { %7596 = vmatmul.mubr.bf16.gmra.mrb[8].mxu1 %v9315_v11  ;;  %v8678_v11 = vld [vmem:[%s10588_s3 + $0xa8] sm:$0xff]   ;;  %v2509_v24 = vrot.slane %v2507_v1, 2  ;;  %v6710_v1 = vcombine.low %v5534_v16, %v9714_v36 }
  0xfb   : > { %7599 = vmatprep.mubr.bf16.mxu1 %v9346_v29  ;;  %8147 = vmatpush3.bf16.msra.mxu1 %v8677_v19  ;;  %v2920_v29 = vrot.slane %v9577_v28, 2  ;;  %v2516_v19 = vshll.u32 %v9493_v17, 16  ;;  %v2502_v17 = vsel %vm2467_vm2, %v2492_v33, %v2501_v34  ;;  %v2515_v14 = vrot.slane %v2513_v39, 1 }
  0xfc   : > { %8140 = vmatprep.subr.bf16.mxu1 %v8678_v11  ;;  %v2510_v35 = vor.u32 %v2509_v24, %v2506_v13  ;;  %v2540_v33 = vshrl.u32 %v9552_v53, 16  ;;  %v2549_v39 = vshrl.u32 %v9556_v6, 16  ;;  %v2545_v53 = vrot.slane %v2543_v37, 2  ;;  %v9766_v37 = vld [vmem:[#allocation2 + $0x14] sm:$0xf] }
  0xfd   : > { %v9654_v3 = vsel %vm2898_vm3, %v2918_v22, %v2920_v29  ;;  %v9658_v30 = vsel %vm2898_vm3, %v2920_v29, %v2922_v4  ;;  %v2518_v54 = vrot.slane %v2516_v19, 2  ;;  %v2531_v22 = vshrl.u32 %v9528_v7, 16 }
  0xfe   : > { %v2511_v4 = vsel %vm2467_vm2, %v2501_v34, %v2510_v35  ;;  %v2552_v19 = vshll.u32 %v9556_v6, 16  ;;  %v2542_v24 = vrot.slane %v2540_v33, 1  ;;  %v2551_v6 = vrot.slane %v2549_v39, 1  ;;  %v9764_v33 = vld [vmem:[%s10588_s3 + $0x180] sm:$0xff]  }
  0xff   : > { %8148 = vmatpush3.bf16.msra.mxu1 %v8678_v11  ;;  %v2525_v11 = vshll.u32 %v9518_v63, 16  ;;  %v2519_v29 = vor.u32 %v2518_v54, %v2515_v14  ;;  %v2533_v18 = vrot.slane %v2531_v22, 1  ;;  %v2536_v63 = vrot.slane %v2534_v38, 2 }
 0x100   : > { %7712 = vmatmul.mubr.bf16.gmra.mrb[28].mxu0 %v2188_v27  ;;  %8141 = vmatprep.subr.bf16.mxu1 %v8679_v55  ;;  %v2524_v27 = vrot.slane %v2522_v45, 1  ;;  %v2554_v54 = vrot.slane %v2552_v19, 2  ;;  %v2558_v45 = vshrl.u32 %v9574_v0, 16  ;;  %v2570_v38 = vshll.u32 %v9577_v28, 16 }
 0x101   : > { %7731 = vmatprep.mubr.bf16.mxu0 %v2484_v9  ;;  %v2527_v32 = vrot.slane %v2525_v11, 2  ;;  %v2520_v62 = vsel %vm2467_vm2, %v2510_v35, %v2519_v29  ;;  %v9716_v9 = vld [vmem:[#allocation2 + $0x90] sm:$0xff]   ;;  %v2537_v34 = vor.u32 %v2536_v63, %v2533_v18  ;;  %v2546_v35 = vor.u32 %v2545_v53, %v2542_v24  ;;  %v9776_v24 = vld [vmem:[#allocation2 + $0x18] sm:$0xff]  }
 0x102   : > { %7600 = vmatmul.mubr.bf16.gmra.mrb[12].mxu1 %v9374_v43  ;;  %v9691_v43 = vld [vmem:[%s10588_s3 + $0x40] sm:$0xff]   ;;  %v2561_v11 = vshll.u32 %v9574_v0, 16  ;;  %v2555_v22 = vor.u32 %v2554_v54, %v2551_v6  ;;  %v2560_v18 = vrot.slane %v2558_v45, 1  ;;  %v2572_v16 = vrot.slane %v2570_v38, 2  ;;  %v9783_v54 = vld [vmem:[#allocation2 + $0x28] sm:$0xff]  }
 0x103   : > { %7603 = vmatprep.mubr.bf16.mxu1 %v9403_v60  ;;  %8149 = vmatpush3.bf16.msra.mxu1 %v8679_v55  ;;  %v2528_v55 = vor.u32 %v2527_v32, %v2524_v27  ;;  %v8545_v27 = vld [vmem:[%s10588_s3 + $0x178] sm:$0xff]   ;;  %v2547_v32 = vsel %vm2467_vm2, %v2537_v34, %v2546_v35  ;;  %v2585_v39 = vshrl.u32 %v9592_v8, 16  ;;  %v2588_v60 = vshll.u32 %v9592_v8, 16 }
 0x104   : > { %8142 = vmatprep.subr.bf16.mxu1 %v8680_v51  ;;  %v2556_v0 = vsel %vm2467_vm2, %v2546_v35, %v2555_v22  ;;  %v8532_v35 = vld [vmem:[%s10588_s3 + $0x48] sm:$0xff]   ;;  %v2594_v45 = vshrl.u32 %v9601_v56, 16  ;;  %v1756_v38 = vrot.slane %v9501_v20, 1 }
 0x105   : > { %v2529_v13 = vsel %vm2467_vm2, %v2519_v29, %v2528_v55  ;;  %v2538_v14 = vsel %vm2467_vm2, %v2528_v55, %v2537_v34  ;;  %v2567_v29 = vshrl.u32 %v9577_v28, 16  ;;  %v1752_v34 = vrot.slane %v9463_v5, 1 }
 0x106   : > { %v2590_v6 = vrot.slane %v2588_v60, 2  ;;  %v9821_v60 = vld [vmem:[#allocation2 + $0x50] sm:$0xff]  }
 0x107   : > { %8150 = vmatpush3.bf16.msra.mxu1 %v8680_v51  ;;  %v5555_v51 = vrot.slane %v9716_v9, 2  ;;  %v2569_v63 = vrot.slane %v2567_v29, 1 }
 0x108   : > { %7732 = vmatmul.mubr.bf16.vlgmr.msra.gmra.mrb[0].mxu0 %v2493_v31  ;;  %7955 = vmatprep.subr.bf16.mxu1 %v9691_v43  ;;  %v8536_v31 = vld [vmem:[%s10588_s3 + $0x168] sm:$0xff]  }
 0x109   : > { %7735 = vmatprep.mubr.bf16.mxu0 %v2502_v17  ;;  %7764 = vmatpush3.bf16.msra.mxu0 %v9582_v25  ;;  %v8530_v25 = vld [vmem:[%s10588_s3 + $0x158] sm:$0xff]   ;;  %v2573_v19 = vor.u32 %v2572_v16, %v2569_v63 }
 0x10a   : > { %7604 = vmatmul.mubr.bf16.gmra.mrb[16].mxu1 %v9433_v10  ;;  %7765 = vmatprep.subr.bf16.mxu0 %v8528_v61 }
 0x10b   : > { %7607 = vmatprep.mubr.bf16.mxu1 %v9463_v5 }
 0x10d   : > { %7766 = vmatpush3.bf16.msra.mxu0 %v8528_v61  ;;  %v5554_v61 = vrot.slane %v6710_v1, 2 }
 0x10e   : > { %7767 = vmatprep.subr.bf16.mxu0 %v8529_v15 }
 0x10f   : > { %v9734_v17 = vsel %vm2898_vm3, %v5554_v61, %v5555_v51  ;;  %v1754_v61 = vrot.slane %v9479_v2, 1 }
 0x110   : > { %7736 = vmatmul.mubr.bf16.gmra.mrb[4].mxu0 %v2511_v4  ;;  %10595 = vst [vmem:[#allocation3_spill] sm:$0xff] %v9734_v17  ;;  %v1750_v4 = vrot.slane %v9433_v10, 1  ;;  %v2579_v10 = vshll.u32 %v9589_v26, 16  ;;  %v8642_v17 = vld [vmem:[#allocation2 + $0x90] ss:$0 sps:$4 sm:$0x77]  }
 0x111   : > { %7739 = vmatprep.mubr.bf16.mxu0 %v2520_v62  ;;  %7768 = vmatpush3.bf16.msra.mxu0 %v8529_v15  ;;  %v8539_v15 = vld [vmem:[%s10588_s3 + $0x170] sm:$0xff]   ;;  %v2563_v62 = vrot.slane %v2561_v11, 2  ;;  %v2597_v11 = vshll.u32 %v9601_v56, 16  ;;  %v4066_v56 = vrot.slane %v9776_v24, 3 }
 0x112   : > { %7608 = vmatmul.mubr.bf16.gmra.mrb[20].mxu1 %v9479_v2  ;;  %7769 = vmatprep.subr.bf16.mxu0 %v8530_v25  ;;  %v1751_v55 = vsel %vm1732_vm0, %v1748_v46, %v1750_v4  ;;  %v4043_v46 = vld [vmem:[#allocation2 + $0x10] sm:$0x8]  ;;  %v1753_v8 = vsel %vm1732_vm0, %v1750_v4, %v1752_v34  ;;  %v10592_v4 = vrot.slane %v9515_v41, 1 }
 0x113   : > { %7611 = vmatprep.mubr.bf16.mxu1 %v9501_v20  ;;  %v6541_v53 = vcombine.low %v4043_v46, %v9766_v37 }
 0x115   : > { %7770 = vmatpush3.bf16.msra.mxu0 %v8530_v25  ;;  %v9746_v25 = vld [vmem:[#allocation2 + $0x98] ss:$0 sps:$4 sm:$0x33]   ;;  %v4065_v63 = vrot.slane %v6541_v53, 3  ;;  %v1759_v53 = vsel %vm1732_vm0, %v1756_v38, %v10592_v4 }
 0x116   : > { %7771 = vmatprep.subr.bf16.mxu0 %v8533_v52  ;;  %10596 = vst [vmem:[#allocation4_spill] sm:$0xff] %v9746_v25  ;;  %v5557_v28 = vrot.slane %v9746_v25, 2  ;;  %v9863_v4 = vld [vmem:[#allocation2 + $0x98] sm:$0xff]  }
 0x117   : > { %v9824_v46 = vsel %vm4064_vm4, %v4065_v63, %v4066_v56 }
 0x118   : > { %7740 = vmatmul.mubr.bf16.gmra.mrb[8].mxu0 %v2529_v13  ;;  %v9769_v1 = vsel %vm2898_vm3, %v5555_v51, %v5557_v28  ;;  %v2581_v13 = vrot.slane %v2579_v10, 2  ;;  %v9778_v51 = vld [vmem:[#allocation2 + $0x20] sm:$0xff]   ;;  %v9807_v28 = vld [vmem:[#allocation2 + $0xc] sm:$0xf]  ;;  %v9811_v10 = vld [vmem:[#allocation2 + $0x38] sm:$0xff]   ;;  %10598 = vst [vmem:[#allocation6_spill] sm:$0xff] %v9824_v46 }
 0x119   : > { %7743 = vmatprep.mubr.bf16.mxu0 %v2538_v14  ;;  %7772 = vmatpush3.bf16.msra.mxu0 %v8533_v52  ;;  %v2576_v52 = vshrl.u32 %v9589_v26, 16  ;;  %10597 = vst [vmem:[#allocation5_spill] sm:$0xff] %v9769_v1  ;;  %v2564_v26 = vor.u32 %v2563_v62, %v2560_v18  ;;  %v2587_v14 = vrot.slane %v2585_v39, 1  ;;  %v9797_v18 = vld [vmem:[#allocation2 + $0x30] sm:$0xff]   ;;  %v2606_v62 = vshll.u32 %v9607_v47, 16 }
 0x11a   : > { %7612 = vmatmul.mubr.bf16.gmra.mrb[24].mxu1 %v9515_v41  ;;  %7773 = vmatprep.subr.bf16.mxu0 %v8536_v31  ;;  %v4068_v16 = vrot.slane %v9778_v51, 3  ;;  %v2599_v39 = vrot.slane %v2597_v11, 2  ;;  %v9846_v11 = vld [vmem:[#allocation2 + $0x60] sm:$0xff]   ;;  %v4074_v63 = vrot.slane %v9811_v10, 3  ;;  %v5953_v46 = vld [vmem:[#allocation2 + $0x90] sm:$0x8] }
 0x11b   : > { %7615 = vmatprep.mubr.bf16.mxu1 %v9530_v48  ;;  %v2565_v5 = vsel %vm2467_vm2, %v2555_v22, %v2564_v26  ;;  %v2574_v2 = vsel %vm2467_vm2, %v2564_v26, %v2573_v19  ;;  %v9792_v22 = vld [vmem:[#allocation2 + $0x8] sm:$0xc]  ;;  %v9805_v20 = vor.u32 %v2590_v6, %v2587_v14  ;;  %v4070_v26 = vrot.slane %v9783_v54, 3  ;;  %v8535_v6 = vld [vmem:[%s10588_s3 + $0x58] sm:$0xff]  }
 0x11d   : > { %7774 = vmatpush3.bf16.msra.mxu0 %v8536_v31  ;;  %v2578_v31 = vrot.slane %v2576_v52, 1  ;;  %v9861_v52 = vld [vmem:[#allocation2 + $0x80] sm:$0xff]  }
 0x11e   : > { %7775 = vmatprep.subr.bf16.mxu0 %v8539_v15 }
 0x11f   : > { %v2582_v29 = vor.u32 %v2581_v13, %v2578_v31  ;;  %v9827_v31 = vsel %vm4064_vm4, %v4066_v56, %v4068_v16  ;;  %v1757_v13 = vsel %vm1732_vm0, %v1754_v61, %v1756_v38  ;;  %v9848_v38 = vld [vmem:[#allocation2 + $0x68] sm:$0xff]  }
 0x120   : > { %7744 = vmatmul.mubr.bf16.gmra.mrb[12].mxu0 %v2547_v32  ;;  %v4847_v32 = vld [vmem:[#allocation2 + $0x80] sm:$0xf]  ;;  %10599 = vst [vmem:[#allocation7_spill] sm:$0xff] %v9827_v31  ;;  %v9866_v31 = vld [vmem:[#allocation2 + $0x88] sm:$0xff]  }
 0x121   : > { %7747 = vmatprep.mubr.bf16.mxu0 %v2556_v0  ;;  %7776 = vmatpush3.bf16.msra.mxu0 %v8539_v15  ;;  %v1755_v15 = vsel %vm1732_vm0, %v1752_v34, %v1754_v61  ;;  %v9800_v0 = vld [vmem:[#allocation2 + $0x84] sm:$0xf]  ;;  %v2596_v34 = vrot.slane %v2594_v45, 1  ;;  %v2583_v14 = vsel %vm2467_vm2, %v2573_v19, %v2582_v29  ;;  %v2612_v61 = vshrl.u32 %v9626_v21, 16  ;;  %v9844_v45 = vld [vmem:[#allocation2 + $0x58] sm:$0xff]  }
 0x122   : > { %7616 = vmatmul.mubr.bf16.gmra.mrb[28].mxu1 %v9542_v42  ;;  %7777 = vmatprep.subr.bf16.mxu0 %v8545_v27 }
 0x123   : > { %7651 = vmatprep.mubr.bf16.mxu1 %v1751_v55  ;;  %v9815_v55 = vld [vmem:[#allocation2 + $0x48] sm:$0xff]  }
 0x124   : > { %v4078_v56 = vrot.slane %v9815_v55, 3 }
 0x125   : > { %7778 = vmatpush3.bf16.msra.mxu0 %v8545_v27  ;;  %v2603_v27 = vshrl.u32 %v9607_v47, 16  ;;  %v9813_v47 = vld [vmem:[#allocation2 + $0x40] sm:$0xff]  }
 0x126   : > { %7811 = vmatprep.subr.bf16.mxu0 %v9764_v33  ;;  %v4076_v19 = vrot.slane %v9813_v47, 3 }
 0x128   : > { %7748 = vmatmul.mubr.bf16.gmra.mrb[16].mxu0 %v2565_v5  ;;  %v9834_v5 = vcombine.low %v4847_v32, %v9800_v0  ;;  %v4072_v32 = vrot.slane %v9797_v18, 3 }
 0x129   : > { %7751 = vmatprep.mubr.bf16.mxu0 %v2574_v2  ;;  %v2605_v2 = vrot.slane %v2603_v27, 1  ;;  %v2592_v27 = vsel %vm2467_vm2, %v2582_v29, %v9805_v20 }
 0x12a   : > { %7652 = vmatmul.mubr.bf16.vlgmr.msra.gmra.mrb[16].mxu1 %v1753_v8  ;;  %v9837_v8 = vsel %vm4064_vm4, %v4068_v16, %v4070_v26  ;;  %v9857_v16 = vld [vmem:[#allocation2 + $0x70] sm:$0xff]   ;;  %v9871_v29 = vsel %vm4064_vm4, %v4070_v26, %v4072_v32  ;;  %v4082_v26 = vrot.slane %v9844_v45, 3 }
 0x12b   : > { %7956 = vmatpush3.bf16.msra.mxu1 %v9691_v43  ;;  %7655 = vmatprep.mubr.bf16.mxu1 %v1755_v15  ;;  %v8534_v43 = vld [vmem:[%s10588_s3 + $0x50] sm:$0xff]   ;;  %10600 = vst [vmem:[#allocation8_spill] sm:$0xff] %v9837_v8  ;;  %v2608_v15 = vrot.slane %v2606_v62, 2  ;;  %v2600_v62 = vor.u32 %v2599_v39, %v2596_v34  ;;  %v4080_v8 = vrot.slane %v9821_v60, 3  ;;  %10601 = vst [vmem:[#allocation9_spill] sm:$0xff] %v9871_v29  ;;  %v4096_v29 = vrot.slane %v8642_v17, 3 }
 0x12c   : > { %7957 = vmatprep.subr.bf16.mxu1 %v8532_v35  ;;  %v9877_v34 = vsel %vm4064_vm4, %v4074_v63, %v4076_v19  ;;  %v9880_v39 = vsel %vm4064_vm4, %v4076_v19, %v4078_v56  ;;  %v4086_v19 = vrot.slane %v9848_v38, 3 }
 0x12d   : > { %10603 = vst [vmem:[#allocation11_spill] sm:$0xff] %v9877_v34  ;;  %10604 = vst [vmem:[#allocation12_spill] sm:$0xff] %v9880_v39  ;;  %v9885_v25 = vsel %vm4064_vm4, %v4078_v56, %v4080_v8  ;;  %v4084_v34 = vrot.slane %v9846_v11, 3  ;;  %v8656_v39 = vld [vmem:[#allocation2 + $0xa0] ss:$0 sps:$4 sm:$0x77]   ;;  %v9894_v56 = vsel %vm4064_vm4, %v4080_v8, %v4082_v26 }
 0x12e   : > { %10605 = vst [vmem:[#allocation13_spill] sm:$0xff] %v9885_v25  ;;  %10606 = vst [vmem:[#allocation14_spill] sm:$0xff] %v9894_v56  ;;  %v9907_v25 = vld [vmem:[#allocation2 + $0x88] sm:$0xff]   ;;  %v4088_v8 = vrot.slane %v9857_v16, 3  ;;  %v4092_v56 = vrot.slane %v9861_v52, 3 }
 0x12f   : > { %7958 = vmatpush3.bf16.msra.mxu1 %v8532_v35  ;;  %v2615_v35 = vshll.u32 %v9626_v21, 16  ;;  %v9874_v21 = vsel %vm4064_vm4, %v4072_v32, %v4074_v63  ;;  %v2609_v32 = vor.u32 %v2608_v15, %v2605_v2  ;;  %v2614_v63 = vrot.slane %v2612_v61, 1 }
 0x130   : > { %7752 = vmatmul.mubr.bf16.gmra.mrb[20].mxu0 %v2583_v14  ;;  %7959 = vmatprep.subr.bf16.mxu1 %v8534_v43  ;;  %v9868_v14 = vld [vmem:[#allocation2 + $0x94] sm:$0xf]  ;;  %10602 = vst [vmem:[#allocation10_spill] sm:$0xff] %v9874_v21  ;;  %v4900_v2 = vshll.u32 %v9834_v5, 16  ;;  %v9902_v15 = vsel %vm4064_vm4, %v4082_v26, %v4084_v34  ;;  %v9905_v61 = vsel %vm4064_vm4, %v4084_v34, %v4086_v19  ;;  %v4094_v21 = vrot.slane %v9866_v31, 3  ;;  %v8538_v34 = vld [vmem:[%s10588_s3 + $0x68] sm:$0xff]  }
 0x131   : > { %7755 = vmatprep.mubr.bf16.mxu0 %v2592_v27  ;;  %v1760_v27 = vrot.slane %v9530_v48, 1  ;;  %v8537_v48 = vld [vmem:[%s10588_s3 + $0x60] sm:$0xff]   ;;  %v6787_v1 = vcombine.low %v5953_v46, %v9868_v14  ;;  %10607 = vst [vmem:[#allocation15_spill] sm:$0xff] %v9905_v61  ;;  %v4090_v46 = vrot.slane %v9859_v49, 3  ;;  %v5976_v26 = vrot.slane %v8656_v39, 3 }
 0x132   : > { %7656 = vmatmul.mubr.bf16.gmra.mrb[20].mxu1 %v1757_v13  ;;  %v2617_v13 = vrot.slane %v2615_v35, 2  ;;  %v9921_v61 = vsel %vm4064_vm4, %v4086_v19, %v4088_v8  ;;  %v10610_v19 = vrot.slane %v9542_v42, 1 }
 0x133   : > { %7960 = vmatpush3.bf16.msra.mxu1 %v8534_v43  ;;  %7659 = vmatprep.mubr.bf16.mxu1 %v1759_v53  ;;  %v5974_v43 = vrot.slane %v9863_v4, 3  ;;  %v2601_v53 = vsel %vm2467_vm2, %v9805_v20, %v2600_v62  ;;  %v5973_v35 = vrot.slane %v6787_v1, 3  ;;  %v2610_v20 = vsel %vm2467_vm2, %v2600_v62, %v2609_v32 }
 0x134   : > { %7961 = vmatprep.subr.bf16.mxu1 %v8535_v6  ;;  %v10609_v62 = vrot.slane %v9515_v41, 1  ;;  %v9930_v39 = vsel %vm4064_vm4, %v4090_v46, %v4092_v56 }
 0x135   : > { %v9918_v1 = vsel %vm4064_vm4, %v5973_v35, %v5974_v43  ;;  %v9936_v35 = vsel %vm4064_vm4, %v4094_v21, %v4096_v29  ;;  %v9943_v41 = vsel %vm4064_vm4, %v5974_v43, %v5976_v26  ;;  %v8542_v29 = vld [vmem:[%s10588_s3 + $0x70] sm:$0xff]   ;;  %v10611_v43 = vcombine.low %v9792_v22, %v9807_v28 }
 0x136   : > { %v1761_v17 = vsel %vm1732_vm0, %v10609_v62, %v1760_v27 }
 0x137   : > { %7962 = vmatpush3.bf16.msra.mxu1 %v8535_v6  ;;  %v9924_v6 = vsel %vm4064_vm4, %v4088_v8, %v4090_v46  ;;  %v1763_v8 = vsel %vm1732_vm0, %v1760_v27, %v10610_v19  ;;  %v2618_v46 = vor.u32 %v2617_v13, %v2614_v63  ;;  %v1764_v27 = vrot.slane %v9558_v59, 1  ;;  %v8546_v19 = vld [vmem:[%s10588_s3 + $0x78] sm:$0xff]  }
 0x138   : > { %7756 = vmatmul.mubr.bf16.gmra.mrb[24].mxu0 %v2601_v53  ;;  %7963 = vmatprep.subr.bf16.mxu1 %v8537_v48  ;;  %10608 = vst [vmem:[#allocation16_spill] sm:$0xff] %v9924_v6  ;;  %v9933_v53 = vsel %vm4064_vm4, %v4092_v56, %v4094_v21  ;;  %v4902_v6 = vrot.slane %v4900_v2, 1  ;;  %v8682_v56 = vld [vmem:[#allocation2 + $0x10] sm:$0xff]   ;;  %v4898_v21 = vshrl.u32 %v9834_v5, 16  ;;  %v2899_v26 = vrot.slane %v10611_v43, 2 }
 0x139   : > { %7759 = vmatprep.mubr.bf16.mxu0 %v2610_v20  ;;  %v4905_v20 = vshll.u32 %v9907_v25, 16  ;;  %v2900_v62 = vrot.slane %v8682_v56, 2  ;;  %v9950_v2 = vld [vmem:[#allocation2 + $0x90] ss:$0 sps:$4 sm:$0x11]   ;;  %v2619_v63 = vsel %vm2467_vm2, %v2609_v32, %v2618_v46  ;;  %v10612_v59 = vrot.slane %v9542_v42, 1 }
 0x13a   : > { %7660 = vmatmul.mubr.bf16.gmra.mrb[24].mxu1 %v1761_v17  ;;  %v4913_v22 = vshll.u32 %v9950_v2, 16  ;;  %v8683_v32 = vld [vmem:[#allocation2 + $0x18] sm:$0xff]   ;;  %v8547_v46 = vld [vmem:[%s10588_s3] sm:$0xff]   ;;  %v4909_v42 = vshrl.u32 %v9907_v25, 16 }
 0x13b   : > { %7964 = vmatpush3.bf16.msra.mxu1 %v8537_v48  ;;  %7663 = vmatprep.mubr.bf16.mxu1 %v1763_v8  ;;  %v4903_v48 = vor.u32 %v4902_v6, %v4898_v21  ;;  %v4907_v17 = vrot.slane %v4905_v20, 1  ;;  %v2901_v13 = vsel %vm2898_vm3, %v2899_v26, %v2900_v62  ;;  %v1765_v8 = vsel %vm1732_vm0, %v10612_v59, %v1764_v27  ;;  %v8684_v6 = vld [vmem:[#allocation2 + $0x20] sm:$0xff]   ;;  %v8553_v21 = vld [vmem:[%s10588_s3 + $0x188] sm:$0xff]   ;;  %v8551_v59 = vld [vmem:[%s10588_s3 + $0x10] sm:$0xff]  }
 0x13c   : > { %7965 = vmatprep.subr.bf16.mxu1 %v8538_v34  ;;  %v2904_v20 = vrot.slane %v8684_v6, 2  ;;  %v4915_v56 = vrot.slane %v4913_v22, 1  ;;  %v8549_v26 = vld [vmem:[%s10588_s3 + $0x8] sm:$0xff]   ;;  %v8552_v22 = vld [vmem:[%s10588_s3 + $0x18] sm:$0xff]   ;;  %v8554_v6 = vld [vmem:[%s10588_s3 + $0x20] sm:$0xff]  }
 0x13d   : > { %v4908_v28 = vsel %vm1128_vm1, %v4903_v48, %v4907_v17  ;;  %v4911_v27 = vor.u32 %v4909_v42, %v4907_v17  ;;  %v8556_v17 = vld [vmem:[%s10588_s3 + $0x190] sm:$0xff]   ;;  %v10613_v42 = vrot.slane %v9528_v7, 2 }
 0x13e   : > { %v8557_v7 = vld [vmem:[%s10588_s3 + $0x30] sm:$0xff]  }
 0x13f   : > { %7966 = vmatpush3.bf16.msra.mxu1 %v8538_v34  ;;  %v2902_v34 = vrot.slane %v8683_v32, 2  ;;  %v4916_v48 = vsel %vm1128_vm1, %v4911_v27, %v4915_v56  ;;  %v8687_v32 = vld [vmem:[#allocation2 + $0x38] sm:$0xff]   ;;  %v8569_v27 = vld [vmem:[%s10588_s3 + $0x1b0] sm:$0xff]  }
 0x140   : > { %7760 = vmatmul.mubr.bf16.gmra.mrb[28].mxu0 %v2619_v63  ;;  %7967 = vmatprep.subr.bf16.mxu1 %v8542_v29 }
 0x141   : > { %7779 = vmatprep.mubr.bf16.mxu0 %v2901_v13  ;;  %v2905_v43 = vsel %vm2898_vm3, %v2902_v34, %v2904_v20  ;;  %v8686_v13 = vld [vmem:[#allocation2 + $0x30] sm:$0xff]  }
 0x142   : > { %7664 = vmatmul.mubr.bf16.gmra.mrb[28].mxu1 %v1765_v8 }
 0x143   : > { %7968 = vmatpush3.bf16.msra.mxu1 %v8542_v29  ;;  %7971 = vmatprep.mubr.bf16.mxu1 %v4908_v28  ;;  %v2903_v29 = vsel %vm2898_vm3, %v2900_v62, %v2902_v34  ;;  %v8685_v62 = vld [vmem:[#allocation2 + $0x28] sm:$0xff]   ;;  %v8563_v28 = vld [vmem:[%s10588_s3 + $0x1a0] sm:$0xff]   ;;  %v2910_v34 = vrot.slane %v8687_v32, 2  ;;  %v5278_v32 = vrot.slane %v9716_v9, 1 }
 0x144   : > { %7969 = vmatprep.subr.bf16.mxu1 %v8546_v19  ;;  %v2906_v63 = vrot.slane %v8685_v62, 2  ;;  %v5136_v62 = vrot.slane %v9907_v25, 1 }
 0x145   : > { %v2913_v56 = vsel %vm2898_vm3, %v2910_v34, %v10613_v42 }
 0x146   : > { %v2907_v8 = vsel %vm2898_vm3, %v2904_v20, %v2906_v63  ;;  %v8566_v20 = vld [vmem:[%s10588_s3 + $0x1a8] sm:$0xff]  }
 0x147   : > { %7970 = vmatpush3.bf16.msra.mxu1 %v8546_v19  ;;  %v2908_v19 = vrot.slane %v8686_v13, 2  ;;  %v8564_v13 = vld [vmem:[%s10588_s3 + $0x90] sm:$0xff]  }
 0x148   : > { %7780 = vmatmul.mubr.bf16.vlgmr.msra.gmra.mrb[0].mxu0 %v2903_v29  ;;  %7975 = vmatprep.subr.bf16.mxu1 %v8547_v46  ;;  %v8573_v29 = vld [vmem:[%s10588_s3 + $0x1b8] sm:$0xff]  }
 0x149   : > { %7783 = vmatprep.mubr.bf16.mxu0 %v2905_v43  ;;  %7812 = vmatpush3.bf16.msra.mxu0 %v9764_v33  ;;  %v8559_v33 = vld [vmem:[%s10588_s3 + $0x198] sm:$0xff]  }
 0x14a   : > { %7972 = vmatmul.mubr.bf16.vlgmr.msra.gmra.mrb[32].mxu1 %v4916_v48  ;;  %7813 = vmatprep.subr.bf16.mxu0 %v8553_v21  ;;  %v8558_v43 = vld [vmem:[%s10588_s3 + $0x38] sm:$0xff]   ;;  %v10027_v48 = vld [vmem:[%s10588_s3 + $0x1c0] sm:$0xff]  }
 0x14b   : > { %7976 = vmatpush3.bf16.msra.mxu1 %v8547_v46  ;;  %7991 = vmatprep.mubr.bf16.mxu1 %v9834_v5  ;;  %v2909_v5 = vsel %vm2898_vm3, %v2906_v63, %v2908_v19  ;;  %v2911_v46 = vsel %vm2898_vm3, %v2908_v19, %v2910_v34  ;;  %v8562_v63 = vld [vmem:[%s10588_s3 + $0x88] sm:$0xff]  }
 0x14c   : > { %7977 = vmatprep.subr.bf16.mxu1 %v8549_v26  ;;  %v8586_v34 = vld [vmem:[%s10588_s3 + $0x1c8] sm:$0xff]  }
 0x14d   : > { %7814 = vmatpush3.bf16.msra.mxu0 %v8553_v21  ;;  %v8555_v21 = vld [vmem:[%s10588_s3 + $0x28] sm:$0xff]  }
 0x14e   : > { %7815 = vmatprep.subr.bf16.mxu0 %v8556_v17 }
 0x14f   : > { %7978 = vmatpush3.bf16.msra.mxu1 %v8549_v26  ;;  %v5115_v26 = vld [vmem:[#allocation2 + $0x80] sm:$0xe] }
 0x150   : > { %7784 = vmatmul.mubr.bf16.gmra.mrb[4].mxu0 %v2907_v8  ;;  %7979 = vmatprep.subr.bf16.mxu1 %v8551_v59  ;;  %v3325_v8 = vrot.slane %v9778_v51, 2 }
 0x151   : > { %7787 = vmatprep.mubr.bf16.mxu0 %v2909_v5  ;;  %7816 = vmatpush3.bf16.msra.mxu0 %v8556_v17  ;;  %v6633_v17 = vcombine.low %v5115_v26, %v9800_v0  ;;  %v3327_v5 = vrot.slane %v9783_v54, 2 }
 0x152   : > { %7817 = vmatprep.subr.bf16.mxu0 %v8559_v33 }
 0x153   : > { %7980 = vmatpush3.bf16.msra.mxu1 %v8551_v59  ;;  %v8572_v59 = vld [vmem:[%s10588_s3 + $0xb0] sm:$0xff]  }
 0x154   : > { %7981 = vmatprep.subr.bf16.mxu1 %v8552_v22 }
 0x155   : > { %7818 = vmatpush3.bf16.msra.mxu0 %v8559_v33 }
 0x156   : > { %7819 = vmatprep.subr.bf16.mxu0 %v8563_v28 }
 0x157   : > { %7982 = vmatpush3.bf16.msra.mxu1 %v8552_v22  ;;  %v8577_v22 = vld [vmem:[%s10588_s3 + $0xc0] sm:$0xff]  }
 0x158   : > { %7788 = vmatmul.mubr.bf16.gmra.mrb[8].mxu0 %v2911_v46  ;;  %7983 = vmatprep.subr.bf16.mxu1 %v8554_v6 }
 0x159   : > { %7791 = vmatprep.mubr.bf16.mxu0 %v2913_v56  ;;  %7820 = vmatpush3.bf16.msra.mxu0 %v8563_v28  ;;  %v5138_v28 = vrot.slane %v9950_v2, 1  ;;  %v8591_v56 = vld [vmem:[%s10588_s3 + $0x1d0] sm:$0xff]  }
 0x15a   : > { %7821 = vmatprep.subr.bf16.mxu0 %v8566_v20 }
 0x15b   : > { %7984 = vmatpush3.bf16.msra.mxu1 %v8554_v6  ;;  %v5139_v2 = vsel %vm1732_vm0, %v5136_v62, %v5138_v28  ;;  %v8599_v28 = vld [vmem:[#allocation2 + $0x98] ss:$0 sps:$4 sm:$0x11]  }
 0x15c   : > { %7985 = vmatprep.subr.bf16.mxu1 %v8555_v21 }
 0x15d   : > { %7822 = vmatpush3.bf16.msra.mxu0 %v8566_v20  ;;  %v3328_v20 = vsel %vm2898_vm3, %v3325_v8, %v3327_v5 }
 0x15e   : > { %7823 = vmatprep.subr.bf16.mxu0 %v8569_v27 }
 0x15f   : > { %7986 = vmatpush3.bf16.msra.mxu1 %v8555_v21  ;;  %v3329_v21 = vrot.slane %v9797_v18, 2 }
 0x160   : > { %7792 = vmatmul.mubr.bf16.gmra.mrb[12].mxu0 %v9643_v40  ;;  %7987 = vmatprep.subr.bf16.mxu1 %v8557_v7  ;;  %v8560_v40 = vld [vmem:[%s10588_s3 + $0x80] sm:$0xff]  }
 0x161   : > { %7795 = vmatprep.mubr.bf16.mxu0 %v9646_v23  ;;  %7824 = vmatpush3.bf16.msra.mxu0 %v8569_v27  ;;  %v5135_v23 = vrot.slane %v6633_v17, 1  ;;  %v3331_v27 = vrot.slane %v9811_v10, 2  ;;  %v3333_v17 = vrot.slane %v9813_v47, 2 }
 0x162   : > { %7825 = vmatprep.subr.bf16.mxu0 %v8573_v29 }
 0x163   : > { %7988 = vmatpush3.bf16.msra.mxu1 %v8557_v7  ;;  %v5137_v0 = vsel %vm1732_vm0, %v5135_v23, %v5136_v62  ;;  %v8584_v7 = vld [vmem:[%s10588_s3 + $0xd0] sm:$0xff]   ;;  %v3332_v26 = vsel %vm2898_vm3, %v3329_v21, %v3331_v27  ;;  %v3335_v62 = vrot.slane %v9815_v55, 2  ;;  %v8589_v23 = vld [vmem:[%s10588_s3 + $0xe0] sm:$0xff]  }
 0x164   : > { %7989 = vmatprep.subr.bf16.mxu1 %v8558_v43 }
 0x165   : > { %7826 = vmatpush3.bf16.msra.mxu0 %v8573_v29  ;;  %v8596_v29 = vld [vmem:[%s10588_s3 + $0x1d8] sm:$0xff]  }
 0x166   : > { %7859 = vmatprep.subr.bf16.mxu0 %v10027_v48 }
 0x167   : > { %7990 = vmatpush3.bf16.msra.mxu1 %v8558_v43  ;;  %v3330_v43 = vsel %vm2898_vm3, %v3327_v5, %v3329_v21 }
 0x168   : > { %7796 = vmatmul.mubr.bf16.gmra.mrb[16].mxu0 %v9651_v58  ;;  %7995 = vmatprep.subr.bf16.mxu1 %v8560_v40  ;;  %v8565_v58 = vld [vmem:[%s10588_s3 + $0x98] sm:$0xff]  }
 0x169   : > { %7799 = vmatprep.mubr.bf16.mxu0 %v9654_v3  ;;  %v8567_v3 = vld [vmem:[%s10588_s3 + $0xa0] sm:$0xff]  }
 0x16a   : > { %7992 = vmatmul.mubr.bf16.vlgmr.msra.gmra.mrb[32].mxu1 %v9907_v25  ;;  %v3189_v25 = vld [vmem:[#allocation2 + $0x10] sm:$0xc] }
 0x16b   : > { %7996 = vmatpush3.bf16.msra.mxu1 %v8560_v40  ;;  %8011 = vmatprep.mubr.bf16.mxu1 %v5137_v0  ;;  %v10059_v19 = vcombine.low %v3189_v25, %v9766_v37  ;;  %v5243_v37 = vld [vmem:[#allocation2 + $0x88] sm:$0xe]  ;;  %v8602_v40 = vld [vmem:[%s10588_s3 + $0x1e0] sm:$0xff]   ;;  %v3334_v0 = vsel %vm2898_vm3, %v3331_v27, %v3333_v17  ;;  %v3337_v25 = vrot.slane %v9821_v60, 2 }
 0x16c   : > { %7997 = vmatprep.subr.bf16.mxu1 %v8562_v63 }
 0x16f   : > { %7998 = vmatpush3.bf16.msra.mxu1 %v8562_v63  ;;  %v8607_v63 = vld [vmem:[%s10588_s3 + $0x1e8] sm:$0xff]  }
 0x170   : > { %7800 = vmatmul.mubr.bf16.gmra.mrb[20].mxu0 %v9658_v30  ;;  %7999 = vmatprep.subr.bf16.mxu1 %v8564_v13  ;;  %v8568_v30 = vld [vmem:[%s10588_s3 + $0xa8] sm:$0xff]  }
 0x171   : > { %7803 = vmatprep.mubr.bf16.mxu0 %v9668_v50  ;;  %v3323_v50 = vrot.slane %v9776_v24, 2 }
 0x173   : > { %8000 = vmatpush3.bf16.msra.mxu1 %v8564_v13  ;;  %v3326_v6 = vsel %vm2898_vm3, %v3323_v50, %v3325_v8  ;;  %v3336_v13 = vsel %vm2898_vm3, %v3333_v17, %v3335_v62  ;;  %v8595_v8 = vld [vmem:[%s10588_s3 + $0xf8] sm:$0xff]   ;;  %v3347_v17 = vrot.slane %v9859_v49, 2 }
 0x174   : > { %8001 = vmatprep.subr.bf16.mxu1 %v8565_v58 }
 0x177   : > { %8002 = vmatpush3.bf16.msra.mxu1 %v8565_v58  ;;  %v8590_v58 = vld [vmem:[%s10588_s3 + $0xe8] sm:$0xff]  }
 0x178   : > { %7804 = vmatmul.mubr.bf16.gmra.mrb[24].mxu0 %v9671_v44  ;;  %8003 = vmatprep.subr.bf16.mxu1 %v8567_v3  ;;  %v3322_v44 = vrot.slane %v10059_v19, 2 }
 0x179   : > { %7807 = vmatprep.mubr.bf16.mxu0 %v9674_v12  ;;  %v8574_v12 = vld [vmem:[%s10588_s3 + $0xb8] sm:$0xff]  }
 0x17a   : > { %v3324_v33 = vsel %vm2898_vm3, %v3322_v44, %v3323_v50  ;;  %v8594_v50 = vld [vmem:[%s10588_s3 + $0xf0] sm:$0xff]   ;;  %v5417_v44 = vshll.u32 %v9716_v9, 16 }
 0x17b   : > { %8004 = vmatpush3.bf16.msra.mxu1 %v8567_v3  ;;  %v8612_v3 = vld [vmem:[%s10588_s3 + $0x1f0] sm:$0xff]  }
 0x17c   : > { %8005 = vmatprep.subr.bf16.mxu1 %v8568_v30 }
 0x17f   : > { %8006 = vmatpush3.bf16.msra.mxu1 %v8568_v30  ;;  %v3339_v30 = vrot.slane %v9844_v45, 2 }
 0x180   : > { %7808 = vmatmul.mubr.bf16.gmra.mrb[28].mxu0 %v9677_v57  ;;  %8007 = vmatprep.subr.bf16.mxu1 %v8572_v59  ;;  %v10077_v57 = vcombine.low %v5243_v37, %v9714_v36  ;;  %v8580_v36 = vld [vmem:[%s10588_s3 + $0xc8] sm:$0xff]  }
 0x181   : > { %7827 = vmatprep.mubr.bf16.mxu0 %v3324_v33  ;;  %v8615_v33 = vld [vmem:[%s10588_s3 + $0x1f8] sm:$0xff]   ;;  %v3340_v37 = vsel %vm2898_vm3, %v3337_v25, %v3339_v30 }
 0x182   : > { %v5277_v46 = vrot.slane %v10077_v57, 1  ;;  %v5406_v5 = vshrl.u32 %v10077_v57, 16 }
 0x183   : > { %8008 = vmatpush3.bf16.msra.mxu1 %v8572_v59  ;;  %v5414_v59 = vshrl.u32 %v9716_v9, 16 }
 0x184   : > { %8009 = vmatprep.subr.bf16.mxu1 %v8574_v12  ;;  %v5279_v42 = vsel %vm1732_vm0, %v5277_v46, %v5278_v32  ;;  %v3341_v46 = vrot.slane %v9846_v11, 2 }
 0x186   : > { %v3342_v27 = vsel %vm2898_vm3, %v3339_v30, %v3341_v46  ;;  %v3638_v30 = vshll.u32 %v10059_v19, 16 }
 0x187   : > { %8010 = vmatpush3.bf16.msra.mxu1 %v8574_v12  ;;  %v3338_v12 = vsel %vm2898_vm3, %v3335_v62, %v3337_v25  ;;  %v8605_v62 = vld [vmem:[%s10588_s3 + $0x110] sm:$0xff]   ;;  %v3635_v25 = vshrl.u32 %v10059_v19, 16  ;;  %v3652_v19 = vshrl.u32 %v9778_v51, 16 }
 0x188   : > { %7828 = vmatmul.mubr.bf16.vlgmr.msra.gmra.mrb[0].mxu0 %v3326_v6  ;;  %8015 = vmatprep.subr.bf16.mxu1 %v8577_v22  ;;  %v5419_v6 = vrot.slane %v5417_v44, 2 }
 0x189   : > { %7831 = vmatprep.mubr.bf16.mxu0 %v3328_v20  ;;  %7860 = vmatpush3.bf16.msra.mxu0 %v10027_v48  ;;  %v8585_v48 = vld [vmem:[%s10588_s3 + $0xd8] sm:$0xff]   ;;  %v10150_v20 = vld [vmem:[%s10588_s3 + $0x200] sm:$0xff]  }
 0x18a   : > { %8012 = vmatmul.mubr.bf16.vlgmr.msra.gmra.mrb[32].mxu1 %v5139_v2  ;;  %7861 = vmatprep.subr.bf16.mxu0 %v8586_v34  ;;  %v5408_v2 = vrot.slane %v5406_v5, 1 }
 0x18b   : > { %8016 = vmatpush3.bf16.msra.mxu1 %v8577_v22  ;;  %8031 = vmatprep.mubr.bf16.mxu1 %v5279_v42  ;;  %v5409_v22 = vshll.u32 %v10077_v57, 16  ;;  %v8600_v57 = vld [vmem:[%s10588_s3 + $0x100] sm:$0xff]  }
 0x18c   : > { %8017 = vmatprep.subr.bf16.mxu1 %v8580_v36 }
 0x18d   : > { %7862 = vmatpush3.bf16.msra.mxu0 %v8586_v34  ;;  %v5416_v34 = vrot.slane %v5414_v59, 1  ;;  %v5411_v42 = vrot.slane %v5409_v22, 2  ;;  %v8613_v59 = vld [vmem:[#allocation2 + $0x90] ss:$0 sps:$4 sm:$0x33]  }
 0x18e   : > { %7863 = vmatprep.subr.bf16.mxu0 %v8591_v56  ;;  %v8614_v22 = vld [vmem:[%s10588_s3 + $0x130] sm:$0xff]  }
 0x18f   : > { %8018 = vmatpush3.bf16.msra.mxu1 %v8580_v36  ;;  %v3343_v36 = vrot.slane %v9848_v38, 2  ;;  %v10157_v21 = vor.u32 %v5419_v6, %v5416_v34  ;;  %v3664_v34 = vshll.u32 %v9783_v54, 16 }
 0x190   : > { %7832 = vmatmul.mubr.bf16.gmra.mrb[4].mxu0 %v3330_v43  ;;  %8019 = vmatprep.subr.bf16.mxu1 %v8584_v7  ;;  %v8601_v43 = vld [vmem:[%s10588_s3 + $0x108] sm:$0xff]  }
 0x191   : > { %7835 = vmatprep.mubr.bf16.mxu0 %v3332_v26  ;;  %7864 = vmatpush3.bf16.msra.mxu0 %v8591_v56  ;;  %v5280_v56 = vrot.slane %v8599_v28, 1  ;;  %v3661_v28 = vshrl.u32 %v9783_v54, 16 }
 0x192   : > { %7865 = vmatprep.subr.bf16.mxu0 %v8596_v29 }
 0x193   : > { %8020 = vmatpush3.bf16.msra.mxu1 %v8584_v7  ;;  %v3344_v7 = vsel %vm2898_vm3, %v3341_v46, %v3343_v36  ;;  %v5281_v26 = vsel %vm1732_vm0, %v5278_v32, %v5280_v56  ;;  %v10614_v46 = vld [vmem:[#allocation4_spill] sm:$0xff] }
 0x194   : > { %8021 = vmatprep.subr.bf16.mxu1 %v8585_v48 }
 0x195   : > { %7866 = vmatpush3.bf16.msra.mxu0 %v8596_v29  ;;  %v5412_v29 = vor.u32 %v5411_v42, %v5408_v2 }
 0x196   : > { %7867 = vmatprep.subr.bf16.mxu0 %v8602_v40 }
 0x197   : > { %8022 = vmatpush3.bf16.msra.mxu1 %v8585_v48  ;;  %v5421_v48 = vsel %vm2467_vm2, %v5412_v29, %v10157_v21 }
 0x198   : > { %7836 = vmatmul.mubr.bf16.gmra.mrb[8].mxu0 %v3334_v0  ;;  %8023 = vmatprep.subr.bf16.mxu1 %v8589_v23  ;;  %v3351_v0 = vrot.slane %v9866_v31, 2  ;;  %v8611_v31 = vld [vmem:[%s10588_s3 + $0x128] sm:$0xff]  }
 0x199   : > { %7839 = vmatprep.mubr.bf16.mxu0 %v3336_v13  ;;  %7868 = vmatpush3.bf16.msra.mxu0 %v8602_v40  ;;  %v3345_v40 = vrot.slane %v9857_v16, 2  ;;  %v8610_v13 = vld [vmem:[%s10588_s3 + $0x120] sm:$0xff]  }
 0x19a   : > { %7869 = vmatprep.subr.bf16.mxu0 %v8607_v63 }
 0x19b   : > { %8024 = vmatpush3.bf16.msra.mxu1 %v8589_v23  ;;  %v3346_v9 = vsel %vm2898_vm3, %v3343_v36, %v3345_v40  ;;  %v3348_v32 = vsel %vm2898_vm3, %v3345_v40, %v3347_v17  ;;  %v8606_v23 = vld [vmem:[%s10588_s3 + $0x118] sm:$0xff]   ;;  %v5423_v36 = vshrl.u32 %v10614_v46, 16 }
 0x19c   : > { %8025 = vmatprep.subr.bf16.mxu1 %v8590_v58 }
 0x19d   : > { %7870 = vmatpush3.bf16.msra.mxu0 %v8607_v63  ;;  %v3349_v63 = vrot.slane %v9861_v52, 2  ;;  %v5425_v40 = vrot.slane %v5423_v36, 1 }
 0x19e   : > { %7871 = vmatprep.subr.bf16.mxu0 %v8612_v3 }
 0x19f   : > { %8026 = vmatpush3.bf16.msra.mxu1 %v8590_v58  ;;  %v3643_v58 = vshrl.u32 %v9776_v24, 16  ;;  %v3352_v52 = vsel %vm2898_vm3, %v3349_v63, %v3351_v0 }
 0x1a0   : > { %7840 = vmatmul.mubr.bf16.gmra.mrb[12].mxu0 %v3338_v12  ;;  %8027 = vmatprep.subr.bf16.mxu1 %v8594_v50  ;;  %v3640_v12 = vrot.slane %v3638_v30, 3  ;;  %v8624_v30 = vld [vmem:[%s10588_s3 + $0x208] sm:$0xff]  }
 0x1a1   : > { %7843 = vmatprep.mubr.bf16.mxu0 %v3340_v37  ;;  %7872 = vmatpush3.bf16.msra.mxu0 %v8612_v3  ;;  %v3646_v3 = vshll.u32 %v9776_v24, 16  ;;  %v3645_v44 = vrot.slane %v3643_v58, 2  ;;  %v3637_v24 = vrot.slane %v3635_v25, 2  ;;  %v3353_v37 = vrot.slane %v8613_v59, 2 }
 0x1a2   : > { %7873 = vmatprep.subr.bf16.mxu0 %v8615_v33 }
 0x1a3   : > { %8028 = vmatpush3.bf16.msra.mxu1 %v8594_v50  ;;  %v3350_v50 = vsel %vm2898_vm3, %v3347_v17, %v3349_v63  ;;  %v3354_v56 = vsel %vm2898_vm3, %v3351_v0, %v3353_v37  ;;  %v8618_v63 = vld [vmem:[%s10588_s3 + $0x140] sm:$0xff]   ;;  %v3679_v0 = vshrl.u32 %v9811_v10, 16  ;;  %v8627_v37 = vld [vmem:[%s10588_s3 + $0x210] sm:$0xff]  }
 0x1a4   : > { %8029 = vmatprep.subr.bf16.mxu1 %v8595_v8 }
 0x1a5   : > { %7874 = vmatpush3.bf16.msra.mxu0 %v8615_v33  ;;  %v3648_v33 = vrot.slane %v3646_v3, 3 }
 0x1a6   : > { %7907 = vmatprep.subr.bf16.mxu0 %v10150_v20 }
 0x1a7   : > { %8030 = vmatpush3.bf16.msra.mxu1 %v8595_v8  ;;  %v3655_v8 = vshll.u32 %v9778_v51, 16  ;;  %v3649_v5 = vor.u32 %v3648_v33, %v3645_v44  ;;  %v3641_v51 = vor.u32 %v3640_v12, %v3637_v24  ;;  %v8620_v44 = vld [vmem:[%s10588_s3 + $0x148] sm:$0xff]   ;;  %v3681_v33 = vrot.slane %v3679_v0, 2 }
 0x1a8   : > { %7844 = vmatmul.mubr.bf16.gmra.mrb[16].mxu0 %v3342_v27  ;;  %8035 = vmatprep.subr.bf16.mxu1 %v8600_v57  ;;  %v3654_v27 = vrot.slane %v3652_v19, 2  ;;  %v10615_v19 = vld [vmem:[#allocation3_spill] sm:$0xff] }
 0x1a9   : > { %7847 = vmatprep.mubr.bf16.mxu0 %v3344_v7  ;;  %v3657_v7 = vrot.slane %v3655_v8, 3  ;;  %v3650_v54 = vsel %vm3633_vm5, %v3641_v51, %v3649_v5 }
 0x1aa   : > { %8032 = vmatmul.mubr.bf16.vlgmr.msra.gmra.mrb[32].mxu1 %v5281_v26  ;;  %v3663_v26 = vrot.slane %v3661_v28, 2 }
 0x1ab   : > { %8036 = vmatpush3.bf16.msra.mxu1 %v8600_v57  ;;  %8051 = vmatprep.mubr.bf16.mxu1 %v5421_v48  ;;  %v5426_v57 = vshll.u32 %v10614_v46, 16  ;;  %v3666_v48 = vrot.slane %v3664_v34, 3  ;;  %v3700_v34 = vshll.u32 %v9815_v55, 16 }
 0x1ac   : > { %8037 = vmatprep.subr.bf16.mxu1 %v8601_v43 }
 0x1ad   : > { %v5428_v17 = vrot.slane %v5426_v57, 2 }
 0x1af   : > { %8038 = vmatpush3.bf16.msra.mxu1 %v8601_v43  ;;  %v8616_v43 = vld [vmem:[%s10588_s3 + $0x138] sm:$0xff]   ;;  %v5429_v3 = vor.u32 %v5428_v17, %v5425_v40  ;;  %v3706_v17 = vshrl.u32 %v9821_v60, 16 }
 0x1b0   : > { %7848 = vmatmul.mubr.bf16.gmra.mrb[20].mxu0 %v3346_v9  ;;  %8039 = vmatprep.subr.bf16.mxu1 %v8605_v62  ;;  %v3670_v9 = vshrl.u32 %v9797_v18, 16 }
 0x1b1   : > { %7851 = vmatprep.mubr.bf16.mxu0 %v3348_v32  ;;  %v3673_v32 = vshll.u32 %v9797_v18, 16  ;;  %v5430_v12 = vsel %vm2467_vm2, %v10157_v21, %v5429_v3  ;;  %v3697_v21 = vshrl.u32 %v9815_v55, 16 }
 0x1b2   : > { %v3672_v59 = vrot.slane %v3670_v9, 2 }
 0x1b3   : > { %8040 = vmatpush3.bf16.msra.mxu1 %v8605_v62  ;;  %v3658_v62 = vor.u32 %v3657_v7, %v3654_v27 }
 0x1b4   : > { %8041 = vmatprep.subr.bf16.mxu1 %v8606_v23 }
 0x1b7   : > { %8042 = vmatpush3.bf16.msra.mxu1 %v8606_v23  ;;  %v3667_v23 = vor.u32 %v3666_v48, %v3663_v26  ;;  %v3702_v26 = vrot.slane %v3700_v34, 3  ;;  %v8635_v48 = vld [vmem:[%s10588_s3 + $0x220] sm:$0xff]  }
 0x1b8   : > { %7852 = vmatmul.mubr.bf16.gmra.mrb[24].mxu0 %v3350_v50  ;;  %8043 = vmatprep.subr.bf16.mxu1 %v8610_v13  ;;  %v3659_v50 = vsel %vm3633_vm5, %v3649_v5, %v3658_v62  ;;  %v3688_v5 = vshrl.u32 %v9813_v47, 16 }
 0x1b9   : > { %7855 = vmatprep.mubr.bf16.mxu0 %v3352_v52  ;;  %v3675_v52 = vrot.slane %v3673_v32, 3  ;;  %v8625_v32 = vld [vmem:[%s10588_s3 + $0x160] sm:$0xff]  }
 0x1bb   : > { %8044 = vmatpush3.bf16.msra.mxu1 %v8610_v13  ;;  %v3682_v13 = vshll.u32 %v9811_v10, 16  ;;  %v3668_v10 = vsel %vm3633_vm5, %v3658_v62, %v3667_v23  ;;  %v3676_v8 = vor.u32 %v3675_v52, %v3672_v59  ;;  %v3709_v62 = vshll.u32 %v9821_v60, 16  ;;  %v8638_v60 = vld [vmem:[%s10588_s3 + $0x228] sm:$0xff]  }
 0x1bc   : > { %8045 = vmatprep.subr.bf16.mxu1 %v8611_v31 }
 0x1bd   : > { %v10201_v6 = vpop.f32.mrb[0].mxu1  ;;  %v3684_v24 = vrot.slane %v3682_v13, 3  ;;  %v3677_v51 = vsel %vm3633_vm5, %v3667_v23, %v3676_v8  ;;  %v3715_v23 = vshrl.u32 %v9844_v45, 16  ;;  %v3711_v59 = vrot.slane %v3709_v62, 3 }
 0x1be   : > { %v10205_v2 = vpop.f32.mrb[1].mxu1  ;;  %v3754_v62 = vshll.u32 %v9859_v49, 16 }
 0x1bf   : > { %8046 = vmatpush3.bf16.msra.mxu1 %v8611_v31  ;;  %v10207_v42 = vpop.f32.mrb[2].mxu1  ;;  %v3685_v28 = vor.u32 %v3684_v24, %v3681_v33  ;;  %v8641_v24 = vld [vmem:[%s10588_s3 + $0x230] sm:$0xff]  }
 0x1c0   : > { %v10210_v29 = vpop.f32.mrb[3].mxu1  ;;  %7856 = vmatmul.mubr.bf16.gmra.mrb[28].mxu0 %v3354_v56  ;;  %8047 = vmatprep.subr.bf16.mxu1 %v8614_v22  ;;  %v3690_v56 = vrot.slane %v3688_v5, 2  ;;  %v8628_v5 = vld [vmem:[%s10588_s3 + $0x170] sm:$0xff]  }
 0x1c1   : > { %7875 = vmatprep.mubr.bf16.mxu0 %v3650_v54  ;;  %v3686_v55 = vsel %vm3633_vm5, %v3676_v8, %v3685_v28  ;;  %v8623_v54 = vld [vmem:[%s10588_s3 + $0x158] sm:$0xff]  }
 0x1c3   : > { %8048 = vmatpush3.bf16.msra.mxu1 %v8614_v22  ;;  %v3691_v22 = vshll.u32 %v9813_v47, 16  ;;  %v8630_v47 = vld [vmem:[%s10588_s3 + $0x218] sm:$0xff]  }
 0x1c4   : > { %8049 = vmatprep.subr.bf16.mxu1 %v8616_v43 }
 0x1c5   : > { %v10223_v58 = vpop.f32.mrb[4].mxu1  ;;  %v3693_v27 = vrot.slane %v3691_v22, 3  ;;  %v3733_v22 = vshrl.u32 %v9848_v38, 16 }
 0x1c6   : > { %v10225_v25 = vpop.f32.mrb[5].mxu1 }
 0x1c7   : > { %8050 = vmatpush3.bf16.msra.mxu1 %v8616_v43  ;;  %v10230_v18 = vpop.f32.mrb[6].mxu1  ;;  %v3699_v43 = vrot.slane %v3697_v21, 2  ;;  %v3694_v40 = vor.u32 %v3693_v27, %v3690_v56  ;;  %v5662_v27 = vld [vmem:[#allocation2 + $0x90] sm:$0xc] }
 0x1c8   : > { %v10233_v31 = vpop.f32.mrb[7].mxu1  ;;  %7876 = vmatmul.mubr.bf16.vlgmr.msra.gmra.mrb[0].mxu0 %v3659_v50  ;;  %8055 = vmatprep.subr.bf16.mxu1 %v8618_v63  ;;  %v3708_v50 = vrot.slane %v3706_v17, 2  ;;  %v3751_v17 = vshrl.u32 %v9859_v49, 16  ;;  %v3756_v49 = vrot.slane %v3754_v62, 3 }
 0x1c9   : > { %7879 = vmatprep.mubr.bf16.mxu0 %v3668_v10  ;;  %7908 = vmatpush3.bf16.msra.mxu0 %v10150_v20  ;;  %v8622_v20 = vld [vmem:[%s10588_s3 + $0x150] sm:$0xff]   ;;  %v3703_v9 = vor.u32 %v3702_v26, %v3699_v43  ;;  %v8626_v10 = vld [vmem:[%s10588_s3 + $0x168] sm:$0xff]   ;;  %v3745_v43 = vshll.u32 %v9857_v16, 16 }
 0x1ca   : > { %8052 = vmatmul.mubr.bf16.vlgmr.msra.gmra.mrb[32].mxu1 %v5430_v12  ;;  %7909 = vmatprep.subr.bf16.mxu0 %v8624_v30  ;;  %v3712_v12 = vor.u32 %v3711_v59, %v3708_v50  ;;  %v10616_v50 = vld [vmem:[#allocation5_spill] sm:$0xff] }
 0x1cb   : > { %8056 = vmatpush3.bf16.msra.mxu1 %v8618_v63  ;;  %8071 = vmatprep.mubr.bf16.mxu1 %v10615_v19  ;;  %v3718_v63 = vshll.u32 %v9844_v45, 16  ;;  %v3704_v45 = vsel %vm3633_vm5, %v3694_v40, %v3703_v9  ;;  %v3727_v19 = vshll.u32 %v9846_v11, 16 }
 0x1cc   : > { %8057 = vmatprep.subr.bf16.mxu1 %v8620_v44  ;;  %v3713_v21 = vsel %vm3633_vm5, %v3703_v9, %v3712_v12  ;;  %v5697_v9 = vrot.slane %v9863_v4, 2 }
 0x1cd   : > { %v10253_v46 = vpop.f32.mrb[8].mxu1  ;;  %7910 = vmatpush3.bf16.msra.mxu0 %v8624_v30  ;;  %v3695_v30 = vsel %vm3633_vm5, %v3685_v28, %v3694_v40  ;;  %v3720_v33 = vrot.slane %v3718_v63, 3  ;;  %v3736_v28 = vshll.u32 %v9848_v38, 16  ;;  %v3729_v34 = vrot.slane %v3727_v19, 3 }
 0x1ce   : > { %v10255_v36 = vpop.f32.mrb[9].mxu1  ;;  %7911 = vmatprep.subr.bf16.mxu0 %v8627_v37  ;;  %v3735_v38 = vrot.slane %v3733_v22, 2  ;;  %v10319_v40 = vcombine.low %v5662_v27, %v9868_v14  ;;  %v8634_v14 = vld [vmem:[%s10588_s3 + $0x188] sm:$0xff]  }
 0x1cf   : > { %8058 = vmatpush3.bf16.msra.mxu1 %v8620_v44  ;;  %v10260_v57 = vpop.f32.mrb[10].mxu1  ;;  %v3717_v44 = vrot.slane %v3715_v23, 2  ;;  %v3738_v56 = vrot.slane %v3736_v28, 3  ;;  %v3747_v23 = vrot.slane %v3745_v43, 3 }
 0x1d0   : > { %v10263_v7 = vpop.f32.mrb[11].mxu1  ;;  %7880 = vmatmul.mubr.bf16.gmra.mrb[4].mxu0 %v3677_v51  ;;  %8059 = vmatprep.subr.bf16.mxu1 %v8622_v20  ;;  %v8629_v51 = vld [vmem:[%s10588_s3 + $0x178] sm:$0xff]  }
 0x1d1   : > { %7883 = vmatprep.mubr.bf16.mxu0 %v3686_v55  ;;  %7912 = vmatpush3.bf16.msra.mxu0 %v8627_v37  ;;  %v3724_v37 = vshrl.u32 %v9846_v11, 16  ;;  %v3721_v8 = vor.u32 %v3720_v33, %v3717_v44  ;;  %v3739_v26 = vor.u32 %v3738_v56, %v3735_v38 }
 0x1d2   : > { %7913 = vmatprep.subr.bf16.mxu0 %v8630_v47 }
 0x1d3   : > { %8060 = vmatpush3.bf16.msra.mxu1 %v8622_v20  ;;  %v8645_v20 = vld [vmem:[%s10588_s3 + $0x238] sm:$0xff]   ;;  %v3726_v11 = vrot.slane %v3724_v37, 2  ;;  %v8689_v37 = vld [vmem:[#allocation2 + $0x88] sm:$0xff]  }
 0x1d4   : > { %8061 = vmatprep.subr.bf16.mxu1 %v8623_v54  ;;  %v3769_v19 = vshrl.u32 %v8689_v37, 16 }
 0x1d5   : > { %v10279_v0 = vpop.f32.mrb[12].mxu1  ;;  %7914 = vmatpush3.bf16.msra.mxu0 %v8630_v47  ;;  %v3722_v47 = vsel %vm3633_vm5, %v3712_v12, %v3721_v8  ;;  %v3730_v55 = vor.u32 %v3729_v34, %v3726_v11  ;;  %v8636_v12 = vld [vmem:[%s10588_s3 + $0x190] sm:$0xff]  }
 0x1d6   : > { %v10281_v13 = vpop.f32.mrb[13].mxu1  ;;  %7915 = vmatprep.subr.bf16.mxu0 %v8635_v48  ;;  %v3771_v11 = vrot.slane %v3769_v19, 2 }
 0x1d7   : > { %8062 = vmatpush3.bf16.msra.mxu1 %v8623_v54  ;;  %v10286_v3 = vpop.f32.mrb[14].mxu1  ;;  %v3742_v54 = vshrl.u32 %v9857_v16, 16  ;;  %v3740_v63 = vsel %vm3633_vm5, %v3730_v55, %v3739_v26 }
 0x1d8   : > { %v10289_v52 = vpop.f32.mrb[15].mxu1  ;;  %7884 = vmatmul.mubr.bf16.gmra.mrb[8].mxu0 %v3695_v30  ;;  %8063 = vmatprep.subr.bf16.mxu1 %v8625_v32  ;;  %v3753_v30 = vrot.slane %v3751_v17, 2  ;;  %v8640_v17 = vld [vmem:[%s10588_s3 + $0x1a8] sm:$0xff]  }
 0x1d9   : > { %7887 = vmatprep.mubr.bf16.mxu0 %v3704_v45  ;;  %7916 = vmatpush3.bf16.msra.mxu0 %v8635_v48  ;;  %v8631_v48 = vld [vmem:[%s10588_s3 + $0x180] sm:$0xff]   ;;  %v3744_v16 = vrot.slane %v3742_v54, 2 }
 0x1da   : > { %7917 = vmatprep.subr.bf16.mxu0 %v8638_v60 }
 0x1db   : > { %8064 = vmatpush3.bf16.msra.mxu1 %v8625_v32  ;;  %v3731_v32 = vsel %vm3633_vm5, %v3721_v8, %v3730_v55  ;;  %v3748_v45 = vor.u32 %v3747_v23, %v3744_v16  ;;  %v3772_v8 = vshll.u32 %v8689_v37, 16  ;;  %v8639_v55 = vld [vmem:[%s10588_s3 + $0x1a0] sm:$0xff]  }
 0x1dc   : > { %8065 = vmatprep.subr.bf16.mxu1 %v8626_v10  ;;  %v8648_v37 = vld [vmem:[%s10588_s3 + $0x1c0] sm:$0xff]  }
 0x1dd   : > { %7918 = vmatpush3.bf16.msra.mxu0 %v8638_v60  ;;  %v5696_v60 = vrot.slane %v10319_v40, 2  ;;  %v3774_v34 = vrot.slane %v3772_v8, 3 }
 0x1de   : > { %7919 = vmatprep.subr.bf16.mxu0 %v8641_v24 }
 0x1df   : > { %8066 = vmatpush3.bf16.msra.mxu1 %v8626_v10  ;;  %v5698_v59 = vsel %vm2898_vm3, %v5696_v60, %v5697_v9  ;;  %v8688_v10 = vld [vmem:[#allocation2 + $0x80] sm:$0xff]   ;;  %v3775_v27 = vor.u32 %v3774_v34, %v3771_v11  ;;  %v10618_v11 = vld [vmem:[#allocation7_spill] sm:$0xff] }
 0x1e0   : > { %7888 = vmatmul.mubr.bf16.gmra.mrb[12].mxu0 %v3713_v21  ;;  %8067 = vmatprep.subr.bf16.mxu1 %v8628_v5  ;;  %v3760_v44 = vshrl.u32 %v8688_v10, 16  ;;  %v3763_v33 = vshll.u32 %v8688_v10, 16  ;;  %v8637_v21 = vld [vmem:[%s10588_s3 + $0x198] sm:$0xff]   ;;  %v5828_v10 = vshll.u32 %v10319_v40, 16 }
 0x1e1   : > { %7891 = vmatprep.mubr.bf16.mxu0 %v3722_v47  ;;  %7920 = vmatpush3.bf16.msra.mxu0 %v8641_v24  ;;  %v3757_v24 = vor.u32 %v3756_v49, %v3753_v30 }
 0x1e2   : > { %7921 = vmatprep.subr.bf16.mxu0 %v8645_v20  ;;  %v3762_v22 = vrot.slane %v3760_v44, 2  ;;  %v3765_v28 = vrot.slane %v3763_v33, 3  ;;  %v10617_v44 = vld [vmem:[#allocation6_spill] sm:$0xff]  ;;  %v8647_v33 = vld [vmem:[#allocation2 + $0xa0] ss:$0 sps:$4 sm:$0x33]  }
 0x1e3   : > { %8068 = vmatpush3.bf16.msra.mxu1 %v8628_v5  ;;  %v3749_v5 = vsel %vm3633_vm5, %v3739_v26, %v3748_v45  ;;  %v5830_v8 = vrot.slane %v5828_v10, 3  ;;  %v8692_v10 = vld [vmem:[#allocation2 + $0xa0] ss:$0 sps:$4 sm:$0x77]  }
 0x1e4   : > { %8069 = vmatprep.subr.bf16.mxu1 %v8629_v51  ;;  %v3766_v47 = vor.u32 %v3765_v28, %v3762_v22  ;;  %v5699_v22 = vrot.slane %v8647_v33, 2  ;;  %v5845_v33 = vshll.u32 %v8692_v10, 16 }
 0x1e5   : > { %7922 = vmatpush3.bf16.msra.mxu0 %v8645_v20  ;;  %v3758_v20 = vsel %vm3633_vm5, %v3748_v45, %v3757_v24  ;;  %v5825_v45 = vshrl.u32 %v10319_v40, 16 }
 0x1e6   : > { %v3767_v54 = vsel %vm3633_vm5, %v3757_v24, %v3766_v47 }
 0x1e7   : > { %8070 = vmatpush3.bf16.msra.mxu1 %v8629_v51  ;;  %v8690_v51 = vld [vmem:[#allocation2 + $0x90] ss:$0 sps:$4 sm:$0x77]   ;;  %v5827_v19 = vrot.slane %v5825_v45, 2 }
 0x1e8   : > { %7892 = vmatmul.mubr.bf16.gmra.mrb[16].mxu0 %v3731_v32  ;;  %8075 = vmatprep.subr.bf16.mxu1 %v8631_v48  ;;  %v3778_v38 = vshrl.u32 %v8690_v51, 16  ;;  %v3781_v56 = vshll.u32 %v8690_v51, 16  ;;  %v8644_v32 = vld [vmem:[%s10588_s3 + $0x1b0] sm:$0xff]  }
 0x1e9   : > { %7895 = vmatprep.mubr.bf16.mxu0 %v3740_v63  ;;  %v8691_v63 = vld [vmem:[#allocation2 + $0x98] sm:$0xff]   ;;  %v5831_v34 = vor.u32 %v5830_v8, %v5827_v19  ;;  %v8654_v45 = vld [vmem:[%s10588_s3 + $0x1f0] sm:$0xff]   ;;  %v5847_v8 = vrot.slane %v5845_v33, 3 }
 0x1ea   : > { %8072 = vmatmul.mubr.bf16.vlgmr.msra.gmra.mrb[32].mxu1 %v10616_v50  ;;  %v3780_v43 = vrot.slane %v3778_v38, 2  ;;  %v3783_v26 = vrot.slane %v3781_v56, 3  ;;  %v5833_v60 = vshrl.u32 %v8691_v63, 16  ;;  %v10619_v51 = vld [vmem:[#allocation8_spill] sm:$0xff]  ;;  %v5700_v38 = vsel %vm2898_vm3, %v5697_v9, %v5699_v22  ;;  %v10620_v9 = vld [vmem:[#allocation9_spill] sm:$0xff] }
 0x1eb   : > { %8076 = vmatpush3.bf16.msra.mxu1 %v8631_v48  ;;  %8091 = vmatprep.mubr.bf16.mxu1 %v5698_v59  ;;  %v3776_v48 = vsel %vm3633_vm5, %v3766_v47, %v3775_v27  ;;  %v8646_v59 = vld [vmem:[%s10588_s3 + $0x1b8] sm:$0xff]   ;;  %v8649_v47 = vld [vmem:[%s10588_s3 + $0x1c8] sm:$0xff]   ;;  %v8657_v22 = vld [vmem:[%s10588_s3 + $0x200] sm:$0xff]  }
 0x1ec   : > { %8077 = vmatprep.subr.bf16.mxu1 %v8634_v14  ;;  %v3784_v62 = vor.u32 %v3783_v26, %v3780_v43  ;;  %v5835_v24 = vrot.slane %v5833_v60, 2  ;;  %v8651_v26 = vld [vmem:[%s10588_s3 + $0x1d8] sm:$0xff]  }
 0x1ee   : > { %v3785_v49 = vsel %vm3633_vm5, %v3775_v27, %v3784_v62  ;;  %v8650_v27 = vld [vmem:[%s10588_s3 + $0x1d0] sm:$0xff]  }
 0x1ef   : > { %8078 = vmatpush3.bf16.msra.mxu1 %v8634_v14  ;;  %v5836_v14 = vshll.u32 %v8691_v63, 16 }
 0x1f0   : > { %7896 = vmatmul.mubr.bf16.gmra.mrb[20].mxu0 %v3749_v5  ;;  %8079 = vmatprep.subr.bf16.mxu1 %v8636_v12 }
 0x1f1   : > { %7899 = vmatprep.mubr.bf16.mxu0 %v3758_v20 }
 0x1f3   : > { %8080 = vmatpush3.bf16.msra.mxu1 %v8636_v12  ;;  %v5838_v12 = vrot.slane %v5836_v14, 3  ;;  %v10622_v14 = vld [vmem:[#allocation11_spill] sm:$0xff] }
 0x1f4   : > { %8081 = vmatprep.subr.bf16.mxu1 %v8637_v21 }
 0x1f5   : > { %v5839_v20 = vor.u32 %v5838_v12, %v5835_v24  ;;  %v10624_v24 = vld [vmem:[#allocation13_spill] sm:$0xff] }
 0x1f6   : > { %v8655_v12 = vld [vmem:[%s10588_s3 + $0x1f8] sm:$0xff]  }
 0x1f7   : > { %8082 = vmatpush3.bf16.msra.mxu1 %v8637_v21  ;;  %v5840_v56 = vsel %vm3633_vm5, %v5831_v34, %v5839_v20  ;;  %v8659_v34 = vld [vmem:[%s10588_s3 + $0x208] sm:$0xff]  }
 0x1f8   : > { %7900 = vmatmul.mubr.bf16.gmra.mrb[24].mxu0 %v3767_v54  ;;  %8083 = vmatprep.subr.bf16.mxu1 %v8639_v55 }
 0x1f9   : > { %7903 = vmatprep.mubr.bf16.mxu0 %v3776_v48  ;;  %v10621_v48 = vld [vmem:[#allocation10_spill] sm:$0xff] }
 0x1fb   : > { %8084 = vmatpush3.bf16.msra.mxu1 %v8639_v55 }
 0x1fc   : > { %8085 = vmatprep.subr.bf16.mxu1 %v8640_v17 }
 0x1fd   : > { %v10353_v16 = vpop.f32.mrb[16].mxu1 }
 0x1fe   : > { %v10355_v23 = vpop.f32.mrb[17].mxu1 }
 0x1ff   : > { %8086 = vmatpush3.bf16.msra.mxu1 %v8640_v17  ;;  %v10357_v30 = vpop.f32.mrb[18].mxu1  ;;  %v8652_v17 = vld [vmem:[%s10588_s3 + $0x1e0] sm:$0xff]  }
 0x200   : > { %v10360_v50 = vpop.f32.mrb[19].mxu1  ;;  %7904 = vmatmul.mubr.bf16.gmra.mrb[28].mxu0 %v3785_v49  ;;  %8087 = vmatprep.subr.bf16.mxu1 %v8644_v32  ;;  %v8653_v49 = vld [vmem:[%s10588_s3 + $0x1e8] sm:$0xff]  }
 0x201   : > { %7923 = vmatprep.mubr.bf16.mxu0 %v10617_v44  ;;  %v5842_v44 = vshrl.u32 %v8692_v10, 16 }
 0x203   : > { %8088 = vmatpush3.bf16.msra.mxu1 %v8644_v32  ;;  %v5844_v19 = vrot.slane %v5842_v44, 2 }
 0x204   : > { %8089 = vmatprep.subr.bf16.mxu1 %v8646_v59 }
 0x205   : > { %v10371_v5 = vpop.f32.mrb[20].mxu1 }
 0x206   : > { %v10373_v28 = vpop.f32.mrb[21].mxu1 }
 0x207   : > { %8090 = vmatpush3.bf16.msra.mxu1 %v8646_v59  ;;  %v10375_v40 = vpop.f32.mrb[22].mxu1  ;;  %v10623_v59 = vld [vmem:[#allocation12_spill] sm:$0xff] }
 0x208   : > { %v10377_v21 = vpop.f32.mrb[23].mxu1  ;;  %7924 = vmatmul.mubr.bf16.vlgmr.msra.gmra.mrb[0].mxu0 %v10618_v11  ;;  %8095 = vmatprep.subr.bf16.mxu1 %v8648_v37  ;;  %v5848_v11 = vor.u32 %v5847_v8, %v5844_v19 }
 0x209   : > { %7927 = vmatprep.mubr.bf16.mxu0 %v10619_v51 }
 0x20a   : > { %8092 = vmatmul.mubr.bf16.vlgmr.msra.gmra.mrb[32].mxu1 %v5700_v38  ;;  %v5849_v51 = vsel %vm3633_vm5, %v5839_v20, %v5848_v11  ;;  %v8660_v38 = vld [vmem:[%s10588_s3 + $0x210] sm:$0xff]  }
 0x20b   : > { %8096 = vmatpush3.bf16.msra.mxu1 %v8648_v37  ;;  %8111 = vmatprep.mubr.bf16.mxu1 %v5840_v56  ;;  %v10625_v37 = vld [vmem:[#allocation14_spill] sm:$0xff]  ;;  %v10627_v56 = vld [vmem:[#allocation16_spill] sm:$0xff] }
 0x20c   : > { %8097 = vmatprep.subr.bf16.mxu1 %v8649_v47  ;;  %v8664_v20 = vld [vmem:[%s10588_s3 + $0x230] sm:$0xff]  }
 0x20d   : > { %v10391_v55 = vpop.f32.mrb[24].mxu1 }
 0x20e   : > { %v10393_v54 = vpop.f32.mrb[25].mxu1 }
 0x20f   : > { %8098 = vmatpush3.bf16.msra.mxu1 %v8649_v47  ;;  %v10395_v43 = vpop.f32.mrb[26].mxu1  ;;  %v10626_v47 = vld [vmem:[#allocation15_spill] sm:$0xff] }
 0x210   : > { %v10397_v4 = vpop.f32.mrb[27].mxu1  ;;  %7928 = vmatmul.mubr.bf16.gmra.mrb[4].mxu0 %v10620_v9  ;;  %8099 = vmatprep.subr.bf16.mxu1 %v8650_v27  ;;  %v4395_v9 = vpop.permute.xlu0 %4394 }
 0x211   : > { %7931 = vmatprep.mubr.bf16.mxu0 %v10621_v48 }
 0x213   : > { %8100 = vmatpush3.bf16.msra.mxu1 %v8650_v27 }
 0x214   : > { %8101 = vmatprep.subr.bf16.mxu1 %v8651_v26  ;;  %v4405_v48 = vpop.permute.xlu0 %4404 }
 0x215   : > { %v10407_v62 = vpop.f32.mrb[28].mxu1 }
 0x216   : > { %v10409_v32 = vpop.f32.mrb[29].mxu1 }
 0x217   : > { %8102 = vmatpush3.bf16.msra.mxu1 %v8651_v26  ;;  %v10411_v63 = vpop.f32.mrb[30].mxu1 }
 0x218   : > { %v10413_v60 = vpop.f32.mrb[31].mxu1  ;;  %7932 = vmatmul.mubr.bf16.gmra.mrb[8].mxu0 %v10622_v14  ;;  %8103 = vmatprep.subr.bf16.mxu1 %v8652_v17  ;;  %v4415_v14 = vpop.permute.xlu0 %4414 }
 0x219   : > { %7935 = vmatprep.mubr.bf16.mxu0 %v10623_v59 }
 0x21b   : > { %8104 = vmatpush3.bf16.msra.mxu1 %v8652_v17 }
 0x21c   : > { %8105 = vmatprep.subr.bf16.mxu1 %v8653_v49 }
 0x21f   : > { %8106 = vmatpush3.bf16.msra.mxu1 %v8653_v49 }
 0x220   : > { %7936 = vmatmul.mubr.bf16.gmra.mrb[12].mxu0 %v10624_v24  ;;  %8107 = vmatprep.subr.bf16.mxu1 %v8654_v45 }
 0x221   : > { %7939 = vmatprep.mubr.bf16.mxu0 %v10625_v37 }
 0x223   : > { %8108 = vmatpush3.bf16.msra.mxu1 %v8654_v45 }
 0x224   : > { %8109 = vmatprep.subr.bf16.mxu1 %v8655_v12 }
 0x227   : > { %8110 = vmatpush3.bf16.msra.mxu1 %v8655_v12 }
 0x228   : > { %7940 = vmatmul.mubr.bf16.gmra.mrb[16].mxu0 %v9902_v15  ;;  %8115 = vmatprep.subr.bf16.mxu1 %v8657_v22  ;;  %v8661_v15 = vld [vmem:[%s10588_s3 + $0x218] sm:$0xff]  }
 0x229   : > { %7943 = vmatprep.mubr.bf16.mxu0 %v10626_v47 }
 0x22a   : > { %8112 = vmatmul.mubr.bf16.vlgmr.msra.gmra.mrb[32].mxu1 %v5849_v51 }
 0x22b   : > { %8116 = vmatpush3.bf16.msra.mxu1 %v8657_v22  ;;  %8131 = vmatprep.mubr.bf16.mxu1 %v9918_v1  ;;  %v8662_v1 = vld [vmem:[%s10588_s3 + $0x220] sm:$0xff]  }
 0x22c   : > { %8117 = vmatprep.subr.bf16.mxu1 %v8659_v34 }
 0x22f   : > { %8118 = vmatpush3.bf16.msra.mxu1 %v8659_v34 }
 0x230   : > { %7944 = vmatmul.mubr.bf16.gmra.mrb[20].mxu0 %v9921_v61  ;;  %8119 = vmatprep.subr.bf16.mxu1 %v8660_v38  ;;  %v8663_v61 = vld [vmem:[%s10588_s3 + $0x228] sm:$0xff]  }
 0x231   : > { %7947 = vmatprep.mubr.bf16.mxu0 %v10627_v56 }
 0x233   : > { %8120 = vmatpush3.bf16.msra.mxu1 %v8660_v38 }
 0x234   : > { %8121 = vmatprep.subr.bf16.mxu1 %v8661_v15 }
 0x237   : > { %8122 = vmatpush3.bf16.msra.mxu1 %v8661_v15 }
 0x238   : > { %7948 = vmatmul.mubr.bf16.gmra.mrb[24].mxu0 %v9930_v39  ;;  %8123 = vmatprep.subr.bf16.mxu1 %v8662_v1  ;;  %v8665_v39 = vld [vmem:[%s10588_s3 + $0x238] sm:$0xff]  }
 0x239   : > { %7951 = vmatprep.mubr.bf16.mxu0 %v9933_v53  ;;  %v4390_v53 = vpop.permute.xlu1 %4389 }
 0x23b   : > { %8124 = vmatpush3.bf16.msra.mxu1 %v8662_v1 }
 0x23c   : > { %8125 = vmatprep.subr.bf16.mxu1 %v8663_v61 }
 0x23d   : > { %v4400_v27 = vpop.permute.xlu1 %4399 }
 0x23f   : > { %8126 = vmatpush3.bf16.msra.mxu1 %v8663_v61 }
 0x240   : > { %7952 = vmatmul.mubr.bf16.gmra.mrb[28].mxu0 %v9936_v35  ;;  %8127 = vmatprep.subr.bf16.mxu1 %v8664_v20  ;;  %v4425_v35 = vpop.permute.xlu0 %4424 }
 0x241   : > { %v4410_v26 = vpop.permute.xlu1 %4409 }
 0x243   : > { %8128 = vmatpush3.bf16.msra.mxu1 %v8664_v20 }
 0x244   : > { %8129 = vmatprep.subr.bf16.mxu1 %v8665_v39  ;;  %v10466_v45 = vpop.permute.xlu0 %4434 }
 0x245   : > { %v4420_v17 = vpop.permute.xlu1 %4419 }
 0x247   : > { %8130 = vmatpush3.bf16.msra.mxu1 %v8665_v39 }
 0x248   : > { %v10470_v44 = vpop.permute.xlu0 %4444 }
 0x249   : > { %v10462_v49 = vpop.permute.xlu1 %4429 }
 0x24a   : > { %8132 = vmatmul.mubr.bf16.vlgmr.msra.gmra.mrb[32].mxu1 %v9943_v41 }
 0x24c   : > { %v10475_v37 = vpop.permute.xlu0 %4454 }
 0x24d   : > { %v10464_v59 = vpop.permute.xlu1 %4439 }
 0x250   : > { %v10488_v56 = vpop.permute.xlu0 %4464 }
 0x251   : > { %v10468_v10 = vpop.permute.xlu1 %4449 }
 0x255   : > { %v10472_v41 = vpop.permute.xlu1 %4459 }
 0x259   : > { %v10481_v15 = vpop.permute.xlu1 %4469 }
 0x2db   : > { %v7925_v33 = vpop.f32.mrb[0].mxu0 }
 0x2dc   : > { %v8151_v24 = vadd.f32 %v7925_v33, %v10201_v6  ;;  %v4196_v12 = vpop.f32.mrb[1].mxu0 }
 0x2dd   : > { %v8152_v19 = vadd.f32 %v4196_v12, %v10205_v2  ;;  %v7926_v8 = vpop.f32.mrb[2].mxu0 }
 0x2de   : > { %v8153_v22 = vadd.f32 %v7926_v8, %v10207_v42  ;;  %v4199_v11 = vpop.f32.mrb[3].mxu0  ;;  %v4549_v51 = vmul.f32 %v8151_v24, %v4400_v27 }
 0x2df   : > { %v4547_v34 = vmul.f32 %v8152_v19, %v4390_v53  ;;  %v8154_v47 = vadd.f32 %v4199_v11, %v10210_v29 }
 0x2e0   : > { %v4550_v38 = vmul.f32 %v8153_v22, %v4405_v48  ;;  %v4619_v27 = vmul.f32 %v4549_v51, %v4549_v51  ;;  %v10495_v22 = vpop.permute.xlu1 %4479 }
 0x2e1   : > { %v4548_v6 = vmul.f32 %v8154_v47, %v4395_v9  ;;  %v4617_v42 = vmul.f32 %v4547_v34, %v4547_v34 }
 0x2e2   : > { %v7078_v2 = vpack.c.bf16 %v4550_v38, %v4549_v51  ;;  %v4620_v9 = vmul.f32 %v4550_v38, %v4550_v38 }
 0x2e3   : > { %v4579_v1 = vadd.f32 %v4548_v6, %v4547_v34  ;;  %v4618_v61 = vmul.f32 %v4548_v6, %v4548_v6  ;;  %v7073_v20 = vpack.c.bf16 %v4548_v6, %v4547_v34  ;;  %v7929_v29 = vpop.f32.mrb[4].mxu0 }
 0x2e4   : > { %7200 = vst [vmem:[%s10486_s12 + $0x8] sm:$0xff] %v7078_v2   ;;  %v8155_v39 = vadd.f32 %v7929_v29, %v10223_v58  ;;  %v4212_v53 = vpop.f32.mrb[5].mxu0 }
 0x2e5   : > { %v4580_v48 = vadd.f32 %v4579_v1, %v4549_v51  ;;  %v4649_v33 = vadd.f32 %v4618_v61, %v4617_v42  ;;  %7074 = vst [vmem:[%s10486_s12] sm:$0xff] %v7073_v20   ;;  %v8156_v24 = vadd.f32 %v4212_v53, %v10225_v25  ;;  %v7930_v12 = vpop.f32.mrb[6].mxu0  ;;  %v10498_v51 = vpop.permute.xlu0 %4474 }
 0x2e6   : > { %v8157_v19 = vadd.f32 %v7930_v12, %v10230_v18  ;;  %v4215_v8 = vpop.f32.mrb[7].mxu0  ;;  %v4553_v6 = vmul.f32 %v8155_v39, %v4420_v17 }
 0x2e7   : > { %v4650_v11 = vadd.f32 %v4649_v33, %v4619_v27  ;;  %v4551_v34 = vmul.f32 %v8156_v24, %v4410_v26  ;;  %v4581_v47 = vadd.f32 %v4580_v48, %v4550_v38  ;;  %v8158_v58 = vadd.f32 %v4215_v8, %v10233_v31  ;;  %v10502_v31 = vpop.permute.xlu1 %4489 }
 0x2e8   : > { %v4554_v2 = vmul.f32 %v8157_v19, %v4425_v35  ;;  %v4623_v17 = vmul.f32 %v4553_v6, %v4553_v6 }
 0x2e9   : > { %v4582_v42 = vadd.f32 %v4581_v47, %v4551_v34  ;;  %v4621_v1 = vmul.f32 %v4551_v34, %v4551_v34  ;;  %v4651_v25 = vadd.f32 %v4650_v11, %v4620_v9  ;;  %v4552_v61 = vmul.f32 %v8158_v58, %v4415_v14  ;;  %v10507_v19 = vpop.permute.xlu0 %4484 }
 0x2ea   : > { %v7088_v20 = vpack.c.bf16 %v4554_v2, %v4553_v6  ;;  %v4624_v14 = vmul.f32 %v4554_v2, %v4554_v2 }
 0x2eb   : > { %v4652_v18 = vadd.f32 %v4651_v25, %v4621_v1  ;;  %v4583_v29 = vadd.f32 %v4582_v42, %v4552_v61  ;;  %v4622_v53 = vmul.f32 %v4552_v61, %v4552_v61  ;;  %v7083_v12 = vpack.c.bf16 %v4552_v61, %v4551_v34  ;;  %v7933_v27 = vpop.f32.mrb[8].mxu0  ;;  %v10514_v25 = vpop.permute.xlu1 %4499 }
 0x2ec   : > { %7202 = vst [vmem:[%s10486_s12 + $0x18] sm:$0xff] %v7088_v20   ;;  %v8159_v26 = vadd.f32 %v7933_v27, %v10253_v46  ;;  %v4228_v38 = vpop.f32.mrb[9].mxu0 }
 0x2ed   : > { %v4584_v35 = vadd.f32 %v4583_v29, %v4553_v6  ;;  %v4653_v39 = vadd.f32 %v4652_v18, %v4622_v53  ;;  %7201 = vst [vmem:[%s10486_s12 + $0x10] sm:$0xff] %v7083_v12   ;;  %v8160_v48 = vadd.f32 %v4228_v38, %v10255_v36  ;;  %v7934_v33 = vpop.f32.mrb[10].mxu0  ;;  %v10518_v29 = vpop.permute.xlu0 %4494 }
 0x2ee   : > { %v8161_v24 = vadd.f32 %v7934_v33, %v10260_v57  ;;  %v4231_v9 = vpop.f32.mrb[11].mxu0  ;;  %v4557_v47 = vmul.f32 %v8159_v26, %v10464_v59 }
 0x2ef   : > { %v4654_v8 = vadd.f32 %v4653_v39, %v4623_v17  ;;  %v4555_v11 = vmul.f32 %v8160_v48, %v10462_v49  ;;  %v4585_v46 = vadd.f32 %v4584_v35, %v4554_v2  ;;  %v8162_v34 = vadd.f32 %v4231_v9, %v10263_v7 }
 0x2f0   : > { %v4558_v58 = vmul.f32 %v8161_v24, %v10470_v44  ;;  %v4627_v44 = vmul.f32 %v4557_v47, %v4557_v47  ;;  %v10527_v24 = vpop.permute.xlu1 %4509 }
 0x2f1   : > { %v4586_v6 = vadd.f32 %v4585_v46, %v4555_v11  ;;  %v4625_v36 = vmul.f32 %v4555_v11, %v4555_v11  ;;  %v4655_v42 = vadd.f32 %v4654_v8, %v4624_v14  ;;  %v4556_v57 = vmul.f32 %v8162_v34, %v10466_v45  ;;  %v4505_v46 = vpop.permute.xlu0 %4504 }
 0x2f2   : > { %v7098_v1 = vpack.c.bf16 %v4558_v58, %v4557_v47  ;;  %v4628_v26 = vmul.f32 %v4558_v58, %v4558_v58 }
 0x2f3   : > { %v4656_v61 = vadd.f32 %v4655_v42, %v4625_v36  ;;  %v4587_v20 = vadd.f32 %v4586_v6, %v4556_v57  ;;  %v4626_v49 = vmul.f32 %v4556_v57, %v4556_v57  ;;  %v7093_v18 = vpack.c.bf16 %v4556_v57, %v4555_v11  ;;  %v7937_v2 = vpop.f32.mrb[12].mxu0 }
 0x2f4   : > { %7204 = vst [vmem:[%s10486_s12 + $0x28] sm:$0xff] %v7098_v1   ;;  %v8163_v7 = vadd.f32 %v7937_v2, %v10279_v0  ;;  %v4244_v59 = vpop.f32.mrb[13].mxu0 }
 0x2f5   : > { %v4588_v53 = vadd.f32 %v4587_v20, %v4557_v47  ;;  %v4657_v12 = vadd.f32 %v4656_v61, %v4626_v49  ;;  %7203 = vst [vmem:[%s10486_s12 + $0x20] sm:$0xff] %v7093_v18   ;;  %v8164_v45 = vadd.f32 %v4244_v59, %v10281_v13  ;;  %v7938_v27 = vpop.f32.mrb[14].mxu0  ;;  %v10535_v49 = vpop.permute.xlu1 %4519 }
 0x2f6   : > { %v8165_v38 = vadd.f32 %v7938_v27, %v10286_v3  ;;  %v4247_v17 = vpop.f32.mrb[15].mxu0  ;;  %v4561_v33 = vmul.f32 %v8163_v7, %v10472_v41 }
 0x2f7   : > { %v4658_v35 = vadd.f32 %v4657_v12, %v4627_v44  ;;  %v4559_v39 = vmul.f32 %v8164_v45, %v10468_v10  ;;  %v4589_v48 = vadd.f32 %v4588_v53, %v4558_v58  ;;  %v8166_v0 = vadd.f32 %v4247_v17, %v10289_v52  ;;  %v10541_v53 = vpop.permute.xlu0 %4514 }
 0x2f8   : > { %v4562_v14 = vmul.f32 %v8165_v38, %v10488_v56  ;;  %v4631_v56 = vmul.f32 %v4561_v33, %v4561_v33 }
 0x2f9   : > { %v4590_v9 = vadd.f32 %v4589_v48, %v4559_v39  ;;  %v4629_v13 = vmul.f32 %v4559_v39, %v4559_v39  ;;  %v4659_v8 = vadd.f32 %v4658_v35, %v4628_v26  ;;  %v4560_v3 = vmul.f32 %v8166_v0, %v10475_v37 }
 0x2fa   : > { %v7108_v11 = vpack.c.bf16 %v4562_v14, %v4561_v33  ;;  %v4632_v61 = vmul.f32 %v4562_v14, %v4562_v14 }
 0x2fb   : > { %v4660_v34 = vadd.f32 %v4659_v8, %v4629_v13  ;;  %v4591_v10 = vadd.f32 %v4590_v9, %v4560_v3  ;;  %v4630_v47 = vmul.f32 %v4560_v3, %v4560_v3  ;;  %v7103_v58 = vpack.c.bf16 %v4560_v3, %v4559_v39  ;;  %v7941_v6 = vpop.f32.mrb[16].mxu0  ;;  %v10546_v39 = vpop.permute.xlu1 %4529 }
 0x2fc   : > { %7206 = vst [vmem:[%s10486_s12 + $0x38] sm:$0xff] %v7108_v11   ;;  %v8167_v52 = vadd.f32 %v7941_v6, %v10353_v16  ;;  %v4260_v41 = vpop.f32.mrb[17].mxu0  ;;  %v4525_v8 = vpop.permute.xlu0 %4524 }
 0x2fd   : > { %v4592_v36 = vadd.f32 %v4591_v10, %v4561_v33  ;;  %v4661_v42 = vadd.f32 %v4660_v34, %v4630_v47  ;;  %7205 = vst [vmem:[%s10486_s12 + $0x30] sm:$0xff] %v7103_v58   ;;  %v8168_v57 = vadd.f32 %v4260_v41, %v10355_v23  ;;  %v7942_v1 = vpop.f32.mrb[18].mxu0 }
 0x2fe   : > { %v8169_v37 = vadd.f32 %v7942_v1, %v10357_v30  ;;  %v4263_v20 = vpop.f32.mrb[19].mxu0  ;;  %v4565_v59 = vmul.f32 %v8167_v52, %v10495_v22 }
 0x2ff   : > { %v4662_v18 = vadd.f32 %v4661_v42, %v4631_v56  ;;  %v4563_v2 = vmul.f32 %v8168_v57, %v10481_v15  ;;  %v4593_v7 = vadd.f32 %v4592_v36, %v4562_v14  ;;  %v8170_v16 = vadd.f32 %v4263_v20, %v10360_v50 }
 0x300   : > { %v4566_v44 = vmul.f32 %v8169_v37, %v10507_v19  ;;  %v4635_v19 = vmul.f32 %v4565_v59, %v4565_v59 }
 0x301   : > { %v4594_v23 = vadd.f32 %v4593_v7, %v4563_v2  ;;  %v4633_v12 = vmul.f32 %v4563_v2, %v4563_v2  ;;  %v4663_v30 = vadd.f32 %v4662_v18, %v4632_v61  ;;  %v4564_v45 = vmul.f32 %v8170_v16, %v10498_v51 }
 0x302   : > { %v7118_v27 = vpack.c.bf16 %v4566_v44, %v4565_v59  ;;  %v4636_v51 = vmul.f32 %v4566_v44, %v4566_v44 }
 0x303   : > { %v4664_v26 = vadd.f32 %v4663_v30, %v4633_v12  ;;  %v4595_v38 = vadd.f32 %v4594_v23, %v4564_v45  ;;  %v4634_v15 = vmul.f32 %v4564_v45, %v4564_v45  ;;  %v7113_v17 = vpack.c.bf16 %v4564_v45, %v4563_v2  ;;  %v7945_v35 = vpop.f32.mrb[20].mxu0 }
 0x304   : > { %7208 = vst [vmem:[%s10486_s12 + $0x48] sm:$0xff] %v7118_v27   ;;  %v8171_v50 = vadd.f32 %v7945_v35, %v10371_v5  ;;  %v4276_v22 = vpop.f32.mrb[21].mxu0 }
 0x305   : > { %v4596_v48 = vadd.f32 %v4595_v38, %v4565_v59  ;;  %v4665_v0 = vadd.f32 %v4664_v26, %v4634_v15  ;;  %7207 = vst [vmem:[%s10486_s12 + $0x40] sm:$0xff] %v7113_v17   ;;  %v8172_v33 = vadd.f32 %v4276_v22, %v10373_v28  ;;  %v7946_v14 = vpop.f32.mrb[22].mxu0 }
 0x306   : > { %v8173_v9 = vadd.f32 %v7946_v14, %v10375_v40  ;;  %v4279_v13 = vpop.f32.mrb[23].mxu0  ;;  %v4569_v10 = vmul.f32 %v8171_v50, %v10514_v25  ;;  %v10555_v40 = vpop.permute.xlu1 %6087 }
 0x307   : > { %v4666_v3 = vadd.f32 %v4665_v0, %v4635_v19  ;;  %v4567_v11 = vmul.f32 %v8172_v33, %v10502_v31  ;;  %v4597_v5 = vadd.f32 %v4596_v48, %v4566_v44  ;;  %v8174_v34 = vadd.f32 %v4279_v13, %v10377_v21  ;;  %v4535_v25 = vpop.permute.xlu0 %4534 }
 0x308   : > { %v4570_v47 = vmul.f32 %v8173_v9, %v4505_v46  ;;  %v4639_v46 = vmul.f32 %v4569_v10, %v4569_v10 }
 0x309   : > { %v4598_v58 = vadd.f32 %v4597_v5, %v4567_v11  ;;  %v4637_v6 = vmul.f32 %v4567_v11, %v4567_v11  ;;  %v4667_v52 = vadd.f32 %v4666_v3, %v4636_v51  ;;  %v4568_v28 = vmul.f32 %v8174_v34, %v10518_v29 }
 0x30a   : > { %v7128_v41 = vpack.c.bf16 %v4570_v47, %v4569_v10  ;;  %v4640_v18 = vmul.f32 %v4570_v47, %v4570_v47  ;;  %v4540_v30 = vpop.permute.xlu1 %4539 }
 0x30b   : > { %v4668_v56 = vadd.f32 %v4667_v52, %v4637_v6  ;;  %v4599_v36 = vadd.f32 %v4598_v58, %v4568_v28  ;;  %v4638_v42 = vmul.f32 %v4568_v28, %v4568_v28  ;;  %v7123_v31 = vpack.c.bf16 %v4568_v28, %v4567_v11  ;;  %v7949_v57 = vpop.f32.mrb[24].mxu0 }
 0x30c   : > { %7210 = vst [vmem:[%s10486_s12 + $0x58] sm:$0xff] %v7128_v41   ;;  %v8175_v21 = vadd.f32 %v7949_v57, %v10391_v55  ;;  %v4292_v1 = vpop.f32.mrb[25].mxu0 }
 0x30d   : > { %v4600_v61 = vadd.f32 %v4599_v36, %v4569_v10  ;;  %v4669_v37 = vadd.f32 %v4668_v56, %v4638_v42  ;;  %7209 = vst [vmem:[%s10486_s12 + $0x50] sm:$0xff] %v7123_v31   ;;  %v8176_v20 = vadd.f32 %v4292_v1, %v10393_v54  ;;  %v7950_v29 = vpop.f32.mrb[26].mxu0 }
 0x30e   : > { %v8177_v2 = vadd.f32 %v7950_v29, %v10395_v43  ;;  %v4295_v7 = vpop.f32.mrb[27].mxu0  ;;  %v4573_v23 = vmul.f32 %v8175_v21, %v10535_v49  ;;  %v6093_v43 = vpop.permute.xlu0 %6092 }
 0x30f   : > { %v4670_v16 = vadd.f32 %v4669_v37, %v4639_v46  ;;  %v4571_v59 = vmul.f32 %v8176_v20, %v10527_v24  ;;  %v4601_v44 = vadd.f32 %v4600_v61, %v4570_v47  ;;  %v8178_v55 = vadd.f32 %v4295_v7, %v10397_v4  ;;  %v4545_v9 = vpop.permute.xlu1 %4544 }
 0x310   : > { %v4574_v12 = vmul.f32 %v8177_v2, %v4525_v8  ;;  %v4643_v49 = vmul.f32 %v4573_v23, %v4573_v23 }
 0x311   : > { %v4602_v45 = vadd.f32 %v4601_v44, %v4571_v59  ;;  %v4641_v27 = vmul.f32 %v4571_v59, %v4571_v59  ;;  %v4671_v54 = vadd.f32 %v4670_v16, %v4640_v18  ;;  %v4572_v26 = vmul.f32 %v8178_v55, %v10541_v53 }
 0x312   : > { %v7138_v38 = vpack.c.bf16 %v4574_v12, %v4573_v23  ;;  %v4644_v14 = vmul.f32 %v4574_v12, %v4574_v12  ;;  %v6098_v34 = vpop.permute.xlu0 %6097 }
 0x313   : > { %v4672_v15 = vadd.f32 %v4671_v54, %v4641_v27  ;;  %v4603_v17 = vadd.f32 %v4602_v45, %v4572_v26  ;;  %v4642_v35 = vmul.f32 %v4572_v26, %v4572_v26  ;;  %v7133_v24 = vpack.c.bf16 %v4572_v26, %v4571_v59  ;;  %v7953_v50 = vpop.f32.mrb[28].mxu0 }
 0x314   : > { %7212 = vst [vmem:[%s10486_s12 + $0x68] sm:$0xff] %v7138_v38   ;;  %v8179_v4 = vadd.f32 %v7953_v50, %v10407_v62  ;;  %v4308_v22 = vpop.f32.mrb[29].mxu0 }
 0x315   : > { %v4604_v19 = vadd.f32 %v4603_v17, %v4573_v23  ;;  %v4673_v48 = vadd.f32 %v4672_v15, %v4642_v35  ;;  %7211 = vst [vmem:[%s10486_s12 + $0x60] sm:$0xff] %v7133_v24   ;;  %v8180_v0 = vadd.f32 %v4308_v22, %v10409_v32  ;;  %v7954_v33 = vpop.f32.mrb[30].mxu0 }
 0x316   : > { %v8181_v53 = vadd.f32 %v7954_v33, %v10411_v63  ;;  %v4311_v51 = vpop.f32.mrb[31].mxu0  ;;  %v4577_v11 = vmul.f32 %v8179_v4, %v4540_v30  ;;  %v6103_v31 = vpop.permute.xlu0 %6102 }
 0x317   : > { %v4674_v13 = vadd.f32 %v4673_v48, %v4643_v49  ;;  %v4575_v8 = vmul.f32 %v8180_v0, %v10546_v39  ;;  %v4605_v3 = vadd.f32 %v4604_v19, %v4574_v12  ;;  %v8182_v62 = vadd.f32 %v4311_v51, %v10413_v60 }
 0x318   : > { %v4578_v5 = vmul.f32 %v8181_v53, %v4545_v9  ;;  %v4647_v56 = vmul.f32 %v4577_v11, %v4577_v11 }
 0x319   : > { %v4606_v10 = vadd.f32 %v4605_v3, %v4575_v8  ;;  %v4645_v47 = vmul.f32 %v4575_v8, %v4575_v8  ;;  %v4675_v32 = vadd.f32 %v4674_v13, %v4644_v14  ;;  %v4576_v58 = vmul.f32 %v8182_v62, %v4535_v25 }
 0x31a   : > { %v7148_v6 = vpack.c.bf16 %v4578_v5, %v4577_v11  ;;  %v4648_v57 = vmul.f32 %v4578_v5, %v4578_v5 }
 0x31b   : > { %v4676_v52 = vadd.f32 %v4675_v32, %v4645_v47  ;;  %v4607_v63 = vadd.f32 %v4606_v10, %v4576_v58  ;;  %v4646_v28 = vmul.f32 %v4576_v58, %v4576_v58  ;;  %v7143_v41 = vpack.c.bf16 %v4576_v58, %v4575_v8 }
 0x31c   : > { %7214 = vst [vmem:[%s10486_s12 + $0x78] sm:$0xff] %v7148_v6  }
 0x31d   : > { %v4608_v36 = vadd.f32 %v4607_v63, %v4577_v11  ;;  %v4677_v39 = vadd.f32 %v4676_v52, %v4646_v28  ;;  %7213 = vst [vmem:[%s10486_s12 + $0x70] sm:$0xff] %v7143_v41   ;;  %v8133_v42 = vpop.f32.mrb[32].mxu1 }
 0x31e   : > { %v6062_v60 = vpop.f32.mrb[33].mxu1  ;;  %v6107_v61 = vmul.f32 %v8133_v42, %v6098_v34 }
 0x31f   : > { %v4609_v21 = vadd.f32 %v4608_v36, %v4578_v5  ;;  %v4678_v1 = vadd.f32 %v4677_v39, %v4647_v56  ;;  %v6105_v46 = vmul.f32 %v10555_v40, %v6062_v60  ;;  %v8134_v25 = vpop.f32.mrb[34].mxu1 }
 0x320   : > { %v6108_v37 = vmul.f32 %v8134_v25, %v6103_v31  ;;  %v6065_v20 = vpop.f32.mrb[35].mxu1  ;;  %v6121_v45 = vmul.f32 %v6107_v61, %v6107_v61 }
 0x321   : > { %v4610_v29 = vrot.slane %v4609_v21, 4  ;;  %v4679_v18 = vadd.f32 %v4678_v1, %v4648_v57  ;;  %v6106_v2 = vmul.f32 %v6093_v43, %v6065_v20  ;;  %v6119_v7 = vmul.f32 %v6105_v46, %v6105_v46 }
 0x322   : > { %v7158_v16 = vpack.c.bf16 %v6108_v37, %v6107_v61  ;;  %v6122_v26 = vmul.f32 %v6108_v37, %v6108_v37 }
 0x323   : > { %v4611_v59 = vadd.f32 %v4610_v29, %v4609_v21  ;;  %v4680_v44 = vrot.slane %v4679_v18, 4  ;;  %v6109_v55 = vadd.f32 %v6106_v2, %v6105_v46  ;;  %v6120_v23 = vmul.f32 %v6106_v2, %v6106_v2 }
 0x324   : > { %7216 = vst [vmem:[%s10486_s12 + $0x88] sm:$0xff] %v7158_v16   ;;  %v7153_v12 = vpack.c.bf16 %v6106_v2, %v6105_v46 }
 0x325   : > { %v4681_v30 = vadd.f32 %v4680_v44, %v4679_v18  ;;  %v6110_v27 = vadd.f32 %v6109_v55, %v6107_v61  ;;  %v6123_v40 = vadd.f32 %v6120_v23, %v6119_v7  ;;  %v4612_v54 = vrot.slane %v4611_v59, 2 }
 0x326   : > { %7215 = vst [vmem:[%s10486_s12 + $0x80] sm:$0xff] %v7153_v12  }
 0x327   : > { %v6111_v38 = vadd.f32 %v6110_v27, %v6108_v37  ;;  %v6124_v15 = vadd.f32 %v6123_v40, %v6121_v45  ;;  %v4682_v17 = vrot.slane %v4681_v30, 2  ;;  %v4613_v24 = vadd.f32 %v4612_v54, %v4611_v59 }
 0x329   : > { %v6112_v43 = vrot.slane %v6111_v38, 4  ;;  %v6125_v35 = vadd.f32 %v6124_v15, %v6122_v26  ;;  %v4683_v22 = vadd.f32 %v4682_v17, %v4681_v30  ;;  %v4614_v48 = vrot.slane %v4613_v24, 1 }
 0x32b   : > { %v6113_v50 = vadd.f32 %v6112_v43, %v6111_v38  ;;  %v6126_v4 = vrot.slane %v6125_v35, 4  ;;  %v4684_v14 = vrot.slane %v4683_v22, 1  ;;  %v4615_v9 = vadd.f32 %v4614_v48, %v4613_v24 }
 0x32d   : > { %v6114_v49 = vrot.slane %v6113_v50, 2  ;;  %v6127_v19 = vadd.f32 %v6126_v4, %v6125_v35  ;;  %v4685_v3 = vadd.f32 %v4684_v14, %v4683_v22 }
 0x32f   : > { %v6115_v0 = vadd.f32 %v6114_v49, %v6113_v50  ;;  %v6128_v33 = vrot.slane %v6127_v19, 2 }
 0x331   : > { %v6116_v53 = vrot.slane %v6115_v0, 1  ;;  %v6129_v51 = vadd.f32 %v6128_v33, %v6127_v19 }
 0x333   : > { %v6117_v13 = vadd.f32 %v6116_v53, %v6115_v0  ;;  %v6130_v8 = vrot.slane %v6129_v51, 1 }
 0x335   : > { %v6118_v62 = vadd.f32 %v6117_v13, %v4615_v9  ;;  %v6131_v11 = vadd.f32 %v6130_v8, %v6129_v51 }
 0x337   : > { %v6132_v5 = vadd.f32 %v6131_v11, %v4685_v3  ;;  %6153 = vst [vmem:[%s235_s26] sm:$0x1] %v6118_v62 }
 0x339   : > { %6154 = vst [vmem:[%s235_s26 + $0x1] sm:$0x1] %v6132_v5 }
 0x33a PF: > { %s16_s18 = sadd.s32 1, %s8699_s18  }
 0x33b   : > { %p13_p4 = scmp.ge.s32.totalorder %s16_s18, 4  }
 0x33d   :  { %15 = sbr.rel (!%p13_p4) target bundleno = 1 (0x1), region = 86 }

</bundles_post_ra>
